<compile_context>
chip_gen: v7x
topology: tpu7x:2x2x1
jax: 0.10.0
libtpu: 0.0.40
codegen_flags: <defaults>
</compile_context>

<pallas_src>
import functools

import jax
import jax.numpy as jnp
from jax.experimental import pallas as pl
from jax.experimental.pallas import tpu as pltpu


# ---------------------------------------------------------------------------
# helpers
# ---------------------------------------------------------------------------
def _round_up(x, m):
    return (x + m - 1) // m * m


def _pick_tile(dim, cap, quantum):
    """Largest multiple of `quantum` that divides `dim` and is <= max(cap, q)."""
    assert dim % quantum == 0, (dim, quantum)
    t = max(quantum, min(cap, dim))
    t -= t % quantum
    while dim % t:
        t -= quantum
    return t


# ---------------------------------------------------------------------------
# Pallas kernel 1: tiled GEMM  out = act(A @ B + bias)  with fused channel stats
# ---------------------------------------------------------------------------
def _convt_gemm_kernel(a_ref, b_ref, bias_ref, o_ref, sum_ref, ssq_ref, acc_ref,
                       *, activation):
    k = pl.program_id(2)

    @pl.when(k == 0)
    def _():
        acc_ref[...] = jnp.zeros_like(acc_ref)

    acc_ref[...] += jnp.dot(a_ref[...], b_ref[...],
                            preferred_element_type=jnp.float32)

    @pl.when(k == pl.num_programs(2) - 1)
    def _():
        y = acc_ref[...] + bias_ref[...]                  # (tm, tn) + (1, tn)
        # per-tile channel statistics (one-pass mean/var for BatchNorm)
        sum_ref[0] = jnp.sum(y, axis=0, keepdims=True)
        ssq_ref[0] = jnp.sum(y * y, axis=0, keepdims=True)
        if activation == "tanh":
            y = jnp.tanh(y)
        o_ref[...] = y.astype(o_ref.dtype)


def _fused_gemm(a, b, bias, activation, tm_cap=256, tn_cap=256, tk_cap=512):
    """act(A @ B + bias), A/B bf16 on the MXU, f32 accumulation.

    Tile caps (256, 256, 512) are sized so the double-buffered working set fits
    v7x's 64 MiB VMEM; v5e/v6e (128 MiB physical) can raise tm/tn to 512.
    """
    mp, kp = a.shape
    kp2, np_ = b.shape
    assert kp == kp2
    tm = _pick_tile(mp, tm_cap, 16)    # bf16 second-minor quantum
    tn = _pick_tile(np_, tn_cap, 128)  # lane quantum
    tk = _pick_tile(kp, tk_cap, 128)
    grid = (mp // tm, np_ // tn, kp // tk)

    kernel = functools.partial(_convt_gemm_kernel, activation=activation)
    cost = pl.CostEstimate(
        flops=2 * mp * np_ * kp,
        transcendentals=mp * np_ if activation == "tanh" else 0,
        bytes_accessed=a.size * 2 + b.size * 2 + bias.size * 4 + mp * np_ * 4)

    return pl.pallas_call(
        kernel,
        out_shape=(
            jax.ShapeDtypeStruct((mp, np_), jnp.float32),        # activation
            jax.ShapeDtypeStruct((grid[0], 1, np_), jnp.float32),  # sum(x)
            jax.ShapeDtypeStruct((grid[0], 1, np_), jnp.float32),  # sum(x*x)
        ),
        grid_spec=pltpu.PrefetchScalarGridSpec(
            num_scalar_prefetch=0,
            grid=grid,
            in_specs=[
                pl.BlockSpec((tm, tk), lambda i, j, k: (i, k)),
                pl.BlockSpec((tk, tn), lambda i, j, k: (k, j)),
                pl.BlockSpec((1, tn), lambda i, j, k: (0, j)),
            ],
            out_specs=(
                pl.BlockSpec((tm, tn), lambda i, j, k: (i, j)),
                pl.BlockSpec((1, 1, tn), lambda i, j, k: (i, 0, j)),
                pl.BlockSpec((1, 1, tn), lambda i, j, k: (i, 0, j)),
            ),
            scratch_shapes=[pltpu.VMEM((tm, tn), jnp.float32)],
        ),
        compiler_params=pltpu.CompilerParams(
            dimension_semantics=("parallel", "parallel", "arbitrary"),
            vmem_limit_bytes=64 * 1024 * 1024),
        cost_estimate=cost,
    )(a, b, bias)


# ---------------------------------------------------------------------------
# Pallas kernel 2: BatchNorm apply (per-channel scale/shift) + ReLU
# ---------------------------------------------------------------------------
def _bn_relu_kernel(x_ref, scale_ref, shift_ref, o_ref):
    y = x_ref[...] * scale_ref[...] + shift_ref[...]     # f32 math (v5e-safe)
    o_ref[...] = jnp.maximum(y, 0.0).astype(o_ref.dtype)


def bn_relu_apply(x, scale, shift):
    """x: (M, Cp) f32; scale/shift: (1, Cp) f32 -> bf16 normalized activation."""
    mp, np_ = x.shape
    tm_cap = max(16, min(1024, (4 * 1024 * 1024) // (np_ * 4)))
    tm = _pick_tile(mp, tm_cap, 16)
    return pl.pallas_call(
        _bn_relu_kernel,
        out_shape=jax.ShapeDtypeStruct((mp, np_), jnp.bfloat16),
        grid_spec=pltpu.PrefetchScalarGridSpec(
            num_scalar_prefetch=0,
            grid=(mp // tm,),
            in_specs=[
                pl.BlockSpec((tm, np_), lambda i: (i, 0)),
                pl.BlockSpec((1, np_), lambda i: (0, 0)),
                pl.BlockSpec((1, np_), lambda i: (0, 0)),
            ],
            out_specs=pl.BlockSpec((tm, np_), lambda i: (i, 0)),
        ),
        compiler_params=pltpu.CompilerParams(
            dimension_semantics=("parallel",),
            vmem_limit_bytes=64 * 1024 * 1024),
    )(x, scale, shift)


# ---------------------------------------------------------------------------
# ConvTranspose2d lowering (PyTorch semantics) -> im2col + Pallas GEMM
# ---------------------------------------------------------------------------
def _extract_patches(x_nhwc, kh, kw, stride, pad):
    """im2col for ConvTranspose2d: zero-dilate by `stride`, pad by (k-1-pad),
    gather the kh*kw shifted windows.  Implemented as ONE grouped identity
    convolution so XLA does not materialize 16 shifted copies + a transpose.
    Output channel order is (ci, kh, kw)."""
    _, _, _, cin = x_nhwc.shape
    taps = kh * kw
    eye = jnp.eye(taps, dtype=x_nhwc.dtype).reshape(kh, kw, taps)
    rhs = jnp.tile(eye, (1, 1, cin))[:, :, None, :]      # (kh, kw, 1, cin*taps)
    ph, pw = kh - 1 - pad, kw - 1 - pad
    return jax.lax.conv_general_dilated(
        x_nhwc, rhs,
        window_strides=(1, 1),
        padding=[(ph, ph), (pw, pw)],
        lhs_dilation=(stride, stride),
        dimension_numbers=("NHWC", "HWIO", "NHWC"),
        feature_group_count=cin)


def conv_transpose_gemm(x_nhwc, w, bias, stride, pad, activation):
    """x_nhwc: (N, H, W, Cin) bf16; w: (Cin, Cout, KH, KW) PyTorch layout."""
    n, h, wdt, cin = x_nhwc.shape
    cin_w, cout, kh, kw = w.shape
    assert cin == cin_w
    oh = (h - 1) * stride - 2 * pad + kh
    ow = (wdt - 1) * stride - 2 * pad + kw

    patches = _extract_patches(x_nhwc, kh, kw, stride, pad)  # (n,oh,ow,cin*kh*kw)
    m, k = n * oh * ow, cin * kh * kw
    a = patches.reshape(m, k)

    mp = _round_up(m, 16)
    kp = _round_up(k, 128)
    np_ = _round_up(cout, 128)          # lane-dense output channels
    if (mp, kp) != (m, k):
        a = jnp.pad(a, ((0, mp - m), (0, kp - k)))

    # flipped kernel, rows ordered (ci, kh, kw) to match the patch layout
    wf = w[:, :, ::-1, ::-1]
    bmat = jnp.transpose(wf, (0, 2, 3, 1)).reshape(k, cout)
    bmat = jnp.pad(bmat, ((0, kp - k), (0, np_ - cout))).astype(jnp.bfloat16)

    if bias is None:
        bias_p = jnp.zeros((1, np_), jnp.float32)
    else:
        bias_p = jnp.pad(bias, (0, np_ - cout)).reshape(1, np_).astype(jnp.float32)

    out, ssum, ssq = _fused_gemm(a, bmat, bias_p, activation)
    return out, ssum, ssq, (m, oh, ow, np_)


# ---------------------------------------------------------------------------
# Generator (DCGAN): 4 x [ConvT -> BN -> ReLU] + [ConvT -> Tanh]
# ---------------------------------------------------------------------------
def make_generator(key, z_dim, img_channels, g_channels):
    specs = [
        # (cin, cout, stride, pad, has_bn)
        (z_dim,           g_channels * 16, 1, 0, True),
        (g_channels * 16, g_channels * 8,  2, 1, True),
        (g_channels * 8,  g_channels * 4,  2, 1, True),
        (g_channels * 4,  g_channels * 2,  2, 1, True),
        (g_channels * 2,  img_channels,    2, 1, False),
    ]
    weights, configs = [], []
    for cin, cout, s, p, has_bn in specs:
        key, kw = jax.random.split(key)
        layer = {
            "w": jax.random.normal(kw, (cin, cout, 4, 4), jnp.float32) * 0.05,
            "b": jnp.zeros((cout,), jnp.float32),
        }
        if has_bn:
            layer["gamma"] = jnp.ones((cout,), jnp.float32)
            layer["beta"] = jnp.zeros((cout,), jnp.float32)
        weights.append(layer)
        configs.append((s, p, has_bn))
    return weights, tuple(configs)


def generator_forward(configs, weights, z, eps=1e-5):
    """z: (N, z_dim, 1, 1) NCHW -> images (N, C, 64, 64) NCHW (tanh range)."""
    n = z.shape[0]
    x = jnp.transpose(z, (0, 2, 3, 1)).astype(jnp.bfloat16)   # NHWC, bf16 MXU feed
    y_final = None
    for (stride, pad, has_bn), layer in zip(configs, weights):
        w = layer["w"]
        cout = w.shape[1]
        # BatchNorm with batch stats cancels a per-channel constant shift, so
        # the conv bias is mathematically irrelevant on BN layers -> skip it.
        out, ssum, ssq, meta = conv_transpose_gemm(
            x, w,
            bias=None if has_bn else layer["b"],
            stride=stride, pad=pad,
            activation=None if has_bn else "tanh")
        m, oh, ow, np_ = meta

        if has_bn:
            gamma_p = jnp.pad(layer["gamma"], (0, np_ - cout)).reshape(1, np_)
            beta_p = jnp.pad(layer["beta"], (0, np_ - cout)).reshape(1, np_)
            col_sum = ssum.sum(axis=0)                       # (1, np_)
            col_ssq = ssq.sum(axis=0)
            mean = col_sum / m
            var = jnp.maximum(col_ssq / m - mean * mean, 0.0)  # biased (training)
            scale = gamma_p * jax.lax.rsqrt(var + eps)
            shift = beta_p - mean * scale
            y = bn_relu_apply(out, scale, shift)             # (Mp, np_) bf16
            x = y[:m, :cout].reshape(n, oh, ow, cout)        # next-layer NHWC
        else:
            y = out[:m, :cout].reshape(n, oh, ow, cout)      # f32, tanh applied
            y_final = jnp.transpose(y, (0, 3, 1, 2))         # single NCHW transpose
    return y_final


if __name__ == "__main__":
    z_dim, img_channels, g_channels = 16, 3, 4
    batch = 2

    key = jax.random.PRNGKey(0)
    key, kz = jax.random.split(key)
    z = jax.random.normal(kz, (batch, z_dim, 1, 1), jnp.float32)

    weights, configs = make_generator(key, z_dim, img_channels, g_channels)

    fwd = jax.jit(functools.partial(generator_forward, configs))
    out = jax.block_until_ready(fwd(weights, z))

    expected_shape = (batch, img_channels, 64, 64)
    assert out.shape == expected_shape, (out.shape, expected_shape)
    assert out.dtype == jnp.float32
    assert bool(jnp.all(jnp.isfinite(out)))
    assert bool(jnp.all(jnp.abs(out) <= 1.0 + 1e-6))   # tanh output range
    print("KERNEL_OK")
</pallas_src>

<mosaic_0001>
module attributes {stable_mosaic.version = 11 : i64} {
  func.func @_convt_gemm_kernel(%arg0: i32, %arg1: i32, %arg2: i32, %arg3: memref<32x256xbf16, #tpu.memory_space<vmem>>, %arg4: memref<256x128xbf16, #tpu.memory_space<vmem>>, %arg5: memref<1x128xf32, #tpu.memory_space<vmem>>, %arg6: memref<32x128xf32, #tpu.memory_space<vmem>>, %arg7: memref<1x1x128xf32, #tpu.memory_space<vmem>>, %arg8: memref<1x1x128xf32, #tpu.memory_space<vmem>>, %arg9: memref<32x128xf32, #tpu.memory_space<vmem>>) attributes {dimension_semantics = [#tpu.dimension_semantics<parallel>, #tpu.dimension_semantics<parallel>, #tpu.dimension_semantics<arbitrary>], iteration_bounds = array<i64: 1, 1, 1>, scalar_prefetch = 0 : i64, scratch_operands = 1 : i64, tpu.core_type = #tpu.core_type<tc>, window_params = [{transform_indices = @transform_0, window_bounds = array<i64: 32, 256>}, {transform_indices = @transform_1, window_bounds = array<i64: 256, 128>}, {transform_indices = @transform_2, window_bounds = array<i64: 1, 128>}, {transform_indices = @transform_3, window_bounds = array<i64: 32, 128>}, {transform_indices = @transform_4, window_bounds = array<i64: 1, 1, 128>}, {transform_indices = @transform_5, window_bounds = array<i64: 1, 1, 128>}]} {
    %c0_i32 = arith.constant 0 : i32
    %0 = arith.cmpi eq, %arg2, %c0_i32 : i32
    %1 = arith.extui %0 : i1 to i32
    %c0_i32_0 = arith.constant 0 : i32
    %2 = arith.cmpi ne, %1, %c0_i32_0 : i32
    scf.if %2 {
      %cst_10 = arith.constant 0.000000e+00 : f32
      %12 = vector.broadcast %cst_10 : f32 to vector<32x128xf32>
      %c0_11 = arith.constant 0 : index
      %c0_12 = arith.constant 0 : index
      %13 = vector.load %arg9[%c0_11, %c0_12] : memref<32x128xf32, #tpu.memory_space<vmem>>, vector<32x128xf32>
      tpu.vector_store %arg9[%c0_11, %c0_12], %12 {strides = array<i32>} : memref<32x128xf32, #tpu.memory_space<vmem>>, vector<32x128xf32>,
    } else {
    }
    %c0 = arith.constant 0 : index
    %c0_1 = arith.constant 0 : index
    %3 = vector.load %arg9[%c0, %c0_1] : memref<32x128xf32, #tpu.memory_space<vmem>>, vector<32x128xf32>
    %c0_2 = arith.constant 0 : index
    %c0_3 = arith.constant 0 : index
    %4 = vector.load %arg3[%c0_2, %c0_3] : memref<32x256xbf16, #tpu.memory_space<vmem>>, vector<32x256xbf16>
    %c0_4 = arith.constant 0 : index
    %c0_5 = arith.constant 0 : index
    %5 = vector.load %arg4[%c0_4, %c0_5] : memref<256x128xbf16, #tpu.memory_space<vmem>>, vector<256x128xbf16>
    %cst = arith.constant dense<0.000000e+00> : vector<32x128xf32>
    %6 = tpu.matmul %4, %5, %cst {dimension_numbers = #tpu.dot_dimension_numbers<[1], [0], [0], [1], [0, 0, 1, 1], [], []>} : vector<32x256xbf16>, vector<256x128xbf16>, vector<32x128xf32> -> vector<32x128xf32>
    %7 = arith.addf %3, %6 : vector<32x128xf32>
    %c0_6 = arith.constant 0 : index
    %c0_7 = arith.constant 0 : index
    %8 = vector.load %arg9[%c0_6, %c0_7] : memref<32x128xf32, #tpu.memory_space<vmem>>, vector<32x128xf32>
    tpu.vector_store %arg9[%c0_6, %c0_7], %7 {strides = array<i32>} : memref<32x128xf32, #tpu.memory_space<vmem>>, vector<32x128xf32>,
    %c0_i32_8 = arith.constant 0 : i32
    %9 = arith.cmpi eq, %arg2, %c0_i32_8 : i32
    %10 = arith.extui %9 : i1 to i32
    %c0_i32_9 = arith.constant 0 : i32
    %11 = arith.cmpi ne, %10, %c0_i32_9 : i32
    scf.if %11 {
      %c0_10 = arith.constant 0 : index
      %c0_11 = arith.constant 0 : index
      %12 = vector.load %arg9[%c0_10, %c0_11] : memref<32x128xf32, #tpu.memory_space<vmem>>, vector<32x128xf32>
      %c0_12 = arith.constant 0 : index
      %c0_13 = arith.constant 0 : index
      %13 = vector.load %arg5[%c0_12, %c0_13] : memref<1x128xf32, #tpu.memory_space<vmem>>, vector<1x128xf32>
      %14 = vector.broadcast %13 : vector<1x128xf32> to vector<32x128xf32>
      %15 = arith.addf %12, %14 : vector<32x128xf32>
      %cst_14 = arith.constant dense<0.000000e+00> : vector<128xf32>
      %16 = vector.multi_reduction <add>, %15, %cst_14 [0] : vector<32x128xf32> to vector<128xf32>
      %17 = vector.shape_cast %16 : vector<128xf32> to vector<1x128xf32>
      %c0_15 = arith.constant 0 : index
      %c0_16 = arith.constant 0 : index
      %c0_17 = arith.constant 0 : index
      %18 = vector.load %arg7[%c0_15, %c0_16, %c0_17] : memref<1x1x128xf32, #tpu.memory_space<vmem>>, vector<1x1x128xf32>
      %19 = vector.shape_cast %18 : vector<1x1x128xf32> to vector<1x128xf32>
      %20 = vector.shape_cast %17 : vector<1x128xf32> to vector<1x1x128xf32>
      tpu.vector_store %arg7[%c0_15, %c0_16, %c0_17], %20 {strides = array<i32>} : memref<1x1x128xf32, #tpu.memory_space<vmem>>, vector<1x1x128xf32>,
      %21 = arith.mulf %15, %15 : vector<32x128xf32>
      %cst_18 = arith.constant dense<0.000000e+00> : vector<128xf32>
      %22 = vector.multi_reduction <add>, %21, %cst_18 [0] : vector<32x128xf32> to vector<128xf32>
      %23 = vector.shape_cast %22 : vector<128xf32> to vector<1x128xf32>
      %c0_19 = arith.constant 0 : index
      %c0_20 = arith.constant 0 : index
      %c0_21 = arith.constant 0 : index
      %24 = vector.load %arg8[%c0_19, %c0_20, %c0_21] : memref<1x1x128xf32, #tpu.memory_space<vmem>>, vector<1x1x128xf32>
      %25 = vector.shape_cast %24 : vector<1x1x128xf32> to vector<1x128xf32>
      %26 = vector.shape_cast %23 : vector<1x128xf32> to vector<1x1x128xf32>
      tpu.vector_store %arg8[%c0_19, %c0_20, %c0_21], %26 {strides = array<i32>} : memref<1x1x128xf32, #tpu.memory_space<vmem>>, vector<1x1x128xf32>,
      %c0_22 = arith.constant 0 : index
      %c0_23 = arith.constant 0 : index
      %27 = vector.load %arg6[%c0_22, %c0_23] : memref<32x128xf32, #tpu.memory_space<vmem>>, vector<32x128xf32>
      tpu.vector_store %arg6[%c0_22, %c0_23], %15 {strides = array<i32>} : memref<32x128xf32, #tpu.memory_space<vmem>>, vector<32x128xf32>,
    } else {
    }
    return
  }
  func.func @transform_0(%arg0: i32, %arg1: i32, %arg2: i32) -> (i32, i32) {
    %c0_i32 = arith.constant 0 : i32
    return %arg0, %arg2 : i32, i32
  }
  func.func @transform_1(%arg0: i32, %arg1: i32, %arg2: i32) -> (i32, i32) {
    %c0_i32 = arith.constant 0 : i32
    return %arg2, %arg1 : i32, i32
  }
  func.func @transform_2(%arg0: i32, %arg1: i32, %arg2: i32) -> (i32, i32) {
    %c0_i32 = arith.constant 0 : i32
    %c0_i32_0 = arith.constant 0 : i32
    return %c0_i32, %arg1 : i32, i32
  }
  func.func @transform_3(%arg0: i32, %arg1: i32, %arg2: i32) -> (i32, i32) {
    %c0_i32 = arith.constant 0 : i32
    return %arg0, %arg1 : i32, i32
  }
  func.func @transform_4(%arg0: i32, %arg1: i32, %arg2: i32) -> (i32, i32, i32) {
    %c0_i32 = arith.constant 0 : i32
    %c0_i32_0 = arith.constant 0 : i32
    return %arg0, %c0_i32, %arg1 : i32, i32, i32
  }
  func.func @transform_5(%arg0: i32, %arg1: i32, %arg2: i32) -> (i32, i32, i32) {
    %c0_i32 = arith.constant 0 : i32
    %c0_i32_0 = arith.constant 0 : i32
    return %arg0, %c0_i32, %arg1 : i32, i32, i32
  }
}

module attributes {stable_mosaic.version = 11 : i64} {
  func.func @_bn_relu_kernel(%arg0: i32, %arg1: memref<32x128xf32, #tpu.memory_space<vmem>>, %arg2: memref<1x128xf32, #tpu.memory_space<vmem>>, %arg3: memref<1x128xf32, #tpu.memory_space<vmem>>, %arg4: memref<32x128xbf16, #tpu.memory_space<vmem>>) attributes {dimension_semantics = [#tpu.dimension_semantics<parallel>], iteration_bounds = array<i64: 1>, scalar_prefetch = 0 : i64, scratch_operands = 0 : i64, tpu.core_type = #tpu.core_type<tc>, window_params = [{transform_indices = @transform_0, window_bounds = array<i64: 32, 128>}, {pipeline_mode = #tpu.pipeline_mode<synchronous>, transform_indices = @transform_1, window_bounds = array<i64: 1, 128>}, {pipeline_mode = #tpu.pipeline_mode<synchronous>, transform_indices = @transform_2, window_bounds = array<i64: 1, 128>}, {transform_indices = @transform_3, window_bounds = array<i64: 32, 128>}]} {
    %c0 = arith.constant 0 : index
    %c0_0 = arith.constant 0 : index
    %0 = vector.load %arg1[%c0, %c0_0] : memref<32x128xf32, #tpu.memory_space<vmem>>, vector<32x128xf32>
    %c0_1 = arith.constant 0 : index
    %c0_2 = arith.constant 0 : index
    %1 = vector.load %arg2[%c0_1, %c0_2] : memref<1x128xf32, #tpu.memory_space<vmem>>, vector<1x128xf32>
    %2 = vector.broadcast %1 : vector<1x128xf32> to vector<32x128xf32>
    %3 = arith.mulf %0, %2 : vector<32x128xf32>
    %c0_3 = arith.constant 0 : index
    %c0_4 = arith.constant 0 : index
    %4 = vector.load %arg3[%c0_3, %c0_4] : memref<1x128xf32, #tpu.memory_space<vmem>>, vector<1x128xf32>
    %5 = vector.broadcast %4 : vector<1x128xf32> to vector<32x128xf32>
    %6 = arith.addf %3, %5 : vector<32x128xf32>
    %cst = arith.constant 0.000000e+00 : f32
    %7 = vector.broadcast %cst : f32 to vector<32x128xf32>
    %8 = arith.maximumf %6, %7 : vector<32x128xf32>
    %9 = arith.truncf %8 : vector<32x128xf32> to vector<32x128xbf16>
    %c0_5 = arith.constant 0 : index
    %c0_6 = arith.constant 0 : index
    %10 = vector.load %arg4[%c0_5, %c0_6] : memref<32x128xbf16, #tpu.memory_space<vmem>>, vector<32x128xbf16>
    tpu.vector_store %arg4[%c0_5, %c0_6], %9 {strides = array<i32>} : memref<32x128xbf16, #tpu.memory_space<vmem>>, vector<32x128xbf16>,
    return
  }
  func.func @transform_0(%arg0: i32) -> (i32, i32) {
    %c0_i32 = arith.constant 0 : i32
    %c0_i32_0 = arith.constant 0 : i32
    return %arg0, %c0_i32 : i32, i32
  }
  func.func @transform_1(%arg0: i32) -> (i32, i32) {
    %c0_i32 = arith.constant 0 : i32
    %c0_i32_0 = arith.constant 0 : i32
    %c0_i32_1 = arith.constant 0 : i32
    return %c0_i32, %c0_i32_0 : i32, i32
  }
  func.func @transform_2(%arg0: i32) -> (i32, i32) {
    %c0_i32 = arith.constant 0 : i32
    %c0_i32_0 = arith.constant 0 : i32
    %c0_i32_1 = arith.constant 0 : i32
    return %c0_i32, %c0_i32_0 : i32, i32
  }
  func.func @transform_3(%arg0: i32) -> (i32, i32) {
    %c0_i32 = arith.constant 0 : i32
    %c0_i32_0 = arith.constant 0 : i32
    return %arg0, %c0_i32 : i32, i32
  }
}

module attributes {stable_mosaic.version = 11 : i64} {
  func.func @_convt_gemm_kernel(%arg0: i32, %arg1: i32, %arg2: i32, %arg3: memref<128x512xbf16, #tpu.memory_space<vmem>>, %arg4: memref<512x128xbf16, #tpu.memory_space<vmem>>, %arg5: memref<1x128xf32, #tpu.memory_space<vmem>>, %arg6: memref<128x128xf32, #tpu.memory_space<vmem>>, %arg7: memref<1x1x128xf32, #tpu.memory_space<vmem>>, %arg8: memref<1x1x128xf32, #tpu.memory_space<vmem>>, %arg9: memref<128x128xf32, #tpu.memory_space<vmem>>) attributes {dimension_semantics = [#tpu.dimension_semantics<parallel>, #tpu.dimension_semantics<parallel>, #tpu.dimension_semantics<arbitrary>], iteration_bounds = array<i64: 1, 1, 2>, scalar_prefetch = 0 : i64, scratch_operands = 1 : i64, tpu.core_type = #tpu.core_type<tc>, window_params = [{transform_indices = @transform_0, window_bounds = array<i64: 128, 512>}, {transform_indices = @transform_1, window_bounds = array<i64: 512, 128>}, {transform_indices = @transform_2, window_bounds = array<i64: 1, 128>}, {transform_indices = @transform_3, window_bounds = array<i64: 128, 128>}, {transform_indices = @transform_4, window_bounds = array<i64: 1, 1, 128>}, {transform_indices = @transform_5, window_bounds = array<i64: 1, 1, 128>}]} {
    %c0_i32 = arith.constant 0 : i32
    %0 = arith.cmpi eq, %arg2, %c0_i32 : i32
    %1 = arith.extui %0 : i1 to i32
    %c0_i32_0 = arith.constant 0 : i32
    %2 = arith.cmpi ne, %1, %c0_i32_0 : i32
    scf.if %2 {
      %cst_9 = arith.constant 0.000000e+00 : f32
      %12 = vector.broadcast %cst_9 : f32 to vector<128x128xf32>
      %c0_10 = arith.constant 0 : index
      %c0_11 = arith.constant 0 : index
      %13 = vector.load %arg9[%c0_10, %c0_11] : memref<128x128xf32, #tpu.memory_space<vmem>>, vector<128x128xf32>
      tpu.vector_store %arg9[%c0_10, %c0_11], %12 {strides = array<i32>} : memref<128x128xf32, #tpu.memory_space<vmem>>, vector<128x128xf32>,
    } else {
    }
    %c0 = arith.constant 0 : index
    %c0_1 = arith.constant 0 : index
    %3 = vector.load %arg9[%c0, %c0_1] : memref<128x128xf32, #tpu.memory_space<vmem>>, vector<128x128xf32>
    %c0_2 = arith.constant 0 : index
    %c0_3 = arith.constant 0 : index
    %4 = vector.load %arg3[%c0_2, %c0_3] : memref<128x512xbf16, #tpu.memory_space<vmem>>, vector<128x512xbf16>
    %c0_4 = arith.constant 0 : index
    %c0_5 = arith.constant 0 : index
    %5 = vector.load %arg4[%c0_4, %c0_5] : memref<512x128xbf16, #tpu.memory_space<vmem>>, vector<512x128xbf16>
    %cst = arith.constant dense<0.000000e+00> : vector<128x128xf32>
    %6 = tpu.matmul %4, %5, %cst {dimension_numbers = #tpu.dot_dimension_numbers<[1], [0], [0], [1], [0, 0, 1, 1], [], []>} : vector<128x512xbf16>, vector<512x128xbf16>, vector<128x128xf32> -> vector<128x128xf32>
    %7 = arith.addf %3, %6 : vector<128x128xf32>
    %c0_6 = arith.constant 0 : index
    %c0_7 = arith.constant 0 : index
    %8 = vector.load %arg9[%c0_6, %c0_7] : memref<128x128xf32, #tpu.memory_space<vmem>>, vector<128x128xf32>
    tpu.vector_store %arg9[%c0_6, %c0_7], %7 {strides = array<i32>} : memref<128x128xf32, #tpu.memory_space<vmem>>, vector<128x128xf32>,
    %c1_i32 = arith.constant 1 : i32
    %9 = arith.cmpi eq, %arg2, %c1_i32 : i32
    %10 = arith.extui %9 : i1 to i32
    %c0_i32_8 = arith.constant 0 : i32
    %11 = arith.cmpi ne, %10, %c0_i32_8 : i32
    scf.if %11 {
      %c0_9 = arith.constant 0 : index
      %c0_10 = arith.constant 0 : index
      %12 = vector.load %arg9[%c0_9, %c0_10] : memref<128x128xf32, #tpu.memory_space<vmem>>, vector<128x128xf32>
      %c0_11 = arith.constant 0 : index
      %c0_12 = arith.constant 0 : index
      %13 = vector.load %arg5[%c0_11, %c0_12] : memref<1x128xf32, #tpu.memory_space<vmem>>, vector<1x128xf32>
      %14 = vector.broadcast %13 : vector<1x128xf32> to vector<128x128xf32>
      %15 = arith.addf %12, %14 : vector<128x128xf32>
      %cst_13 = arith.constant dense<0.000000e+00> : vector<128xf32>
      %16 = vector.multi_reduction <add>, %15, %cst_13 [0] : vector<128x128xf32> to vector<128xf32>
      %17 = vector.shape_cast %16 : vector<128xf32> to vector<1x128xf32>
      %c0_14 = arith.constant 0 : index
      %c0_15 = arith.constant 0 : index
      %c0_16 = arith.constant 0 : index
      %18 = vector.load %arg7[%c0_14, %c0_15, %c0_16] : memref<1x1x128xf32, #tpu.memory_space<vmem>>, vector<1x1x128xf32>
      %19 = vector.shape_cast %18 : vector<1x1x128xf32> to vector<1x128xf32>
      %20 = vector.shape_cast %17 : vector<1x128xf32> to vector<1x1x128xf32>
      tpu.vector_store %arg7[%c0_14, %c0_15, %c0_16], %20 {strides = array<i32>} : memref<1x1x128xf32, #tpu.memory_space<vmem>>, vector<1x1x128xf32>,
      %21 = arith.mulf %15, %15 : vector<128x128xf32>
      %cst_17 = arith.constant dense<0.000000e+00> : vector<128xf32>
      %22 = vector.multi_reduction <add>, %21, %cst_17 [0] : vector<128x128xf32> to vector<128xf32>
      %23 = vector.shape_cast %22 : vector<128xf32> to vector<1x128xf32>
      %c0_18 = arith.constant 0 : index
      %c0_19 = arith.constant 0 : index
      %c0_20 = arith.constant 0 : index
      %24 = vector.load %arg8[%c0_18, %c0_19, %c0_20] : memref<1x1x128xf32, #tpu.memory_space<vmem>>, vector<1x1x128xf32>
      %25 = vector.shape_cast %24 : vector<1x1x128xf32> to vector<1x128xf32>
      %26 = vector.shape_cast %23 : vector<1x128xf32> to vector<1x1x128xf32>
      tpu.vector_store %arg8[%c0_18, %c0_19, %c0_20], %26 {strides = array<i32>} : memref<1x1x128xf32, #tpu.memory_space<vmem>>, vector<1x1x128xf32>,
      %c0_21 = arith.constant 0 : index
      %c0_22 = arith.constant 0 : index
      %27 = vector.load %arg6[%c0_21, %c0_22] : memref<128x128xf32, #tpu.memory_space<vmem>>, vector<128x128xf32>
      tpu.vector_store %arg6[%c0_21, %c0_22], %15 {strides = array<i32>} : memref<128x128xf32, #tpu.memory_space<vmem>>, vector<128x128xf32>,
    } else {
    }
    return
  }
  func.func @transform_0(%arg0: i32, %arg1: i32, %arg2: i32) -> (i32, i32) {
    %c0_i32 = arith.constant 0 : i32
    return %arg0, %arg2 : i32, i32
  }
  func.func @transform_1(%arg0: i32, %arg1: i32, %arg2: i32) -> (i32, i32) {
    %c0_i32 = arith.constant 0 : i32
    return %arg2, %arg1 : i32, i32
  }
  func.func @transform_2(%arg0: i32, %arg1: i32, %arg2: i32) -> (i32, i32) {
    %c0_i32 = arith.constant 0 : i32
    %c0_i32_0 = arith.constant 0 : i32
    return %c0_i32, %arg1 : i32, i32
  }
  func.func @transform_3(%arg0: i32, %arg1: i32, %arg2: i32) -> (i32, i32) {
    %c0_i32 = arith.constant 0 : i32
    return %arg0, %arg1 : i32, i32
  }
  func.func @transform_4(%arg0: i32, %arg1: i32, %arg2: i32) -> (i32, i32, i32) {
    %c0_i32 = arith.constant 0 : i32
    %c0_i32_0 = arith.constant 0 : i32
    return %arg0, %c0_i32, %arg1 : i32, i32, i32
  }
  func.func @transform_5(%arg0: i32, %arg1: i32, %arg2: i32) -> (i32, i32, i32) {
    %c0_i32 = arith.constant 0 : i32
    %c0_i32_0 = arith.constant 0 : i32
    return %arg0, %c0_i32, %arg1 : i32, i32, i32
  }
}

module attributes {stable_mosaic.version = 11 : i64} {
  func.func @_bn_relu_kernel(%arg0: i32, %arg1: memref<128x128xf32, #tpu.memory_space<vmem>>, %arg2: memref<1x128xf32, #tpu.memory_space<vmem>>, %arg3: memref<1x128xf32, #tpu.memory_space<vmem>>, %arg4: memref<128x128xbf16, #tpu.memory_space<vmem>>) attributes {dimension_semantics = [#tpu.dimension_semantics<parallel>], iteration_bounds = array<i64: 1>, scalar_prefetch = 0 : i64, scratch_operands = 0 : i64, tpu.core_type = #tpu.core_type<tc>, window_params = [{transform_indices = @transform_0, window_bounds = array<i64: 128, 128>}, {pipeline_mode = #tpu.pipeline_mode<synchronous>, transform_indices = @transform_1, window_bounds = array<i64: 1, 128>}, {pipeline_mode = #tpu.pipeline_mode<synchronous>, transform_indices = @transform_2, window_bounds = array<i64: 1, 128>}, {transform_indices = @transform_3, window_bounds = array<i64: 128, 128>}]} {
    %c0 = arith.constant 0 : index
    %c0_0 = arith.constant 0 : index
    %0 = vector.load %arg1[%c0, %c0_0] : memref<128x128xf32, #tpu.memory_space<vmem>>, vector<128x128xf32>
    %c0_1 = arith.constant 0 : index
    %c0_2 = arith.constant 0 : index
    %1 = vector.load %arg2[%c0_1, %c0_2] : memref<1x128xf32, #tpu.memory_space<vmem>>, vector<1x128xf32>
    %2 = vector.broadcast %1 : vector<1x128xf32> to vector<128x128xf32>
    %3 = arith.mulf %0, %2 : vector<128x128xf32>
    %c0_3 = arith.constant 0 : index
    %c0_4 = arith.constant 0 : index
    %4 = vector.load %arg3[%c0_3, %c0_4] : memref<1x128xf32, #tpu.memory_space<vmem>>, vector<1x128xf32>
    %5 = vector.broadcast %4 : vector<1x128xf32> to vector<128x128xf32>
    %6 = arith.addf %3, %5 : vector<128x128xf32>
    %cst = arith.constant 0.000000e+00 : f32
    %7 = vector.broadcast %cst : f32 to vector<128x128xf32>
    %8 = arith.maximumf %6, %7 : vector<128x128xf32>
    %9 = arith.truncf %8 : vector<128x128xf32> to vector<128x128xbf16>
    %c0_5 = arith.constant 0 : index
    %c0_6 = arith.constant 0 : index
    %10 = vector.load %arg4[%c0_5, %c0_6] : memref<128x128xbf16, #tpu.memory_space<vmem>>, vector<128x128xbf16>
    tpu.vector_store %arg4[%c0_5, %c0_6], %9 {strides = array<i32>} : memref<128x128xbf16, #tpu.memory_space<vmem>>, vector<128x128xbf16>,
    return
  }
  func.func @transform_0(%arg0: i32) -> (i32, i32) {
    %c0_i32 = arith.constant 0 : i32
    %c0_i32_0 = arith.constant 0 : i32
    return %arg0, %c0_i32 : i32, i32
  }
  func.func @transform_1(%arg0: i32) -> (i32, i32) {
    %c0_i32 = arith.constant 0 : i32
    %c0_i32_0 = arith.constant 0 : i32
    %c0_i32_1 = arith.constant 0 : i32
    return %c0_i32, %c0_i32_0 : i32, i32
  }
  func.func @transform_2(%arg0: i32) -> (i32, i32) {
    %c0_i32 = arith.constant 0 : i32
    %c0_i32_0 = arith.constant 0 : i32
    %c0_i32_1 = arith.constant 0 : i32
    return %c0_i32, %c0_i32_0 : i32, i32
  }
  func.func @transform_3(%arg0: i32) -> (i32, i32) {
    %c0_i32 = arith.constant 0 : i32
    %c0_i32_0 = arith.constant 0 : i32
    return %arg0, %c0_i32 : i32, i32
  }
}

module attributes {stable_mosaic.version = 11 : i64} {
  func.func @_convt_gemm_kernel(%arg0: i32, %arg1: i32, %arg2: i32, %arg3: memref<256x512xbf16, #tpu.memory_space<vmem>>, %arg4: memref<512x128xbf16, #tpu.memory_space<vmem>>, %arg5: memref<1x128xf32, #tpu.memory_space<vmem>>, %arg6: memref<256x128xf32, #tpu.memory_space<vmem>>, %arg7: memref<1x1x128xf32, #tpu.memory_space<vmem>>, %arg8: memref<1x1x128xf32, #tpu.memory_space<vmem>>, %arg9: memref<256x128xf32, #tpu.memory_space<vmem>>) attributes {dimension_semantics = [#tpu.dimension_semantics<parallel>, #tpu.dimension_semantics<parallel>, #tpu.dimension_semantics<arbitrary>], iteration_bounds = array<i64: 2, 1, 1>, scalar_prefetch = 0 : i64, scratch_operands = 1 : i64, tpu.core_type = #tpu.core_type<tc>, window_params = [{transform_indices = @transform_0, window_bounds = array<i64: 256, 512>}, {transform_indices = @transform_1, window_bounds = array<i64: 512, 128>}, {transform_indices = @transform_2, window_bounds = array<i64: 1, 128>}, {transform_indices = @transform_3, window_bounds = array<i64: 256, 128>}, {transform_indices = @transform_4, window_bounds = array<i64: 1, 1, 128>}, {transform_indices = @transform_5, window_bounds = array<i64: 1, 1, 128>}]} {
    %c0_i32 = arith.constant 0 : i32
    %0 = arith.cmpi eq, %arg2, %c0_i32 : i32
    %1 = arith.extui %0 : i1 to i32
    %c0_i32_0 = arith.constant 0 : i32
    %2 = arith.cmpi ne, %1, %c0_i32_0 : i32
    scf.if %2 {
      %cst_10 = arith.constant 0.000000e+00 : f32
      %12 = vector.broadcast %cst_10 : f32 to vector<256x128xf32>
      %c0_11 = arith.constant 0 : index
      %c0_12 = arith.constant 0 : index
      %13 = vector.load %arg9[%c0_11, %c0_12] : memref<256x128xf32, #tpu.memory_space<vmem>>, vector<256x128xf32>
      tpu.vector_store %arg9[%c0_11, %c0_12], %12 {strides = array<i32>} : memref<256x128xf32, #tpu.memory_space<vmem>>, vector<256x128xf32>,
    } else {
    }
    %c0 = arith.constant 0 : index
    %c0_1 = arith.constant 0 : index
    %3 = vector.load %arg9[%c0, %c0_1] : memref<256x128xf32, #tpu.memory_space<vmem>>, vector<256x128xf32>
    %c0_2 = arith.constant 0 : index
    %c0_3 = arith.constant 0 : index
    %4 = vector.load %arg3[%c0_2, %c0_3] : memref<256x512xbf16, #tpu.memory_space<vmem>>, vector<256x512xbf16>
    %c0_4 = arith.constant 0 : index
    %c0_5 = arith.constant 0 : index
    %5 = vector.load %arg4[%c0_4, %c0_5] : memref<512x128xbf16, #tpu.memory_space<vmem>>, vector<512x128xbf16>
    %cst = arith.constant dense<0.000000e+00> : vector<256x128xf32>
    %6 = tpu.matmul %4, %5, %cst {dimension_numbers = #tpu.dot_dimension_numbers<[1], [0], [0], [1], [0, 0, 1, 1], [], []>} : vector<256x512xbf16>, vector<512x128xbf16>, vector<256x128xf32> -> vector<256x128xf32>
    %7 = arith.addf %3, %6 : vector<256x128xf32>
    %c0_6 = arith.constant 0 : index
    %c0_7 = arith.constant 0 : index
    %8 = vector.load %arg9[%c0_6, %c0_7] : memref<256x128xf32, #tpu.memory_space<vmem>>, vector<256x128xf32>
    tpu.vector_store %arg9[%c0_6, %c0_7], %7 {strides = array<i32>} : memref<256x128xf32, #tpu.memory_space<vmem>>, vector<256x128xf32>,
    %c0_i32_8 = arith.constant 0 : i32
    %9 = arith.cmpi eq, %arg2, %c0_i32_8 : i32
    %10 = arith.extui %9 : i1 to i32
    %c0_i32_9 = arith.constant 0 : i32
    %11 = arith.cmpi ne, %10, %c0_i32_9 : i32
    scf.if %11 {
      %c0_10 = arith.constant 0 : index
      %c0_11 = arith.constant 0 : index
      %12 = vector.load %arg9[%c0_10, %c0_11] : memref<256x128xf32, #tpu.memory_space<vmem>>, vector<256x128xf32>
      %c0_12 = arith.constant 0 : index
      %c0_13 = arith.constant 0 : index
      %13 = vector.load %arg5[%c0_12, %c0_13] : memref<1x128xf32, #tpu.memory_space<vmem>>, vector<1x128xf32>
      %14 = vector.broadcast %13 : vector<1x128xf32> to vector<256x128xf32>
      %15 = arith.addf %12, %14 : vector<256x128xf32>
      %cst_14 = arith.constant dense<0.000000e+00> : vector<128xf32>
      %16 = vector.multi_reduction <add>, %15, %cst_14 [0] : vector<256x128xf32> to vector<128xf32>
      %17 = vector.shape_cast %16 : vector<128xf32> to vector<1x128xf32>
      %c0_15 = arith.constant 0 : index
      %c0_16 = arith.constant 0 : index
      %c0_17 = arith.constant 0 : index
      %18 = vector.load %arg7[%c0_15, %c0_16, %c0_17] : memref<1x1x128xf32, #tpu.memory_space<vmem>>, vector<1x1x128xf32>
      %19 = vector.shape_cast %18 : vector<1x1x128xf32> to vector<1x128xf32>
      %20 = vector.shape_cast %17 : vector<1x128xf32> to vector<1x1x128xf32>
      tpu.vector_store %arg7[%c0_15, %c0_16, %c0_17], %20 {strides = array<i32>} : memref<1x1x128xf32, #tpu.memory_space<vmem>>, vector<1x1x128xf32>,
      %21 = arith.mulf %15, %15 : vector<256x128xf32>
      %cst_18 = arith.constant dense<0.000000e+00> : vector<128xf32>
      %22 = vector.multi_reduction <add>, %21, %cst_18 [0] : vector<256x128xf32> to vector<128xf32>
      %23 = vector.shape_cast %22 : vector<128xf32> to vector<1x128xf32>
      %c0_19 = arith.constant 0 : index
      %c0_20 = arith.constant 0 : index
      %c0_21 = arith.constant 0 : index
      %24 = vector.load %arg8[%c0_19, %c0_20, %c0_21] : memref<1x1x128xf32, #tpu.memory_space<vmem>>, vector<1x1x128xf32>
      %25 = vector.shape_cast %24 : vector<1x1x128xf32> to vector<1x128xf32>
      %26 = vector.shape_cast %23 : vector<1x128xf32> to vector<1x1x128xf32>
      tpu.vector_store %arg8[%c0_19, %c0_20, %c0_21], %26 {strides = array<i32>} : memref<1x1x128xf32, #tpu.memory_space<vmem>>, vector<1x1x128xf32>,
      %c0_22 = arith.constant 0 : index
      %c0_23 = arith.constant 0 : index
      %27 = vector.load %arg6[%c0_22, %c0_23] : memref<256x128xf32, #tpu.memory_space<vmem>>, vector<256x128xf32>
      tpu.vector_store %arg6[%c0_22, %c0_23], %15 {strides = array<i32>} : memref<256x128xf32, #tpu.memory_space<vmem>>, vector<256x128xf32>,
    } else {
    }
    return
  }
  func.func @transform_0(%arg0: i32, %arg1: i32, %arg2: i32) -> (i32, i32) {
    %c0_i32 = arith.constant 0 : i32
    return %arg0, %arg2 : i32, i32
  }
  func.func @transform_1(%arg0: i32, %arg1: i32, %arg2: i32) -> (i32, i32) {
    %c0_i32 = arith.constant 0 : i32
    return %arg2, %arg1 : i32, i32
  }
  func.func @transform_2(%arg0: i32, %arg1: i32, %arg2: i32) -> (i32, i32) {
    %c0_i32 = arith.constant 0 : i32
    %c0_i32_0 = arith.constant 0 : i32
    return %c0_i32, %arg1 : i32, i32
  }
  func.func @transform_3(%arg0: i32, %arg1: i32, %arg2: i32) -> (i32, i32) {
    %c0_i32 = arith.constant 0 : i32
    return %arg0, %arg1 : i32, i32
  }
  func.func @transform_4(%arg0: i32, %arg1: i32, %arg2: i32) -> (i32, i32, i32) {
    %c0_i32 = arith.constant 0 : i32
    %c0_i32_0 = arith.constant 0 : i32
    return %arg0, %c0_i32, %arg1 : i32, i32, i32
  }
  func.func @transform_5(%arg0: i32, %arg1: i32, %arg2: i32) -> (i32, i32, i32) {
    %c0_i32 = arith.constant 0 : i32
    %c0_i32_0 = arith.constant 0 : i32
    return %arg0, %c0_i32, %arg1 : i32, i32, i32
  }
}

module attributes {stable_mosaic.version = 11 : i64} {
  func.func @_bn_relu_kernel(%arg0: i32, %arg1: memref<512x128xf32, #tpu.memory_space<vmem>>, %arg2: memref<1x128xf32, #tpu.memory_space<vmem>>, %arg3: memref<1x128xf32, #tpu.memory_space<vmem>>, %arg4: memref<512x128xbf16, #tpu.memory_space<vmem>>) attributes {dimension_semantics = [#tpu.dimension_semantics<parallel>], iteration_bounds = array<i64: 1>, scalar_prefetch = 0 : i64, scratch_operands = 0 : i64, tpu.core_type = #tpu.core_type<tc>, window_params = [{transform_indices = @transform_0, window_bounds = array<i64: 512, 128>}, {pipeline_mode = #tpu.pipeline_mode<synchronous>, transform_indices = @transform_1, window_bounds = array<i64: 1, 128>}, {pipeline_mode = #tpu.pipeline_mode<synchronous>, transform_indices = @transform_2, window_bounds = array<i64: 1, 128>}, {transform_indices = @transform_3, window_bounds = array<i64: 512, 128>}]} {
    %c0 = arith.constant 0 : index
    %c0_0 = arith.constant 0 : index
    %0 = vector.load %arg1[%c0, %c0_0] : memref<512x128xf32, #tpu.memory_space<vmem>>, vector<512x128xf32>
    %c0_1 = arith.constant 0 : index
    %c0_2 = arith.constant 0 : index
    %1 = vector.load %arg2[%c0_1, %c0_2] : memref<1x128xf32, #tpu.memory_space<vmem>>, vector<1x128xf32>
    %2 = vector.broadcast %1 : vector<1x128xf32> to vector<512x128xf32>
    %3 = arith.mulf %0, %2 : vector<512x128xf32>
    %c0_3 = arith.constant 0 : index
    %c0_4 = arith.constant 0 : index
    %4 = vector.load %arg3[%c0_3, %c0_4] : memref<1x128xf32, #tpu.memory_space<vmem>>, vector<1x128xf32>
    %5 = vector.broadcast %4 : vector<1x128xf32> to vector<512x128xf32>
    %6 = arith.addf %3, %5 : vector<512x128xf32>
    %cst = arith.constant 0.000000e+00 : f32
    %7 = vector.broadcast %cst : f32 to vector<512x128xf32>
    %8 = arith.maximumf %6, %7 : vector<512x128xf32>
    %9 = arith.truncf %8 : vector<512x128xf32> to vector<512x128xbf16>
    %c0_5 = arith.constant 0 : index
    %c0_6 = arith.constant 0 : index
    %10 = vector.load %arg4[%c0_5, %c0_6] : memref<512x128xbf16, #tpu.memory_space<vmem>>, vector<512x128xbf16>
    tpu.vector_store %arg4[%c0_5, %c0_6], %9 {strides = array<i32>} : memref<512x128xbf16, #tpu.memory_space<vmem>>, vector<512x128xbf16>,
    return
  }
  func.func @transform_0(%arg0: i32) -> (i32, i32) {
    %c0_i32 = arith.constant 0 : i32
    %c0_i32_0 = arith.constant 0 : i32
    return %arg0, %c0_i32 : i32, i32
  }
  func.func @transform_1(%arg0: i32) -> (i32, i32) {
    %c0_i32 = arith.constant 0 : i32
    %c0_i32_0 = arith.constant 0 : i32
    %c0_i32_1 = arith.constant 0 : i32
    return %c0_i32, %c0_i32_0 : i32, i32
  }
  func.func @transform_2(%arg0: i32) -> (i32, i32) {
    %c0_i32 = arith.constant 0 : i32
    %c0_i32_0 = arith.constant 0 : i32
    %c0_i32_1 = arith.constant 0 : i32
    return %c0_i32, %c0_i32_0 : i32, i32
  }
  func.func @transform_3(%arg0: i32) -> (i32, i32) {
    %c0_i32 = arith.constant 0 : i32
    %c0_i32_0 = arith.constant 0 : i32
    return %arg0, %c0_i32 : i32, i32
  }
}

module attributes {stable_mosaic.version = 11 : i64} {
  func.func @_convt_gemm_kernel(%arg0: i32, %arg1: i32, %arg2: i32, %arg3: memref<256x256xbf16, #tpu.memory_space<vmem>>, %arg4: memref<256x128xbf16, #tpu.memory_space<vmem>>, %arg5: memref<1x128xf32, #tpu.memory_space<vmem>>, %arg6: memref<256x128xf32, #tpu.memory_space<vmem>>, %arg7: memref<1x1x128xf32, #tpu.memory_space<vmem>>, %arg8: memref<1x1x128xf32, #tpu.memory_space<vmem>>, %arg9: memref<256x128xf32, #tpu.memory_space<vmem>>) attributes {dimension_semantics = [#tpu.dimension_semantics<parallel>, #tpu.dimension_semantics<parallel>, #tpu.dimension_semantics<arbitrary>], iteration_bounds = array<i64: 8, 1, 1>, scalar_prefetch = 0 : i64, scratch_operands = 1 : i64, tpu.core_type = #tpu.core_type<tc>, window_params = [{transform_indices = @transform_0, window_bounds = array<i64: 256, 256>}, {transform_indices = @transform_1, window_bounds = array<i64: 256, 128>}, {transform_indices = @transform_2, window_bounds = array<i64: 1, 128>}, {transform_indices = @transform_3, window_bounds = array<i64: 256, 128>}, {transform_indices = @transform_4, window_bounds = array<i64: 1, 1, 128>}, {transform_indices = @transform_5, window_bounds = array<i64: 1, 1, 128>}]} {
    %c0_i32 = arith.constant 0 : i32
    %0 = arith.cmpi eq, %arg2, %c0_i32 : i32
    %1 = arith.extui %0 : i1 to i32
    %c0_i32_0 = arith.constant 0 : i32
    %2 = arith.cmpi ne, %1, %c0_i32_0 : i32
    scf.if %2 {
      %cst_10 = arith.constant 0.000000e+00 : f32
      %12 = vector.broadcast %cst_10 : f32 to vector<256x128xf32>
      %c0_11 = arith.constant 0 : index
      %c0_12 = arith.constant 0 : index
      %13 = vector.load %arg9[%c0_11, %c0_12] : memref<256x128xf32, #tpu.memory_space<vmem>>, vector<256x128xf32>
      tpu.vector_store %arg9[%c0_11, %c0_12], %12 {strides = array<i32>} : memref<256x128xf32, #tpu.memory_space<vmem>>, vector<256x128xf32>,
    } else {
    }
    %c0 = arith.constant 0 : index
    %c0_1 = arith.constant 0 : index
    %3 = vector.load %arg9[%c0, %c0_1] : memref<256x128xf32, #tpu.memory_space<vmem>>, vector<256x128xf32>
    %c0_2 = arith.constant 0 : index
    %c0_3 = arith.constant 0 : index
    %4 = vector.load %arg3[%c0_2, %c0_3] : memref<256x256xbf16, #tpu.memory_space<vmem>>, vector<256x256xbf16>
    %c0_4 = arith.constant 0 : index
    %c0_5 = arith.constant 0 : index
    %5 = vector.load %arg4[%c0_4, %c0_5] : memref<256x128xbf16, #tpu.memory_space<vmem>>, vector<256x128xbf16>
    %cst = arith.constant dense<0.000000e+00> : vector<256x128xf32>
    %6 = tpu.matmul %4, %5, %cst {dimension_numbers = #tpu.dot_dimension_numbers<[1], [0], [0], [1], [0, 0, 1, 1], [], []>} : vector<256x256xbf16>, vector<256x128xbf16>, vector<256x128xf32> -> vector<256x128xf32>
    %7 = arith.addf %3, %6 : vector<256x128xf32>
    %c0_6 = arith.constant 0 : index
    %c0_7 = arith.constant 0 : index
    %8 = vector.load %arg9[%c0_6, %c0_7] : memref<256x128xf32, #tpu.memory_space<vmem>>, vector<256x128xf32>
    tpu.vector_store %arg9[%c0_6, %c0_7], %7 {strides = array<i32>} : memref<256x128xf32, #tpu.memory_space<vmem>>, vector<256x128xf32>,
    %c0_i32_8 = arith.constant 0 : i32
    %9 = arith.cmpi eq, %arg2, %c0_i32_8 : i32
    %10 = arith.extui %9 : i1 to i32
    %c0_i32_9 = arith.constant 0 : i32
    %11 = arith.cmpi ne, %10, %c0_i32_9 : i32
    scf.if %11 {
      %c0_10 = arith.constant 0 : index
      %c0_11 = arith.constant 0 : index
      %12 = vector.load %arg9[%c0_10, %c0_11] : memref<256x128xf32, #tpu.memory_space<vmem>>, vector<256x128xf32>
      %c0_12 = arith.constant 0 : index
      %c0_13 = arith.constant 0 : index
      %13 = vector.load %arg5[%c0_12, %c0_13] : memref<1x128xf32, #tpu.memory_space<vmem>>, vector<1x128xf32>
      %14 = vector.broadcast %13 : vector<1x128xf32> to vector<256x128xf32>
      %15 = arith.addf %12, %14 : vector<256x128xf32>
      %cst_14 = arith.constant dense<0.000000e+00> : vector<128xf32>
      %16 = vector.multi_reduction <add>, %15, %cst_14 [0] : vector<256x128xf32> to vector<128xf32>
      %17 = vector.shape_cast %16 : vector<128xf32> to vector<1x128xf32>
      %c0_15 = arith.constant 0 : index
      %c0_16 = arith.constant 0 : index
      %c0_17 = arith.constant 0 : index
      %18 = vector.load %arg7[%c0_15, %c0_16, %c0_17] : memref<1x1x128xf32, #tpu.memory_space<vmem>>, vector<1x1x128xf32>
      %19 = vector.shape_cast %18 : vector<1x1x128xf32> to vector<1x128xf32>
      %20 = vector.shape_cast %17 : vector<1x128xf32> to vector<1x1x128xf32>
      tpu.vector_store %arg7[%c0_15, %c0_16, %c0_17], %20 {strides = array<i32>} : memref<1x1x128xf32, #tpu.memory_space<vmem>>, vector<1x1x128xf32>,
      %21 = arith.mulf %15, %15 : vector<256x128xf32>
      %cst_18 = arith.constant dense<0.000000e+00> : vector<128xf32>
      %22 = vector.multi_reduction <add>, %21, %cst_18 [0] : vector<256x128xf32> to vector<128xf32>
      %23 = vector.shape_cast %22 : vector<128xf32> to vector<1x128xf32>
      %c0_19 = arith.constant 0 : index
      %c0_20 = arith.constant 0 : index
      %c0_21 = arith.constant 0 : index
      %24 = vector.load %arg8[%c0_19, %c0_20, %c0_21] : memref<1x1x128xf32, #tpu.memory_space<vmem>>, vector<1x1x128xf32>
      %25 = vector.shape_cast %24 : vector<1x1x128xf32> to vector<1x128xf32>
      %26 = vector.shape_cast %23 : vector<1x128xf32> to vector<1x1x128xf32>
      tpu.vector_store %arg8[%c0_19, %c0_20, %c0_21], %26 {strides = array<i32>} : memref<1x1x128xf32, #tpu.memory_space<vmem>>, vector<1x1x128xf32>,
      %c0_22 = arith.constant 0 : index
      %c0_23 = arith.constant 0 : index
      %27 = vector.load %arg6[%c0_22, %c0_23] : memref<256x128xf32, #tpu.memory_space<vmem>>, vector<256x128xf32>
      tpu.vector_store %arg6[%c0_22, %c0_23], %15 {strides = array<i32>} : memref<256x128xf32, #tpu.memory_space<vmem>>, vector<256x128xf32>,
    } else {
    }
    return
  }
  func.func @transform_0(%arg0: i32, %arg1: i32, %arg2: i32) -> (i32, i32) {
    %c0_i32 = arith.constant 0 : i32
    return %arg0, %arg2 : i32, i32
  }
  func.func @transform_1(%arg0: i32, %arg1: i32, %arg2: i32) -> (i32, i32) {
    %c0_i32 = arith.constant 0 : i32
    return %arg2, %arg1 : i32, i32
  }
  func.func @transform_2(%arg0: i32, %arg1: i32, %arg2: i32) -> (i32, i32) {
    %c0_i32 = arith.constant 0 : i32
    %c0_i32_0 = arith.constant 0 : i32
    return %c0_i32, %arg1 : i32, i32
  }
  func.func @transform_3(%arg0: i32, %arg1: i32, %arg2: i32) -> (i32, i32) {
    %c0_i32 = arith.constant 0 : i32
    return %arg0, %arg1 : i32, i32
  }
  func.func @transform_4(%arg0: i32, %arg1: i32, %arg2: i32) -> (i32, i32, i32) {
    %c0_i32 = arith.constant 0 : i32
    %c0_i32_0 = arith.constant 0 : i32
    return %arg0, %c0_i32, %arg1 : i32, i32, i32
  }
  func.func @transform_5(%arg0: i32, %arg1: i32, %arg2: i32) -> (i32, i32, i32) {
    %c0_i32 = arith.constant 0 : i32
    %c0_i32_0 = arith.constant 0 : i32
    return %arg0, %c0_i32, %arg1 : i32, i32, i32
  }
}

module attributes {stable_mosaic.version = 11 : i64} {
  func.func @_bn_relu_kernel(%arg0: i32, %arg1: memref<1024x128xf32, #tpu.memory_space<vmem>>, %arg2: memref<1x128xf32, #tpu.memory_space<vmem>>, %arg3: memref<1x128xf32, #tpu.memory_space<vmem>>, %arg4: memref<1024x128xbf16, #tpu.memory_space<vmem>>) attributes {dimension_semantics = [#tpu.dimension_semantics<parallel>], iteration_bounds = array<i64: 2>, scalar_prefetch = 0 : i64, scratch_operands = 0 : i64, tpu.core_type = #tpu.core_type<tc>, window_params = [{transform_indices = @transform_0, window_bounds = array<i64: 1024, 128>}, {pipeline_mode = #tpu.pipeline_mode<synchronous>, transform_indices = @transform_1, window_bounds = array<i64: 1, 128>}, {pipeline_mode = #tpu.pipeline_mode<synchronous>, transform_indices = @transform_2, window_bounds = array<i64: 1, 128>}, {transform_indices = @transform_3, window_bounds = array<i64: 1024, 128>}]} {
    %c0 = arith.constant 0 : index
    %c0_0 = arith.constant 0 : index
    %0 = vector.load %arg1[%c0, %c0_0] : memref<1024x128xf32, #tpu.memory_space<vmem>>, vector<1024x128xf32>
    %c0_1 = arith.constant 0 : index
    %c0_2 = arith.constant 0 : index
    %1 = vector.load %arg2[%c0_1, %c0_2] : memref<1x128xf32, #tpu.memory_space<vmem>>, vector<1x128xf32>
    %2 = vector.broadcast %1 : vector<1x128xf32> to vector<1024x128xf32>
    %3 = arith.mulf %0, %2 : vector<1024x128xf32>
    %c0_3 = arith.constant 0 : index
    %c0_4 = arith.constant 0 : index
    %4 = vector.load %arg3[%c0_3, %c0_4] : memref<1x128xf32, #tpu.memory_space<vmem>>, vector<1x128xf32>
    %5 = vector.broadcast %4 : vector<1x128xf32> to vector<1024x128xf32>
    %6 = arith.addf %3, %5 : vector<1024x128xf32>
    %cst = arith.constant 0.000000e+00 : f32
    %7 = vector.broadcast %cst : f32 to vector<1024x128xf32>
    %8 = arith.maximumf %6, %7 : vector<1024x128xf32>
    %9 = arith.truncf %8 : vector<1024x128xf32> to vector<1024x128xbf16>
    %c0_5 = arith.constant 0 : index
    %c0_6 = arith.constant 0 : index
    %10 = vector.load %arg4[%c0_5, %c0_6] : memref<1024x128xbf16, #tpu.memory_space<vmem>>, vector<1024x128xbf16>
    tpu.vector_store %arg4[%c0_5, %c0_6], %9 {strides = array<i32>} : memref<1024x128xbf16, #tpu.memory_space<vmem>>, vector<1024x128xbf16>,
    return
  }
  func.func @transform_0(%arg0: i32) -> (i32, i32) {
    %c0_i32 = arith.constant 0 : i32
    %c0_i32_0 = arith.constant 0 : i32
    return %arg0, %c0_i32 : i32, i32
  }
  func.func @transform_1(%arg0: i32) -> (i32, i32) {
    %c0_i32 = arith.constant 0 : i32
    %c0_i32_0 = arith.constant 0 : i32
    %c0_i32_1 = arith.constant 0 : i32
    return %c0_i32, %c0_i32_0 : i32, i32
  }
  func.func @transform_2(%arg0: i32) -> (i32, i32) {
    %c0_i32 = arith.constant 0 : i32
    %c0_i32_0 = arith.constant 0 : i32
    %c0_i32_1 = arith.constant 0 : i32
    return %c0_i32, %c0_i32_0 : i32, i32
  }
  func.func @transform_3(%arg0: i32) -> (i32, i32) {
    %c0_i32 = arith.constant 0 : i32
    %c0_i32_0 = arith.constant 0 : i32
    return %arg0, %c0_i32 : i32, i32
  }
}

module attributes {stable_mosaic.version = 11 : i64} {
  func.func @_convt_gemm_kernel(%arg0: i32, %arg1: i32, %arg2: i32, %arg3: memref<256x128xbf16, #tpu.memory_space<vmem>>, %arg4: memref<128x128xbf16, #tpu.memory_space<vmem>>, %arg5: memref<1x128xf32, #tpu.memory_space<vmem>>, %arg6: memref<256x128xf32, #tpu.memory_space<vmem>>, %arg7: memref<1x1x128xf32, #tpu.memory_space<vmem>>, %arg8: memref<1x1x128xf32, #tpu.memory_space<vmem>>, %arg9: memref<256x128xf32, #tpu.memory_space<vmem>>) attributes {dimension_semantics = [#tpu.dimension_semantics<parallel>, #tpu.dimension_semantics<parallel>, #tpu.dimension_semantics<arbitrary>], iteration_bounds = array<i64: 32, 1, 1>, scalar_prefetch = 0 : i64, scratch_operands = 1 : i64, tpu.core_type = #tpu.core_type<tc>, window_params = [{transform_indices = @transform_0, window_bounds = array<i64: 256, 128>}, {transform_indices = @transform_1, window_bounds = array<i64: 128, 128>}, {transform_indices = @transform_2, window_bounds = array<i64: 1, 128>}, {transform_indices = @transform_3, window_bounds = array<i64: 256, 128>}, {transform_indices = @transform_4, window_bounds = array<i64: 1, 1, 128>}, {transform_indices = @transform_5, window_bounds = array<i64: 1, 1, 128>}]} {
    %c0_i32 = arith.constant 0 : i32
    %0 = arith.cmpi eq, %arg2, %c0_i32 : i32
    %1 = arith.extui %0 : i1 to i32
    %c0_i32_0 = arith.constant 0 : i32
    %2 = arith.cmpi ne, %1, %c0_i32_0 : i32
    scf.if %2 {
      %cst_10 = arith.constant 0.000000e+00 : f32
      %12 = vector.broadcast %cst_10 : f32 to vector<256x128xf32>
      %c0_11 = arith.constant 0 : index
      %c0_12 = arith.constant 0 : index
      %13 = vector.load %arg9[%c0_11, %c0_12] : memref<256x128xf32, #tpu.memory_space<vmem>>, vector<256x128xf32>
      tpu.vector_store %arg9[%c0_11, %c0_12], %12 {strides = array<i32>} : memref<256x128xf32, #tpu.memory_space<vmem>>, vector<256x128xf32>,
    } else {
    }
    %c0 = arith.constant 0 : index
    %c0_1 = arith.constant 0 : index
    %3 = vector.load %arg9[%c0, %c0_1] : memref<256x128xf32, #tpu.memory_space<vmem>>, vector<256x128xf32>
    %c0_2 = arith.constant 0 : index
    %c0_3 = arith.constant 0 : index
    %4 = vector.load %arg3[%c0_2, %c0_3] : memref<256x128xbf16, #tpu.memory_space<vmem>>, vector<256x128xbf16>
    %c0_4 = arith.constant 0 : index
    %c0_5 = arith.constant 0 : index
    %5 = vector.load %arg4[%c0_4, %c0_5] : memref<128x128xbf16, #tpu.memory_space<vmem>>, vector<128x128xbf16>
    %cst = arith.constant dense<0.000000e+00> : vector<256x128xf32>
    %6 = tpu.matmul %4, %5, %cst {dimension_numbers = #tpu.dot_dimension_numbers<[1], [0], [0], [1], [0, 0, 1, 1], [], []>} : vector<256x128xbf16>, vector<128x128xbf16>, vector<256x128xf32> -> vector<256x128xf32>
    %7 = arith.addf %3, %6 : vector<256x128xf32>
    %c0_6 = arith.constant 0 : index
    %c0_7 = arith.constant 0 : index
    %8 = vector.load %arg9[%c0_6, %c0_7] : memref<256x128xf32, #tpu.memory_space<vmem>>, vector<256x128xf32>
    tpu.vector_store %arg9[%c0_6, %c0_7], %7 {strides = array<i32>} : memref<256x128xf32, #tpu.memory_space<vmem>>, vector<256x128xf32>,
    %c0_i32_8 = arith.constant 0 : i32
    %9 = arith.cmpi eq, %arg2, %c0_i32_8 : i32
    %10 = arith.extui %9 : i1 to i32
    %c0_i32_9 = arith.constant 0 : i32
    %11 = arith.cmpi ne, %10, %c0_i32_9 : i32
    scf.if %11 {
      %c0_10 = arith.constant 0 : index
      %c0_11 = arith.constant 0 : index
      %12 = vector.load %arg9[%c0_10, %c0_11] : memref<256x128xf32, #tpu.memory_space<vmem>>, vector<256x128xf32>
      %c0_12 = arith.constant 0 : index
      %c0_13 = arith.constant 0 : index
      %13 = vector.load %arg5[%c0_12, %c0_13] : memref<1x128xf32, #tpu.memory_space<vmem>>, vector<1x128xf32>
      %14 = vector.broadcast %13 : vector<1x128xf32> to vector<256x128xf32>
      %15 = arith.addf %12, %14 : vector<256x128xf32>
      %cst_14 = arith.constant dense<0.000000e+00> : vector<128xf32>
      %16 = vector.multi_reduction <add>, %15, %cst_14 [0] : vector<256x128xf32> to vector<128xf32>
      %17 = vector.shape_cast %16 : vector<128xf32> to vector<1x128xf32>
      %c0_15 = arith.constant 0 : index
      %c0_16 = arith.constant 0 : index
      %c0_17 = arith.constant 0 : index
      %18 = vector.load %arg7[%c0_15, %c0_16, %c0_17] : memref<1x1x128xf32, #tpu.memory_space<vmem>>, vector<1x1x128xf32>
      %19 = vector.shape_cast %18 : vector<1x1x128xf32> to vector<1x128xf32>
      %20 = vector.shape_cast %17 : vector<1x128xf32> to vector<1x1x128xf32>
      tpu.vector_store %arg7[%c0_15, %c0_16, %c0_17], %20 {strides = array<i32>} : memref<1x1x128xf32, #tpu.memory_space<vmem>>, vector<1x1x128xf32>,
      %21 = arith.mulf %15, %15 : vector<256x128xf32>
      %cst_18 = arith.constant dense<0.000000e+00> : vector<128xf32>
      %22 = vector.multi_reduction <add>, %21, %cst_18 [0] : vector<256x128xf32> to vector<128xf32>
      %23 = vector.shape_cast %22 : vector<128xf32> to vector<1x128xf32>
      %c0_19 = arith.constant 0 : index
      %c0_20 = arith.constant 0 : index
      %c0_21 = arith.constant 0 : index
      %24 = vector.load %arg8[%c0_19, %c0_20, %c0_21] : memref<1x1x128xf32, #tpu.memory_space<vmem>>, vector<1x1x128xf32>
      %25 = vector.shape_cast %24 : vector<1x1x128xf32> to vector<1x128xf32>
      %26 = vector.shape_cast %23 : vector<1x128xf32> to vector<1x1x128xf32>
      tpu.vector_store %arg8[%c0_19, %c0_20, %c0_21], %26 {strides = array<i32>} : memref<1x1x128xf32, #tpu.memory_space<vmem>>, vector<1x1x128xf32>,
      %27 = math.tanh %15 : vector<256x128xf32>
      %c0_22 = arith.constant 0 : index
      %c0_23 = arith.constant 0 : index
      %28 = vector.load %arg6[%c0_22, %c0_23] : memref<256x128xf32, #tpu.memory_space<vmem>>, vector<256x128xf32>
      tpu.vector_store %arg6[%c0_22, %c0_23], %27 {strides = array<i32>} : memref<256x128xf32, #tpu.memory_space<vmem>>, vector<256x128xf32>,
    } else {
    }
    return
  }
  func.func @transform_0(%arg0: i32, %arg1: i32, %arg2: i32) -> (i32, i32) {
    %c0_i32 = arith.constant 0 : i32
    return %arg0, %arg2 : i32, i32
  }
  func.func @transform_1(%arg0: i32, %arg1: i32, %arg2: i32) -> (i32, i32) {
    %c0_i32 = arith.constant 0 : i32
    return %arg2, %arg1 : i32, i32
  }
  func.func @transform_2(%arg0: i32, %arg1: i32, %arg2: i32) -> (i32, i32) {
    %c0_i32 = arith.constant 0 : i32
    %c0_i32_0 = arith.constant 0 : i32
    return %c0_i32, %arg1 : i32, i32
  }
  func.func @transform_3(%arg0: i32, %arg1: i32, %arg2: i32) -> (i32, i32) {
    %c0_i32 = arith.constant 0 : i32
    return %arg0, %arg1 : i32, i32
  }
  func.func @transform_4(%arg0: i32, %arg1: i32, %arg2: i32) -> (i32, i32, i32) {
    %c0_i32 = arith.constant 0 : i32
    %c0_i32_0 = arith.constant 0 : i32
    return %arg0, %c0_i32, %arg1 : i32, i32, i32
  }
  func.func @transform_5(%arg0: i32, %arg1: i32, %arg2: i32) -> (i32, i32, i32) {
    %c0_i32 = arith.constant 0 : i32
    %c0_i32_0 = arith.constant 0 : i32
    return %arg0, %c0_i32, %arg1 : i32, i32, i32
  }
}

</mosaic_0001>

<bundles_post_ra>
// kernel: generator_forward.10
= control target key start
LH: loop header
LB: loop body
LE: loop exit
PB: predicated region body
PF: predicated region fallthrough
CT: control target
= control target key end

     0   :  { %8 = vsyncpa [#allocation3], 0  ;;  %s326_s0 = inlined_call_operand.hbm [shape: f32[32,128], index: 0, kind: input, shape index: {}]   ;;  %s327_s1 = inlined_call_operand.hbm [shape: f32[1,128], index: 1, kind: input, shape index: {}]   ;;  %s328_s2 = inlined_call_operand.hbm [shape: f32[1,128], index: 2, kind: input, shape index: {}]   ;;  %s329_s3 = inlined_call_operand.hbm [shape: bf16[32,128], index: 3, kind: output, shape index: {}]  }
   0x1   :  { %9 = vsyncpa [#allocation6], 0 }
   0x2   :  { %10 = vsyncpa [#allocation4], 0  ;;  %s243_s12 = smov [#allocation5]   ;;  %s244_s14 = smov [#allocation2]  }
   0x3   :  { %s29_s13 = sshll.u32 %s243_s12, 4  ;;  %s16_s15 = sshll.u32 %s244_s14, 4  ;;  %s30_s13 = int_to_ptr.vmem [resolvable:$true] %s29_s13  ;;  %s271_s15 = int_to_ptr.vmem [resolvable:$true] %s16_s15 }
   0x4   :  { %s149_s18 = scalar_lea.hbm %s327_s1, 16 }
   0x5   :  { %p150_p0 = scmp.ne.s32.totalorder %s327_s1, %s149_s18  ;;  %p153_p1 = scmp.lt.u32.totalorder %s149_s18, %s327_s1 }
   0x7   :  { %p155_p2 = pnand %p153_p1, %p150_p0 }
   0x9   :  { %158 = shalt.err (!%p155_p2)
}
   0xa   :  { %s159_s23 = scalar_lea.vmem %s30_s13, 16  ;;  %s163_s24 = scalar_lea.vmem %s30_s13, 32 }
   0xb   :  { %p160_p3 = scmp.ne.s32.totalorder %s30_s13, %s159_s23  ;;  %p164_p4 = scmp.lt.s32.totalorder %s30_s13, %s30_s13 }
   0xc   :  { %p165_p5 = scmp.lt.s32.totalorder %s163_s24, %s159_s23 }
   0xe   :  { %p166_p6 = por %p165_p5, %p164_p4 }
  0x10   :  { %p167_p7 = pnand %p166_p6, %p160_p3 }
  0x12   :  { %170 = shalt.err (!%p167_p7)
}
  0x13   :  { %32 = dma.hbm_to_vmem [thread:$0]  %s327_s1, 16, %s30_s13, [#allocation6]  }
  0x14   :  { %s171_s29 = scalar_lea.hbm %s326_s0, 512 }
  0x15   :  { %p172_p8 = scmp.ne.s32.totalorder %s326_s0, %s171_s29  ;;  %p175_p9 = scmp.lt.u32.totalorder %s171_s29, %s326_s0 }
  0x17   :  { %p177_p10 = pnand %p175_p9, %p172_p8 }
  0x19   :  { %180 = shalt.err (!%p177_p10)
}
  0x1a   :  { %s181_s7 = scalar_lea.vmem %s271_s15, 512  ;;  %p186_p12 = scmp.lt.s32.totalorder %s271_s15, %s271_s15 }
  0x1b   :  { %p182_p11 = scmp.ne.s32.totalorder %s271_s15, %s181_s7  ;;  %p187_p13 = scmp.lt.s32.totalorder %s181_s7, %s181_s7 }
  0x1d   :  { %p188_p0 = por %p187_p13, %p186_p12 }
  0x1f   :  { %p189_p1 = pnand %p188_p0, %p182_p11 }
  0x21   :  { %192 = shalt.err (!%p189_p1)
}
  0x22   :  { %s245_s1 = smov 128   ;;  %s246_s8 = smov 8  }
  0x23   :  { %22 = dma.hbm_to_vmem [thread:$0]  %s326_s0, 512, %s271_s15, [#allocation3], %s245_s1, %s245_s1, %s246_s8  }
  0x24   :  { %s247_s11 = smov [#allocation7]   ;;  %s193_s16 = scalar_lea.hbm %s328_s2, 16 }
  0x25   :  { %s39_s12 = sshll.u32 %s247_s11, 4  ;;  %p194_p2 = scmp.ne.s32.totalorder %s328_s2, %s193_s16  ;;  %s40_s12 = int_to_ptr.vmem [resolvable:$true] %s39_s12 }
  0x26   :  { %p197_p3 = scmp.lt.u32.totalorder %s193_s16, %s328_s2 }
  0x28   :  { %p199_p4 = pnand %p197_p3, %p194_p2 }
  0x2a   :  { %202 = shalt.err (!%p199_p4)
}
  0x2b   :  { %s203_s21 = scalar_lea.vmem %s40_s12, 16  ;;  %s207_s0 = scalar_lea.vmem %s40_s12, 32 }
  0x2c   :  { %p204_p5 = scmp.ne.s32.totalorder %s40_s12, %s203_s21  ;;  %p208_p6 = scmp.lt.s32.totalorder %s40_s12, %s40_s12 }
  0x2d   :  { %p209_p7 = scmp.lt.s32.totalorder %s207_s0, %s203_s21 }
  0x2f   :  { %p210_p8 = por %p209_p7, %p208_p6 }
  0x31   :  { %p211_p9 = pnand %p210_p8, %p204_p5 }
  0x33   :  { %214 = shalt.err (!%p211_p9)
}
  0x34   :  { %42 = dma.hbm_to_vmem [thread:$0]  %s328_s2, 16, %s40_s12, [#allocation6]  }
  0x35   :  { %237 = dma.done.wait [#allocation3], 512  }
  0x36   :  { %238 = vsyncadd [#allocation3], 4294966784 }
  0x37   :  { %239 = dma.done.wait [#allocation6], 32  }
  0x38   :  { %240 = vsyncadd [#allocation6], 4294967264  ;;  %v52_v0 = vld [vmem:[#allocation2] sm:$0xff]  ;;  %v53_v1 = vld [vmem:[#allocation2 + $0x8] sm:$0xff]  ;;  %s248_s2 = smov [#allocation8]  }
  0x39   :  { %v120_v2 = vld [vmem:[#allocation5] ss:$0 sm:$0xff]  ;;  %v121_v5 = vld [vmem:[#allocation7] ss:$0 sm:$0xff]  ;;  %v54_v6 = vld [vmem:[#allocation2 + $0x10] sm:$0xff]  ;;  %s107_s23 = sshll.u32 %s248_s2, 4  ;;  %s108_s23 = int_to_ptr.vmem [resolvable:$true] %s107_s23 }
  0x3a   :  { %v63_v3 = vmul.f32 %v120_v2, %v52_v0  ;;  %v64_v4 = vmul.f32 %v120_v2, %v53_v1  ;;  %v55_v7 = vld [vmem:[#allocation2 + $0x18] sm:$0xff]  ;;  %v65_v8 = vmul.f32 %v120_v2, %v54_v6  ;;  %s215_s24 = scalar_lea.vmem %s108_s23, 256  ;;  %p220_p11 = scmp.lt.s32.totalorder %s108_s23, %s108_s23 }
  0x3b   :  { %v66_v9 = vmul.f32 %v120_v2, %v55_v7  ;;  %p216_p10 = scmp.ne.s32.totalorder %s108_s23, %s215_s24  ;;  %p221_p12 = scmp.lt.s32.totalorder %s215_s24, %s215_s24 }
  0x3c   :  { %v74_v10 = vadd.f32 %v121_v5, %v63_v3  ;;  %v75_v11 = vadd.f32 %v121_v5, %v64_v4  ;;  %v76_v12 = vadd.f32 %v121_v5, %v65_v8 }
  0x3d   :  { %v77_v13 = vadd.f32 %v121_v5, %v66_v9  ;;  %p222_p13 = por %p221_p12, %p220_p11 }
  0x3e   :  { %v78_v14 = vmax.f32 %v74_v10, 0.0  ;;  %v79_v15 = vmax.f32 %v75_v11, 0.0  ;;  %v80_v16 = vmax.f32 %v76_v12, 0.0 }
  0x3f   :  { %v81_v17 = vmax.f32 %v77_v13, 0.0  ;;  %p223_p0 = pnand %p222_p13, %p216_p10 }
  0x40   :  { %v133_v18 = vpack.c.bf16 %v79_v15, %v78_v14 }
  0x41   :  { %v138_v19 = vpack.c.bf16 %v81_v17, %v80_v16 }
  0x42   :  { %134 = vst [vmem:[#allocation8] sm:$0xff] %v133_v18  }
  0x43   :  { %140 = vst [vmem:[#allocation8 + $0x8] sm:$0xff] %v138_v19  }
  0x44   :  { %226 = shalt.err (!%p223_p0)
}
  0x45   :  { %s227_s27 = scalar_lea.hbm %s329_s3, 256 }
  0x46   :  { %p228_p1 = scmp.ne.s32.totalorder %s329_s3, %s227_s27  ;;  %p231_p2 = scmp.lt.u32.totalorder %s227_s27, %s329_s3 }
  0x48   :  { %p233_p3 = pnand %p231_p2, %p228_p1 }
  0x4a   :  { %236 = shalt.err (!%p233_p3)
}
  0x4b   :  { %s249_s5 = smov 64   ;;  %s250_s6 = smov 4  }
  0x4c   :  { %113 = dma.vmem_to_hbm [thread:$0]  %s108_s23, 256, %s329_s3, [#allocation4], %s249_s5, %s249_s5, %s250_s6  }
  0x4d   :  { %241 = dma.done.wait [#allocation4], 256  }
  0x4e   :  { %242 = vsyncadd [#allocation4], 4294967040 }
  0x4f   :  { %117 = vsyncpa [#allocation3], 1 }
  0x50   :  { %118 = vsyncpa [#allocation6], 1 }
  0x51   :  { %119 = vsyncpa [#allocation4], 1 }

// kernel: generator_forward.9
= control target key start
LH: loop header
LB: loop body
LE: loop exit
PB: predicated region body
PF: predicated region fallthrough
CT: control target
= control target key end

     0   :  { %11 = vsyncpa [#allocation4], 0  ;;  %s734_s0 = inlined_call_operand.hbm [shape: bf16[32,256], index: 0, kind: input, shape index: {}]   ;;  %s735_s1 = inlined_call_operand.hbm [shape: bf16[256,128], index: 1, kind: input, shape index: {}]   ;;  %s736_s2 = inlined_call_operand.hbm [shape: f32[1,128], index: 2, kind: input, shape index: {}]   ;;  %s737_s3 = inlined_call_operand.hbm [shape: f32[32,128], index: 3, kind: output, shape index: {0}]   ;;  %s738_s4 = inlined_call_operand.hbm [shape: f32[1,1,128], index: 4, kind: output, shape index: {1}]   ;;  %s739_s5 = inlined_call_operand.hbm [shape: f32[1,1,128], index: 5, kind: output, shape index: {2}]  }
   0x1   :  { %12 = vsyncpa [#allocation7], 0 }
   0x2   :  { %13 = vsyncpa [#allocation5], 0 }
   0x3   :  { %14 = vsyncpa [#allocation11], 0  ;;  %s608_s18 = smov [#allocation6]   ;;  %s468_s22 = scalar_lea.hbm %s735_s1, 2048 }
   0x4   :  { %s32_s19 = sshll.u32 %s608_s18, 4  ;;  %p469_p0 = scmp.ne.s32.totalorder %s735_s1, %s468_s22  ;;  %s33_s19 = int_to_ptr.vmem [resolvable:$true] %s32_s19 }
   0x5   :  { %p472_p1 = scmp.lt.u32.totalorder %s468_s22, %s735_s1 }
   0x7   :  { %p474_p2 = pnand %p472_p1, %p469_p0 }
   0x9   :  { %477 = shalt.err (!%p474_p2)
}
   0xa   :  { %s478_s27 = scalar_lea.vmem %s33_s19, 2048  ;;  %p483_p4 = scmp.lt.s32.totalorder %s33_s19, %s33_s19 }
   0xb   :  { %p479_p3 = scmp.ne.s32.totalorder %s33_s19, %s478_s27  ;;  %p484_p5 = scmp.lt.s32.totalorder %s478_s27, %s478_s27 }
   0xd   :  { %p485_p6 = por %p484_p5, %p483_p4 }
   0xf   :  { %p486_p7 = pnand %p485_p6, %p479_p3 }
  0x11   :  { %489 = shalt.err (!%p486_p7)
}
  0x12   :  { %s609_s28 = smov 64   ;;  %s610_s29 = smov 4  }
  0x13   :  { %38 = dma.hbm_to_vmem [thread:$0]  %s735_s1, 2048, %s33_s19, [#allocation7], %s609_s28, %s609_s28, %s610_s29  }
  0x14   :  { %s611_s7 = smov [#allocation3]   ;;  %s490_s11 = scalar_lea.hbm %s734_s0, 512 }
  0x15   :  { %s20_s8 = sshll.u32 %s611_s7, 4  ;;  %p491_p8 = scmp.ne.s32.totalorder %s734_s0, %s490_s11  ;;  %s21_s8 = int_to_ptr.vmem [resolvable:$true] %s20_s8 }
  0x16   :  { %p494_p9 = scmp.lt.u32.totalorder %s490_s11, %s734_s0 }
  0x18   :  { %p496_p10 = pnand %p494_p9, %p491_p8 }
  0x1a   :  { %499 = shalt.err (!%p496_p10)
}
  0x1b   :  { %s500_s16 = scalar_lea.vmem %s21_s8, 512  ;;  %p505_p12 = scmp.lt.s32.totalorder %s21_s8, %s21_s8 }
  0x1c   :  { %p501_p11 = scmp.ne.s32.totalorder %s21_s8, %s500_s16  ;;  %p506_p13 = scmp.lt.s32.totalorder %s500_s16, %s500_s16 }
  0x1e   :  { %p507_p0 = por %p506_p13, %p505_p12 }
  0x20   :  { %p508_p1 = pnand %p507_p0, %p501_p11 }
  0x22   :  { %511 = shalt.err (!%p508_p1)
}
  0x23   :  { %s612_s1 = smov 128   ;;  %s613_s17 = smov 8  }
  0x24   :  { %26 = dma.hbm_to_vmem [thread:$0]  %s734_s0, 512, %s21_s8, [#allocation4], %s612_s1, %s612_s1, %s613_s17  }
  0x25   :  { %s614_s20 = smov [#allocation8]   ;;  %s512_s24 = scalar_lea.hbm %s736_s2, 16 }
  0x26   :  { %s45_s21 = sshll.u32 %s614_s20, 4  ;;  %p513_p2 = scmp.ne.s32.totalorder %s736_s2, %s512_s24  ;;  %s46_s21 = int_to_ptr.vmem [resolvable:$true] %s45_s21 }
  0x27   :  { %p516_p3 = scmp.lt.u32.totalorder %s512_s24, %s736_s2 }
  0x29   :  { %p518_p4 = pnand %p516_p3, %p513_p2 }
  0x2b   :  { %521 = shalt.err (!%p518_p4)
}
  0x2c   :  { %s522_s29 = scalar_lea.vmem %s46_s21, 16  ;;  %s526_s0 = scalar_lea.vmem %s46_s21, 32 }
  0x2d   :  { %p523_p5 = scmp.ne.s32.totalorder %s46_s21, %s522_s29  ;;  %p527_p6 = scmp.lt.s32.totalorder %s46_s21, %s46_s21 }
  0x2e   :  { %p528_p7 = scmp.lt.s32.totalorder %s526_s0, %s522_s29 }
  0x30   :  { %p529_p8 = por %p528_p7, %p527_p6 }
  0x32   :  { %p530_p9 = pnand %p529_p8, %p523_p5 }
  0x34   :  { %533 = shalt.err (!%p530_p9)
}
  0x35   :  { %48 = dma.hbm_to_vmem [thread:$0]  %s736_s2, 16, %s46_s21, [#allocation7]  }
  0x36   :  { %600 = dma.done.wait [#allocation4], 512  }
  0x37   :  { %601 = vsyncadd [#allocation4], 4294966784 }
  0x38   :  { %602 = dma.done.wait [#allocation7], 2064  }
  0x39   :  { %603 = vsyncadd [#allocation7], 4294965232  ;;  %v446_v0 = vld [vmem:[#allocation6 + $0x40] sm:$0xff]   ;;  %v448_v2 = vld [vmem:[#allocation6 + $0x48] sm:$0xff]   ;;  %s615_s2 = smov [#allocation9]  }
  0x3a   :  { %v447_v1 = vld [vmem:[#allocation6] sm:$0xff]   ;;  %392 = vmatprep.subr.bf16.mxu0 %v446_v0  ;;  %420 = vmatprep.subr.bf16.mxu1 %v446_v0  ;;  %v449_v3 = vld [vmem:[#allocation6 + $0x8] sm:$0xff]   ;;  %v450_v4 = vld [vmem:[#allocation6 + $0x50] sm:$0xff]   ;;  %s331_s7 = sshll.u32 %s615_s2, 4  ;;  %s332_s7 = int_to_ptr.vmem [resolvable:$true] %s331_s7 }
  0x3b   :  { %393 = vmatpush3.bf16.msra.mxu0 %v447_v1  ;;  %428 = vmatpush3.bf16.msra.mxu1 %v447_v1  ;;  %v451_v5 = vld [vmem:[#allocation6 + $0x10] sm:$0xff]   ;;  %v452_v6 = vld [vmem:[#allocation6 + $0x58] sm:$0xff]   ;;  %v454_v8 = vld [vmem:[#allocation6 + $0x60] sm:$0xff]   ;;  %s534_s8 = scalar_lea.vmem %s332_s7, 512  ;;  %p539_p11 = scmp.lt.s32.totalorder %s332_s7, %s332_s7 }
  0x3c   :  { %394 = vmatprep.subr.bf16.mxu0 %v448_v2  ;;  %421 = vmatprep.subr.bf16.mxu1 %v448_v2  ;;  %v453_v7 = vld [vmem:[#allocation6 + $0x18] sm:$0xff]   ;;  %v455_v9 = vld [vmem:[#allocation6 + $0x20] sm:$0xff]   ;;  %v456_v10 = vld [vmem:[#allocation6 + $0x68] sm:$0xff]   ;;  %p535_p10 = scmp.ne.s32.totalorder %s332_s7, %s534_s8  ;;  %p540_p12 = scmp.lt.s32.totalorder %s534_s8, %s534_s8 }
  0x3d   :  { %v464_v11 = vld [vmem:[#allocation3 + $0x4] ss:$8 sps:$4 sm:$0xff]   ;;  %v467_v12 = vld [vmem:[#allocation3 + $0x14] ss:$8 sps:$4 sm:$0xff]   ;;  %v462_v18 = vld [vmem:[#allocation3] ss:$8 sps:$4 sm:$0xff]  }
  0x3e   :  { %v457_v13 = vld [vmem:[#allocation6 + $0x28] sm:$0xff]   ;;  %v458_v14 = vld [vmem:[#allocation6 + $0x70] sm:$0xff]   ;;  %255 = vmatprep.mubr.bf16.mxu0 %v464_v11  ;;  %263 = vmatprep.mubr.bf16.mxu1 %v467_v12  ;;  %v460_v16 = vld [vmem:[#allocation6 + $0x78] sm:$0xff]   ;;  %p541_p13 = por %p540_p12, %p539_p11 }
  0x3f   :  { %395 = vmatpush3.bf16.msra.mxu0 %v449_v3  ;;  %429 = vmatpush3.bf16.msra.mxu1 %v449_v3  ;;  %v459_v15 = vld [vmem:[#allocation6 + $0x30] sm:$0xff]   ;;  %v461_v17 = vld [vmem:[#allocation6 + $0x38] sm:$0xff]   ;;  %v391_v23 = vld [vmem:[#allocation8] ss:$0 sm:$0xff] }
  0x40   :  { %396 = vmatprep.subr.bf16.mxu0 %v450_v4  ;;  %422 = vmatprep.subr.bf16.mxu1 %v450_v4  ;;  %v465_v19 = vld [vmem:[#allocation3 + $0x10] ss:$8 sps:$4 sm:$0xff]   ;;  %p542_p0 = pnand %p541_p13, %p535_p10 }
  0x43   :  { %397 = vmatpush3.bf16.msra.mxu0 %v451_v5  ;;  %430 = vmatpush3.bf16.msra.mxu1 %v451_v5 }
  0x44   :  { %398 = vmatprep.subr.bf16.mxu0 %v452_v6  ;;  %423 = vmatprep.subr.bf16.mxu1 %v452_v6 }
  0x47   :  { %399 = vmatpush3.bf16.msra.mxu0 %v453_v7  ;;  %431 = vmatpush3.bf16.msra.mxu1 %v453_v7 }
  0x48   :  { %400 = vmatprep.subr.bf16.mxu0 %v454_v8  ;;  %424 = vmatprep.subr.bf16.mxu1 %v454_v8 }
  0x4b   :  { %401 = vmatpush3.bf16.msra.mxu0 %v455_v9  ;;  %432 = vmatpush3.bf16.msra.mxu1 %v455_v9 }
  0x4c   :  { %402 = vmatprep.subr.bf16.mxu0 %v456_v10  ;;  %425 = vmatprep.subr.bf16.mxu1 %v456_v10 }
  0x4f   :  { %403 = vmatpush3.bf16.msra.mxu0 %v457_v13  ;;  %433 = vmatpush3.bf16.msra.mxu1 %v457_v13 }
  0x50   :  { %404 = vmatprep.subr.bf16.mxu0 %v458_v14  ;;  %426 = vmatprep.subr.bf16.mxu1 %v458_v14 }
  0x53   :  { %405 = vmatpush3.bf16.msra.mxu0 %v459_v15  ;;  %434 = vmatpush3.bf16.msra.mxu1 %v459_v15 }
  0x54   :  { %406 = vmatprep.subr.bf16.mxu0 %v460_v16  ;;  %427 = vmatprep.subr.bf16.mxu1 %v460_v16 }
  0x57   :  { %407 = vmatpush3.bf16.msra.mxu0 %v461_v17  ;;  %435 = vmatpush3.bf16.msra.mxu1 %v461_v17 }
  0x5a   :  { %256 = vmatmul.mubr.bf16.vlgmr.msra.gmra.mrb[0].mxu0 %v462_v18  ;;  %264 = vmatmul.mubr.bf16.vlgmr.msra.gmra.mrb[0].mxu1 %v465_v19 }
 0x12d   :  { %v408_v20 = vpop.f32.mrb[0].mxu0  ;;  %v414_v21 = vpop.f32.mrb[0].mxu1 }
 0x12e   :  { %v409_v22 = vpop.f32.mrb[1].mxu0  ;;  %v415_v24 = vpop.f32.mrb[1].mxu1 }
 0x12f   :  { %v410_v25 = vadd.f32 %v409_v22, %v408_v20  ;;  %v411_v26 = vpop.f32.mrb[2].mxu0  ;;  %v416_v27 = vadd.f32 %v415_v24, %v414_v21  ;;  %v417_v28 = vpop.f32.mrb[2].mxu1 }
 0x130   :  { %v412_v29 = vpop.f32.mrb[3].mxu0  ;;  %v418_v30 = vpop.f32.mrb[3].mxu1 }
 0x131   :  { %v294_v31 = vadd.f32 %v410_v25, %v391_v23  ;;  %v296_v32 = vadd.f32 %v416_v27, %v391_v23  ;;  %v413_v33 = vadd.f32 %v412_v29, %v411_v26  ;;  %v419_v34 = vadd.f32 %v418_v30, %v417_v28 }
 0x133   :  { %322 = vst [vmem:[#allocation9] sm:$0xff] %v294_v31  ;;  %324 = vst [vmem:[#allocation9 + $0x10] sm:$0xff] %v296_v32  ;;  %v295_v35 = vadd.f32 %v413_v33, %v391_v23  ;;  %v297_v36 = vadd.f32 %v419_v34, %v391_v23  ;;  %v308_v37 = vmul.f32 %v294_v31, %v294_v31 }
 0x134   :  { %v310_v38 = vmul.f32 %v296_v32, %v296_v32 }
 0x135   :  { %v298_v39 = vadd.f32 %v295_v35, %v294_v31  ;;  %v309_v40 = vmul.f32 %v295_v35, %v295_v35  ;;  %323 = vst [vmem:[#allocation9 + $0x8] sm:$0xff] %v295_v35  ;;  %325 = vst [vmem:[#allocation9 + $0x18] sm:$0xff] %v297_v36 }
 0x136   :  { %545 = shalt.err (!%p542_p0)
}
 0x137   :  { %s546_s11 = scalar_lea.hbm %s737_s3, 512 }
 0x138   :  { %p547_p1 = scmp.ne.s32.totalorder %s737_s3, %s546_s11  ;;  %p550_p2 = scmp.lt.u32.totalorder %s546_s11, %s737_s3 }
 0x13a   :  { %p552_p3 = pnand %p550_p2, %p547_p1 }
 0x13c   :  { %555 = shalt.err (!%p552_p3)
}
 0x13d   :  { %337 = dma.vmem_to_hbm [thread:$0]  %s332_s7, 512, %s737_s3, [#allocation5], %s612_s1, %s612_s1, %s613_s17   ;;  %v312_v41 = vadd.f32 %v309_v40, %v308_v37  ;;  %v299_v42 = vadd.f32 %v298_v39, %v296_v32  ;;  %v311_v44 = vmul.f32 %v297_v36, %v297_v36 }
 0x13e   :  { %s616_s19 = smov [#allocation10]   ;;  %s617_s21 = smov [#allocation12]  }
 0x13f   :  { %v300_v43 = vadd.f32 %v299_v42, %v297_v36  ;;  %v313_v45 = vadd.f32 %v312_v41, %v310_v38  ;;  %s344_s20 = sshll.u32 %s616_s19, 4  ;;  %s354_s22 = sshll.u32 %s617_s21, 4  ;;  %s345_s20 = int_to_ptr.vmem [resolvable:$true] %s344_s20  ;;  %s702_s22 = int_to_ptr.vmem [resolvable:$true] %s354_s22 }
 0x140   :  { %s556_s3 = scalar_lea.vmem %s345_s20, 16  ;;  %s560_s1 = scalar_lea.vmem %s345_s20, 32 }
 0x141   :  { %v301_v46 = vrot.slane %v300_v43, 4  ;;  %v314_v47 = vadd.f32 %v313_v45, %v311_v44  ;;  %p557_p4 = scmp.ne.s32.totalorder %s345_s20, %s556_s3  ;;  %p561_p5 = scmp.lt.s32.totalorder %s345_s20, %s345_s20 }
 0x142   :  { %p562_p6 = scmp.lt.s32.totalorder %s560_s1, %s556_s3 }
 0x143   :  { %v315_v48 = vrot.slane %v314_v47, 4  ;;  %v302_v49 = vadd.f32 %v301_v46, %v300_v43 }
 0x144   :  { %p563_p7 = por %p562_p6, %p561_p5 }
 0x145   :  { %v303_v50 = vrot.slane %v302_v49, 2  ;;  %v316_v51 = vadd.f32 %v315_v48, %v314_v47 }
 0x146   :  { %p564_p8 = pnand %p563_p7, %p557_p4 }
 0x147   :  { %v304_v52 = vadd.f32 %v303_v50, %v302_v49  ;;  %v317_v53 = vrot.slane %v316_v51, 2 }
 0x149   :  { %v305_v54 = vrot.slane %v304_v52, 1  ;;  %v318_v55 = vadd.f32 %v317_v53, %v316_v51 }
 0x14b   :  { %v306_v56 = vadd.f32 %v305_v54, %v304_v52  ;;  %v319_v57 = vrot.slane %v318_v55, 1 }
 0x14d   :  { %307 = vst [vmem:[#allocation10] sm:$0x1] %v306_v56  ;;  %v320_v58 = vadd.f32 %v319_v57, %v318_v55 }
 0x14e   :  { %567 = shalt.err (!%p564_p8)
}
 0x14f   :  { %s568_s24 = scalar_lea.hbm %s738_s4, 16 }
 0x150   :  { %p569_p9 = scmp.ne.s32.totalorder %s738_s4, %s568_s24  ;;  %p572_p10 = scmp.lt.u32.totalorder %s568_s24, %s738_s4 }
 0x152   :  { %p574_p11 = pnand %p572_p10, %p569_p9 }
 0x154   :  { %577 = shalt.err (!%p574_p11)
}
 0x155   :  { %347 = dma.vmem_to_hbm [thread:$0]  %s345_s20, 16, %s738_s4, [#allocation11]   ;;  %321 = vst [vmem:[#allocation12] sm:$0x1] %v320_v58 }
 0x156   :  { %s578_s30 = scalar_lea.vmem %s702_s22, 16  ;;  %s582_s6 = scalar_lea.vmem %s702_s22, 32 }
 0x157   :  { %p579_p12 = scmp.ne.s32.totalorder %s702_s22, %s578_s30  ;;  %p583_p13 = scmp.lt.s32.totalorder %s702_s22, %s702_s22 }
 0x158   :  { %p584_p0 = scmp.lt.s32.totalorder %s582_s6, %s578_s30 }
 0x15a   :  { %p585_p1 = por %p584_p0, %p583_p13 }
 0x15c   :  { %p586_p2 = pnand %p585_p1, %p579_p12 }
 0x15e   :  { %589 = shalt.err (!%p586_p2)
}
 0x15f   :  { %s590_s8 = scalar_lea.hbm %s739_s5, 16 }
 0x160   :  { %p591_p3 = scmp.ne.s32.totalorder %s739_s5, %s590_s8  ;;  %p594_p4 = scmp.lt.u32.totalorder %s590_s8, %s739_s5 }
 0x162   :  { %p596_p5 = pnand %p594_p4, %p591_p3 }
 0x164   :  { %599 = shalt.err (!%p596_p5)
}
 0x165   :  { %357 = dma.vmem_to_hbm [thread:$0]  %s702_s22, 16, %s739_s5, [#allocation11]  }
 0x166   :  { %604 = dma.done.wait [#allocation5], 512  }
 0x167   :  { %605 = vsyncadd [#allocation5], 4294966784 }
 0x168   :  { %606 = dma.done.wait [#allocation11], 32  }
 0x169   :  { %607 = vsyncadd [#allocation11], 4294967264 }
 0x16a   :  { %367 = vsyncpa [#allocation4], 1 }
 0x16b   :  { %368 = vsyncpa [#allocation7], 1 }
 0x16c   :  { %369 = vsyncpa [#allocation5], 1 }
 0x16d   :  { %370 = vsyncpa [#allocation11], 1 }

// kernel: generator_forward.12
= control target key start
LH: loop header
LB: loop body
LE: loop exit
PB: predicated region body
PF: predicated region fallthrough
CT: control target
= control target key end

     0   :  { %8 = vsyncpa [#allocation3], 0  ;;  %s530_s0 = inlined_call_operand.hbm [shape: f32[128,128], index: 0, kind: input, shape index: {}]   ;;  %s531_s1 = inlined_call_operand.hbm [shape: f32[1,128], index: 1, kind: input, shape index: {}]   ;;  %s532_s2 = inlined_call_operand.hbm [shape: f32[1,128], index: 2, kind: input, shape index: {}]   ;;  %s533_s3 = inlined_call_operand.hbm [shape: bf16[128,128], index: 3, kind: output, shape index: {}]  }
   0x1   :  { %9 = vsyncpa [#allocation6], 0 }
   0x2   :  { %10 = vsyncpa [#allocation4], 0  ;;  %s411_s12 = smov [#allocation5]   ;;  %s412_s14 = smov [#allocation2]  }
   0x3   :  { %s29_s13 = sshll.u32 %s411_s12, 4  ;;  %s16_s15 = sshll.u32 %s412_s14, 4  ;;  %s30_s13 = int_to_ptr.vmem [resolvable:$true] %s29_s13  ;;  %s439_s15 = int_to_ptr.vmem [resolvable:$true] %s16_s15 }
   0x4   :  { %s317_s18 = scalar_lea.hbm %s531_s1, 16 }
   0x5   :  { %p318_p0 = scmp.ne.s32.totalorder %s531_s1, %s317_s18  ;;  %p321_p1 = scmp.lt.u32.totalorder %s317_s18, %s531_s1 }
   0x7   :  { %p323_p2 = pnand %p321_p1, %p318_p0 }
   0x9   :  { %326 = shalt.err (!%p323_p2)
}
   0xa   :  { %s327_s23 = scalar_lea.vmem %s30_s13, 16  ;;  %s331_s24 = scalar_lea.vmem %s30_s13, 32 }
   0xb   :  { %p328_p3 = scmp.ne.s32.totalorder %s30_s13, %s327_s23  ;;  %p332_p4 = scmp.lt.s32.totalorder %s30_s13, %s30_s13 }
   0xc   :  { %p333_p5 = scmp.lt.s32.totalorder %s331_s24, %s327_s23 }
   0xe   :  { %p334_p6 = por %p333_p5, %p332_p4 }
  0x10   :  { %p335_p7 = pnand %p334_p6, %p328_p3 }
  0x12   :  { %338 = shalt.err (!%p335_p7)
}
  0x13   :  { %32 = dma.hbm_to_vmem [thread:$0]  %s531_s1, 16, %s30_s13, [#allocation6]  }
  0x14   :  { %s339_s29 = scalar_lea.hbm %s530_s0, 2048 }
  0x15   :  { %p340_p8 = scmp.ne.s32.totalorder %s530_s0, %s339_s29  ;;  %p343_p9 = scmp.lt.u32.totalorder %s339_s29, %s530_s0 }
  0x17   :  { %p345_p10 = pnand %p343_p9, %p340_p8 }
  0x19   :  { %348 = shalt.err (!%p345_p10)
}
  0x1a   :  { %s349_s7 = scalar_lea.vmem %s439_s15, 2048  ;;  %p354_p12 = scmp.lt.s32.totalorder %s439_s15, %s439_s15 }
  0x1b   :  { %p350_p11 = scmp.ne.s32.totalorder %s439_s15, %s349_s7  ;;  %p355_p13 = scmp.lt.s32.totalorder %s349_s7, %s349_s7 }
  0x1d   :  { %p356_p0 = por %p355_p13, %p354_p12 }
  0x1f   :  { %p357_p1 = pnand %p356_p0, %p350_p11 }
  0x21   :  { %360 = shalt.err (!%p357_p1)
}
  0x22   :  { %s413_s1 = smov 128   ;;  %s414_s8 = smov 8  }
  0x23   :  { %22 = dma.hbm_to_vmem [thread:$0]  %s530_s0, 2048, %s439_s15, [#allocation3], %s413_s1, %s413_s1, %s414_s8  }
  0x24   :  { %s415_s11 = smov [#allocation7]   ;;  %s361_s16 = scalar_lea.hbm %s532_s2, 16 }
  0x25   :  { %s39_s12 = sshll.u32 %s415_s11, 4  ;;  %p362_p2 = scmp.ne.s32.totalorder %s532_s2, %s361_s16  ;;  %s40_s12 = int_to_ptr.vmem [resolvable:$true] %s39_s12 }
  0x26   :  { %p365_p3 = scmp.lt.u32.totalorder %s361_s16, %s532_s2 }
  0x28   :  { %p367_p4 = pnand %p365_p3, %p362_p2 }
  0x2a   :  { %370 = shalt.err (!%p367_p4)
}
  0x2b   :  { %s371_s21 = scalar_lea.vmem %s40_s12, 16  ;;  %s375_s0 = scalar_lea.vmem %s40_s12, 32 }
  0x2c   :  { %p372_p5 = scmp.ne.s32.totalorder %s40_s12, %s371_s21  ;;  %p376_p6 = scmp.lt.s32.totalorder %s40_s12, %s40_s12 }
  0x2d   :  { %p377_p7 = scmp.lt.s32.totalorder %s375_s0, %s371_s21 }
  0x2f   :  { %p378_p8 = por %p377_p7, %p376_p6 }
  0x31   :  { %p379_p9 = pnand %p378_p8, %p372_p5 }
  0x33   :  { %382 = shalt.err (!%p379_p9)
}
  0x34   :  { %42 = dma.hbm_to_vmem [thread:$0]  %s532_s2, 16, %s40_s12, [#allocation6]  }
  0x35   :  { %405 = dma.done.wait [#allocation3], 2048  }
  0x36   :  { %406 = vsyncadd [#allocation3], 4294965248 }
  0x37   :  { %407 = dma.done.wait [#allocation6], 32  }
  0x38   :  { %408 = vsyncadd [#allocation6], 4294967264  ;;  %v52_v0 = vld [vmem:[#allocation2] sm:$0xff]  ;;  %v53_v1 = vld [vmem:[#allocation2 + $0x8] sm:$0xff]  ;;  %s416_s2 = smov [#allocation8]  }
  0x39   :  { %v482_v2 = vld [vmem:[#allocation5] ss:$0 sm:$0xff]  ;;  %v486_v5 = vld [vmem:[#allocation7] ss:$0 sm:$0xff]  ;;  %v54_v6 = vld [vmem:[#allocation2 + $0x10] sm:$0xff]  ;;  %s215_s23 = sshll.u32 %s416_s2, 4  ;;  %s216_s23 = int_to_ptr.vmem [resolvable:$true] %s215_s23 }
  0x3a   :  { %v75_v3 = vmul.f32 %v482_v2, %v52_v0  ;;  %v76_v4 = vmul.f32 %v482_v2, %v53_v1  ;;  %v55_v7 = vld [vmem:[#allocation2 + $0x18] sm:$0xff]  ;;  %v77_v8 = vmul.f32 %v482_v2, %v54_v6  ;;  %v56_v10 = vld [vmem:[#allocation2 + $0x20] sm:$0xff]  ;;  %v57_v11 = vld [vmem:[#allocation2 + $0x28] sm:$0xff]  ;;  %s383_s24 = scalar_lea.vmem %s216_s23, 1024  ;;  %p388_p11 = scmp.lt.s32.totalorder %s216_s23, %s216_s23 }
  0x3b   :  { %v78_v9 = vmul.f32 %v482_v2, %v55_v7  ;;  %v58_v12 = vld [vmem:[#allocation2 + $0x30] sm:$0xff]  ;;  %v79_v15 = vmul.f32 %v482_v2, %v56_v10  ;;  %v80_v16 = vmul.f32 %v482_v2, %v57_v11  ;;  %v59_v17 = vld [vmem:[#allocation2 + $0x38] sm:$0xff]  ;;  %v60_v22 = vld [vmem:[#allocation2 + $0x40] sm:$0xff]  ;;  %p384_p10 = scmp.ne.s32.totalorder %s216_s23, %s383_s24  ;;  %p389_p12 = scmp.lt.s32.totalorder %s383_s24, %s383_s24 }
  0x3c   :  { %v98_v13 = vadd.f32 %v486_v5, %v75_v3  ;;  %v99_v14 = vadd.f32 %v486_v5, %v76_v4  ;;  %v100_v18 = vadd.f32 %v486_v5, %v77_v8  ;;  %v81_v20 = vmul.f32 %v482_v2, %v58_v12  ;;  %v61_v27 = vld [vmem:[#allocation2 + $0x48] sm:$0xff]  ;;  %v62_v32 = vld [vmem:[#allocation2 + $0x50] sm:$0xff]  ;;  %v63_v33 = vld [vmem:[#allocation2 + $0x58] sm:$0xff] }
  0x3d   :  { %v101_v19 = vadd.f32 %v486_v5, %v78_v9  ;;  %v82_v21 = vmul.f32 %v482_v2, %v59_v17  ;;  %v102_v25 = vadd.f32 %v486_v5, %v79_v15  ;;  %v103_v26 = vadd.f32 %v486_v5, %v80_v16  ;;  %v64_v38 = vld [vmem:[#allocation2 + $0x60] sm:$0xff]  ;;  %v65_v39 = vld [vmem:[#allocation2 + $0x68] sm:$0xff]  ;;  %v66_v44 = vld [vmem:[#allocation2 + $0x70] sm:$0xff]  ;;  %p390_p13 = por %p389_p12, %p388_p11 }
  0x3e   :  { %v114_v23 = vmax.f32 %v98_v13, 0.0  ;;  %v115_v24 = vmax.f32 %v99_v14, 0.0  ;;  %v116_v28 = vmax.f32 %v100_v18, 0.0  ;;  %v104_v30 = vadd.f32 %v486_v5, %v81_v20  ;;  %v67_v49 = vld [vmem:[#allocation2 + $0x78] sm:$0xff] }
  0x3f   :  { %v117_v29 = vmax.f32 %v101_v19, 0.0  ;;  %v105_v31 = vadd.f32 %v486_v5, %v82_v21  ;;  %v118_v35 = vmax.f32 %v102_v25, 0.0  ;;  %v119_v36 = vmax.f32 %v103_v26, 0.0  ;;  %p391_p0 = pnand %p390_p13, %p384_p10 }
  0x40   :  { %v265_v34 = vpack.c.bf16 %v115_v24, %v114_v23  ;;  %v83_v37 = vmul.f32 %v482_v2, %v60_v22  ;;  %v120_v41 = vmax.f32 %v104_v30, 0.0  ;;  %v84_v43 = vmul.f32 %v482_v2, %v61_v27 }
  0x41   :  { %v270_v40 = vpack.c.bf16 %v117_v29, %v116_v28  ;;  %v121_v42 = vmax.f32 %v105_v31, 0.0  ;;  %v275_v45 = vpack.c.bf16 %v119_v36, %v118_v35  ;;  %v85_v47 = vmul.f32 %v482_v2, %v62_v32 }
  0x42   :  { %266 = vst [vmem:[#allocation8] sm:$0xff] %v265_v34   ;;  %v106_v46 = vadd.f32 %v486_v5, %v83_v37  ;;  %v86_v48 = vmul.f32 %v482_v2, %v63_v33  ;;  %v107_v51 = vadd.f32 %v486_v5, %v84_v43  ;;  %v87_v52 = vmul.f32 %v482_v2, %v64_v38 }
  0x43   :  { %302 = vst [vmem:[#allocation8 + $0x8] sm:$0xff] %v270_v40   ;;  %v280_v50 = vpack.c.bf16 %v121_v42, %v120_v41  ;;  %v88_v53 = vmul.f32 %v482_v2, %v65_v39  ;;  %303 = vst [vmem:[#allocation8 + $0x10] sm:$0xff] %v275_v45   ;;  %v108_v55 = vadd.f32 %v486_v5, %v85_v47 }
  0x44   :  { %v122_v54 = vmax.f32 %v106_v46, 0.0  ;;  %v109_v56 = vadd.f32 %v486_v5, %v86_v48  ;;  %v89_v57 = vmul.f32 %v482_v2, %v66_v44  ;;  %v123_v58 = vmax.f32 %v107_v51, 0.0 }
  0x45   :  { %304 = vst [vmem:[#allocation8 + $0x18] sm:$0xff] %v280_v50   ;;  %v110_v59 = vadd.f32 %v486_v5, %v87_v52  ;;  %v111_v60 = vadd.f32 %v486_v5, %v88_v53  ;;  %v90_v61 = vmul.f32 %v482_v2, %v67_v49  ;;  %v124_v62 = vmax.f32 %v108_v55, 0.0 }
  0x46   :  { %v125_v63 = vmax.f32 %v109_v56, 0.0  ;;  %v112_v0 = vadd.f32 %v486_v5, %v89_v57  ;;  %v285_v1 = vpack.c.bf16 %v123_v58, %v122_v54 }
  0x47   :  { %v126_v3 = vmax.f32 %v110_v59, 0.0  ;;  %v127_v4 = vmax.f32 %v111_v60, 0.0  ;;  %v113_v6 = vadd.f32 %v486_v5, %v90_v61 }
  0x48   :  { %v290_v7 = vpack.c.bf16 %v125_v63, %v124_v62  ;;  %v128_v8 = vmax.f32 %v112_v0, 0.0  ;;  %305 = vst [vmem:[#allocation8 + $0x20] sm:$0xff] %v285_v1  }
  0x49   :  { %v295_v9 = vpack.c.bf16 %v127_v4, %v126_v3  ;;  %v129_v10 = vmax.f32 %v113_v6, 0.0 }
  0x4a   :  { %306 = vst [vmem:[#allocation8 + $0x28] sm:$0xff] %v290_v7  }
  0x4b   :  { %307 = vst [vmem:[#allocation8 + $0x30] sm:$0xff] %v295_v9   ;;  %v300_v11 = vpack.c.bf16 %v129_v10, %v128_v8 }
  0x4d   :  { %308 = vst [vmem:[#allocation8 + $0x38] sm:$0xff] %v300_v11  }
  0x4e   :  { %394 = shalt.err (!%p391_p0)
}
  0x4f   :  { %s395_s27 = scalar_lea.hbm %s533_s3, 1024 }
  0x50   :  { %p396_p1 = scmp.ne.s32.totalorder %s533_s3, %s395_s27  ;;  %p399_p2 = scmp.lt.u32.totalorder %s395_s27, %s533_s3 }
  0x52   :  { %p401_p3 = pnand %p399_p2, %p396_p1 }
  0x54   :  { %404 = shalt.err (!%p401_p3)
}
  0x55   :  { %s417_s5 = smov 64   ;;  %s418_s6 = smov 4  }
  0x56   :  { %221 = dma.vmem_to_hbm [thread:$0]  %s216_s23, 1024, %s533_s3, [#allocation4], %s417_s5, %s417_s5, %s418_s6  }
  0x57   :  { %409 = dma.done.wait [#allocation4], 1024  }
  0x58   :  { %410 = vsyncadd [#allocation4], 4294966272 }
  0x59   :  { %225 = vsyncpa [#allocation3], 1 }
  0x5a   :  { %226 = vsyncpa [#allocation6], 1 }
  0x5b   :  { %227 = vsyncpa [#allocation4], 1 }

// kernel: generator_forward.11
= control target key start
LH: loop header
LB: loop body
LE: loop exit
PB: predicated region body
PF: predicated region fallthrough
CT: control target
= control target key end

     0   :  { %s2355_s0 = inlined_call_operand.hbm [shape: bf16[128,1024], index: 0, kind: input, shape index: {}]   ;;  %s2356_s1 = inlined_call_operand.hbm [shape: bf16[1024,128], index: 1, kind: input, shape index: {}]   ;;  %s2357_s2 = inlined_call_operand.hbm [shape: f32[1,128], index: 2, kind: input, shape index: {}]   ;;  %s2358_s3 = inlined_call_operand.hbm [shape: f32[128,128], index: 3, kind: output, shape index: {0}]   ;;  %s2359_s4 = inlined_call_operand.hbm [shape: f32[1,1,128], index: 4, kind: output, shape index: {1}]   ;;  %s2360_s5 = inlined_call_operand.hbm [shape: f32[1,1,128], index: 5, kind: output, shape index: {2}]  }
   0x1   :  { %2365 = sst [smem:[#allocation18_spill]] %s2355_s0 }
   0x2   :  { %2366 = sst [smem:[#allocation19_spill]] %s2357_s2 }
   0x3   :  { %11 = vsyncpa [#allocation4], 0 }
   0x4   :  { %13 = vsyncpa [#allocation4 + $0x1], 0 }
   0x5   :  { %14 = vsyncpa [#allocation7], 0 }
   0x6   :  { %16 = vsyncpa [#allocation7 + $0x1], 0 }
   0x7   :  { %17 = vsyncpa [#allocation5], 0 }
   0x8   :  { %18 = vsyncpa [#allocation11], 0  ;;  %s2018_s18 = smov 0   ;;  %s2020_s19 = smov 0  }
   0x9   :  { %s2022_s20 = smov 0   ;;  %s2024_s21 = smov 0  }
   0xa   :  { %s2026_s22 = smov 0   ;;  %s2028_s23 = smov 0  }
   0xb LB: > { %s2047_s24 = sadd.s32 4294967295, %s1972_s23   ;;  %s52_s25 = sadd.s32 1, %s1960_s20  ;;  %s1972_s23 = sphi %s2028_s23, %s24_s23   ;;  %s1968_s22 = sphi %s2026_s22, %s2382_s22   ;;  %s1964_s21 = sphi %s2024_s21, %s2381_s21   ;;  %s1960_s20 = sphi %s2022_s20, %s2380_s20   ;;  %s1956_s19 = sphi %s2020_s19, %s2379_s19   ;;  %s1952_s18 = sphi %s2018_s18, %s2378_s18  }
   0xc   : > { %p59_p0 = scmp.ne.s32.totalorder %s1960_s20, %s1956_s19  ;;  %p60_p1 = scmp.eq.s32.totalorder %s1972_s23, 0 }
   0xd   : > { %p65_p2 = scmp.ne.s32.totalorder %s1956_s19, %s1952_s18  ;;  %p2361_p3 = scmp.eq.s32.totalorder %s2047_s24, 0 }
   0xe   : > { %p61_p4 = por %p60_p1, %p59_p0  ;;  %p1342_p5 = scmp.ge.s32.totalorder %s1972_s23, 1 }
   0xf   : > { %p2058_p6 = por %p2361_p3, %p65_p2  ;;  %p214_p7 = scmp.lt.s32.totalorder %s1972_s23, 3 }
  0x10   : > { %s1974_s28 = smov [#allocation8]   ;;  %p1592_p10 = scmp.lt.s32.totalorder %s1972_s23, 2 }
  0x11   : > { %s2367_s26 = scalar_select %p2058_p6, 1, 0 }
  0x12   : > { %p2063_p8 = pnand %p1342_p5, %p214_p7  ;;  %s229_s29 = sshll.u32 %s1974_s28, 4  ;;  %s230_s29 = int_to_ptr.vmem [resolvable:$true] %s229_s29 }
  0x13   : > { %s240_s30 = sand.u32 1, %s1960_s20   ;;  %p2077_p12 = pnand %p1592_p10, %p61_p4 }
  0x14   : > { %s2368_s27 = scalar_select %p2063_p8, 1, 0 }
  0x15   : > { %p1580_p9 = pneg %p2063_p8  ;;  %s2371_s2 = sld [smem:[#allocation19_spill]] }
  0x16   : > { %s2370_s7 = scalar_select %p2077_p12, 1, 0 }
  0x17   : > { %p2073_p11 = pnand %p1580_p9, %p2361_p3 }
  0x19   : > { %p1742_p0 = pneg %p2073_p11 }
  0x1b   : > { %s1740_s10 = scalar_lea.hbm %s2371_s2, 16 }
  0x1c   : > { %p1741_p13 = scmp.ne.s32.totalorder %s2371_s2, %s1740_s10  ;;  %p1747_p5 = scmp.lt.u32.totalorder %s1740_s10, %s2371_s2 }
  0x1e   : > { %p1743_p1 = pnand %p1742_p0, %p1741_p13 }
  0x20   : > { %p1744_p2 = pneg %p1743_p1 }
  0x22   : > { %p1749_p4 = pnand %p1747_p5, %p1744_p2 }
  0x24   : > { %1752 = shalt.err (!%p1749_p4)
}
  0x25   : > { %s1753_s15 = scalar_lea.vmem %s230_s29, 16  ;;  %s1760_s16 = scalar_lea.vmem %s230_s29, 32 }
  0x26   : > { %p1754_p7 = scmp.ne.s32.totalorder %s230_s29, %s1753_s15  ;;  %p1761_p3 = scmp.lt.s32.totalorder %s230_s29, %s230_s29 }
  0x27   : > { %p1762_p6 = scmp.lt.s32.totalorder %s1760_s16, %s1753_s15 }
  0x28   : > { %p1756_p9 = pnand %p1754_p7, %p1742_p0 }
  0x29   : > { %p1763_p8 = por %p1762_p6, %p1761_p3 }
  0x2a   : > { %p1757_p10 = pneg %p1756_p9 }
  0x2c   : > { %p1764_p12 = pnand %p1763_p8, %p1757_p10 }
  0x2e   : > { %1767 = shalt.err (!%p1764_p12)
}
  0x2f   : > { %1583 = dma.hbm_to_vmem [thread:$0]  (!%p2073_p11), %s2371_s2, 16, %s230_s29, [#allocation7]  }
  0x30   : > { %s36_s28 = sadd.s32 1, %s1968_s22  ;;  %s2100_s8 = sshll.u32 %s240_s30, 8 }
  0x31   : > { %p37_p3 = scmp.ge.s32.totalorder %s36_s28, 2  ;;  %s1430_s6 = sshll.u32 %s1968_s22, 8 }
  0x32   : > { %s244_s9 = scalar_lea.vmem [#allocation3], %s2100_s8  ;;  %s2372_s0 = sld [smem:[#allocation18_spill]] }
  0x33   : > { %s254_s10 = sshll.u32 %s244_s9, 4  ;;  %s2384_s28 = smov (%p37_p3, %s36_s28), 0  ;;  %s2111_s10 = int_to_ptr.vmem [resolvable:$true] %s254_s10 }
  0x34   : > { %s48_s29 = ssub.s32 %s1968_s22, %s2384_s28  ;;  %s264_s14 = sand.u32 1, %s1972_s23  }
  0x35   : > { %p50_p6 = scmp.eq.s32.totalorder %s48_s29, 0  ;;  %s2123_s16 = scalar_lea.sflag [#allocation4], %s240_s30 }
  0x36   : > { %p2373_p11 = scmp.ne.s32.totalorder %s2370_s7, 0 }
  0x37   : > { %s2119_s15 = scalar_select %p50_p6, %s1960_s20, %s52_s25  }
  0x38   : > { %s2109_s13 = scalar_lea.hbm %s2372_s0, %s1430_s6  ;;  %p1770_p12 = pneg %p2373_p11 }
  0x39   : > { %s1768_s17 = scalar_lea.hbm %s2109_s13, 4096  ;;  %s1773_s9 = scalar_lea.hbm %s2372_s0, 8192 }
  0x3a   : > { %p1769_p8 = scmp.ne.s32.totalorder %s2109_s13, %s1768_s17  ;;  %p1774_p1 = scmp.lt.u32.totalorder %s2109_s13, %s2372_s0 }
  0x3b   : > { %p1775_p2 = scmp.lt.u32.totalorder %s1773_s9, %s1768_s17  ;;  %p1777_p4 = scmp.lt.u32.totalorder %s1768_s17, %s2109_s13 }
  0x3c   : > { %p1771_p13 = pnand %p1770_p12, %p1769_p8 }
  0x3d   : > { %p1776_p5 = por %p1775_p2, %p1774_p1 }
  0x3e   : > { %p1772_p0 = pneg %p1771_p13 }
  0x3f   : > { %p1778_p7 = por %p1777_p4, %p1776_p5 }
  0x41   : > { %p1779_p9 = pnand %p1778_p7, %p1772_p0 }
  0x43   : > { %1782 = shalt.err (!%p1779_p9)
}
  0x44   : > { %s1783_s25 = scalar_lea.vmem %s2111_s10, 4096  ;;  %s1975_s30 = smov [#allocation3]  }
  0x45   : > { %p1784_p10 = scmp.ne.s32.totalorder %s2111_s10, %s1783_s25  ;;  %s1788_s29 = sshll.u32 %s1975_s30, 4  ;;  %s1789_s29 = int_to_ptr.vmem [resolvable:$false] %s1788_s29 }
  0x46   : > { %s1790_s18 = scalar_lea.vmem %s1789_s29, 8192  ;;  %p1791_p8 = scmp.lt.s32.totalorder %s2111_s10, %s1789_s29 }
  0x47   : > { %p1786_p3 = pnand %p1784_p10, %p1770_p12  ;;  %p1792_p13 = scmp.lt.s32.totalorder %s1790_s18, %s1783_s25 }
  0x49   : > { %p1787_p6 = pneg %p1786_p3  ;;  %p1793_p1 = por %p1792_p13, %p1791_p8 }
  0x4b   : > { %p1794_p2 = pnand %p1793_p1, %p1787_p6 }
  0x4d   : > { %1797 = shalt.err (!%p1794_p2)
}
  0x4e   : > { %s1976_s17 = smov 512   ;;  %s1977_s6 = smov 256  }
  0x4f   : > { %s1978_s9 = smov 16   ;;  %s1431_s11 = sshll.u32 %s1968_s22, 12 }
  0x50   : > { %1587 = dma.hbm_to_vmem [thread:$0]  (!%p2373_p11), %s2109_s13, 4096, %s2111_s10, %s2123_s16, %s1976_s17, %s1977_s6, %s1978_s9  }
  0x51   : > { %s268_s12 = scalar_lea.vmem [#allocation6], %s2100_s8  ;;  %s2156_s18 = scalar_lea.hbm %s2356_s1, %s1431_s11 }
  0x52   : > { %s276_s30 = sshll.u32 %s268_s12, 4  ;;  %s2162_s0 = scalar_lea.sflag [#allocation7], %s264_s14  ;;  %s2158_s30 = int_to_ptr.vmem [resolvable:$true] %s276_s30 }
  0x53   : > { %s1798_s2 = scalar_lea.hbm %s2156_s18, 4096  ;;  %s1803_s13 = scalar_lea.hbm %s2356_s1, 8192 }
  0x54   : > { %p1799_p0 = scmp.ne.s32.totalorder %s2156_s18, %s1798_s2  ;;  %p1804_p7 = scmp.lt.u32.totalorder %s2156_s18, %s2356_s1 }
  0x55   : > { %p1805_p9 = scmp.lt.u32.totalorder %s1803_s13, %s1798_s2  ;;  %p1807_p3 = scmp.lt.u32.totalorder %s1798_s2, %s2156_s18 }
  0x56   : > { %p1801_p5 = pnand %p1799_p0, %p1770_p12 }
  0x57   : > { %p1806_p10 = por %p1805_p9, %p1804_p7 }
  0x58   : > { %p1802_p4 = pneg %p1801_p5 }
  0x59   : > { %p1808_p6 = por %p1807_p3, %p1806_p10 }
  0x5b   : > { %p1809_p8 = pnand %p1808_p6, %p1802_p4 }
  0x5d   : > { %1812 = shalt.err (!%p1809_p8)
}
  0x5e   : > { %s1813_s14 = scalar_lea.vmem %s2158_s30, 4096  ;;  %s1979_s6 = smov [#allocation6]  }
  0x5f   : > { %p1814_p13 = scmp.ne.s32.totalorder %s2158_s30, %s1813_s14  ;;  %s1818_s9 = sshll.u32 %s1979_s6, 4  ;;  %s1819_s9 = int_to_ptr.vmem [resolvable:$false] %s1818_s9 }
  0x60   : > { %s1820_s11 = scalar_lea.vmem %s1819_s9, 8192  ;;  %p1821_p0 = scmp.lt.s32.totalorder %s2158_s30, %s1819_s9 }
  0x61   : > { %p1816_p1 = pnand %p1814_p13, %p1770_p12  ;;  %p1822_p5 = scmp.lt.s32.totalorder %s1820_s11, %s1813_s14 }
  0x63   : > { %p1817_p2 = pneg %p1816_p1  ;;  %p1823_p7 = por %p1822_p5, %p1821_p0 }
  0x65   : > { %p1824_p9 = pnand %p1823_p7, %p1817_p2 }
  0x67   : > { %1827 = shalt.err (!%p1824_p9)
}
  0x68   : > { %s1980_s2 = smov 64   ;;  %s1981_s12 = smov 4  }
  0x69   : > { %1590 = dma.hbm_to_vmem [thread:$0]  (!%p2373_p11), %s2156_s18, 4096, %s2158_s30, %s2162_s0, %s1980_s2, %s1980_s2, %s1981_s12  }
  0x6a   : > { %p2374_p12 = scmp.ne.s32.totalorder %s2368_s27, 0 }
  0x6b   : > { %s290_s25 = sand.u32 (!%p2374_p12), 1, %s1956_s19   ;;  %p2375_p4 = scmp.ne.s32.totalorder (!%p2374_p12), %s2367_s26, 0 }
  0x6c   : > { %288 = sbr.rel (%p2374_p12) target bundleno = 550 (0x226), region = 32  ;;  %s1352_s29 = sshll.u32 (!%p2374_p12), %s290_s25, 8 }
  0x6d   : > { %s291_s8 = scalar_lea.sflag (!%p2374_p12), [#allocation4], %s290_s25  ;;  %s2191_s10 = scalar_lea.vmem (!%p2374_p12), [#allocation3], %s1352_s29 }
  0x73   : > { %1931 = dma.done.wait (%p2375_p4), %s291_s8, 4096  }
  0x74   : > { %1933 = vsyncadd (%p2375_p4), %s291_s8, 4294963200  ;;  %s299_s13 = sand.u32 1, %s2047_s24   ;;  %s2198_s0 = scalar_lea.vmem [#allocation6], %s1352_s29 }
  0x75   : > { %s300_s7 = scalar_lea.sflag [#allocation7], %s299_s13 }
  0x76   : > { %1935 = dma.done.wait (%p2375_p4), %s300_s7, 4096  }
  0x77   : > { %1937 = vsyncadd (%p2375_p4), %s300_s7, 4294963200  ;;  %p2376_p11 = scmp.eq.s32.totalorder %s2047_s24, 0 }
  0x79   : > { %1939 = dma.done.wait (%p2376_p11), [#allocation7], 16   ;;  %p2377_p10 = pmov %p2376_p11 }
  0x7a   : > { %p1355_p3 = scmp.ne.s32.totalorder %s1964_s21, 0 }
  0x7b   : > { %1941 = vsyncadd (%p2377_p10), [#allocation7], 4294967280  ;;  %v1982_v0 = vmov (!%p1355_p3), 0.0  }
  0x7c   : > { %342 = sbr.rel (%p1355_p3) target bundleno = 132 (0x84), region = 48  ;;  %343 = vst [vmem:[#allocation2] sm:$0xff] (!%p1355_p3), %v1982_v0  ;;  %344 = vst [vmem:[#allocation2 + $0x8] sm:$0xff] (!%p1355_p3), %v1982_v0 }
  0x7d   : > { %345 = vst [vmem:[#allocation2 + $0x10] sm:$0xff] (!%p1355_p3), %v1982_v0  ;;  %346 = vst [vmem:[#allocation2 + $0x18] sm:$0xff] (!%p1355_p3), %v1982_v0 }
  0x7e   : > { %347 = vst [vmem:[#allocation2 + $0x20] sm:$0xff] (!%p1355_p3), %v1982_v0  ;;  %348 = vst [vmem:[#allocation2 + $0x28] sm:$0xff] (!%p1355_p3), %v1982_v0 }
  0x7f   : > { %349 = vst [vmem:[#allocation2 + $0x30] sm:$0xff] (!%p1355_p3), %v1982_v0  ;;  %350 = vst [vmem:[#allocation2 + $0x38] sm:$0xff] (!%p1355_p3), %v1982_v0 }
  0x80   : > { %351 = vst [vmem:[#allocation2 + $0x40] sm:$0xff] (!%p1355_p3), %v1982_v0  ;;  %352 = vst [vmem:[#allocation2 + $0x48] sm:$0xff] (!%p1355_p3), %v1982_v0 }
  0x81   : > { %353 = vst [vmem:[#allocation2 + $0x50] sm:$0xff] (!%p1355_p3), %v1982_v0  ;;  %354 = vst [vmem:[#allocation2 + $0x58] sm:$0xff] (!%p1355_p3), %v1982_v0 }
  0x82   : > { %355 = vst [vmem:[#allocation2 + $0x60] sm:$0xff] (!%p1355_p3), %v1982_v0  ;;  %356 = vst [vmem:[#allocation2 + $0x68] sm:$0xff] (!%p1355_p3), %v1982_v0 }
  0x83   : > { %357 = vst [vmem:[#allocation2 + $0x70] sm:$0xff] %v1982_v0  ;;  %358 = vst [vmem:[#allocation2 + $0x78] sm:$0xff] %v1982_v0 }
  0x84 PF: > { %v1660_v1 = vld [vmem:[%s2198_s0 + $0x40] sm:$0xff]   ;;  %v1664_v5 = vld [vmem:[%s2198_s0 + $0x48] sm:$0xff]   ;;  %v1668_v9 = vld [vmem:[%s2198_s0 + $0x50] sm:$0xff]   ;;  %p1420_p6 = scmp.ne.s32.totalorder %s1964_s21, 1 }
  0x85   : > { %v1661_v2 = vld [vmem:[%s2198_s0 + $0xc0] sm:$0xff]   ;;  %1432 = vmatprep.subr.bf16.mxu0 %v1660_v1  ;;  %v1665_v6 = vld [vmem:[%s2198_s0 + $0xc8] sm:$0xff]   ;;  %v1669_v10 = vld [vmem:[%s2198_s0 + $0xd0] sm:$0xff]  }
  0x86   : > { %v1662_v3 = vld [vmem:[%s2198_s0] sm:$0xff]   ;;  %1496 = vmatprep.subr.bf16.mxu1 %v1661_v2  ;;  %v1666_v7 = vld [vmem:[%s2198_s0 + $0x8] sm:$0xff]   ;;  %v1670_v11 = vld [vmem:[%s2198_s0 + $0x10] sm:$0xff]  }
  0x87   : > { %v1663_v4 = vld [vmem:[%s2198_s0 + $0x80] sm:$0xff]   ;;  %1433 = vmatpush3.bf16.msra.mxu0 %v1662_v3  ;;  %v1667_v8 = vld [vmem:[%s2198_s0 + $0x88] sm:$0xff]   ;;  %v1671_v12 = vld [vmem:[%s2198_s0 + $0x90] sm:$0xff]  }
  0x88   : > { %1497 = vmatpush3.bf16.msra.mxu1 %v1663_v4  ;;  %1434 = vmatprep.subr.bf16.mxu0 %v1664_v5  ;;  %v1672_v13 = vld [vmem:[%s2198_s0 + $0x58] sm:$0xff]   ;;  %v1676_v17 = vld [vmem:[%s2198_s0 + $0x60] sm:$0xff]   ;;  %v1680_v21 = vld [vmem:[%s2198_s0 + $0x68] sm:$0xff]  }
  0x89   : > { %1498 = vmatprep.subr.bf16.mxu1 %v1665_v6  ;;  %v1673_v14 = vld [vmem:[%s2198_s0 + $0xd8] sm:$0xff]   ;;  %v1677_v18 = vld [vmem:[%s2198_s0 + $0xe0] sm:$0xff]   ;;  %v1681_v22 = vld [vmem:[%s2198_s0 + $0xe8] sm:$0xff]  }
  0x8a   : > { %v1674_v15 = vld [vmem:[%s2198_s0 + $0x18] sm:$0xff]   ;;  %v1678_v19 = vld [vmem:[%s2198_s0 + $0x20] sm:$0xff]   ;;  %v1682_v23 = vld [vmem:[%s2198_s0 + $0x28] sm:$0xff]  }
  0x8b   : > { %1435 = vmatpush3.bf16.msra.mxu0 %v1666_v7  ;;  %v1675_v16 = vld [vmem:[%s2198_s0 + $0x98] sm:$0xff]   ;;  %v1679_v20 = vld [vmem:[%s2198_s0 + $0xa0] sm:$0xff]   ;;  %v1683_v24 = vld [vmem:[%s2198_s0 + $0xa8] sm:$0xff]  }
  0x8c   : > { %1499 = vmatpush3.bf16.msra.mxu1 %v1667_v8  ;;  %1436 = vmatprep.subr.bf16.mxu0 %v1668_v9  ;;  %v1684_v25 = vld [vmem:[%s2198_s0 + $0x70] sm:$0xff]   ;;  %v1688_v29 = vld [vmem:[%s2198_s0 + $0x78] sm:$0xff]  }
  0x8d   : > { %1500 = vmatprep.subr.bf16.mxu1 %v1669_v10  ;;  %v1685_v26 = vld [vmem:[%s2198_s0 + $0xf0] sm:$0xff]   ;;  %v1689_v30 = vld [vmem:[%s2198_s0 + $0xf8] sm:$0xff]   ;;  %v359_v10 = vld [vmem:[#allocation2] sm:$0xff] }
  0x8e   : > { %v1686_v27 = vld [vmem:[%s2198_s0 + $0x30] sm:$0xff]   ;;  %v1690_v31 = vld [vmem:[%s2198_s0 + $0x38] sm:$0xff]  }
  0x8f   : > { %1437 = vmatpush3.bf16.msra.mxu0 %v1670_v11  ;;  %v1687_v28 = vld [vmem:[%s2198_s0 + $0xb0] sm:$0xff]   ;;  %v1691_v32 = vld [vmem:[%s2198_s0 + $0xb8] sm:$0xff]  }
  0x90   : > { %1501 = vmatpush3.bf16.msra.mxu1 %v1671_v12  ;;  %1438 = vmatprep.subr.bf16.mxu0 %v1672_v13  ;;  %v1692_v33 = vld [vmem:[%s2191_s10] ss:$16 sps:$4 sm:$0xff]   ;;  %v1694_v34 = vld [vmem:[%s2191_s10 + $0x4] ss:$16 sps:$4 sm:$0xff]   ;;  %v1695_v35 = vld [vmem:[%s2191_s10 + $0x8] ss:$16 sps:$4 sm:$0xff]  }
  0x91   : > { %1502 = vmatprep.subr.bf16.mxu1 %v1673_v14  ;;  %v1697_v36 = vld [vmem:[%s2191_s10 + $0xc] ss:$16 sps:$4 sm:$0xff]   ;;  %855 = vmatprep.mubr.bf16.mxu0 %v1694_v34  ;;  %v1698_v37 = vld [vmem:[%s2191_s10 + $0x24] ss:$16 sps:$4 sm:$0xff]   ;;  %v1702_v39 = vld [vmem:[%s2191_s10 + $0x20] ss:$16 sps:$4 sm:$0xff]  }
  0x92   : > { %952 = vmatprep.mubr.bf16.mxu1 %v1697_v36  ;;  %v1700_v38 = vld [vmem:[%s2191_s10 + $0x2c] ss:$16 sps:$4 sm:$0xff]   ;;  %v1703_v40 = vld [vmem:[%s2191_s10 + $0x28] ss:$16 sps:$4 sm:$0xff]   ;;  %v1704_v41 = vld [vmem:[%s2191_s10 + $0x44] ss:$16 sps:$4 sm:$0xff]  }
  0x93   : > { %1439 = vmatpush3.bf16.msra.mxu0 %v1674_v15  ;;  %v1706_v42 = vld [vmem:[%s2191_s10 + $0x4c] ss:$16 sps:$4 sm:$0xff]   ;;  %v1708_v43 = vld [vmem:[%s2191_s10 + $0x40] ss:$16 sps:$4 sm:$0xff]   ;;  %v1709_v44 = vld [vmem:[%s2191_s10 + $0x48] ss:$16 sps:$4 sm:$0xff]  }
  0x94   : > { %1503 = vmatpush3.bf16.msra.mxu1 %v1675_v16  ;;  %1440 = vmatprep.subr.bf16.mxu0 %v1676_v17  ;;  %v1710_v45 = vld [vmem:[%s2191_s10 + $0x64] ss:$16 sps:$4 sm:$0xff]   ;;  %v1712_v46 = vld [vmem:[%s2191_s10 + $0x6c] ss:$16 sps:$4 sm:$0xff]   ;;  %v1714_v47 = vld [vmem:[%s2191_s10 + $0x60] ss:$16 sps:$4 sm:$0xff]  }
  0x95   : > { %1504 = vmatprep.subr.bf16.mxu1 %v1677_v18  ;;  %v1715_v48 = vld [vmem:[%s2191_s10 + $0x68] ss:$16 sps:$4 sm:$0xff]   ;;  %v1716_v49 = vld [vmem:[%s2191_s10 + $0x84] ss:$16 sps:$4 sm:$0xff]   ;;  %v1718_v50 = vld [vmem:[%s2191_s10 + $0x8c] ss:$16 sps:$4 sm:$0xff]  }
  0x96   : > { %v1720_v51 = vld [vmem:[%s2191_s10 + $0x80] ss:$16 sps:$4 sm:$0xff]   ;;  %v1721_v52 = vld [vmem:[%s2191_s10 + $0x88] ss:$16 sps:$4 sm:$0xff]   ;;  %v1722_v53 = vld [vmem:[%s2191_s10 + $0xa4] ss:$16 sps:$4 sm:$0xff]  }
  0x97   : > { %1441 = vmatpush3.bf16.msra.mxu0 %v1678_v19  ;;  %v1724_v54 = vld [vmem:[%s2191_s10 + $0xac] ss:$16 sps:$4 sm:$0xff]   ;;  %v1726_v55 = vld [vmem:[%s2191_s10 + $0xa0] ss:$16 sps:$4 sm:$0xff]   ;;  %v1727_v56 = vld [vmem:[%s2191_s10 + $0xa8] ss:$16 sps:$4 sm:$0xff]  }
  0x98   : > { %1505 = vmatpush3.bf16.msra.mxu1 %v1679_v20  ;;  %1442 = vmatprep.subr.bf16.mxu0 %v1680_v21  ;;  %v1728_v57 = vld [vmem:[%s2191_s10 + $0xc4] ss:$16 sps:$4 sm:$0xff]   ;;  %v1730_v58 = vld [vmem:[%s2191_s10 + $0xcc] ss:$16 sps:$4 sm:$0xff]   ;;  %v1732_v59 = vld [vmem:[%s2191_s10 + $0xc0] ss:$16 sps:$4 sm:$0xff]  }
  0x99   : > { %1506 = vmatprep.subr.bf16.mxu1 %v1681_v22  ;;  %v1733_v60 = vld [vmem:[%s2191_s10 + $0xc8] ss:$16 sps:$4 sm:$0xff]   ;;  %v1734_v61 = vld [vmem:[%s2191_s10 + $0xe4] ss:$16 sps:$4 sm:$0xff]   ;;  %v1736_v62 = vld [vmem:[%s2191_s10 + $0xec] ss:$16 sps:$4 sm:$0xff]  }
  0x9a   : > { %v1738_v63 = vld [vmem:[%s2191_s10 + $0xe0] ss:$16 sps:$4 sm:$0xff]   ;;  %v1739_v0 = vld [vmem:[%s2191_s10 + $0xe8] ss:$16 sps:$4 sm:$0xff]  }
  0x9b   : > { %1443 = vmatpush3.bf16.msra.mxu0 %v1682_v23  ;;  %v360_v15 = vld [vmem:[#allocation2 + $0x8] sm:$0xff] }
  0x9c   : > { %1507 = vmatpush3.bf16.msra.mxu1 %v1683_v24  ;;  %1444 = vmatprep.subr.bf16.mxu0 %v1684_v25 }
  0x9d   : > { %1508 = vmatprep.subr.bf16.mxu1 %v1685_v26 }
  0x9f   : > { %1445 = vmatpush3.bf16.msra.mxu0 %v1686_v27 }
  0xa0   : > { %1509 = vmatpush3.bf16.msra.mxu1 %v1687_v28  ;;  %1446 = vmatprep.subr.bf16.mxu0 %v1688_v29  ;;  %v361_v28 = vld [vmem:[#allocation2 + $0x10] sm:$0xff] }
  0xa1   : > { %1510 = vmatprep.subr.bf16.mxu1 %v1689_v30 }
  0xa3   : > { %1447 = vmatpush3.bf16.msra.mxu0 %v1690_v31 }
  0xa4   : > { %1511 = vmatpush3.bf16.msra.mxu1 %v1691_v32 }
  0xa6   : > { %856 = vmatmul.mubr.bf16.vlgmr.msra.gmra.mrb[0].mxu0 %v1692_v33  ;;  %v362_v33 = vld [vmem:[#allocation2 + $0x18] sm:$0xff] }
  0xa7   : > { %953 = vmatmul.mubr.bf16.vlgmr.msra.gmra.mrb[0].mxu1 %v1695_v35  ;;  %863 = vmatprep.mubr.bf16.mxu0 %v1698_v37 }
  0xa8   : > { %960 = vmatprep.mubr.bf16.mxu1 %v1700_v38 }
  0xae   : > { %864 = vmatmul.mubr.bf16.gmra.mrb[4].mxu0 %v1702_v39 }
  0xaf   : > { %961 = vmatmul.mubr.bf16.gmra.mrb[4].mxu1 %v1703_v40  ;;  %871 = vmatprep.mubr.bf16.mxu0 %v1704_v41 }
  0xb0   : > { %968 = vmatprep.mubr.bf16.mxu1 %v1706_v42 }
  0xb6   : > { %872 = vmatmul.mubr.bf16.gmra.mrb[8].mxu0 %v1708_v43 }
  0xb7   : > { %969 = vmatmul.mubr.bf16.gmra.mrb[8].mxu1 %v1709_v44  ;;  %879 = vmatprep.mubr.bf16.mxu0 %v1710_v45 }
  0xb8   : > { %976 = vmatprep.mubr.bf16.mxu1 %v1712_v46  ;;  %v363_v46 = vld [vmem:[#allocation2 + $0x20] sm:$0xff] }
  0xbe   : > { %880 = vmatmul.mubr.bf16.gmra.mrb[12].mxu0 %v1714_v47 }
  0xbf   : > { %977 = vmatmul.mubr.bf16.gmra.mrb[12].mxu1 %v1715_v48  ;;  %887 = vmatprep.mubr.bf16.mxu0 %v1716_v49 }
  0xc0   : > { %984 = vmatprep.mubr.bf16.mxu1 %v1718_v50 }
  0xc6   : > { %888 = vmatmul.mubr.bf16.gmra.mrb[16].mxu0 %v1720_v51  ;;  %v364_v51 = vld [vmem:[#allocation2 + $0x28] sm:$0xff] }
  0xc7   : > { %985 = vmatmul.mubr.bf16.gmra.mrb[16].mxu1 %v1721_v52  ;;  %895 = vmatprep.mubr.bf16.mxu0 %v1722_v53 }
  0xc8   : > { %992 = vmatprep.mubr.bf16.mxu1 %v1724_v54 }
  0xce   : > { %896 = vmatmul.mubr.bf16.gmra.mrb[20].mxu0 %v1726_v55 }
  0xcf   : > { %993 = vmatmul.mubr.bf16.gmra.mrb[20].mxu1 %v1727_v56  ;;  %903 = vmatprep.mubr.bf16.mxu0 %v1728_v57 }
  0xd0   : > { %1000 = vmatprep.mubr.bf16.mxu1 %v1730_v58 }
  0xd6   : > { %904 = vmatmul.mubr.bf16.gmra.mrb[24].mxu0 %v1732_v59 }
  0xd7   : > { %1001 = vmatmul.mubr.bf16.gmra.mrb[24].mxu1 %v1733_v60  ;;  %911 = vmatprep.mubr.bf16.mxu0 %v1734_v61 }
  0xd8   : > { %1008 = vmatprep.mubr.bf16.mxu1 %v1736_v62 }
  0xde   : > { %912 = vmatmul.mubr.bf16.gmra.mrb[28].mxu0 %v1738_v63 }
  0xdf   : > { %1009 = vmatmul.mubr.bf16.gmra.mrb[28].mxu1 %v1739_v0  ;;  %v365_v0 = vld [vmem:[#allocation2 + $0x30] sm:$0xff] }
 0x179   : > { %v1448_v1 = vpop.f32.mrb[0].mxu0 }
 0x17a   : > { %v1512_v2 = vpop.f32.mrb[0].mxu1  ;;  %v1449_v3 = vpop.f32.mrb[1].mxu0 }
 0x17b   : > { %v1450_v4 = vadd.f32 %v1449_v3, %v1448_v1  ;;  %v1513_v5 = vpop.f32.mrb[1].mxu1  ;;  %v1451_v6 = vpop.f32.mrb[2].mxu0 }
 0x17c   : > { %v1514_v7 = vadd.f32 %v1513_v5, %v1512_v2  ;;  %v1515_v8 = vpop.f32.mrb[2].mxu1  ;;  %v1452_v9 = vpop.f32.mrb[3].mxu0  ;;  %v366_v5 = vld [vmem:[#allocation2 + $0x38] sm:$0xff] }
 0x17d   : > { %v1453_v11 = vadd.f32 %v1452_v9, %v1451_v6  ;;  %v1516_v12 = vpop.f32.mrb[3].mxu1 }
 0x17e   : > { %v955_v13 = vadd.f32 %v1514_v7, %v1450_v4  ;;  %v1517_v14 = vadd.f32 %v1516_v12, %v1515_v8 }
 0x180   : > { %v1017_v16 = vadd.f32 %v955_v13, %v359_v10  ;;  %v958_v17 = vadd.f32 %v1517_v14, %v1453_v11 }
 0x181   : > { %v1454_v18 = vpop.f32.mrb[4].mxu0 }
 0x182   : > { %1033 = vst [vmem:[#allocation2] sm:$0xff] %v1017_v16  ;;  %v1018_v19 = vadd.f32 %v958_v17, %v360_v15  ;;  %v1518_v20 = vpop.f32.mrb[4].mxu1  ;;  %v1455_v21 = vpop.f32.mrb[5].mxu0 }
 0x183   : > { %v1456_v22 = vadd.f32 %v1455_v21, %v1454_v18  ;;  %v1519_v23 = vpop.f32.mrb[5].mxu1  ;;  %v1457_v24 = vpop.f32.mrb[6].mxu0  ;;  %v367_v18 = vld [vmem:[#allocation2 + $0x40] sm:$0xff] }
 0x184   : > { %1034 = vst [vmem:[#allocation2 + $0x8] sm:$0xff] %v1018_v19  ;;  %v1520_v25 = vadd.f32 %v1519_v23, %v1518_v20  ;;  %v1521_v26 = vpop.f32.mrb[6].mxu1  ;;  %v1458_v27 = vpop.f32.mrb[7].mxu0  ;;  %v368_v23 = vld [vmem:[#allocation2 + $0x48] sm:$0xff] }
 0x185   : > { %v1459_v29 = vadd.f32 %v1458_v27, %v1457_v24  ;;  %v1522_v30 = vpop.f32.mrb[7].mxu1 }
 0x186   : > { %v963_v31 = vadd.f32 %v1520_v25, %v1456_v22  ;;  %v1523_v32 = vadd.f32 %v1522_v30, %v1521_v26 }
 0x188   : > { %v1019_v34 = vadd.f32 %v963_v31, %v361_v28  ;;  %v966_v35 = vadd.f32 %v1523_v32, %v1459_v29 }
 0x189   : > { %v1460_v36 = vpop.f32.mrb[8].mxu0 }
 0x18a   : > { %1035 = vst [vmem:[#allocation2 + $0x10] sm:$0xff] %v1019_v34  ;;  %v1020_v37 = vadd.f32 %v966_v35, %v362_v33  ;;  %v1524_v38 = vpop.f32.mrb[8].mxu1  ;;  %v1461_v39 = vpop.f32.mrb[9].mxu0 }
 0x18b   : > { %v1462_v40 = vadd.f32 %v1461_v39, %v1460_v36  ;;  %v1525_v41 = vpop.f32.mrb[9].mxu1  ;;  %v1463_v42 = vpop.f32.mrb[10].mxu0  ;;  %v369_v36 = vld [vmem:[#allocation2 + $0x50] sm:$0xff] }
 0x18c   : > { %1036 = vst [vmem:[#allocation2 + $0x18] sm:$0xff] %v1020_v37  ;;  %v1526_v43 = vadd.f32 %v1525_v41, %v1524_v38  ;;  %v1527_v44 = vpop.f32.mrb[10].mxu1  ;;  %v1464_v45 = vpop.f32.mrb[11].mxu0  ;;  %v370_v41 = vld [vmem:[#allocation2 + $0x58] sm:$0xff] }
 0x18d   : > { %v1465_v47 = vadd.f32 %v1464_v45, %v1463_v42  ;;  %v1528_v48 = vpop.f32.mrb[11].mxu1 }
 0x18e   : > { %v971_v49 = vadd.f32 %v1526_v43, %v1462_v40  ;;  %v1529_v50 = vadd.f32 %v1528_v48, %v1527_v44 }
 0x190   : > { %v1021_v52 = vadd.f32 %v971_v49, %v363_v46  ;;  %v974_v53 = vadd.f32 %v1529_v50, %v1465_v47 }
 0x191   : > { %v1466_v54 = vpop.f32.mrb[12].mxu0 }
 0x192   : > { %1037 = vst [vmem:[#allocation2 + $0x20] sm:$0xff] %v1021_v52  ;;  %v1022_v55 = vadd.f32 %v974_v53, %v364_v51  ;;  %v1530_v56 = vpop.f32.mrb[12].mxu1  ;;  %v1467_v57 = vpop.f32.mrb[13].mxu0 }
 0x193   : > { %v1468_v58 = vadd.f32 %v1467_v57, %v1466_v54  ;;  %v1531_v59 = vpop.f32.mrb[13].mxu1  ;;  %v1469_v60 = vpop.f32.mrb[14].mxu0  ;;  %v371_v54 = vld [vmem:[#allocation2 + $0x60] sm:$0xff] }
 0x194   : > { %1038 = vst [vmem:[#allocation2 + $0x28] sm:$0xff] %v1022_v55  ;;  %v1532_v61 = vadd.f32 %v1531_v59, %v1530_v56  ;;  %v1533_v62 = vpop.f32.mrb[14].mxu1  ;;  %v1470_v63 = vpop.f32.mrb[15].mxu0  ;;  %v372_v59 = vld [vmem:[#allocation2 + $0x68] sm:$0xff] }
 0x195   : > { %v1471_v1 = vadd.f32 %v1470_v63, %v1469_v60  ;;  %v1534_v2 = vpop.f32.mrb[15].mxu1 }
 0x196   : > { %v979_v3 = vadd.f32 %v1532_v61, %v1468_v58  ;;  %v1535_v4 = vadd.f32 %v1534_v2, %v1533_v62 }
 0x198   : > { %v1023_v6 = vadd.f32 %v979_v3, %v365_v0  ;;  %v982_v7 = vadd.f32 %v1535_v4, %v1471_v1 }
 0x199   : > { %v1472_v8 = vpop.f32.mrb[16].mxu0 }
 0x19a   : > { %1039 = vst [vmem:[#allocation2 + $0x30] sm:$0xff] %v1023_v6  ;;  %v1024_v9 = vadd.f32 %v982_v7, %v366_v5  ;;  %v1536_v10 = vpop.f32.mrb[16].mxu1  ;;  %v1473_v11 = vpop.f32.mrb[17].mxu0 }
 0x19b   : > { %v1474_v12 = vadd.f32 %v1473_v11, %v1472_v8  ;;  %v1537_v13 = vpop.f32.mrb[17].mxu1  ;;  %v1475_v14 = vpop.f32.mrb[18].mxu0  ;;  %v373_v8 = vld [vmem:[#allocation2 + $0x70] sm:$0xff] }
 0x19c   : > { %1040 = vst [vmem:[#allocation2 + $0x38] sm:$0xff] %v1024_v9  ;;  %v1538_v15 = vadd.f32 %v1537_v13, %v1536_v10  ;;  %v1539_v16 = vpop.f32.mrb[18].mxu1  ;;  %v1476_v17 = vpop.f32.mrb[19].mxu0  ;;  %v374_v13 = vld [vmem:[#allocation2 + $0x78] sm:$0xff] }
 0x19d   : > { %v1477_v19 = vadd.f32 %v1476_v17, %v1475_v14  ;;  %v1540_v20 = vpop.f32.mrb[19].mxu1  ;;  %v1053_v17 = vld [vmem:[#allocation2] sm:$0xff] (!%p1420_p6) }
 0x19e   : > { %v987_v21 = vadd.f32 %v1538_v15, %v1474_v12  ;;  %v1541_v22 = vadd.f32 %v1540_v20, %v1539_v16  ;;  %v1056_v20 = vld [vmem:[#allocation2 + $0x18] sm:$0xff] (!%p1420_p6) }
 0x1a0   : > { %v1025_v24 = vadd.f32 %v987_v21, %v367_v18  ;;  %v990_v25 = vadd.f32 %v1541_v22, %v1477_v19  ;;  %v1054_v18 = vld [vmem:[#allocation2 + $0x8] sm:$0xff] (!%p1420_p6)  ;;  %v1055_v19 = vld [vmem:[#allocation2 + $0x10] sm:$0xff] (!%p1420_p6)  ;;  %v1057_v21 = vld [vmem:[#allocation2 + $0x20] sm:$0xff] (!%p1420_p6) }
 0x1a1   : > { %v1478_v26 = vpop.f32.mrb[20].mxu0  ;;  %v1058_v22 = vld [vmem:[#allocation2 + $0x28] sm:$0xff] (!%p1420_p6) }
 0x1a2   : > { %1041 = vst [vmem:[#allocation2 + $0x40] sm:$0xff] %v1025_v24  ;;  %v1026_v27 = vadd.f32 %v990_v25, %v368_v23  ;;  %v1542_v28 = vpop.f32.mrb[20].mxu1  ;;  %v1479_v29 = vpop.f32.mrb[21].mxu0  ;;  %v1059_v23 = vld [vmem:[#allocation2 + $0x30] sm:$0xff] (!%p1420_p6) }
 0x1a3   : > { %v1480_v30 = vadd.f32 %v1479_v29, %v1478_v26  ;;  %v1543_v31 = vpop.f32.mrb[21].mxu1  ;;  %v1481_v32 = vpop.f32.mrb[22].mxu0  ;;  %v1060_v24 = vld [vmem:[#allocation2 + $0x38] sm:$0xff] (!%p1420_p6) }
 0x1a4   : > { %1042 = vst [vmem:[#allocation2 + $0x48] sm:$0xff] %v1026_v27  ;;  %v1544_v33 = vadd.f32 %v1543_v31, %v1542_v28  ;;  %v1545_v34 = vpop.f32.mrb[22].mxu1  ;;  %v1482_v35 = vpop.f32.mrb[23].mxu0 }
 0x1a5   : > { %v1483_v37 = vadd.f32 %v1482_v35, %v1481_v32  ;;  %v1546_v38 = vpop.f32.mrb[23].mxu1 }
 0x1a6   : > { %v995_v39 = vadd.f32 %v1544_v33, %v1480_v30  ;;  %v1547_v40 = vadd.f32 %v1546_v38, %v1545_v34  ;;  %v1421_v30 = vld [vmem:[#allocation8] ss:$0 sm:$0xff] (!%p1420_p6) }
 0x1a7   : > { %v1076_v34 = vadd.f32 (!%p1420_p6), %v1421_v30, %v1053_v17  ;;  %v1077_v35 = vadd.f32 (!%p1420_p6), %v1421_v30, %v1054_v18  ;;  %v1080_v38 = vadd.f32 (!%p1420_p6), %v1421_v30, %v1057_v21 }
 0x1a8   : > { %v1027_v42 = vadd.f32 %v995_v39, %v369_v36  ;;  %v998_v43 = vadd.f32 %v1547_v40, %v1483_v37  ;;  %v1078_v36 = vadd.f32 (!%p1420_p6), %v1421_v30, %v1055_v19  ;;  %v1079_v37 = vadd.f32 (!%p1420_p6), %v1421_v30, %v1056_v20 }
 0x1a9   : > { %v1484_v44 = vpop.f32.mrb[24].mxu0  ;;  %v1061_v25 = vld [vmem:[#allocation2 + $0x40] sm:$0xff] (!%p1420_p6)  ;;  %v1081_v39 = vadd.f32 (!%p1420_p6), %v1421_v30, %v1058_v22  ;;  %v1082_v40 = vadd.f32 (!%p1420_p6), %v1421_v30, %v1059_v23  ;;  %1152 = vst [vmem:[#allocation9] sm:$0xff] (!%p1420_p6), %v1076_v34  ;;  %1153 = vst [vmem:[#allocation9 + $0x8] sm:$0xff] (!%p1420_p6), %v1077_v35 }
 0x1aa   : > { %1043 = vst [vmem:[#allocation2 + $0x50] sm:$0xff] %v1027_v42  ;;  %v1028_v45 = vadd.f32 %v998_v43, %v370_v41  ;;  %v1548_v46 = vpop.f32.mrb[24].mxu1  ;;  %v1485_v47 = vpop.f32.mrb[25].mxu0  ;;  %v1083_v41 = vadd.f32 (!%p1420_p6), %v1421_v30, %v1060_v24  ;;  %v1084_v42 = vadd.f32 (!%p1420_p6), %v1421_v30, %v1061_v25  ;;  %1154 = vst [vmem:[#allocation9 + $0x10] sm:$0xff] (!%p1420_p6), %v1078_v36 }
 0x1ab   : > { %v1486_v48 = vadd.f32 %v1485_v47, %v1484_v44  ;;  %v1549_v49 = vpop.f32.mrb[25].mxu1  ;;  %v1487_v50 = vpop.f32.mrb[26].mxu0  ;;  %v1062_v26 = vld [vmem:[#allocation2 + $0x48] sm:$0xff] (!%p1420_p6)  ;;  %1155 = vst [vmem:[#allocation9 + $0x18] sm:$0xff] (!%p1420_p6), %v1079_v37  ;;  %1156 = vst [vmem:[#allocation9 + $0x20] sm:$0xff] (!%p1420_p6), %v1080_v38 }
 0x1ac   : > { %1044 = vst [vmem:[#allocation2 + $0x58] sm:$0xff] %v1028_v45  ;;  %v1550_v51 = vadd.f32 %v1549_v49, %v1548_v46  ;;  %v1551_v52 = vpop.f32.mrb[26].mxu1  ;;  %v1488_v53 = vpop.f32.mrb[27].mxu0  ;;  %v1085_v43 = vadd.f32 (!%p1420_p6), %v1421_v30, %v1062_v26  ;;  %1157 = vst [vmem:[#allocation9 + $0x28] sm:$0xff] (!%p1420_p6), %v1081_v39 }
 0x1ad   : > { %v1489_v55 = vadd.f32 %v1488_v53, %v1487_v50  ;;  %v1552_v56 = vpop.f32.mrb[27].mxu1  ;;  %1158 = vst [vmem:[#allocation9 + $0x30] sm:$0xff] (!%p1420_p6), %v1082_v40  ;;  %1159 = vst [vmem:[#allocation9 + $0x38] sm:$0xff] (!%p1420_p6), %v1083_v41  ;;  %v1092_v50 = vadd.f32 (!%p1420_p6), %v1077_v35, %v1076_v34 }
 0x1ae   : > { %v1003_v57 = vadd.f32 %v1550_v51, %v1486_v48  ;;  %v1553_v58 = vadd.f32 %v1552_v56, %v1551_v52  ;;  %1160 = vst [vmem:[#allocation9 + $0x40] sm:$0xff] (!%p1420_p6), %v1084_v42  ;;  %1161 = vst [vmem:[#allocation9 + $0x48] sm:$0xff] (!%p1420_p6), %v1085_v43  ;;  %v1114_v51 = vmul.f32 (!%p1420_p6), %v1076_v34, %v1076_v34 }
 0x1af   : > { %v1115_v52 = vmul.f32 (!%p1420_p6), %v1077_v35, %v1077_v35  ;;  %v1093_v53 = vadd.f32 (!%p1420_p6), %v1092_v50, %v1078_v36  ;;  %v1117_v56 = vmul.f32 (!%p1420_p6), %v1079_v37, %v1079_v37 }
 0x1b0   : > { %v1029_v60 = vadd.f32 %v1003_v57, %v371_v54  ;;  %v1006_v61 = vadd.f32 %v1553_v58, %v1489_v55  ;;  %v1116_v54 = vmul.f32 (!%p1420_p6), %v1078_v36, %v1078_v36 }
 0x1b1   : > { %v1490_v62 = vpop.f32.mrb[28].mxu0  ;;  %v1063_v27 = vld [vmem:[#allocation2 + $0x50] sm:$0xff] (!%p1420_p6)  ;;  %v1094_v55 = vadd.f32 (!%p1420_p6), %v1093_v53, %v1079_v37  ;;  %v1130_v57 = vadd.f32 (!%p1420_p6), %v1115_v52, %v1114_v51 }
 0x1b2   : > { %1045 = vst [vmem:[#allocation2 + $0x60] sm:$0xff] %v1029_v60  ;;  %v1030_v63 = vadd.f32 %v1006_v61, %v372_v59  ;;  %v1554_v0 = vpop.f32.mrb[28].mxu1  ;;  %v1491_v1 = vpop.f32.mrb[29].mxu0  ;;  %v1086_v44 = vadd.f32 (!%p1420_p6), %v1421_v30, %v1063_v27  ;;  %v1118_v59 = vmul.f32 (!%p1420_p6), %v1080_v38, %v1080_v38 }
 0x1b3   : > { %v1492_v2 = vadd.f32 %v1491_v1, %v1490_v62  ;;  %v1555_v3 = vpop.f32.mrb[29].mxu1  ;;  %v1493_v4 = vpop.f32.mrb[30].mxu0  ;;  %v1064_v28 = vld [vmem:[#allocation2 + $0x58] sm:$0xff] (!%p1420_p6)  ;;  %v1095_v58 = vadd.f32 (!%p1420_p6), %v1094_v55, %v1080_v38  ;;  %v1131_v60 = vadd.f32 (!%p1420_p6), %v1130_v57, %v1116_v54  ;;  %v1119_v62 = vmul.f32 (!%p1420_p6), %v1081_v39, %v1081_v39 }
 0x1b4   : > { %1046 = vst [vmem:[#allocation2 + $0x68] sm:$0xff] %v1030_v63  ;;  %v1556_v5 = vadd.f32 %v1555_v3, %v1554_v0  ;;  %v1557_v6 = vpop.f32.mrb[30].mxu1  ;;  %v1494_v7 = vpop.f32.mrb[31].mxu0  ;;  %v1087_v45 = vadd.f32 (!%p1420_p6), %v1421_v30, %v1064_v28  ;;  %1162 = vst [vmem:[#allocation9 + $0x50] sm:$0xff] (!%p1420_p6), %v1086_v44  ;;  %v1120_v1 = vmul.f32 (!%p1420_p6), %v1082_v40, %v1082_v40 }
 0x1b5   : > { %v1495_v9 = vadd.f32 %v1494_v7, %v1493_v4  ;;  %v1558_v10 = vpop.f32.mrb[31].mxu1  ;;  %v1096_v61 = vadd.f32 (!%p1420_p6), %v1095_v58, %v1081_v39  ;;  %v1132_v63 = vadd.f32 (!%p1420_p6), %v1131_v60, %v1117_v56  ;;  %v1121_v4 = vmul.f32 (!%p1420_p6), %v1083_v41, %v1083_v41 }
 0x1b6   : > { %v1011_v11 = vadd.f32 %v1556_v5, %v1492_v2  ;;  %v1559_v12 = vadd.f32 %v1558_v10, %v1557_v6  ;;  %1052 = sbr.rel (%p1420_p6) target bundleno = 476 (0x1dc), region = 52  ;;  %1163 = vst [vmem:[#allocation9 + $0x58] sm:$0xff] (!%p1420_p6), %v1087_v45  ;;  %v1122_v7 = vmul.f32 (!%p1420_p6), %v1084_v42, %v1084_v42  ;;  %v1123_v10 = vmul.f32 (!%p1420_p6), %v1085_v43, %v1085_v43 }
 0x1b7   : > { %v1097_v0 = vadd.f32 (!%p1420_p6), %v1096_v61, %v1082_v40  ;;  %v1133_v2 = vadd.f32 (!%p1420_p6), %v1132_v63, %v1118_v59 }
 0x1b8   : > { %v1031_v14 = vadd.f32 %v1011_v11, %v373_v8  ;;  %v1014_v15 = vadd.f32 %v1559_v12, %v1495_v9 }
 0x1b9   : > { %v1065_v29 = vld [vmem:[#allocation2 + $0x60] sm:$0xff] (!%p1420_p6)  ;;  %v1098_v3 = vadd.f32 (!%p1420_p6), %v1097_v0, %v1083_v41  ;;  %v1134_v5 = vadd.f32 (!%p1420_p6), %v1133_v2, %v1119_v62 }
 0x1ba   : > { %1047 = vst [vmem:[#allocation2 + $0x70] sm:$0xff] %v1031_v14  ;;  %v1032_v16 = vadd.f32 %v1014_v15, %v374_v13  ;;  %v1088_v46 = vadd.f32 (!%p1420_p6), %v1421_v30, %v1065_v29  ;;  %v1124_v13 = vmul.f32 (!%p1420_p6), %v1086_v44, %v1086_v44 }
 0x1bb   : > { %v1066_v31 = vld [vmem:[#allocation2 + $0x68] sm:$0xff] (!%p1420_p6)  ;;  %v1099_v6 = vadd.f32 (!%p1420_p6), %v1098_v3, %v1084_v42  ;;  %v1135_v8 = vadd.f32 (!%p1420_p6), %v1134_v5, %v1120_v1 }
 0x1bc   : > { %1048 = vst [vmem:[#allocation2 + $0x78] sm:$0xff] %v1032_v16  ;;  %v1089_v47 = vadd.f32 (!%p1420_p6), %v1421_v30, %v1066_v31  ;;  %1164 = vst [vmem:[#allocation9 + $0x60] sm:$0xff] (!%p1420_p6), %v1088_v46  ;;  %v1125_v16 = vmul.f32 (!%p1420_p6), %v1087_v45, %v1087_v45  ;;  %v1126_v19 = vmul.f32 (!%p1420_p6), %v1088_v46, %v1088_v46 }
 0x1bd   : > { %v1100_v9 = vadd.f32 %v1099_v6, %v1085_v43  ;;  %v1136_v11 = vadd.f32 %v1135_v8, %v1121_v4 }
 0x1be   : > { %1165 = vst [vmem:[#allocation9 + $0x68] sm:$0xff] %v1089_v47  ;;  %v1127_v22 = vmul.f32 %v1089_v47, %v1089_v47 }
 0x1bf   : > { %v1101_v12 = vadd.f32 %v1100_v9, %v1086_v44  ;;  %v1137_v14 = vadd.f32 %v1136_v11, %v1122_v7 }
 0x1c1   : > { %v1067_v32 = vld [vmem:[#allocation2 + $0x70] sm:$0xff]  ;;  %v1102_v15 = vadd.f32 %v1101_v12, %v1087_v45  ;;  %v1138_v17 = vadd.f32 %v1137_v14, %v1123_v10 }
 0x1c2   : > { %v1090_v48 = vadd.f32 %v1421_v30, %v1067_v32 }
 0x1c3   : > { %v1068_v33 = vld [vmem:[#allocation2 + $0x78] sm:$0xff]  ;;  %v1103_v18 = vadd.f32 %v1102_v15, %v1088_v46  ;;  %v1139_v20 = vadd.f32 %v1138_v17, %v1124_v13 }
 0x1c4   : > { %v1091_v49 = vadd.f32 %v1421_v30, %v1068_v33  ;;  %1166 = vst [vmem:[#allocation9 + $0x70] sm:$0xff] %v1090_v48  ;;  %v1128_v25 = vmul.f32 %v1090_v48, %v1090_v48 }
 0x1c5   : > { %v1104_v21 = vadd.f32 %v1103_v18, %v1089_v47  ;;  %v1140_v23 = vadd.f32 %v1139_v20, %v1125_v16 }
 0x1c6   : > { %1167 = vst [vmem:[#allocation9 + $0x78] sm:$0xff] %v1091_v49  ;;  %v1129_v28 = vmul.f32 %v1091_v49, %v1091_v49 }
 0x1c7   : > { %v1105_v24 = vadd.f32 %v1104_v21, %v1090_v48  ;;  %v1141_v26 = vadd.f32 %v1140_v23, %v1126_v19 }
 0x1c9   : > { %v1106_v27 = vadd.f32 %v1105_v24, %v1091_v49  ;;  %v1142_v29 = vadd.f32 %v1141_v26, %v1127_v22 }
 0x1cb   : > { %v1107_v30 = vrot.slane %v1106_v27, 4  ;;  %v1143_v31 = vadd.f32 %v1142_v29, %v1128_v25 }
 0x1cd   : > { %v1108_v32 = vadd.f32 %v1107_v30, %v1106_v27  ;;  %v1144_v33 = vadd.f32 %v1143_v31, %v1129_v28 }
 0x1cf   : > { %v1109_v34 = vrot.slane %v1108_v32, 2  ;;  %v1145_v35 = vrot.slane %v1144_v33, 4 }
 0x1d1   : > { %v1110_v36 = vadd.f32 %v1109_v34, %v1108_v32  ;;  %v1146_v37 = vadd.f32 %v1145_v35, %v1144_v33 }
 0x1d3   : > { %v1111_v38 = vrot.slane %v1110_v36, 1  ;;  %v1147_v39 = vrot.slane %v1146_v37, 2 }
 0x1d5   : > { %v1112_v40 = vadd.f32 %v1111_v38, %v1110_v36  ;;  %v1148_v41 = vadd.f32 %v1147_v39, %v1146_v37 }
 0x1d7   : > { %1113 = vst [vmem:[#allocation10] sm:$0x1] %v1112_v40  ;;  %v1149_v42 = vrot.slane %v1148_v41, 1 }
 0x1d9   : > { %v1150_v43 = vadd.f32 %v1149_v42, %v1148_v41 }
 0x1db   : > { %1151 = vst [vmem:[#allocation12] sm:$0x1] %v1150_v43 }
 0x1dc PF: > { %p1594_p8 = scmp.eq.s32.totalorder %s2047_s24, 1  ;;  %s1983_s21 = smov [#allocation10]  }
 0x1dd   : > { %s1195_s26 = sshll.u32 %s1983_s21, 4  ;;  %s1196_s26 = int_to_ptr.vmem [resolvable:$true] %s1195_s26 }
 0x1de   : > { %s1828_s27 = scalar_lea.vmem %s1196_s26, 16  ;;  %s1834_s30 = scalar_lea.vmem %s1196_s26, 32 }
 0x1df   : > { %p1829_p13 = scmp.ne.s32.totalorder %s1196_s26, %s1828_s27  ;;  %p1835_p0 = scmp.lt.s32.totalorder %s1196_s26, %s1196_s26 }
 0x1e0   : > { %p1836_p5 = scmp.lt.s32.totalorder %s1834_s30, %s1828_s27 }
 0x1e1   : > { %p1830_p1 = pnand %p1829_p13, %p1594_p8 }
 0x1e2   : > { %p1837_p7 = por %p1836_p5, %p1835_p0 }
 0x1e3   : > { %p1831_p2 = pneg %p1830_p1 }
 0x1e5   : > { %p1838_p9 = pnand %p1837_p7, %p1831_p2 }
 0x1e7   : > { %1841 = shalt.err (!%p1838_p9)
}
 0x1e8   : > { %s1842_s17 = scalar_lea.hbm %s2359_s4, 16 }
 0x1e9   : > { %p1843_p12 = scmp.ne.s32.totalorder %s2359_s4, %s1842_s17  ;;  %p1848_p10 = scmp.lt.u32.totalorder %s1842_s17, %s2359_s4 }
 0x1eb   : > { %p1844_p4 = pnand %p1843_p12, %p1594_p8 }
 0x1ed   : > { %p1845_p11 = pneg %p1844_p4 }
 0x1ef   : > { %p1850_p3 = pnand %p1848_p10, %p1845_p11 }
 0x1f1   : > { %1853 = shalt.err (!%p1850_p3)
}
 0x1f2   : > { %1571 = dma.vmem_to_hbm [thread:$0]  (%p1594_p8), %s1196_s26, 16, %s2359_s4, [#allocation11]  }
 0x1f3   : > { %s1984_s25 = smov [#allocation9]  }
 0x1f4   : > { %s1178_s29 = sshll.u32 %s1984_s25, 4  ;;  %s1179_s29 = int_to_ptr.vmem [resolvable:$true] %s1178_s29 }
 0x1f5   : > { %s1854_s8 = scalar_lea.vmem %s1179_s29, 2048  ;;  %p1861_p2 = scmp.lt.s32.totalorder %s1179_s29, %s1179_s29 }
 0x1f6   : > { %p1855_p6 = scmp.ne.s32.totalorder %s1179_s29, %s1854_s8  ;;  %p1862_p0 = scmp.lt.s32.totalorder %s1854_s8, %s1854_s8 }
 0x1f8   : > { %p1856_p13 = pnand %p1855_p6, %p1594_p8  ;;  %p1863_p5 = por %p1862_p0, %p1861_p2 }
 0x1fa   : > { %p1857_p1 = pneg %p1856_p13 }
 0x1fc   : > { %p1864_p7 = pnand %p1863_p5, %p1857_p1 }
 0x1fe   : > { %1867 = shalt.err (!%p1864_p7)
}
 0x1ff   : > { %s1868_s7 = scalar_lea.hbm %s2358_s3, 2048 }
 0x200   : > { %p1869_p9 = scmp.ne.s32.totalorder %s2358_s3, %s1868_s7  ;;  %p1874_p11 = scmp.lt.u32.totalorder %s1868_s7, %s2358_s3 }
 0x202   : > { %p1870_p12 = pnand %p1869_p9, %p1594_p8 }
 0x204   : > { %p1871_p4 = pneg %p1870_p12 }
 0x206   : > { %p1876_p10 = pnand %p1874_p11, %p1871_p4 }
 0x208   : > { %1879 = shalt.err (!%p1876_p10)
}
 0x209   : > { %s1985_s30 = smov 128   ;;  %s1986_s18 = smov 8  }
 0x20a   : > { %1569 = dma.vmem_to_hbm [thread:$0]  (%p1594_p8), %s1179_s29, 2048, %s2358_s3, [#allocation5], %s1985_s30, %s1985_s30, %s1986_s18  }
 0x20b   : > { %s1987_s14 = smov [#allocation12]  }
 0x20c   : > { %s1209_s6 = sshll.u32 %s1987_s14, 4  ;;  %s1210_s6 = int_to_ptr.vmem [resolvable:$true] %s1209_s6 }
 0x20d   : > { %s1880_s9 = scalar_lea.vmem %s1210_s6, 16  ;;  %s1886_s11 = scalar_lea.vmem %s1210_s6, 32 }
 0x20e   : > { %p1881_p3 = scmp.ne.s32.totalorder %s1210_s6, %s1880_s9  ;;  %p1887_p1 = scmp.lt.s32.totalorder %s1210_s6, %s1210_s6 }
 0x20f   : > { %p1888_p2 = scmp.lt.s32.totalorder %s1886_s11, %s1880_s9 }
 0x210   : > { %p1882_p6 = pnand %p1881_p3, %p1594_p8 }
 0x211   : > { %p1889_p0 = por %p1888_p2, %p1887_p1 }
 0x212   : > { %p1883_p13 = pneg %p1882_p6 }
 0x214   : > { %p1890_p5 = pnand %p1889_p0, %p1883_p13 }
 0x216   : > { %1893 = shalt.err (!%p1890_p5)
}
 0x217   : > { %s1894_s25 = scalar_lea.hbm %s2360_s5, 16 }
 0x218   : > { %p1895_p7 = scmp.ne.s32.totalorder %s2360_s5, %s1894_s25  ;;  %p1900_p4 = scmp.lt.u32.totalorder %s1894_s25, %s2360_s5 }
 0x21a   : > { %p1896_p9 = pnand %p1895_p7, %p1594_p8 }
 0x21c   : > { %p1897_p12 = pneg %p1896_p9 }
 0x21e   : > { %p1902_p11 = pnand %p1900_p4, %p1897_p12 }
 0x220   : > { %1905 = shalt.err (!%p1902_p11)
}
 0x221   : > { %1573 = dma.vmem_to_hbm [thread:$0]  (%p1594_p8), %s1210_s6, 16, %s2360_s5, [#allocation11]  }
 0x222   : > { %1943 = dma.done.wait (%p1594_p8), [#allocation5], 2048  }
 0x223   : > { %1945 = vsyncadd (%p1594_p8), [#allocation5], 4294965248 }
 0x224   : > { %1947 = dma.done.wait (%p1594_p8), [#allocation11], 32  }
 0x225   : > { %1949 = vsyncadd (%p1594_p8), [#allocation11], 4294967264 }
 0x226 PF: > { %s24_s23 = sadd.s32 1, %s1972_s23   ;;  %s2378_s18 = smov %s1956_s19 }
 0x227   : > { %p21_p10 = scmp.ge.s32.totalorder %s24_s23, 4   ;;  %s2379_s19 = smov %s1960_s20 }
 0x228   : > { %s2380_s20 = smov %s2119_s15  ;;  %s2381_s21 = smov %s1968_s22 }
 0x229   : > { %s2382_s22 = smov %s2384_s28  ;;  %23 = sbr.rel (!%p21_p10) target bundleno = 11 (0xb), region = 114 }
 0x230   :  { %1230 = vsyncpa [#allocation4], 1 }
 0x231   :  { %1232 = vsyncpa [#allocation4 + $0x1], 1 }
 0x232   :  { %1233 = vsyncpa [#allocation7], 1 }
 0x233   :  { %1235 = vsyncpa [#allocation7 + $0x1], 1 }
 0x234   :  { %1236 = vsyncpa [#allocation5], 1 }
 0x235   :  { %1238 = vsyncpa [#allocation5 + $0x1], 1 }
 0x236   :  { %1239 = vsyncpa [#allocation11], 1 }

// kernel: generator_forward.14
= control target key start
LH: loop header
LB: loop body
LE: loop exit
PB: predicated region body
PF: predicated region fallthrough
CT: control target
= control target key end

     0   :  { %8 = vsyncpa [#allocation3], 0  ;;  %s1298_s0 = inlined_call_operand.hbm [shape: f32[512,128], index: 0, kind: input, shape index: {}]   ;;  %s1299_s1 = inlined_call_operand.hbm [shape: f32[1,128], index: 1, kind: input, shape index: {}]   ;;  %s1300_s2 = inlined_call_operand.hbm [shape: f32[1,128], index: 2, kind: input, shape index: {}]   ;;  %s1301_s3 = inlined_call_operand.hbm [shape: bf16[512,128], index: 3, kind: output, shape index: {}]  }
   0x1   :  { %9 = vsyncpa [#allocation6], 0 }
   0x2   :  { %10 = vsyncpa [#allocation4], 0  ;;  %s1083_s12 = smov [#allocation5]   ;;  %s1084_s14 = smov [#allocation2]  }
   0x3   :  { %s29_s13 = sshll.u32 %s1083_s12, 4  ;;  %s16_s15 = sshll.u32 %s1084_s14, 4  ;;  %s30_s13 = int_to_ptr.vmem [resolvable:$true] %s29_s13  ;;  %s1111_s15 = int_to_ptr.vmem [resolvable:$true] %s16_s15 }
   0x4   :  { %s989_s18 = scalar_lea.hbm %s1299_s1, 16 }
   0x5   :  { %p990_p0 = scmp.ne.s32.totalorder %s1299_s1, %s989_s18  ;;  %p993_p1 = scmp.lt.u32.totalorder %s989_s18, %s1299_s1 }
   0x7   :  { %p995_p2 = pnand %p993_p1, %p990_p0 }
   0x9   :  { %998 = shalt.err (!%p995_p2)
}
   0xa   :  { %s999_s23 = scalar_lea.vmem %s30_s13, 16  ;;  %s1003_s24 = scalar_lea.vmem %s30_s13, 32 }
   0xb   :  { %p1000_p3 = scmp.ne.s32.totalorder %s30_s13, %s999_s23  ;;  %p1004_p4 = scmp.lt.s32.totalorder %s30_s13, %s30_s13 }
   0xc   :  { %p1005_p5 = scmp.lt.s32.totalorder %s1003_s24, %s999_s23 }
   0xe   :  { %p1006_p6 = por %p1005_p5, %p1004_p4 }
  0x10   :  { %p1007_p7 = pnand %p1006_p6, %p1000_p3 }
  0x12   :  { %1010 = shalt.err (!%p1007_p7)
}
  0x13   :  { %32 = dma.hbm_to_vmem [thread:$0]  %s1299_s1, 16, %s30_s13, [#allocation6]  }
  0x14   :  { %s1011_s29 = scalar_lea.hbm %s1298_s0, 8192 }
  0x15   :  { %p1012_p8 = scmp.ne.s32.totalorder %s1298_s0, %s1011_s29  ;;  %p1015_p9 = scmp.lt.u32.totalorder %s1011_s29, %s1298_s0 }
  0x17   :  { %p1017_p10 = pnand %p1015_p9, %p1012_p8 }
  0x19   :  { %1020 = shalt.err (!%p1017_p10)
}
  0x1a   :  { %s1021_s7 = scalar_lea.vmem %s1111_s15, 8192  ;;  %p1026_p12 = scmp.lt.s32.totalorder %s1111_s15, %s1111_s15 }
  0x1b   :  { %p1022_p11 = scmp.ne.s32.totalorder %s1111_s15, %s1021_s7  ;;  %p1027_p13 = scmp.lt.s32.totalorder %s1021_s7, %s1021_s7 }
  0x1d   :  { %p1028_p0 = por %p1027_p13, %p1026_p12 }
  0x1f   :  { %p1029_p1 = pnand %p1028_p0, %p1022_p11 }
  0x21   :  { %1032 = shalt.err (!%p1029_p1)
}
  0x22   :  { %s1085_s1 = smov 128   ;;  %s1086_s8 = smov 8  }
  0x23   :  { %22 = dma.hbm_to_vmem [thread:$0]  %s1298_s0, 8192, %s1111_s15, [#allocation3], %s1085_s1, %s1085_s1, %s1086_s8  }
  0x24   :  { %s1087_s11 = smov [#allocation7]   ;;  %s1033_s16 = scalar_lea.hbm %s1300_s2, 16 }
  0x25   :  { %s39_s12 = sshll.u32 %s1087_s11, 4  ;;  %p1034_p2 = scmp.ne.s32.totalorder %s1300_s2, %s1033_s16  ;;  %s40_s12 = int_to_ptr.vmem [resolvable:$true] %s39_s12 }
  0x26   :  { %p1037_p3 = scmp.lt.u32.totalorder %s1033_s16, %s1300_s2 }
  0x28   :  { %p1039_p4 = pnand %p1037_p3, %p1034_p2 }
  0x2a   :  { %1042 = shalt.err (!%p1039_p4)
}
  0x2b   :  { %s1043_s21 = scalar_lea.vmem %s40_s12, 16  ;;  %s1047_s0 = scalar_lea.vmem %s40_s12, 32 }
  0x2c   :  { %p1044_p5 = scmp.ne.s32.totalorder %s40_s12, %s1043_s21  ;;  %p1048_p6 = scmp.lt.s32.totalorder %s40_s12, %s40_s12 }
  0x2d   :  { %p1049_p7 = scmp.lt.s32.totalorder %s1047_s0, %s1043_s21 }
  0x2f   :  { %p1050_p8 = por %p1049_p7, %p1048_p6 }
  0x31   :  { %p1051_p9 = pnand %p1050_p8, %p1044_p5 }
  0x33   :  { %1054 = shalt.err (!%p1051_p9)
}
  0x34   :  { %42 = dma.hbm_to_vmem [thread:$0]  %s1300_s2, 16, %s40_s12, [#allocation6]  }
  0x35   :  { %1077 = dma.done.wait [#allocation3], 8192  }
  0x36   :  { %1078 = vsyncadd [#allocation3], 4294959104 }
  0x37   :  { %1079 = dma.done.wait [#allocation6], 32  }
  0x38   :  { %1080 = vsyncadd [#allocation6], 4294967264  ;;  %v52_v0 = vld [vmem:[#allocation2] sm:$0xff]  ;;  %v53_v1 = vld [vmem:[#allocation2 + $0x8] sm:$0xff]  ;;  %s1088_s2 = smov [#allocation8]  }
  0x39   :  { %v1154_v2 = vld [vmem:[#allocation5] ss:$0 sm:$0xff]  ;;  %v1158_v5 = vld [vmem:[#allocation7] ss:$0 sm:$0xff]  ;;  %v54_v6 = vld [vmem:[#allocation2 + $0x10] sm:$0xff]  ;;  %s647_s23 = sshll.u32 %s1088_s2, 4  ;;  %s648_s23 = int_to_ptr.vmem [resolvable:$true] %s647_s23 }
  0x3a   :  { %v123_v3 = vmul.f32 %v1154_v2, %v52_v0  ;;  %v124_v4 = vmul.f32 %v1154_v2, %v53_v1  ;;  %v55_v7 = vld [vmem:[#allocation2 + $0x18] sm:$0xff]  ;;  %v125_v8 = vmul.f32 %v1154_v2, %v54_v6  ;;  %v56_v10 = vld [vmem:[#allocation2 + $0x20] sm:$0xff]  ;;  %v57_v11 = vld [vmem:[#allocation2 + $0x28] sm:$0xff]  ;;  %s1055_s24 = scalar_lea.vmem %s648_s23, 4096  ;;  %p1060_p11 = scmp.lt.s32.totalorder %s648_s23, %s648_s23 }
  0x3b   :  { %v126_v9 = vmul.f32 %v1154_v2, %v55_v7  ;;  %v58_v12 = vld [vmem:[#allocation2 + $0x30] sm:$0xff]  ;;  %v127_v15 = vmul.f32 %v1154_v2, %v56_v10  ;;  %v128_v16 = vmul.f32 %v1154_v2, %v57_v11  ;;  %v59_v17 = vld [vmem:[#allocation2 + $0x38] sm:$0xff]  ;;  %v60_v22 = vld [vmem:[#allocation2 + $0x40] sm:$0xff]  ;;  %p1056_p10 = scmp.ne.s32.totalorder %s648_s23, %s1055_s24  ;;  %p1061_p12 = scmp.lt.s32.totalorder %s1055_s24, %s1055_s24 }
  0x3c   :  { %v194_v13 = vadd.f32 %v1158_v5, %v123_v3  ;;  %v195_v14 = vadd.f32 %v1158_v5, %v124_v4  ;;  %v196_v18 = vadd.f32 %v1158_v5, %v125_v8  ;;  %v129_v20 = vmul.f32 %v1154_v2, %v58_v12  ;;  %v61_v27 = vld [vmem:[#allocation2 + $0x48] sm:$0xff]  ;;  %v62_v32 = vld [vmem:[#allocation2 + $0x50] sm:$0xff]  ;;  %v63_v33 = vld [vmem:[#allocation2 + $0x58] sm:$0xff] }
  0x3d   :  { %v197_v19 = vadd.f32 %v1158_v5, %v126_v9  ;;  %v130_v21 = vmul.f32 %v1154_v2, %v59_v17  ;;  %v198_v25 = vadd.f32 %v1158_v5, %v127_v15  ;;  %v199_v26 = vadd.f32 %v1158_v5, %v128_v16  ;;  %v64_v38 = vld [vmem:[#allocation2 + $0x60] sm:$0xff]  ;;  %v65_v39 = vld [vmem:[#allocation2 + $0x68] sm:$0xff]  ;;  %v66_v44 = vld [vmem:[#allocation2 + $0x70] sm:$0xff]  ;;  %p1062_p13 = por %p1061_p12, %p1060_p11 }
  0x3e   :  { %v258_v23 = vmax.f32 %v194_v13, 0.0  ;;  %v259_v24 = vmax.f32 %v195_v14, 0.0  ;;  %v260_v28 = vmax.f32 %v196_v18, 0.0  ;;  %v200_v30 = vadd.f32 %v1158_v5, %v129_v20  ;;  %v67_v49 = vld [vmem:[#allocation2 + $0x78] sm:$0xff]  ;;  %v68_v54 = vld [vmem:[#allocation2 + $0x80] sm:$0xff]  ;;  %v69_v63 = vld [vmem:[#allocation2 + $0x88] sm:$0xff] }
  0x3f   :  { %v261_v29 = vmax.f32 %v197_v19, 0.0  ;;  %v201_v31 = vadd.f32 %v1158_v5, %v130_v21  ;;  %v262_v35 = vmax.f32 %v198_v25, 0.0  ;;  %v263_v36 = vmax.f32 %v199_v26, 0.0  ;;  %v70_v6 = vld [vmem:[#allocation2 + $0x90] sm:$0xff]  ;;  %v71_v7 = vld [vmem:[#allocation2 + $0x98] sm:$0xff]  ;;  %v72_v12 = vld [vmem:[#allocation2 + $0xa0] sm:$0xff]  ;;  %p1063_p0 = pnand %p1062_p13, %p1056_p10 }
  0x40   :  { %v793_v34 = vpack.c.bf16 %v259_v24, %v258_v23  ;;  %v131_v37 = vmul.f32 %v1154_v2, %v60_v22  ;;  %v264_v41 = vmax.f32 %v200_v30, 0.0  ;;  %v132_v43 = vmul.f32 %v1154_v2, %v61_v27  ;;  %v73_v13 = vld [vmem:[#allocation2 + $0xa8] sm:$0xff]  ;;  %v74_v18 = vld [vmem:[#allocation2 + $0xb0] sm:$0xff]  ;;  %v75_v23 = vld [vmem:[#allocation2 + $0xb8] sm:$0xff] }
  0x41   :  { %v798_v40 = vpack.c.bf16 %v261_v29, %v260_v28  ;;  %v265_v42 = vmax.f32 %v201_v31, 0.0  ;;  %v803_v45 = vpack.c.bf16 %v263_v36, %v262_v35  ;;  %v133_v47 = vmul.f32 %v1154_v2, %v62_v32  ;;  %v76_v28 = vld [vmem:[#allocation2 + $0xc0] sm:$0xff] }
  0x42   :  { %794 = vst [vmem:[#allocation8] sm:$0xff] %v793_v34   ;;  %v202_v46 = vadd.f32 %v1158_v5, %v131_v37  ;;  %v134_v48 = vmul.f32 %v1154_v2, %v63_v33  ;;  %v203_v51 = vadd.f32 %v1158_v5, %v132_v43  ;;  %v135_v52 = vmul.f32 %v1154_v2, %v64_v38  ;;  %v77_v37 = vld [vmem:[#allocation2 + $0xc8] sm:$0xff]  ;;  %v79_v43 = vld [vmem:[#allocation2 + $0xd8] sm:$0xff] }
  0x43   :  { %950 = vst [vmem:[#allocation8 + $0x8] sm:$0xff] %v798_v40   ;;  %v808_v50 = vpack.c.bf16 %v265_v42, %v264_v41  ;;  %v136_v53 = vmul.f32 %v1154_v2, %v65_v39  ;;  %951 = vst [vmem:[#allocation8 + $0x10] sm:$0xff] %v803_v45   ;;  %v204_v56 = vadd.f32 %v1158_v5, %v133_v47  ;;  %v78_v42 = vld [vmem:[#allocation2 + $0xd0] sm:$0xff] }
  0x44   :  { %v266_v55 = vmax.f32 %v202_v46, 0.0  ;;  %v205_v57 = vadd.f32 %v1158_v5, %v134_v48  ;;  %v137_v58 = vmul.f32 %v1154_v2, %v66_v44  ;;  %v267_v59 = vmax.f32 %v203_v51, 0.0  ;;  %v80_v48 = vld [vmem:[#allocation2 + $0xe0] sm:$0xff] }
  0x45   :  { %952 = vst [vmem:[#allocation8 + $0x18] sm:$0xff] %v808_v50   ;;  %v206_v60 = vadd.f32 %v1158_v5, %v135_v52  ;;  %v207_v61 = vadd.f32 %v1158_v5, %v136_v53  ;;  %v138_v62 = vmul.f32 %v1154_v2, %v67_v49  ;;  %v268_v0 = vmax.f32 %v204_v56, 0.0  ;;  %v81_v49 = vld [vmem:[#allocation2 + $0xe8] sm:$0xff] }
  0x46   :  { %v269_v1 = vmax.f32 %v205_v57, 0.0  ;;  %v208_v3 = vadd.f32 %v1158_v5, %v137_v58  ;;  %v139_v4 = vmul.f32 %v1154_v2, %v68_v54  ;;  %v813_v8 = vpack.c.bf16 %v267_v59, %v266_v55  ;;  %v82_v54 = vld [vmem:[#allocation2 + $0xf0] sm:$0xff]  ;;  %v83_v59 = vld [vmem:[#allocation2 + $0xf8] sm:$0xff] }
  0x47   :  { %v270_v9 = vmax.f32 %v206_v60, 0.0  ;;  %v271_v10 = vmax.f32 %v207_v61, 0.0  ;;  %v209_v11 = vadd.f32 %v1158_v5, %v138_v62  ;;  %v140_v16 = vmul.f32 %v1154_v2, %v69_v63 }
  0x48   :  { %v818_v14 = vpack.c.bf16 %v269_v1, %v268_v0  ;;  %v272_v15 = vmax.f32 %v208_v3, 0.0  ;;  %v210_v17 = vadd.f32 %v1158_v5, %v139_v4  ;;  %953 = vst [vmem:[#allocation8 + $0x20] sm:$0xff] %v813_v8   ;;  %v141_v21 = vmul.f32 %v1154_v2, %v70_v6  ;;  %v84_v0 = vld [vmem:[#allocation2 + $0x100] sm:$0xff] }
  0x49   :  { %v823_v19 = vpack.c.bf16 %v271_v10, %v270_v9  ;;  %v273_v20 = vmax.f32 %v209_v11, 0.0  ;;  %v142_v22 = vmul.f32 %v1154_v2, %v71_v7  ;;  %v211_v24 = vadd.f32 %v1158_v5, %v140_v16  ;;  %v85_v11 = vld [vmem:[#allocation2 + $0x108] sm:$0xff]  ;;  %v86_v16 = vld [vmem:[#allocation2 + $0x110] sm:$0xff] }
  0x4a   :  { %954 = vst [vmem:[#allocation8 + $0x28] sm:$0xff] %v818_v14   ;;  %v274_v25 = vmax.f32 %v210_v17, 0.0  ;;  %v143_v26 = vmul.f32 %v1154_v2, %v72_v12  ;;  %v144_v27 = vmul.f32 %v1154_v2, %v73_v13  ;;  %v212_v30 = vadd.f32 %v1158_v5, %v141_v21  ;;  %v87_v17 = vld [vmem:[#allocation2 + $0x118] sm:$0xff] }
  0x4b   :  { %955 = vst [vmem:[#allocation8 + $0x30] sm:$0xff] %v823_v19   ;;  %v828_v29 = vpack.c.bf16 %v273_v20, %v272_v15  ;;  %v213_v31 = vadd.f32 %v1158_v5, %v142_v22  ;;  %v145_v32 = vmul.f32 %v1154_v2, %v74_v18  ;;  %v275_v33 = vmax.f32 %v211_v24, 0.0  ;;  %v88_v22 = vld [vmem:[#allocation2 + $0x120] sm:$0xff] }
  0x4c   :  { %v214_v34 = vadd.f32 %v1158_v5, %v143_v26  ;;  %v215_v35 = vadd.f32 %v1158_v5, %v144_v27  ;;  %v146_v36 = vmul.f32 %v1154_v2, %v75_v23  ;;  %v276_v38 = vmax.f32 %v212_v30, 0.0  ;;  %v89_v23 = vld [vmem:[#allocation2 + $0x128] sm:$0xff] }
  0x4d   :  { %956 = vst [vmem:[#allocation8 + $0x38] sm:$0xff] %v828_v29   ;;  %v277_v39 = vmax.f32 %v213_v31, 0.0  ;;  %v216_v40 = vadd.f32 %v1158_v5, %v145_v32  ;;  %v147_v41 = vmul.f32 %v1154_v2, %v76_v28  ;;  %v833_v44 = vpack.c.bf16 %v275_v33, %v274_v25  ;;  %v90_v28 = vld [vmem:[#allocation2 + $0x130] sm:$0xff]  ;;  %v91_v33 = vld [vmem:[#allocation2 + $0x138] sm:$0xff] }
  0x4e   :  { %v278_v45 = vmax.f32 %v214_v34, 0.0  ;;  %v279_v46 = vmax.f32 %v215_v35, 0.0  ;;  %v217_v47 = vadd.f32 %v1158_v5, %v146_v36  ;;  %v148_v52 = vmul.f32 %v1154_v2, %v77_v37 }
  0x4f   :  { %v838_v50 = vpack.c.bf16 %v277_v39, %v276_v38  ;;  %v280_v51 = vmax.f32 %v216_v40, 0.0  ;;  %v218_v53 = vadd.f32 %v1158_v5, %v147_v41  ;;  %957 = vst [vmem:[#allocation8 + $0x40] sm:$0xff] %v833_v44   ;;  %v149_v57 = vmul.f32 %v1154_v2, %v78_v42  ;;  %v92_v38 = vld [vmem:[#allocation2 + $0x140] sm:$0xff] }
  0x50   :  { %v843_v55 = vpack.c.bf16 %v279_v46, %v278_v45  ;;  %v281_v56 = vmax.f32 %v217_v47, 0.0  ;;  %v150_v58 = vmul.f32 %v1154_v2, %v79_v43  ;;  %v219_v60 = vadd.f32 %v1158_v5, %v148_v52  ;;  %v93_v47 = vld [vmem:[#allocation2 + $0x148] sm:$0xff]  ;;  %v94_v52 = vld [vmem:[#allocation2 + $0x150] sm:$0xff] }
  0x51   :  { %958 = vst [vmem:[#allocation8 + $0x48] sm:$0xff] %v838_v50   ;;  %v282_v61 = vmax.f32 %v218_v53, 0.0  ;;  %v151_v62 = vmul.f32 %v1154_v2, %v80_v48  ;;  %v152_v63 = vmul.f32 %v1154_v2, %v81_v49  ;;  %v220_v3 = vadd.f32 %v1158_v5, %v149_v57  ;;  %v95_v53 = vld [vmem:[#allocation2 + $0x158] sm:$0xff] }
  0x52   :  { %959 = vst [vmem:[#allocation8 + $0x50] sm:$0xff] %v843_v55   ;;  %v848_v1 = vpack.c.bf16 %v281_v56, %v280_v51  ;;  %v221_v4 = vadd.f32 %v1158_v5, %v150_v58  ;;  %v153_v6 = vmul.f32 %v1154_v2, %v82_v54  ;;  %v283_v7 = vmax.f32 %v219_v60, 0.0  ;;  %v96_v58 = vld [vmem:[#allocation2 + $0x160] sm:$0xff] }
  0x53   :  { %v222_v8 = vadd.f32 %v1158_v5, %v151_v62  ;;  %v223_v9 = vadd.f32 %v1158_v5, %v152_v63  ;;  %v154_v10 = vmul.f32 %v1154_v2, %v83_v59  ;;  %v284_v12 = vmax.f32 %v220_v3, 0.0  ;;  %v97_v59 = vld [vmem:[#allocation2 + $0x168] sm:$0xff] }
  0x54   :  { %960 = vst [vmem:[#allocation8 + $0x58] sm:$0xff] %v848_v1   ;;  %v285_v13 = vmax.f32 %v221_v4, 0.0  ;;  %v224_v14 = vadd.f32 %v1158_v5, %v153_v6  ;;  %v155_v15 = vmul.f32 %v1154_v2, %v84_v0  ;;  %v853_v18 = vpack.c.bf16 %v283_v7, %v282_v61  ;;  %v98_v0 = vld [vmem:[#allocation2 + $0x170] sm:$0xff]  ;;  %v99_v7 = vld [vmem:[#allocation2 + $0x178] sm:$0xff] }
  0x55   :  { %v286_v19 = vmax.f32 %v222_v8, 0.0  ;;  %v287_v20 = vmax.f32 %v223_v9, 0.0  ;;  %v225_v21 = vadd.f32 %v1158_v5, %v154_v10  ;;  %v156_v26 = vmul.f32 %v1154_v2, %v85_v11 }
  0x56   :  { %v858_v24 = vpack.c.bf16 %v285_v13, %v284_v12  ;;  %v288_v25 = vmax.f32 %v224_v14, 0.0  ;;  %v226_v27 = vadd.f32 %v1158_v5, %v155_v15  ;;  %961 = vst [vmem:[#allocation8 + $0x60] sm:$0xff] %v853_v18   ;;  %v157_v31 = vmul.f32 %v1154_v2, %v86_v16  ;;  %v100_v12 = vld [vmem:[#allocation2 + $0x180] sm:$0xff] }
  0x57   :  { %v863_v29 = vpack.c.bf16 %v287_v20, %v286_v19  ;;  %v289_v30 = vmax.f32 %v225_v21, 0.0  ;;  %v158_v32 = vmul.f32 %v1154_v2, %v87_v17  ;;  %v227_v34 = vadd.f32 %v1158_v5, %v156_v26  ;;  %v101_v21 = vld [vmem:[#allocation2 + $0x188] sm:$0xff]  ;;  %v102_v26 = vld [vmem:[#allocation2 + $0x190] sm:$0xff] }
  0x58   :  { %962 = vst [vmem:[#allocation8 + $0x68] sm:$0xff] %v858_v24   ;;  %v290_v35 = vmax.f32 %v226_v27, 0.0  ;;  %v159_v36 = vmul.f32 %v1154_v2, %v88_v22  ;;  %v160_v37 = vmul.f32 %v1154_v2, %v89_v23  ;;  %v228_v40 = vadd.f32 %v1158_v5, %v157_v31  ;;  %v103_v27 = vld [vmem:[#allocation2 + $0x198] sm:$0xff] }
  0x59   :  { %963 = vst [vmem:[#allocation8 + $0x70] sm:$0xff] %v863_v29   ;;  %v868_v39 = vpack.c.bf16 %v289_v30, %v288_v25  ;;  %v229_v41 = vadd.f32 %v1158_v5, %v158_v32  ;;  %v161_v42 = vmul.f32 %v1154_v2, %v90_v28  ;;  %v291_v43 = vmax.f32 %v227_v34, 0.0  ;;  %v104_v32 = vld [vmem:[#allocation2 + $0x1a0] sm:$0xff] }
  0x5a   :  { %v230_v44 = vadd.f32 %v1158_v5, %v159_v36  ;;  %v231_v45 = vadd.f32 %v1158_v5, %v160_v37  ;;  %v162_v46 = vmul.f32 %v1154_v2, %v91_v33  ;;  %v292_v48 = vmax.f32 %v228_v40, 0.0  ;;  %v105_v33 = vld [vmem:[#allocation2 + $0x1a8] sm:$0xff] }
  0x5b   :  { %964 = vst [vmem:[#allocation8 + $0x78] sm:$0xff] %v868_v39   ;;  %v293_v49 = vmax.f32 %v229_v41, 0.0  ;;  %v232_v50 = vadd.f32 %v1158_v5, %v161_v42  ;;  %v163_v51 = vmul.f32 %v1154_v2, %v92_v38  ;;  %v873_v54 = vpack.c.bf16 %v291_v43, %v290_v35  ;;  %v106_v38 = vld [vmem:[#allocation2 + $0x1b0] sm:$0xff]  ;;  %v107_v43 = vld [vmem:[#allocation2 + $0x1b8] sm:$0xff] }
  0x5c   :  { %v294_v55 = vmax.f32 %v230_v44, 0.0  ;;  %v295_v56 = vmax.f32 %v231_v45, 0.0  ;;  %v233_v57 = vadd.f32 %v1158_v5, %v162_v46  ;;  %v164_v62 = vmul.f32 %v1154_v2, %v93_v47 }
  0x5d   :  { %v878_v60 = vpack.c.bf16 %v293_v49, %v292_v48  ;;  %v296_v61 = vmax.f32 %v232_v50, 0.0  ;;  %v234_v63 = vadd.f32 %v1158_v5, %v163_v51  ;;  %965 = vst [vmem:[#allocation8 + $0x80] sm:$0xff] %v873_v54   ;;  %v165_v4 = vmul.f32 %v1154_v2, %v94_v52  ;;  %v108_v48 = vld [vmem:[#allocation2 + $0x1c0] sm:$0xff] }
  0x5e   :  { %v883_v1 = vpack.c.bf16 %v295_v56, %v294_v55  ;;  %v297_v3 = vmax.f32 %v233_v57, 0.0  ;;  %v166_v6 = vmul.f32 %v1154_v2, %v95_v53  ;;  %v235_v8 = vadd.f32 %v1158_v5, %v164_v62  ;;  %v109_v57 = vld [vmem:[#allocation2 + $0x1c8] sm:$0xff]  ;;  %v110_v62 = vld [vmem:[#allocation2 + $0x1d0] sm:$0xff] }
  0x5f   :  { %966 = vst [vmem:[#allocation8 + $0x88] sm:$0xff] %v878_v60   ;;  %v298_v9 = vmax.f32 %v234_v63, 0.0  ;;  %v167_v10 = vmul.f32 %v1154_v2, %v96_v58  ;;  %v168_v11 = vmul.f32 %v1154_v2, %v97_v59  ;;  %v236_v14 = vadd.f32 %v1158_v5, %v165_v4  ;;  %v111_v63 = vld [vmem:[#allocation2 + $0x1d8] sm:$0xff] }
  0x60   :  { %967 = vst [vmem:[#allocation8 + $0x90] sm:$0xff] %v883_v1   ;;  %v888_v13 = vpack.c.bf16 %v297_v3, %v296_v61  ;;  %v237_v15 = vadd.f32 %v1158_v5, %v166_v6  ;;  %v169_v16 = vmul.f32 %v1154_v2, %v98_v0  ;;  %v299_v17 = vmax.f32 %v235_v8, 0.0  ;;  %v112_v6 = vld [vmem:[#allocation2 + $0x1e0] sm:$0xff] }
  0x61   :  { %v238_v18 = vadd.f32 %v1158_v5, %v167_v10  ;;  %v239_v19 = vadd.f32 %v1158_v5, %v168_v11  ;;  %v170_v20 = vmul.f32 %v1154_v2, %v99_v7  ;;  %v300_v22 = vmax.f32 %v236_v14, 0.0  ;;  %v113_v7 = vld [vmem:[#allocation2 + $0x1e8] sm:$0xff] }
  0x62   :  { %968 = vst [vmem:[#allocation8 + $0x98] sm:$0xff] %v888_v13   ;;  %v301_v23 = vmax.f32 %v237_v15, 0.0  ;;  %v240_v24 = vadd.f32 %v1158_v5, %v169_v16  ;;  %v171_v25 = vmul.f32 %v1154_v2, %v100_v12  ;;  %v893_v28 = vpack.c.bf16 %v299_v17, %v298_v9  ;;  %v114_v12 = vld [vmem:[#allocation2 + $0x1f0] sm:$0xff]  ;;  %v115_v17 = vld [vmem:[#allocation2 + $0x1f8] sm:$0xff] }
  0x63   :  { %v302_v29 = vmax.f32 %v238_v18, 0.0  ;;  %v303_v30 = vmax.f32 %v239_v19, 0.0  ;;  %v241_v31 = vadd.f32 %v1158_v5, %v170_v20  ;;  %v172_v36 = vmul.f32 %v1154_v2, %v101_v21 }
  0x64   :  { %v898_v34 = vpack.c.bf16 %v301_v23, %v300_v22  ;;  %v304_v35 = vmax.f32 %v240_v24, 0.0  ;;  %v242_v37 = vadd.f32 %v1158_v5, %v171_v25  ;;  %969 = vst [vmem:[#allocation8 + $0xa0] sm:$0xff] %v893_v28   ;;  %v173_v41 = vmul.f32 %v1154_v2, %v102_v26 }
  0x65   :  { %v903_v39 = vpack.c.bf16 %v303_v30, %v302_v29  ;;  %v305_v40 = vmax.f32 %v241_v31, 0.0  ;;  %v174_v42 = vmul.f32 %v1154_v2, %v103_v27  ;;  %v243_v44 = vadd.f32 %v1158_v5, %v172_v36 }
  0x66   :  { %970 = vst [vmem:[#allocation8 + $0xa8] sm:$0xff] %v898_v34   ;;  %v306_v45 = vmax.f32 %v242_v37, 0.0  ;;  %v175_v46 = vmul.f32 %v1154_v2, %v104_v32  ;;  %v176_v47 = vmul.f32 %v1154_v2, %v105_v33  ;;  %v244_v50 = vadd.f32 %v1158_v5, %v173_v41 }
  0x67   :  { %971 = vst [vmem:[#allocation8 + $0xb0] sm:$0xff] %v903_v39   ;;  %v908_v49 = vpack.c.bf16 %v305_v40, %v304_v35  ;;  %v245_v51 = vadd.f32 %v1158_v5, %v174_v42  ;;  %v177_v52 = vmul.f32 %v1154_v2, %v106_v38  ;;  %v307_v53 = vmax.f32 %v243_v44, 0.0 }
  0x68   :  { %v246_v54 = vadd.f32 %v1158_v5, %v175_v46  ;;  %v247_v55 = vadd.f32 %v1158_v5, %v176_v47  ;;  %v178_v56 = vmul.f32 %v1154_v2, %v107_v43  ;;  %v308_v58 = vmax.f32 %v244_v50, 0.0 }
  0x69   :  { %972 = vst [vmem:[#allocation8 + $0xb8] sm:$0xff] %v908_v49   ;;  %v309_v59 = vmax.f32 %v245_v51, 0.0  ;;  %v248_v60 = vadd.f32 %v1158_v5, %v177_v52  ;;  %v179_v61 = vmul.f32 %v1154_v2, %v108_v48  ;;  %v913_v0 = vpack.c.bf16 %v307_v53, %v306_v45 }
  0x6a   :  { %v310_v1 = vmax.f32 %v246_v54, 0.0  ;;  %v311_v3 = vmax.f32 %v247_v55, 0.0  ;;  %v249_v4 = vadd.f32 %v1158_v5, %v178_v56  ;;  %v180_v10 = vmul.f32 %v1154_v2, %v109_v57 }
  0x6b   :  { %v918_v8 = vpack.c.bf16 %v309_v59, %v308_v58  ;;  %v312_v9 = vmax.f32 %v248_v60, 0.0  ;;  %v250_v11 = vadd.f32 %v1158_v5, %v179_v61  ;;  %973 = vst [vmem:[#allocation8 + $0xc0] sm:$0xff] %v913_v0   ;;  %v181_v15 = vmul.f32 %v1154_v2, %v110_v62 }
  0x6c   :  { %v923_v13 = vpack.c.bf16 %v311_v3, %v310_v1  ;;  %v313_v14 = vmax.f32 %v249_v4, 0.0  ;;  %v182_v16 = vmul.f32 %v1154_v2, %v111_v63  ;;  %v251_v18 = vadd.f32 %v1158_v5, %v180_v10 }
  0x6d   :  { %974 = vst [vmem:[#allocation8 + $0xc8] sm:$0xff] %v918_v8   ;;  %v314_v19 = vmax.f32 %v250_v11, 0.0  ;;  %v183_v20 = vmul.f32 %v1154_v2, %v112_v6  ;;  %v184_v21 = vmul.f32 %v1154_v2, %v113_v7  ;;  %v252_v23 = vadd.f32 %v1158_v5, %v181_v15 }
  0x6e   :  { %975 = vst [vmem:[#allocation8 + $0xd0] sm:$0xff] %v923_v13   ;;  %v928_v22 = vpack.c.bf16 %v313_v14, %v312_v9  ;;  %v253_v24 = vadd.f32 %v1158_v5, %v182_v16  ;;  %v185_v25 = vmul.f32 %v1154_v2, %v114_v12  ;;  %v315_v26 = vmax.f32 %v251_v18, 0.0 }
  0x6f   :  { %v254_v27 = vadd.f32 %v1158_v5, %v183_v20  ;;  %v255_v28 = vadd.f32 %v1158_v5, %v184_v21  ;;  %v186_v29 = vmul.f32 %v1154_v2, %v115_v17  ;;  %v316_v30 = vmax.f32 %v252_v23, 0.0 }
  0x70   :  { %976 = vst [vmem:[#allocation8 + $0xd8] sm:$0xff] %v928_v22   ;;  %v317_v31 = vmax.f32 %v253_v24, 0.0  ;;  %v256_v32 = vadd.f32 %v1158_v5, %v185_v25  ;;  %v933_v33 = vpack.c.bf16 %v315_v26, %v314_v19 }
  0x71   :  { %v318_v34 = vmax.f32 %v254_v27, 0.0  ;;  %v319_v35 = vmax.f32 %v255_v28, 0.0  ;;  %v257_v36 = vadd.f32 %v1158_v5, %v186_v29 }
  0x72   :  { %v938_v37 = vpack.c.bf16 %v317_v31, %v316_v30  ;;  %v320_v38 = vmax.f32 %v256_v32, 0.0  ;;  %977 = vst [vmem:[#allocation8 + $0xe0] sm:$0xff] %v933_v33  }
  0x73   :  { %v943_v39 = vpack.c.bf16 %v319_v35, %v318_v34  ;;  %v321_v40 = vmax.f32 %v257_v36, 0.0 }
  0x74   :  { %978 = vst [vmem:[#allocation8 + $0xe8] sm:$0xff] %v938_v37  }
  0x75   :  { %979 = vst [vmem:[#allocation8 + $0xf0] sm:$0xff] %v943_v39   ;;  %v948_v2 = vpack.c.bf16 %v321_v40, %v320_v38 }
  0x77   :  { %980 = vst [vmem:[#allocation8 + $0xf8] sm:$0xff] %v948_v2  }
  0x78   :  { %1066 = shalt.err (!%p1063_p0)
}
  0x79   :  { %s1067_s27 = scalar_lea.hbm %s1301_s3, 4096 }
  0x7a   :  { %p1068_p1 = scmp.ne.s32.totalorder %s1301_s3, %s1067_s27  ;;  %p1071_p2 = scmp.lt.u32.totalorder %s1067_s27, %s1301_s3 }
  0x7c   :  { %p1073_p3 = pnand %p1071_p2, %p1068_p1 }
  0x7e   :  { %1076 = shalt.err (!%p1073_p3)
}
  0x7f   :  { %s1089_s5 = smov 64   ;;  %s1090_s6 = smov 4  }
  0x80   :  { %653 = dma.vmem_to_hbm [thread:$0]  %s648_s23, 4096, %s1301_s3, [#allocation4], %s1089_s5, %s1089_s5, %s1090_s6  }
  0x81   :  { %1081 = dma.done.wait [#allocation4], 4096  }
  0x82   :  { %1082 = vsyncadd [#allocation4], 4294963200 }
  0x83   :  { %657 = vsyncpa [#allocation3], 1 }
  0x84   :  { %658 = vsyncpa [#allocation6], 1 }
  0x85   :  { %659 = vsyncpa [#allocation4], 1 }

// kernel: generator_forward.13
= control target key start
LH: loop header
LB: loop body
LE: loop exit
PB: predicated region body
PF: predicated region fallthrough
CT: control target
= control target key end

     0   :  { %11 = vsyncpa [#allocation4], 0  ;;  %s3176_s0 = inlined_call_operand.hbm [shape: bf16[512,512], index: 0, kind: input, shape index: {}]   ;;  %s3177_s1 = inlined_call_operand.hbm [shape: bf16[512,128], index: 1, kind: input, shape index: {}]   ;;  %s3178_s2 = inlined_call_operand.hbm [shape: f32[1,128], index: 2, kind: input, shape index: {}]   ;;  %s3179_s3 = inlined_call_operand.hbm [shape: f32[512,128], index: 3, kind: output, shape index: {0}]   ;;  %s3180_s4 = inlined_call_operand.hbm [shape: f32[2,1,128], index: 4, kind: output, shape index: {1}]   ;;  %s3181_s5 = inlined_call_operand.hbm [shape: f32[2,1,128], index: 5, kind: output, shape index: {2}]  }
   0x1   :  { %13 = vsyncpa [#allocation4 + $0x1], 0 }
   0x2   :  { %14 = vsyncpa [#allocation7], 0 }
   0x3   :  { %15 = vsyncpa [#allocation5], 0 }
   0x4   :  { %17 = vsyncpa [#allocation5 + $0x1], 0 }
   0x5   :  { %18 = vsyncpa [#allocation11], 0 }
   0x6   :  { %20 = vsyncpa [#allocation11 + $0x1], 0  ;;  %s2716_s18 = smov 0   ;;  %s2718_s19 = smov 0  }
   0x7   :  { %s2720_s20 = smov 0   ;;  %s2722_s21 = smov 0  }
   0x8   :  { %s2724_s22 = smov 0   ;;  %s2726_s23 = smov 0  }
   0x9 LB: > { %s2747_s24 = sadd.s32 4294967295, %s2672_s23   ;;  %s3185_s25 = sadd.s32 4294967294, %s2672_s23   ;;  %s2672_s23 = sphi %s2726_s23, %s26_s23   ;;  %s2668_s22 = sphi %s2724_s22, %s3204_s22   ;;  %s2664_s21 = sphi %s2722_s21, %s3203_s21   ;;  %s2660_s20 = sphi %s2720_s20, %s3202_s20   ;;  %s2656_s19 = sphi %s2718_s19, %s3201_s19   ;;  %s2652_s18 = sphi %s2716_s18, %s3200_s18  }
   0xa   : > { %p67_p0 = scmp.ne.s32.totalorder %s2656_s19, %s2652_s18  ;;  %p3182_p1 = scmp.eq.s32.totalorder %s2747_s24, 0 }
   0xb   : > { %p153_p3 = scmp.eq.s32.totalorder %s3185_s25, 1  ;;  %p1869_p5 = scmp.ge.s32.totalorder %s2672_s23, 1 }
   0xc   : > { %p2758_p4 = por %p3182_p1, %p67_p0  ;;  %p216_p7 = scmp.lt.s32.totalorder %s2672_s23, 3 }
   0xd   : > { %p2763_p6 = por %p153_p3, %p67_p0  ;;  %s2674_s29 = smov [#allocation6]  }
   0xe   : > { %s3186_s26 = scalar_select %p2758_p4, 1, 0 }
   0xf   : > { %s3187_s27 = scalar_select %p2763_p6, 1, 0 }
  0x10   : > { %p2768_p8 = pnand %p1869_p5, %p216_p7  ;;  %s232_s30 = sshll.u32 %s2674_s29, 4  ;;  %s2772_s30 = int_to_ptr.vmem [resolvable:$true] %s232_s30 }
  0x11   : > { %s2675_s7 = smov [#allocation8]   ;;  %s2440_s11 = scalar_lea.hbm %s3177_s1, 4096 }
  0x12   : > { %p2229_p9 = pneg %p2768_p8  ;;  %s248_s8 = sshll.u32 %s2675_s7, 4  ;;  %s2783_s8 = int_to_ptr.vmem [resolvable:$true] %s248_s8 }
  0x13   : > { %p2441_p12 = scmp.ne.s32.totalorder %s3177_s1, %s2440_s11  ;;  %p2447_p5 = scmp.lt.u32.totalorder %s2440_s11, %s3177_s1 }
  0x14   : > { %p2779_p11 = pnand %p2229_p9, %p3182_p1 }
  0x16   : > { %p2442_p13 = pneg %p2779_p11 }
  0x18   : > { %p2443_p0 = pnand %p2442_p13, %p2441_p12 }
  0x1a   : > { %p2444_p3 = pneg %p2443_p0 }
  0x1c   : > { %p2449_p7 = pnand %p2447_p5, %p2444_p3 }
  0x1e   : > { %2452 = shalt.err (!%p2449_p7)
}
  0x1f   : > { %s2453_s16 = scalar_lea.vmem %s2772_s30, 4096  ;;  %p2461_p2 = scmp.lt.s32.totalorder %s2772_s30, %s2772_s30 }
  0x20   : > { %p2454_p9 = scmp.ne.s32.totalorder %s2772_s30, %s2453_s16  ;;  %p2462_p12 = scmp.lt.s32.totalorder %s2453_s16, %s2453_s16 }
  0x22   : > { %p2456_p10 = pnand %p2454_p9, %p2442_p13  ;;  %p2463_p0 = por %p2462_p12, %p2461_p2 }
  0x24   : > { %p2457_p1 = pneg %p2456_p10 }
  0x26   : > { %p2464_p6 = pnand %p2463_p0, %p2457_p1 }
  0x28   : > { %2467 = shalt.err (!%p2464_p6)
}
  0x29   : > { %s2676_s17 = smov 64   ;;  %s2677_s29 = smov 4  }
  0x2a   : > { %2232 = dma.hbm_to_vmem [thread:$0]  (!%p2779_p11), %s3177_s1, 4096, %s2772_s30, [#allocation7], %s2676_s17, %s2676_s17, %s2677_s29  }
  0x2b   : > { %s2468_s12 = scalar_lea.hbm %s3178_s2, 16 }
  0x2c   : > { %p2469_p2 = scmp.ne.s32.totalorder %s3178_s2, %s2468_s12  ;;  %p2475_p10 = scmp.lt.u32.totalorder %s2468_s12, %s3178_s2 }
  0x2e   : > { %p2471_p1 = pnand %p2469_p2, %p2442_p13 }
  0x30   : > { %p2472_p6 = pneg %p2471_p1 }
  0x32   : > { %p2477_p3 = pnand %p2475_p10, %p2472_p6 }
  0x34   : > { %2480 = shalt.err (!%p2477_p3)
}
  0x35   : > { %s2481_s30 = scalar_lea.vmem %s2783_s8, 16  ;;  %s2488_s17 = scalar_lea.vmem %s2783_s8, 32 }
  0x36   : > { %p2482_p5 = scmp.ne.s32.totalorder %s2783_s8, %s2481_s30  ;;  %p2489_p12 = scmp.lt.s32.totalorder %s2783_s8, %s2783_s8 }
  0x37   : > { %p2490_p0 = scmp.lt.s32.totalorder %s2488_s17, %s2481_s30 }
  0x38   : > { %p2484_p7 = pnand %p2482_p5, %p2442_p13 }
  0x39   : > { %p2491_p2 = por %p2490_p0, %p2489_p12 }
  0x3a   : > { %p2485_p9 = pneg %p2484_p7 }
  0x3c   : > { %p2492_p1 = pnand %p2491_p2, %p2485_p9 }
  0x3e   : > { %2495 = shalt.err (!%p2492_p1)
}
  0x3f   : > { %2235 = dma.hbm_to_vmem [thread:$0]  (!%p2779_p11), %s3178_s2, 16, %s2783_s8, [#allocation7]  }
  0x40   : > { %s45_s9 = sadd.s32 1, %s2668_s22  ;;  %s54_s10 = sadd.s32 1, %s2660_s20 }
  0x41   : > { %p47_p13 = scmp.ge.s32.totalorder %s45_s9, 2  ;;  %p61_p6 = scmp.ne.s32.totalorder %s2660_s20, %s2656_s19 }
  0x42   : > { %p62_p10 = scmp.eq.s32.totalorder %s2672_s23, 0  ;;  %p2252_p3 = scmp.lt.s32.totalorder %s2672_s23, 2 }
  0x43   : > { %s3206_s9 = smov (%p47_p13, %s45_s9), 0  ;;  %p3190_p7 = scmp.eq.s32.totalorder %s2747_s24, 1 }
  0x44   : > { %p63_p5 = por %p62_p10, %p61_p6  ;;  %s49_s11 = ssub.s32 %s2668_s22, %s3206_s9 }
  0x45   : > { %p2848_p9 = por %p3190_p7, %p61_p6  ;;  %s259_s12 = sand.u32 1, %s2660_s20  }
  0x46   : > { %p52_p12 = scmp.eq.s32.totalorder %s49_s11, 0  ;;  %s1873_s8 = sshll.u32 %s259_s12, 9 }
  0x47   : > { %s3191_s6 = scalar_select %p2848_p9, 1, 0 }
  0x48   : > { %s1987_s13 = sshll.u32 %s2668_s22, 13  ;;  %s263_s17 = scalar_lea.vmem [#allocation3], %s1873_s8 }
  0x49   : > { %s2857_s14 = scalar_select %p52_p12, %s2660_s20, %s54_s10  }
  0x4a   : > { %s2862_s30 = scalar_lea.hbm %s3176_s0, %s1987_s13  ;;  %s273_s29 = sshll.u32 %s263_s17, 4  ;;  %s2870_s29 = int_to_ptr.vmem [resolvable:$true] %s273_s29 }
  0x4b   : > { %p2866_p11 = pnand %p2252_p3, %p63_p5  ;;  %s2872_s10 = scalar_lea.sflag [#allocation4], %s259_s12 }
  0x4c   : > { %s2496_s11 = scalar_lea.hbm %s2862_s30, 8192  ;;  %s2501_s15 = scalar_lea.hbm %s3176_s0, 16384 }
  0x4d   : > { %p2497_p0 = scmp.ne.s32.totalorder %s2862_s30, %s2496_s11  ;;  %p2498_p2 = pneg %p2866_p11 }
  0x4e   : > { %p2502_p6 = scmp.lt.u32.totalorder %s2862_s30, %s3176_s0  ;;  %p2503_p10 = scmp.lt.u32.totalorder %s2501_s15, %s2496_s11 }
  0x4f   : > { %p2499_p1 = pnand %p2498_p2, %p2497_p0  ;;  %p2505_p5 = scmp.lt.u32.totalorder %s2496_s11, %s2862_s30 }
  0x50   : > { %p2504_p3 = por %p2503_p10, %p2502_p6 }
  0x51   : > { %p2500_p13 = pneg %p2499_p1 }
  0x52   : > { %p2506_p7 = por %p2505_p5, %p2504_p3 }
  0x54   : > { %p2507_p12 = pnand %p2506_p7, %p2500_p13 }
  0x56   : > { %2510 = shalt.err (!%p2507_p12)
}
  0x57   : > { %s2511_s12 = scalar_lea.vmem %s2870_s29, 8192  ;;  %s2678_s8 = smov [#allocation3]  }
  0x58   : > { %p2512_p0 = scmp.ne.s32.totalorder %s2870_s29, %s2511_s12  ;;  %s2516_s13 = sshll.u32 %s2678_s8, 4  ;;  %s2517_s13 = int_to_ptr.vmem [resolvable:$false] %s2516_s13 }
  0x59   : > { %s2518_s16 = scalar_lea.vmem %s2517_s13, 16384  ;;  %p2519_p4 = scmp.lt.s32.totalorder %s2870_s29, %s2517_s13 }
  0x5a   : > { %p2514_p1 = pnand %p2512_p0, %p2498_p2  ;;  %p2520_p6 = scmp.lt.s32.totalorder %s2518_s16, %s2511_s12 }
  0x5c   : > { %p2515_p9 = pneg %p2514_p1  ;;  %p2521_p10 = por %p2520_p6, %p2519_p4 }
  0x5e   : > { %p2522_p3 = pnand %p2521_p10, %p2515_p9 }
  0x60   : > { %2525 = shalt.err (!%p2522_p3)
}
  0x61   : > { %s2679_s11 = smov 256   ;;  %s2680_s15 = smov 16  }
  0x62   : > { %2239 = dma.hbm_to_vmem [thread:$0]  (!%p2866_p11), %s2862_s30, 8192, %s2870_s29, %s2872_s10, %s2679_s11, %s2679_s11, %s2680_s15  }
  0x63   : > { %285 = sbr.rel (%p2768_p8) target bundleno = 550 (0x226), region = 32  ;;  %s2903_s17 = sand.u32 (!%p2768_p8), 1, %s2656_s19  }
  0x64   : > { %s1878_s12 = sshll.u32 (!%p2768_p8), %s2903_s17, 9  ;;  %s288_s8 = scalar_lea.sflag (!%p2768_p8), [#allocation4], %s2903_s17 }
  0x65   : > { %s2907_s13 = scalar_lea.vmem (!%p2768_p8), [#allocation3], %s1878_s12  ;;  %p3193_p4 = scmp.ne.s32.totalorder (!%p2768_p8), %s3186_s26, 0 }
  0x6a   : > { %2635 = dma.done.wait (%p3193_p4), %s288_s8, 8192  }
  0x6b   : > { %2637 = vsyncadd (%p3193_p4), %s288_s8, 4294959104  ;;  %p3194_p9 = scmp.eq.s32.totalorder %s2747_s24, 0 }
  0x6d   : > { %2639 = dma.done.wait (%p3194_p9), [#allocation7], 4112   ;;  %p3195_p8 = pmov %p3194_p9 }
  0x6e   : > { %v2312_v0 = vld [vmem:[#allocation6 + $0x40] sm:$0xff]   ;;  %v2316_v4 = vld [vmem:[#allocation6 + $0x48] sm:$0xff]   ;;  %v2320_v8 = vld [vmem:[#allocation6 + $0x50] sm:$0xff]   ;;  %s1881_s26 = sshll.u32 %s2903_s17, 8  ;;  %s1988_s30 = sshll.u32 %s2664_s21, 12 }
  0x6f   : > { %2641 = vsyncadd (%p3195_p8), [#allocation7], 4294963184  ;;  %v2313_v1 = vld [vmem:[#allocation6 + $0xc0] sm:$0xff]   ;;  %1989 = vmatprep.subr.bf16.mxu0 %v2312_v0  ;;  %v2317_v5 = vld [vmem:[#allocation6 + $0xc8] sm:$0xff]   ;;  %s2985_s28 = scalar_lea.vmem [#allocation9], %s1881_s26  ;;  %s3052_s16 = scalar_lea.hbm %s3179_s3, %s1988_s30 }
  0x70   : > { %v2314_v2 = vld [vmem:[#allocation6] sm:$0xff]   ;;  %2101 = vmatprep.subr.bf16.mxu1 %v2313_v1  ;;  %v2318_v6 = vld [vmem:[#allocation6 + $0x8] sm:$0xff]   ;;  %v2321_v9 = vld [vmem:[#allocation6 + $0xd0] sm:$0xff]   ;;  %s1670_s29 = sshll.u32 %s2985_s28, 4  ;;  %s1648_s11 = scalar_lea.sflag [#allocation5], %s2903_s17  ;;  %s3054_s29 = int_to_ptr.vmem [resolvable:$true] %s1670_s29 }
  0x71   : > { %v2315_v3 = vld [vmem:[#allocation6 + $0x80] sm:$0xff]   ;;  %1990 = vmatpush3.bf16.msra.mxu0 %v2314_v2  ;;  %v2319_v7 = vld [vmem:[#allocation6 + $0x88] sm:$0xff]   ;;  %v2322_v10 = vld [vmem:[#allocation6 + $0x10] sm:$0xff]   ;;  %s2526_s15 = scalar_lea.vmem %s3054_s29, 4096  ;;  %p3196_p2 = scmp.ne.s32.totalorder %s3191_s6, 0 }
  0x72   : > { %2102 = vmatpush3.bf16.msra.mxu1 %v2315_v3  ;;  %1991 = vmatprep.subr.bf16.mxu0 %v2316_v4  ;;  %v2323_v11 = vld [vmem:[#allocation6 + $0x90] sm:$0xff]   ;;  %v2324_v12 = vld [vmem:[#allocation6 + $0x58] sm:$0xff]   ;;  %v2328_v16 = vld [vmem:[#allocation6 + $0x60] sm:$0xff]   ;;  %p2527_p11 = scmp.ne.s32.totalorder %s3054_s29, %s2526_s15  ;;  %s2681_s12 = smov [#allocation9]  }
  0x73   : > { %2103 = vmatprep.subr.bf16.mxu1 %v2317_v5  ;;  %v2325_v13 = vld [vmem:[#allocation6 + $0xd8] sm:$0xff]   ;;  %v2329_v17 = vld [vmem:[#allocation6 + $0xe0] sm:$0xff]   ;;  %v2332_v20 = vld [vmem:[#allocation6 + $0x68] sm:$0xff]   ;;  %s2530_s8 = sshll.u32 %s2681_s12, 4  ;;  %s2531_s8 = int_to_ptr.vmem [resolvable:$false] %s2530_s8 }
  0x74   : > { %v2326_v14 = vld [vmem:[#allocation6 + $0x18] sm:$0xff]   ;;  %v2330_v18 = vld [vmem:[#allocation6 + $0x20] sm:$0xff]   ;;  %v2333_v21 = vld [vmem:[#allocation6 + $0xe8] sm:$0xff]   ;;  %p2528_p13 = pnand %p2527_p11, %p3196_p2  ;;  %p2533_p7 = scmp.lt.s32.totalorder %s3054_s29, %s2531_s8 }
  0x75   : > { %1992 = vmatpush3.bf16.msra.mxu0 %v2318_v6  ;;  %v2327_v15 = vld [vmem:[#allocation6 + $0x98] sm:$0xff]   ;;  %v2331_v19 = vld [vmem:[#allocation6 + $0xa0] sm:$0xff]   ;;  %v2334_v22 = vld [vmem:[#allocation6 + $0x28] sm:$0xff]  }
  0x76   : > { %2104 = vmatpush3.bf16.msra.mxu1 %v2319_v7  ;;  %1993 = vmatprep.subr.bf16.mxu0 %v2320_v8  ;;  %v2335_v23 = vld [vmem:[#allocation6 + $0xa8] sm:$0xff]   ;;  %v2336_v24 = vld [vmem:[#allocation6 + $0x70] sm:$0xff]   ;;  %v2340_v28 = vld [vmem:[#allocation6 + $0x78] sm:$0xff]   ;;  %p2529_p5 = pneg %p2528_p13 }
  0x77   : > { %2105 = vmatprep.subr.bf16.mxu1 %v2321_v9  ;;  %v2337_v25 = vld [vmem:[#allocation6 + $0xf0] sm:$0xff]   ;;  %v2341_v29 = vld [vmem:[#allocation6 + $0xf8] sm:$0xff]  }
  0x78   : > { %v2338_v26 = vld [vmem:[#allocation6 + $0x30] sm:$0xff]   ;;  %v2342_v30 = vld [vmem:[#allocation6 + $0x38] sm:$0xff]  }
  0x79   : > { %1994 = vmatpush3.bf16.msra.mxu0 %v2322_v10  ;;  %v2339_v27 = vld [vmem:[#allocation6 + $0xb0] sm:$0xff]   ;;  %v2343_v31 = vld [vmem:[#allocation6 + $0xb8] sm:$0xff]  }
  0x7a   : > { %2106 = vmatpush3.bf16.msra.mxu1 %v2323_v11  ;;  %1995 = vmatprep.subr.bf16.mxu0 %v2324_v12  ;;  %v2344_v32 = vld [vmem:[%s2907_s13] ss:$16 sps:$4 sm:$0xff]   ;;  %v2346_v33 = vld [vmem:[%s2907_s13 + $0x4] ss:$16 sps:$4 sm:$0xff]   ;;  %v2347_v34 = vld [vmem:[%s2907_s13 + $0x8] ss:$16 sps:$4 sm:$0xff]  }
  0x7b   : > { %2107 = vmatprep.subr.bf16.mxu1 %v2325_v13  ;;  %v2349_v35 = vld [vmem:[%s2907_s13 + $0xc] ss:$16 sps:$4 sm:$0xff]   ;;  %1079 = vmatprep.mubr.bf16.mxu0 %v2346_v33  ;;  %v2350_v36 = vld [vmem:[%s2907_s13 + $0x24] ss:$16 sps:$4 sm:$0xff]   ;;  %v2354_v38 = vld [vmem:[%s2907_s13 + $0x20] ss:$16 sps:$4 sm:$0xff]  }
  0x7c   : > { %1240 = vmatprep.mubr.bf16.mxu1 %v2349_v35  ;;  %v2352_v37 = vld [vmem:[%s2907_s13 + $0x2c] ss:$16 sps:$4 sm:$0xff]   ;;  %v2355_v39 = vld [vmem:[%s2907_s13 + $0x28] ss:$16 sps:$4 sm:$0xff]   ;;  %v2356_v40 = vld [vmem:[%s2907_s13 + $0x44] ss:$16 sps:$4 sm:$0xff]  }
  0x7d   : > { %1996 = vmatpush3.bf16.msra.mxu0 %v2326_v14  ;;  %v2358_v41 = vld [vmem:[%s2907_s13 + $0x4c] ss:$16 sps:$4 sm:$0xff]   ;;  %v2360_v42 = vld [vmem:[%s2907_s13 + $0x40] ss:$16 sps:$4 sm:$0xff]   ;;  %v2361_v43 = vld [vmem:[%s2907_s13 + $0x48] ss:$16 sps:$4 sm:$0xff]  }
  0x7e   : > { %2108 = vmatpush3.bf16.msra.mxu1 %v2327_v15  ;;  %1997 = vmatprep.subr.bf16.mxu0 %v2328_v16  ;;  %v2362_v44 = vld [vmem:[%s2907_s13 + $0x64] ss:$16 sps:$4 sm:$0xff]   ;;  %v2364_v45 = vld [vmem:[%s2907_s13 + $0x6c] ss:$16 sps:$4 sm:$0xff]   ;;  %v2366_v46 = vld [vmem:[%s2907_s13 + $0x60] ss:$16 sps:$4 sm:$0xff]  }
  0x7f   : > { %2109 = vmatprep.subr.bf16.mxu1 %v2329_v17  ;;  %v2367_v47 = vld [vmem:[%s2907_s13 + $0x68] ss:$16 sps:$4 sm:$0xff]   ;;  %v2368_v48 = vld [vmem:[%s2907_s13 + $0x84] ss:$16 sps:$4 sm:$0xff]   ;;  %v2370_v49 = vld [vmem:[%s2907_s13 + $0x8c] ss:$16 sps:$4 sm:$0xff]  }
  0x80   : > { %v2372_v50 = vld [vmem:[%s2907_s13 + $0x80] ss:$16 sps:$4 sm:$0xff]   ;;  %v2373_v51 = vld [vmem:[%s2907_s13 + $0x88] ss:$16 sps:$4 sm:$0xff]   ;;  %v2374_v52 = vld [vmem:[%s2907_s13 + $0xa4] ss:$16 sps:$4 sm:$0xff]  }
  0x81   : > { %1998 = vmatpush3.bf16.msra.mxu0 %v2330_v18  ;;  %v2376_v53 = vld [vmem:[%s2907_s13 + $0xac] ss:$16 sps:$4 sm:$0xff]   ;;  %v2378_v54 = vld [vmem:[%s2907_s13 + $0xa0] ss:$16 sps:$4 sm:$0xff]   ;;  %v2379_v55 = vld [vmem:[%s2907_s13 + $0xa8] ss:$16 sps:$4 sm:$0xff]  }
  0x82   : > { %2110 = vmatpush3.bf16.msra.mxu1 %v2331_v19  ;;  %1999 = vmatprep.subr.bf16.mxu0 %v2332_v20  ;;  %v2380_v56 = vld [vmem:[%s2907_s13 + $0xc4] ss:$16 sps:$4 sm:$0xff]   ;;  %v2382_v57 = vld [vmem:[%s2907_s13 + $0xcc] ss:$16 sps:$4 sm:$0xff]   ;;  %v2384_v58 = vld [vmem:[%s2907_s13 + $0xc0] ss:$16 sps:$4 sm:$0xff]  }
  0x83   : > { %2111 = vmatprep.subr.bf16.mxu1 %v2333_v21  ;;  %v2385_v59 = vld [vmem:[%s2907_s13 + $0xc8] ss:$16 sps:$4 sm:$0xff]   ;;  %v2386_v60 = vld [vmem:[%s2907_s13 + $0xe4] ss:$16 sps:$4 sm:$0xff]   ;;  %v2388_v61 = vld [vmem:[%s2907_s13 + $0xec] ss:$16 sps:$4 sm:$0xff]  }
  0x84   : > { %v2390_v62 = vld [vmem:[%s2907_s13 + $0xe0] ss:$16 sps:$4 sm:$0xff]   ;;  %v2391_v63 = vld [vmem:[%s2907_s13 + $0xe8] ss:$16 sps:$4 sm:$0xff]   ;;  %v2392_v0 = vld [vmem:[%s2907_s13 + $0x104] ss:$16 sps:$4 sm:$0xff]  }
  0x85   : > { %2000 = vmatpush3.bf16.msra.mxu0 %v2334_v22  ;;  %v2394_v1 = vld [vmem:[%s2907_s13 + $0x10c] ss:$16 sps:$4 sm:$0xff]   ;;  %v2396_v2 = vld [vmem:[%s2907_s13 + $0x100] ss:$16 sps:$4 sm:$0xff]   ;;  %v2397_v3 = vld [vmem:[%s2907_s13 + $0x108] ss:$16 sps:$4 sm:$0xff]  }
  0x86   : > { %2112 = vmatpush3.bf16.msra.mxu1 %v2335_v23  ;;  %2001 = vmatprep.subr.bf16.mxu0 %v2336_v24  ;;  %v2398_v4 = vld [vmem:[%s2907_s13 + $0x124] ss:$16 sps:$4 sm:$0xff]   ;;  %v2400_v5 = vld [vmem:[%s2907_s13 + $0x12c] ss:$16 sps:$4 sm:$0xff]   ;;  %v2402_v6 = vld [vmem:[%s2907_s13 + $0x120] ss:$16 sps:$4 sm:$0xff]  }
  0x87   : > { %2113 = vmatprep.subr.bf16.mxu1 %v2337_v25  ;;  %v2403_v7 = vld [vmem:[%s2907_s13 + $0x128] ss:$16 sps:$4 sm:$0xff]   ;;  %v2404_v8 = vld [vmem:[%s2907_s13 + $0x144] ss:$16 sps:$4 sm:$0xff]   ;;  %v2406_v9 = vld [vmem:[%s2907_s13 + $0x14c] ss:$16 sps:$4 sm:$0xff]  }
  0x88   : > { %v2408_v10 = vld [vmem:[%s2907_s13 + $0x140] ss:$16 sps:$4 sm:$0xff]   ;;  %v2409_v11 = vld [vmem:[%s2907_s13 + $0x148] ss:$16 sps:$4 sm:$0xff]   ;;  %v2410_v12 = vld [vmem:[%s2907_s13 + $0x164] ss:$16 sps:$4 sm:$0xff]  }
  0x89   : > { %2002 = vmatpush3.bf16.msra.mxu0 %v2338_v26  ;;  %v2412_v13 = vld [vmem:[%s2907_s13 + $0x16c] ss:$16 sps:$4 sm:$0xff]   ;;  %v2414_v14 = vld [vmem:[%s2907_s13 + $0x160] ss:$16 sps:$4 sm:$0xff]   ;;  %v2415_v15 = vld [vmem:[%s2907_s13 + $0x168] ss:$16 sps:$4 sm:$0xff]  }
  0x8a   : > { %2114 = vmatpush3.bf16.msra.mxu1 %v2339_v27  ;;  %2003 = vmatprep.subr.bf16.mxu0 %v2340_v28  ;;  %v2416_v16 = vld [vmem:[%s2907_s13 + $0x184] ss:$16 sps:$4 sm:$0xff]   ;;  %v2418_v17 = vld [vmem:[%s2907_s13 + $0x18c] ss:$16 sps:$4 sm:$0xff]   ;;  %v2420_v18 = vld [vmem:[%s2907_s13 + $0x180] ss:$16 sps:$4 sm:$0xff]  }
  0x8b   : > { %2115 = vmatprep.subr.bf16.mxu1 %v2341_v29  ;;  %v2421_v19 = vld [vmem:[%s2907_s13 + $0x188] ss:$16 sps:$4 sm:$0xff]   ;;  %v2422_v20 = vld [vmem:[%s2907_s13 + $0x1a4] ss:$16 sps:$4 sm:$0xff]   ;;  %v2424_v21 = vld [vmem:[%s2907_s13 + $0x1ac] ss:$16 sps:$4 sm:$0xff]  }
  0x8c   : > { %v2426_v22 = vld [vmem:[%s2907_s13 + $0x1a0] ss:$16 sps:$4 sm:$0xff]   ;;  %v2427_v23 = vld [vmem:[%s2907_s13 + $0x1a8] ss:$16 sps:$4 sm:$0xff]   ;;  %v2428_v24 = vld [vmem:[%s2907_s13 + $0x1c4] ss:$16 sps:$4 sm:$0xff]  }
  0x8d   : > { %2004 = vmatpush3.bf16.msra.mxu0 %v2342_v30  ;;  %v2430_v25 = vld [vmem:[%s2907_s13 + $0x1cc] ss:$16 sps:$4 sm:$0xff]   ;;  %v2432_v26 = vld [vmem:[%s2907_s13 + $0x1c0] ss:$16 sps:$4 sm:$0xff]   ;;  %v2433_v27 = vld [vmem:[%s2907_s13 + $0x1c8] ss:$16 sps:$4 sm:$0xff]  }
  0x8e   : > { %2116 = vmatpush3.bf16.msra.mxu1 %v2343_v31  ;;  %v2434_v28 = vld [vmem:[%s2907_s13 + $0x1e4] ss:$16 sps:$4 sm:$0xff]   ;;  %v2436_v29 = vld [vmem:[%s2907_s13 + $0x1ec] ss:$16 sps:$4 sm:$0xff]   ;;  %v2438_v30 = vld [vmem:[%s2907_s13 + $0x1e0] ss:$16 sps:$4 sm:$0xff]  }
  0x8f   : > { %v2439_v31 = vld [vmem:[%s2907_s13 + $0x1e8] ss:$16 sps:$4 sm:$0xff]   ;;  %s2532_s13 = scalar_lea.vmem %s2531_s8, 8192 }
  0x90   : > { %1080 = vmatmul.mubr.bf16.vlgmr.msra.gmra.mrb[0].mxu0 %v2344_v32  ;;  %p2534_p12 = scmp.lt.s32.totalorder %s2532_s13, %s2526_s15 }
  0x91   : > { %1241 = vmatmul.mubr.bf16.vlgmr.msra.gmra.mrb[0].mxu1 %v2347_v34  ;;  %1087 = vmatprep.mubr.bf16.mxu0 %v2350_v36 }
  0x92   : > { %1248 = vmatprep.mubr.bf16.mxu1 %v2352_v37  ;;  %p2535_p0 = por %p2534_p12, %p2533_p7 }
  0x94   : > { %p2536_p1 = pnand %p2535_p0, %p2529_p5 }
  0x98   : > { %1088 = vmatmul.mubr.bf16.gmra.mrb[4].mxu0 %v2354_v38 }
  0x99   : > { %1249 = vmatmul.mubr.bf16.gmra.mrb[4].mxu1 %v2355_v39  ;;  %1095 = vmatprep.mubr.bf16.mxu0 %v2356_v40 }
  0x9a   : > { %1256 = vmatprep.mubr.bf16.mxu1 %v2358_v41  ;;  %v2982_v41 = vld [vmem:[#allocation8] ss:$0 sm:$0xff] }
  0xa0   : > { %1096 = vmatmul.mubr.bf16.gmra.mrb[8].mxu0 %v2360_v42 }
  0xa1   : > { %1257 = vmatmul.mubr.bf16.gmra.mrb[8].mxu1 %v2361_v43  ;;  %1103 = vmatprep.mubr.bf16.mxu0 %v2362_v44 }
  0xa2   : > { %1264 = vmatprep.mubr.bf16.mxu1 %v2364_v45 }
  0xa8   : > { %1104 = vmatmul.mubr.bf16.gmra.mrb[12].mxu0 %v2366_v46 }
  0xa9   : > { %1265 = vmatmul.mubr.bf16.gmra.mrb[12].mxu1 %v2367_v47  ;;  %1111 = vmatprep.mubr.bf16.mxu0 %v2368_v48 }
  0xaa   : > { %1272 = vmatprep.mubr.bf16.mxu1 %v2370_v49 }
  0xb0   : > { %1112 = vmatmul.mubr.bf16.gmra.mrb[16].mxu0 %v2372_v50 }
  0xb1   : > { %1273 = vmatmul.mubr.bf16.gmra.mrb[16].mxu1 %v2373_v51  ;;  %1119 = vmatprep.mubr.bf16.mxu0 %v2374_v52 }
  0xb2   : > { %1280 = vmatprep.mubr.bf16.mxu1 %v2376_v53 }
  0xb8   : > { %1120 = vmatmul.mubr.bf16.gmra.mrb[20].mxu0 %v2378_v54 }
  0xb9   : > { %1281 = vmatmul.mubr.bf16.gmra.mrb[20].mxu1 %v2379_v55  ;;  %1127 = vmatprep.mubr.bf16.mxu0 %v2380_v56 }
  0xba   : > { %1288 = vmatprep.mubr.bf16.mxu1 %v2382_v57 }
  0xc0   : > { %1128 = vmatmul.mubr.bf16.gmra.mrb[24].mxu0 %v2384_v58 }
  0xc1   : > { %1289 = vmatmul.mubr.bf16.gmra.mrb[24].mxu1 %v2385_v59  ;;  %1135 = vmatprep.mubr.bf16.mxu0 %v2386_v60 }
  0xc2   : > { %1296 = vmatprep.mubr.bf16.mxu1 %v2388_v61 }
  0xc8   : > { %1136 = vmatmul.mubr.bf16.gmra.mrb[28].mxu0 %v2390_v62 }
  0xc9   : > { %1297 = vmatmul.mubr.bf16.gmra.mrb[28].mxu1 %v2391_v63  ;;  %1143 = vmatprep.mubr.bf16.mxu0 %v2392_v0 }
  0xca   : > { %1304 = vmatprep.mubr.bf16.mxu1 %v2394_v1 }
  0xd0   : > { %1144 = vmatmul.mubr.bf16.gmra.mrb[32].mxu0 %v2396_v2 }
  0xd1   : > { %1305 = vmatmul.mubr.bf16.gmra.mrb[32].mxu1 %v2397_v3  ;;  %1151 = vmatprep.mubr.bf16.mxu0 %v2398_v4 }
  0xd2   : > { %1312 = vmatprep.mubr.bf16.mxu1 %v2400_v5 }
  0xd8   : > { %1152 = vmatmul.mubr.bf16.gmra.mrb[36].mxu0 %v2402_v6 }
  0xd9   : > { %1313 = vmatmul.mubr.bf16.gmra.mrb[36].mxu1 %v2403_v7  ;;  %1159 = vmatprep.mubr.bf16.mxu0 %v2404_v8 }
  0xda   : > { %1320 = vmatprep.mubr.bf16.mxu1 %v2406_v9 }
  0xe0   : > { %1160 = vmatmul.mubr.bf16.gmra.mrb[40].mxu0 %v2408_v10 }
  0xe1   : > { %1321 = vmatmul.mubr.bf16.gmra.mrb[40].mxu1 %v2409_v11  ;;  %1167 = vmatprep.mubr.bf16.mxu0 %v2410_v12 }
  0xe2   : > { %1328 = vmatprep.mubr.bf16.mxu1 %v2412_v13 }
  0xe8   : > { %1168 = vmatmul.mubr.bf16.gmra.mrb[44].mxu0 %v2414_v14 }
  0xe9   : > { %1329 = vmatmul.mubr.bf16.gmra.mrb[44].mxu1 %v2415_v15  ;;  %1175 = vmatprep.mubr.bf16.mxu0 %v2416_v16 }
  0xea   : > { %1336 = vmatprep.mubr.bf16.mxu1 %v2418_v17 }
  0xf0   : > { %1176 = vmatmul.mubr.bf16.gmra.mrb[48].mxu0 %v2420_v18 }
  0xf1   : > { %1337 = vmatmul.mubr.bf16.gmra.mrb[48].mxu1 %v2421_v19  ;;  %1183 = vmatprep.mubr.bf16.mxu0 %v2422_v20 }
  0xf2   : > { %1344 = vmatprep.mubr.bf16.mxu1 %v2424_v21 }
  0xf8   : > { %1184 = vmatmul.mubr.bf16.gmra.mrb[52].mxu0 %v2426_v22 }
  0xf9   : > { %1345 = vmatmul.mubr.bf16.gmra.mrb[52].mxu1 %v2427_v23  ;;  %1191 = vmatprep.mubr.bf16.mxu0 %v2428_v24 }
  0xfa   : > { %1352 = vmatprep.mubr.bf16.mxu1 %v2430_v25 }
 0x100   : > { %1192 = vmatmul.mubr.bf16.gmra.mrb[56].mxu0 %v2432_v26 }
 0x101   : > { %1353 = vmatmul.mubr.bf16.gmra.mrb[56].mxu1 %v2433_v27  ;;  %1199 = vmatprep.mubr.bf16.mxu0 %v2434_v28 }
 0x102   : > { %1360 = vmatprep.mubr.bf16.mxu1 %v2436_v29 }
 0x108   : > { %1200 = vmatmul.mubr.bf16.gmra.mrb[60].mxu0 %v2438_v30 }
 0x109   : > { %1361 = vmatmul.mubr.bf16.gmra.mrb[60].mxu1 %v2439_v31 }
 0x163   : > { %v2005_v32 = vpop.f32.mrb[0].mxu0 }
 0x164   : > { %v2117_v33 = vpop.f32.mrb[0].mxu1  ;;  %v2006_v34 = vpop.f32.mrb[1].mxu0 }
 0x165   : > { %v2007_v35 = vadd.f32 %v2006_v34, %v2005_v32  ;;  %v2118_v36 = vpop.f32.mrb[1].mxu1  ;;  %v2008_v37 = vpop.f32.mrb[2].mxu0 }
 0x166   : > { %v2119_v38 = vadd.f32 %v2118_v36, %v2117_v33  ;;  %v2120_v39 = vpop.f32.mrb[2].mxu1  ;;  %v2009_v40 = vpop.f32.mrb[3].mxu0 }
 0x167   : > { %v2010_v42 = vadd.f32 %v2009_v40, %v2008_v37  ;;  %v2121_v43 = vpop.f32.mrb[3].mxu1 }
 0x168   : > { %v1243_v44 = vadd.f32 %v2119_v38, %v2007_v35  ;;  %v2122_v45 = vadd.f32 %v2121_v43, %v2120_v39 }
 0x16a   : > { %v1475_v46 = vadd.f32 %v2982_v41, %v1243_v44  ;;  %v1246_v47 = vadd.f32 %v2122_v45, %v2010_v42 }
 0x16b   : > { %v2011_v48 = vpop.f32.mrb[4].mxu0 }
 0x16c   : > { %1615 = vst [vmem:[%s2985_s28] sm:$0xff] %v1475_v46  ;;  %v1476_v49 = vadd.f32 %v2982_v41, %v1246_v47  ;;  %v2123_v50 = vpop.f32.mrb[4].mxu1  ;;  %v2012_v51 = vpop.f32.mrb[5].mxu0  ;;  %v1545_v55 = vmul.f32 %v1475_v46, %v1475_v46 }
 0x16d   : > { %v2013_v52 = vadd.f32 %v2012_v51, %v2011_v48  ;;  %v2124_v53 = vpop.f32.mrb[5].mxu1  ;;  %v2014_v54 = vpop.f32.mrb[6].mxu0 }
 0x16e   : > { %v1507_v56 = vadd.f32 %v1476_v49, %v1475_v46  ;;  %v1546_v57 = vmul.f32 %v1476_v49, %v1476_v49  ;;  %1616 = vst [vmem:[%s2985_s28 + $0x8] sm:$0xff] %v1476_v49  ;;  %v2125_v58 = vadd.f32 %v2124_v53, %v2123_v50  ;;  %v2126_v59 = vpop.f32.mrb[6].mxu1  ;;  %v2015_v60 = vpop.f32.mrb[7].mxu0 }
 0x16f   : > { %v2016_v61 = vadd.f32 %v2015_v60, %v2014_v54  ;;  %v2127_v62 = vpop.f32.mrb[7].mxu1 }
 0x170   : > { %v1577_v63 = vadd.f32 %v1546_v57, %v1545_v55  ;;  %v1251_v0 = vadd.f32 %v2125_v58, %v2013_v52  ;;  %v2128_v1 = vadd.f32 %v2127_v62, %v2126_v59 }
 0x172   : > { %v1477_v2 = vadd.f32 %v2982_v41, %v1251_v0  ;;  %v1254_v3 = vadd.f32 %v2128_v1, %v2016_v61 }
 0x173   : > { %v2017_v4 = vpop.f32.mrb[8].mxu0 }
 0x174   : > { %v1508_v5 = vadd.f32 %v1507_v56, %v1477_v2  ;;  %v1547_v6 = vmul.f32 %v1477_v2, %v1477_v2  ;;  %1617 = vst [vmem:[%s2985_s28 + $0x10] sm:$0xff] %v1477_v2  ;;  %v1478_v7 = vadd.f32 %v2982_v41, %v1254_v3  ;;  %v2129_v8 = vpop.f32.mrb[8].mxu1  ;;  %v2018_v9 = vpop.f32.mrb[9].mxu0 }
 0x175   : > { %v2019_v10 = vadd.f32 %v2018_v9, %v2017_v4  ;;  %v2130_v11 = vpop.f32.mrb[9].mxu1  ;;  %v2020_v12 = vpop.f32.mrb[10].mxu0 }
 0x176   : > { %v1578_v13 = vadd.f32 %v1577_v63, %v1547_v6  ;;  %v1509_v14 = vadd.f32 %v1508_v5, %v1478_v7  ;;  %v1548_v15 = vmul.f32 %v1478_v7, %v1478_v7  ;;  %1618 = vst [vmem:[%s2985_s28 + $0x18] sm:$0xff] %v1478_v7  ;;  %v2131_v16 = vadd.f32 %v2130_v11, %v2129_v8  ;;  %v2132_v17 = vpop.f32.mrb[10].mxu1  ;;  %v2021_v18 = vpop.f32.mrb[11].mxu0 }
 0x177   : > { %v2022_v19 = vadd.f32 %v2021_v18, %v2020_v12  ;;  %v2133_v20 = vpop.f32.mrb[11].mxu1 }
 0x178   : > { %v1579_v21 = vadd.f32 %v1578_v13, %v1548_v15  ;;  %v1259_v22 = vadd.f32 %v2131_v16, %v2019_v10  ;;  %v2134_v23 = vadd.f32 %v2133_v20, %v2132_v17 }
 0x17a   : > { %v1479_v24 = vadd.f32 %v2982_v41, %v1259_v22  ;;  %v1262_v25 = vadd.f32 %v2134_v23, %v2022_v19 }
 0x17b   : > { %v2023_v26 = vpop.f32.mrb[12].mxu0 }
 0x17c   : > { %v1510_v27 = vadd.f32 %v1509_v14, %v1479_v24  ;;  %v1549_v28 = vmul.f32 %v1479_v24, %v1479_v24  ;;  %1619 = vst [vmem:[%s2985_s28 + $0x20] sm:$0xff] %v1479_v24  ;;  %v1480_v29 = vadd.f32 %v2982_v41, %v1262_v25  ;;  %v2135_v30 = vpop.f32.mrb[12].mxu1  ;;  %v2024_v31 = vpop.f32.mrb[13].mxu0 }
 0x17d   : > { %v2025_v32 = vadd.f32 %v2024_v31, %v2023_v26  ;;  %v2136_v33 = vpop.f32.mrb[13].mxu1  ;;  %v2026_v34 = vpop.f32.mrb[14].mxu0 }
 0x17e   : > { %v1580_v35 = vadd.f32 %v1579_v21, %v1549_v28  ;;  %v1511_v36 = vadd.f32 %v1510_v27, %v1480_v29  ;;  %v1550_v37 = vmul.f32 %v1480_v29, %v1480_v29  ;;  %1620 = vst [vmem:[%s2985_s28 + $0x28] sm:$0xff] %v1480_v29  ;;  %v2137_v38 = vadd.f32 %v2136_v33, %v2135_v30  ;;  %v2138_v39 = vpop.f32.mrb[14].mxu1  ;;  %v2027_v40 = vpop.f32.mrb[15].mxu0 }
 0x17f   : > { %v2028_v42 = vadd.f32 %v2027_v40, %v2026_v34  ;;  %v2139_v43 = vpop.f32.mrb[15].mxu1 }
 0x180   : > { %v1581_v44 = vadd.f32 %v1580_v35, %v1550_v37  ;;  %v1267_v45 = vadd.f32 %v2137_v38, %v2025_v32  ;;  %v2140_v46 = vadd.f32 %v2139_v43, %v2138_v39 }
 0x182   : > { %v1481_v47 = vadd.f32 %v2982_v41, %v1267_v45  ;;  %v1270_v48 = vadd.f32 %v2140_v46, %v2028_v42 }
 0x183   : > { %v2029_v49 = vpop.f32.mrb[16].mxu0 }
 0x184   : > { %v1512_v50 = vadd.f32 %v1511_v36, %v1481_v47  ;;  %v1551_v51 = vmul.f32 %v1481_v47, %v1481_v47  ;;  %1621 = vst [vmem:[%s2985_s28 + $0x30] sm:$0xff] %v1481_v47  ;;  %v1482_v52 = vadd.f32 %v2982_v41, %v1270_v48  ;;  %v2141_v53 = vpop.f32.mrb[16].mxu1  ;;  %v2030_v54 = vpop.f32.mrb[17].mxu0 }
 0x185   : > { %v2031_v55 = vadd.f32 %v2030_v54, %v2029_v49  ;;  %v2142_v56 = vpop.f32.mrb[17].mxu1  ;;  %v2032_v57 = vpop.f32.mrb[18].mxu0 }
 0x186   : > { %v1582_v58 = vadd.f32 %v1581_v44, %v1551_v51  ;;  %v1513_v59 = vadd.f32 %v1512_v50, %v1482_v52  ;;  %v1552_v60 = vmul.f32 %v1482_v52, %v1482_v52  ;;  %1622 = vst [vmem:[%s2985_s28 + $0x38] sm:$0xff] %v1482_v52  ;;  %v2143_v61 = vadd.f32 %v2142_v56, %v2141_v53  ;;  %v2144_v62 = vpop.f32.mrb[18].mxu1  ;;  %v2033_v63 = vpop.f32.mrb[19].mxu0 }
 0x187   : > { %v2034_v0 = vadd.f32 %v2033_v63, %v2032_v57  ;;  %v2145_v1 = vpop.f32.mrb[19].mxu1 }
 0x188   : > { %v1583_v2 = vadd.f32 %v1582_v58, %v1552_v60  ;;  %v1275_v3 = vadd.f32 %v2143_v61, %v2031_v55  ;;  %v2146_v4 = vadd.f32 %v2145_v1, %v2144_v62 }
 0x18a   : > { %v1483_v5 = vadd.f32 %v2982_v41, %v1275_v3  ;;  %v1278_v6 = vadd.f32 %v2146_v4, %v2034_v0 }
 0x18b   : > { %v2035_v7 = vpop.f32.mrb[20].mxu0 }
 0x18c   : > { %v1514_v8 = vadd.f32 %v1513_v59, %v1483_v5  ;;  %v1553_v9 = vmul.f32 %v1483_v5, %v1483_v5  ;;  %1623 = vst [vmem:[%s2985_s28 + $0x40] sm:$0xff] %v1483_v5  ;;  %v1484_v10 = vadd.f32 %v2982_v41, %v1278_v6  ;;  %v2147_v11 = vpop.f32.mrb[20].mxu1  ;;  %v2036_v12 = vpop.f32.mrb[21].mxu0 }
 0x18d   : > { %v2037_v13 = vadd.f32 %v2036_v12, %v2035_v7  ;;  %v2148_v14 = vpop.f32.mrb[21].mxu1  ;;  %v2038_v15 = vpop.f32.mrb[22].mxu0 }
 0x18e   : > { %v1584_v16 = vadd.f32 %v1583_v2, %v1553_v9  ;;  %v1515_v17 = vadd.f32 %v1514_v8, %v1484_v10  ;;  %v1554_v18 = vmul.f32 %v1484_v10, %v1484_v10  ;;  %1624 = vst [vmem:[%s2985_s28 + $0x48] sm:$0xff] %v1484_v10  ;;  %v2149_v19 = vadd.f32 %v2148_v14, %v2147_v11  ;;  %v2150_v20 = vpop.f32.mrb[22].mxu1  ;;  %v2039_v21 = vpop.f32.mrb[23].mxu0 }
 0x18f   : > { %v2040_v22 = vadd.f32 %v2039_v21, %v2038_v15  ;;  %v2151_v23 = vpop.f32.mrb[23].mxu1 }
 0x190   : > { %v1585_v24 = vadd.f32 %v1584_v16, %v1554_v18  ;;  %v1283_v25 = vadd.f32 %v2149_v19, %v2037_v13  ;;  %v2152_v26 = vadd.f32 %v2151_v23, %v2150_v20 }
 0x192   : > { %v1485_v27 = vadd.f32 %v2982_v41, %v1283_v25  ;;  %v1286_v28 = vadd.f32 %v2152_v26, %v2040_v22 }
 0x193   : > { %v2041_v29 = vpop.f32.mrb[24].mxu0 }
 0x194   : > { %v1516_v30 = vadd.f32 %v1515_v17, %v1485_v27  ;;  %v1555_v31 = vmul.f32 %v1485_v27, %v1485_v27  ;;  %1625 = vst [vmem:[%s2985_s28 + $0x50] sm:$0xff] %v1485_v27  ;;  %v1486_v32 = vadd.f32 %v2982_v41, %v1286_v28  ;;  %v2153_v33 = vpop.f32.mrb[24].mxu1  ;;  %v2042_v34 = vpop.f32.mrb[25].mxu0 }
 0x195   : > { %v2043_v35 = vadd.f32 %v2042_v34, %v2041_v29  ;;  %v2154_v36 = vpop.f32.mrb[25].mxu1  ;;  %v2044_v37 = vpop.f32.mrb[26].mxu0 }
 0x196   : > { %v1586_v38 = vadd.f32 %v1585_v24, %v1555_v31  ;;  %v1517_v39 = vadd.f32 %v1516_v30, %v1486_v32  ;;  %v1556_v40 = vmul.f32 %v1486_v32, %v1486_v32  ;;  %1626 = vst [vmem:[%s2985_s28 + $0x58] sm:$0xff] %v1486_v32  ;;  %v2155_v42 = vadd.f32 %v2154_v36, %v2153_v33  ;;  %v2156_v43 = vpop.f32.mrb[26].mxu1  ;;  %v2045_v44 = vpop.f32.mrb[27].mxu0 }
 0x197   : > { %v2046_v45 = vadd.f32 %v2045_v44, %v2044_v37  ;;  %v2157_v46 = vpop.f32.mrb[27].mxu1 }
 0x198   : > { %v1587_v47 = vadd.f32 %v1586_v38, %v1556_v40  ;;  %v1291_v48 = vadd.f32 %v2155_v42, %v2043_v35  ;;  %v2158_v49 = vadd.f32 %v2157_v46, %v2156_v43 }
 0x19a   : > { %v1487_v50 = vadd.f32 %v2982_v41, %v1291_v48  ;;  %v1294_v51 = vadd.f32 %v2158_v49, %v2046_v45 }
 0x19b   : > { %v2047_v52 = vpop.f32.mrb[28].mxu0 }
 0x19c   : > { %v1518_v53 = vadd.f32 %v1517_v39, %v1487_v50  ;;  %v1557_v54 = vmul.f32 %v1487_v50, %v1487_v50  ;;  %1627 = vst [vmem:[%s2985_s28 + $0x60] sm:$0xff] %v1487_v50  ;;  %v1488_v55 = vadd.f32 %v2982_v41, %v1294_v51  ;;  %v2159_v56 = vpop.f32.mrb[28].mxu1  ;;  %v2048_v57 = vpop.f32.mrb[29].mxu0 }
 0x19d   : > { %v2049_v58 = vadd.f32 %v2048_v57, %v2047_v52  ;;  %v2160_v59 = vpop.f32.mrb[29].mxu1  ;;  %v2050_v60 = vpop.f32.mrb[30].mxu0 }
 0x19e   : > { %v1588_v61 = vadd.f32 %v1587_v47, %v1557_v54  ;;  %v1519_v62 = vadd.f32 %v1518_v53, %v1488_v55  ;;  %v1558_v63 = vmul.f32 %v1488_v55, %v1488_v55  ;;  %1628 = vst [vmem:[%s2985_s28 + $0x68] sm:$0xff] %v1488_v55  ;;  %v2161_v0 = vadd.f32 %v2160_v59, %v2159_v56  ;;  %v2162_v1 = vpop.f32.mrb[30].mxu1  ;;  %v2051_v2 = vpop.f32.mrb[31].mxu0 }
 0x19f   : > { %v2052_v3 = vadd.f32 %v2051_v2, %v2050_v60  ;;  %v2163_v4 = vpop.f32.mrb[31].mxu1 }
 0x1a0   : > { %v1589_v5 = vadd.f32 %v1588_v61, %v1558_v63  ;;  %v1299_v6 = vadd.f32 %v2161_v0, %v2049_v58  ;;  %v2164_v7 = vadd.f32 %v2163_v4, %v2162_v1 }
 0x1a2   : > { %v1489_v8 = vadd.f32 %v2982_v41, %v1299_v6  ;;  %v1302_v9 = vadd.f32 %v2164_v7, %v2052_v3 }
 0x1a3   : > { %v2053_v10 = vpop.f32.mrb[32].mxu0 }
 0x1a4   : > { %v1520_v11 = vadd.f32 %v1519_v62, %v1489_v8  ;;  %v1559_v12 = vmul.f32 %v1489_v8, %v1489_v8  ;;  %1629 = vst [vmem:[%s2985_s28 + $0x70] sm:$0xff] %v1489_v8  ;;  %v1490_v13 = vadd.f32 %v2982_v41, %v1302_v9  ;;  %v2165_v14 = vpop.f32.mrb[32].mxu1  ;;  %v2054_v15 = vpop.f32.mrb[33].mxu0 }
 0x1a5   : > { %v2055_v16 = vadd.f32 %v2054_v15, %v2053_v10  ;;  %v2166_v17 = vpop.f32.mrb[33].mxu1  ;;  %v2056_v18 = vpop.f32.mrb[34].mxu0 }
 0x1a6   : > { %v1590_v19 = vadd.f32 %v1589_v5, %v1559_v12  ;;  %v1521_v20 = vadd.f32 %v1520_v11, %v1490_v13  ;;  %v1560_v21 = vmul.f32 %v1490_v13, %v1490_v13  ;;  %1630 = vst [vmem:[%s2985_s28 + $0x78] sm:$0xff] %v1490_v13  ;;  %v2167_v22 = vadd.f32 %v2166_v17, %v2165_v14  ;;  %v2168_v23 = vpop.f32.mrb[34].mxu1  ;;  %v2057_v24 = vpop.f32.mrb[35].mxu0 }
 0x1a7   : > { %v2058_v25 = vadd.f32 %v2057_v24, %v2056_v18  ;;  %v2169_v26 = vpop.f32.mrb[35].mxu1 }
 0x1a8   : > { %v1591_v27 = vadd.f32 %v1590_v19, %v1560_v21  ;;  %v1307_v28 = vadd.f32 %v2167_v22, %v2055_v16  ;;  %v2170_v29 = vadd.f32 %v2169_v26, %v2168_v23 }
 0x1aa   : > { %v1491_v30 = vadd.f32 %v2982_v41, %v1307_v28  ;;  %v1310_v31 = vadd.f32 %v2170_v29, %v2058_v25 }
 0x1ab   : > { %v2059_v32 = vpop.f32.mrb[36].mxu0 }
 0x1ac   : > { %v1522_v33 = vadd.f32 %v1521_v20, %v1491_v30  ;;  %v1561_v34 = vmul.f32 %v1491_v30, %v1491_v30  ;;  %1631 = vst [vmem:[%s2985_s28 + $0x80] sm:$0xff] %v1491_v30  ;;  %v1492_v35 = vadd.f32 %v2982_v41, %v1310_v31  ;;  %v2171_v36 = vpop.f32.mrb[36].mxu1  ;;  %v2060_v37 = vpop.f32.mrb[37].mxu0 }
 0x1ad   : > { %v2061_v38 = vadd.f32 %v2060_v37, %v2059_v32  ;;  %v2172_v39 = vpop.f32.mrb[37].mxu1  ;;  %v2062_v40 = vpop.f32.mrb[38].mxu0 }
 0x1ae   : > { %v1592_v42 = vadd.f32 %v1591_v27, %v1561_v34  ;;  %v1523_v43 = vadd.f32 %v1522_v33, %v1492_v35  ;;  %v1562_v44 = vmul.f32 %v1492_v35, %v1492_v35  ;;  %1632 = vst [vmem:[%s2985_s28 + $0x88] sm:$0xff] %v1492_v35  ;;  %v2173_v45 = vadd.f32 %v2172_v39, %v2171_v36  ;;  %v2174_v46 = vpop.f32.mrb[38].mxu1  ;;  %v2063_v47 = vpop.f32.mrb[39].mxu0 }
 0x1af   : > { %v2064_v48 = vadd.f32 %v2063_v47, %v2062_v40  ;;  %v2175_v49 = vpop.f32.mrb[39].mxu1 }
 0x1b0   : > { %v1593_v50 = vadd.f32 %v1592_v42, %v1562_v44  ;;  %v1315_v51 = vadd.f32 %v2173_v45, %v2061_v38  ;;  %v2176_v52 = vadd.f32 %v2175_v49, %v2174_v46 }
 0x1b2   : > { %v1493_v53 = vadd.f32 %v2982_v41, %v1315_v51  ;;  %v1318_v54 = vadd.f32 %v2176_v52, %v2064_v48 }
 0x1b3   : > { %v2065_v55 = vpop.f32.mrb[40].mxu0 }
 0x1b4   : > { %v1524_v56 = vadd.f32 %v1523_v43, %v1493_v53  ;;  %v1563_v57 = vmul.f32 %v1493_v53, %v1493_v53  ;;  %1633 = vst [vmem:[%s2985_s28 + $0x90] sm:$0xff] %v1493_v53  ;;  %v1494_v58 = vadd.f32 %v2982_v41, %v1318_v54  ;;  %v2177_v59 = vpop.f32.mrb[40].mxu1  ;;  %v2066_v60 = vpop.f32.mrb[41].mxu0 }
 0x1b5   : > { %v2067_v61 = vadd.f32 %v2066_v60, %v2065_v55  ;;  %v2178_v62 = vpop.f32.mrb[41].mxu1  ;;  %v2068_v63 = vpop.f32.mrb[42].mxu0 }
 0x1b6   : > { %v1594_v0 = vadd.f32 %v1593_v50, %v1563_v57  ;;  %v1525_v1 = vadd.f32 %v1524_v56, %v1494_v58  ;;  %v1564_v2 = vmul.f32 %v1494_v58, %v1494_v58  ;;  %1634 = vst [vmem:[%s2985_s28 + $0x98] sm:$0xff] %v1494_v58  ;;  %v2179_v3 = vadd.f32 %v2178_v62, %v2177_v59  ;;  %v2180_v4 = vpop.f32.mrb[42].mxu1  ;;  %v2069_v5 = vpop.f32.mrb[43].mxu0 }
 0x1b7   : > { %v2070_v6 = vadd.f32 %v2069_v5, %v2068_v63  ;;  %v2181_v7 = vpop.f32.mrb[43].mxu1 }
 0x1b8   : > { %v1595_v8 = vadd.f32 %v1594_v0, %v1564_v2  ;;  %v1323_v9 = vadd.f32 %v2179_v3, %v2067_v61  ;;  %v2182_v10 = vadd.f32 %v2181_v7, %v2180_v4 }
 0x1ba   : > { %v1495_v11 = vadd.f32 %v2982_v41, %v1323_v9  ;;  %v1326_v12 = vadd.f32 %v2182_v10, %v2070_v6 }
 0x1bb   : > { %v2071_v13 = vpop.f32.mrb[44].mxu0 }
 0x1bc   : > { %v1526_v14 = vadd.f32 %v1525_v1, %v1495_v11  ;;  %v1565_v15 = vmul.f32 %v1495_v11, %v1495_v11  ;;  %1635 = vst [vmem:[%s2985_s28 + $0xa0] sm:$0xff] %v1495_v11  ;;  %v1496_v16 = vadd.f32 %v2982_v41, %v1326_v12  ;;  %v2183_v17 = vpop.f32.mrb[44].mxu1  ;;  %v2072_v18 = vpop.f32.mrb[45].mxu0 }
 0x1bd   : > { %v2073_v19 = vadd.f32 %v2072_v18, %v2071_v13  ;;  %v2184_v20 = vpop.f32.mrb[45].mxu1  ;;  %v2074_v21 = vpop.f32.mrb[46].mxu0 }
 0x1be   : > { %v1596_v22 = vadd.f32 %v1595_v8, %v1565_v15  ;;  %v1527_v23 = vadd.f32 %v1526_v14, %v1496_v16  ;;  %v1566_v24 = vmul.f32 %v1496_v16, %v1496_v16  ;;  %1636 = vst [vmem:[%s2985_s28 + $0xa8] sm:$0xff] %v1496_v16  ;;  %v2185_v25 = vadd.f32 %v2184_v20, %v2183_v17  ;;  %v2186_v26 = vpop.f32.mrb[46].mxu1  ;;  %v2075_v27 = vpop.f32.mrb[47].mxu0 }
 0x1bf   : > { %v2076_v28 = vadd.f32 %v2075_v27, %v2074_v21  ;;  %v2187_v29 = vpop.f32.mrb[47].mxu1 }
 0x1c0   : > { %v1597_v30 = vadd.f32 %v1596_v22, %v1566_v24  ;;  %v1331_v31 = vadd.f32 %v2185_v25, %v2073_v19  ;;  %v2188_v32 = vadd.f32 %v2187_v29, %v2186_v26 }
 0x1c2   : > { %v1497_v33 = vadd.f32 %v2982_v41, %v1331_v31  ;;  %v1334_v34 = vadd.f32 %v2188_v32, %v2076_v28 }
 0x1c3   : > { %v2077_v35 = vpop.f32.mrb[48].mxu0 }
 0x1c4   : > { %v1528_v36 = vadd.f32 %v1527_v23, %v1497_v33  ;;  %v1567_v37 = vmul.f32 %v1497_v33, %v1497_v33  ;;  %1637 = vst [vmem:[%s2985_s28 + $0xb0] sm:$0xff] %v1497_v33  ;;  %v1498_v38 = vadd.f32 %v2982_v41, %v1334_v34  ;;  %v2189_v39 = vpop.f32.mrb[48].mxu1  ;;  %v2078_v40 = vpop.f32.mrb[49].mxu0 }
 0x1c5   : > { %v2079_v42 = vadd.f32 %v2078_v40, %v2077_v35  ;;  %v2190_v43 = vpop.f32.mrb[49].mxu1  ;;  %v2080_v44 = vpop.f32.mrb[50].mxu0 }
 0x1c6   : > { %v1598_v45 = vadd.f32 %v1597_v30, %v1567_v37  ;;  %v1529_v46 = vadd.f32 %v1528_v36, %v1498_v38  ;;  %v1568_v47 = vmul.f32 %v1498_v38, %v1498_v38  ;;  %1638 = vst [vmem:[%s2985_s28 + $0xb8] sm:$0xff] %v1498_v38  ;;  %v2191_v48 = vadd.f32 %v2190_v43, %v2189_v39  ;;  %v2192_v49 = vpop.f32.mrb[50].mxu1  ;;  %v2081_v50 = vpop.f32.mrb[51].mxu0 }
 0x1c7   : > { %v2082_v51 = vadd.f32 %v2081_v50, %v2080_v44  ;;  %v2193_v52 = vpop.f32.mrb[51].mxu1 }
 0x1c8   : > { %v1599_v53 = vadd.f32 %v1598_v45, %v1568_v47  ;;  %v1339_v54 = vadd.f32 %v2191_v48, %v2079_v42  ;;  %v2194_v55 = vadd.f32 %v2193_v52, %v2192_v49 }
 0x1ca   : > { %v1499_v56 = vadd.f32 %v2982_v41, %v1339_v54  ;;  %v1342_v57 = vadd.f32 %v2194_v55, %v2082_v51 }
 0x1cb   : > { %v2083_v58 = vpop.f32.mrb[52].mxu0 }
 0x1cc   : > { %v1530_v59 = vadd.f32 %v1529_v46, %v1499_v56  ;;  %v1569_v60 = vmul.f32 %v1499_v56, %v1499_v56  ;;  %1639 = vst [vmem:[%s2985_s28 + $0xc0] sm:$0xff] %v1499_v56  ;;  %v1500_v61 = vadd.f32 %v2982_v41, %v1342_v57  ;;  %v2195_v62 = vpop.f32.mrb[52].mxu1  ;;  %v2084_v63 = vpop.f32.mrb[53].mxu0 }
 0x1cd   : > { %v2085_v0 = vadd.f32 %v2084_v63, %v2083_v58  ;;  %v2196_v1 = vpop.f32.mrb[53].mxu1  ;;  %v2086_v2 = vpop.f32.mrb[54].mxu0 }
 0x1ce   : > { %v1600_v3 = vadd.f32 %v1599_v53, %v1569_v60  ;;  %v1531_v4 = vadd.f32 %v1530_v59, %v1500_v61  ;;  %v1570_v5 = vmul.f32 %v1500_v61, %v1500_v61  ;;  %1640 = vst [vmem:[%s2985_s28 + $0xc8] sm:$0xff] %v1500_v61  ;;  %v2197_v6 = vadd.f32 %v2196_v1, %v2195_v62  ;;  %v2198_v7 = vpop.f32.mrb[54].mxu1  ;;  %v2087_v8 = vpop.f32.mrb[55].mxu0 }
 0x1cf   : > { %v2088_v9 = vadd.f32 %v2087_v8, %v2086_v2  ;;  %v2199_v10 = vpop.f32.mrb[55].mxu1 }
 0x1d0   : > { %v1601_v11 = vadd.f32 %v1600_v3, %v1570_v5  ;;  %v1347_v12 = vadd.f32 %v2197_v6, %v2085_v0  ;;  %v2200_v13 = vadd.f32 %v2199_v10, %v2198_v7 }
 0x1d2   : > { %v1501_v14 = vadd.f32 %v2982_v41, %v1347_v12  ;;  %v1350_v15 = vadd.f32 %v2200_v13, %v2088_v9 }
 0x1d3   : > { %v2089_v16 = vpop.f32.mrb[56].mxu0 }
 0x1d4   : > { %v1532_v17 = vadd.f32 %v1531_v4, %v1501_v14  ;;  %v1571_v18 = vmul.f32 %v1501_v14, %v1501_v14  ;;  %1641 = vst [vmem:[%s2985_s28 + $0xd0] sm:$0xff] %v1501_v14  ;;  %v1502_v19 = vadd.f32 %v2982_v41, %v1350_v15  ;;  %v2201_v20 = vpop.f32.mrb[56].mxu1  ;;  %v2090_v21 = vpop.f32.mrb[57].mxu0 }
 0x1d5   : > { %v2091_v22 = vadd.f32 %v2090_v21, %v2089_v16  ;;  %v2202_v23 = vpop.f32.mrb[57].mxu1  ;;  %v2092_v24 = vpop.f32.mrb[58].mxu0 }
 0x1d6   : > { %v1602_v25 = vadd.f32 %v1601_v11, %v1571_v18  ;;  %v1533_v26 = vadd.f32 %v1532_v17, %v1502_v19  ;;  %v1572_v27 = vmul.f32 %v1502_v19, %v1502_v19  ;;  %1642 = vst [vmem:[%s2985_s28 + $0xd8] sm:$0xff] %v1502_v19  ;;  %v2203_v28 = vadd.f32 %v2202_v23, %v2201_v20  ;;  %v2204_v29 = vpop.f32.mrb[58].mxu1  ;;  %v2093_v30 = vpop.f32.mrb[59].mxu0 }
 0x1d7   : > { %v2094_v31 = vadd.f32 %v2093_v30, %v2092_v24  ;;  %v2205_v32 = vpop.f32.mrb[59].mxu1 }
 0x1d8   : > { %v1603_v33 = vadd.f32 %v1602_v25, %v1572_v27  ;;  %v1355_v34 = vadd.f32 %v2203_v28, %v2091_v22  ;;  %v2206_v35 = vadd.f32 %v2205_v32, %v2204_v29 }
 0x1da   : > { %v1503_v36 = vadd.f32 %v2982_v41, %v1355_v34  ;;  %v1358_v37 = vadd.f32 %v2206_v35, %v2094_v31 }
 0x1db   : > { %v2095_v38 = vpop.f32.mrb[60].mxu0 }
 0x1dc   : > { %v1534_v39 = vadd.f32 %v1533_v26, %v1503_v36  ;;  %v1573_v40 = vmul.f32 %v1503_v36, %v1503_v36  ;;  %1643 = vst [vmem:[%s2985_s28 + $0xe0] sm:$0xff] %v1503_v36  ;;  %v1504_v42 = vadd.f32 %v2982_v41, %v1358_v37  ;;  %v2207_v43 = vpop.f32.mrb[60].mxu1  ;;  %v2096_v44 = vpop.f32.mrb[61].mxu0 }
 0x1dd   : > { %v2097_v45 = vadd.f32 %v2096_v44, %v2095_v38  ;;  %v2208_v46 = vpop.f32.mrb[61].mxu1  ;;  %v2098_v47 = vpop.f32.mrb[62].mxu0 }
 0x1de   : > { %v1604_v48 = vadd.f32 %v1603_v33, %v1573_v40  ;;  %v1535_v49 = vadd.f32 %v1534_v39, %v1504_v42  ;;  %v1574_v50 = vmul.f32 %v1504_v42, %v1504_v42  ;;  %1644 = vst [vmem:[%s2985_s28 + $0xe8] sm:$0xff] %v1504_v42  ;;  %v2209_v51 = vadd.f32 %v2208_v46, %v2207_v43  ;;  %v2210_v52 = vpop.f32.mrb[62].mxu1  ;;  %v2099_v53 = vpop.f32.mrb[63].mxu0 }
 0x1df   : > { %v2100_v54 = vadd.f32 %v2099_v53, %v2098_v47  ;;  %v2211_v55 = vpop.f32.mrb[63].mxu1 }
 0x1e0   : > { %v1605_v56 = vadd.f32 %v1604_v48, %v1574_v50  ;;  %v1363_v57 = vadd.f32 %v2209_v51, %v2097_v45  ;;  %v2212_v58 = vadd.f32 %v2211_v55, %v2210_v52 }
 0x1e2   : > { %v1505_v59 = vadd.f32 %v2982_v41, %v1363_v57  ;;  %v1366_v60 = vadd.f32 %v2212_v58, %v2100_v54 }
 0x1e4   : > { %v1536_v61 = vadd.f32 %v1535_v49, %v1505_v59  ;;  %v1575_v62 = vmul.f32 %v1505_v59, %v1505_v59  ;;  %1645 = vst [vmem:[%s2985_s28 + $0xf0] sm:$0xff] %v1505_v59  ;;  %v1506_v63 = vadd.f32 %v2982_v41, %v1366_v60 }
 0x1e6   : > { %v1606_v0 = vadd.f32 %v1605_v56, %v1575_v62  ;;  %v1537_v1 = vadd.f32 %v1536_v61, %v1506_v63  ;;  %v1576_v2 = vmul.f32 %v1506_v63, %v1506_v63  ;;  %1646 = vst [vmem:[%s2985_s28 + $0xf8] sm:$0xff] %v1506_v63 }
 0x1e7   : > { %2539 = shalt.err (!%p2536_p1)
}
 0x1e8   : > { %s2540_s26 = scalar_lea.hbm %s3052_s16, 4096  ;;  %s2544_s7 = scalar_lea.hbm %s3179_s3, 8192 }
 0x1e9   : > { %p2541_p6 = scmp.ne.s32.totalorder %s3052_s16, %s2540_s26  ;;  %p2545_p4 = scmp.lt.u32.totalorder %s3052_s16, %s3179_s3 }
 0x1ea   : > { %p2546_p9 = scmp.lt.u32.totalorder %s2544_s7, %s2540_s26  ;;  %p2548_p11 = scmp.lt.u32.totalorder %s2540_s26, %s3052_s16 }
 0x1eb   : > { %p2542_p10 = pnand %p2541_p6, %p3196_p2 }
 0x1ec   : > { %p2547_p8 = por %p2546_p9, %p2545_p4 }
 0x1ed   : > { %p2543_p3 = pneg %p2542_p10 }
 0x1ee   : > { %p2549_p13 = por %p2548_p11, %p2547_p8 }
 0x1f0   : > { %p2550_p5 = pnand %p2549_p13, %p2543_p3 }
 0x1f2   : > { %2553 = shalt.err (!%p2550_p5)
}
 0x1f3   : > { %s2682_s15 = smov 128   ;;  %s2683_s8 = smov 8   ;;  %v1538_v41 = vrot.slane %v1537_v1, 4  ;;  %v1607_v3 = vadd.f32 %v1606_v0, %v1576_v2 }
 0x1f4   : > { %2223 = dma.vmem_to_hbm [thread:$0]  (%p3196_p2), %s3054_s29, 4096, %s3052_s16, %s1648_s11, %s2682_s15, %s2682_s15, %s2683_s8  }
 0x1f5   : > { %v1539_v4 = vadd.f32 %v1538_v41, %v1537_v1  ;;  %v1608_v5 = vrot.slane %v1607_v3, 4  ;;  %s1652_s13 = sand.u32 1, %s2747_s24   ;;  %s1982_s26 = sshll.u32 %s2664_s21, 4 }
 0x1f6   : > { %s327_s28 = scalar_lea.vmem [#allocation10], %s2903_s17  ;;  %s333_s7 = scalar_lea.vmem [#allocation12], %s2903_s17 }
 0x1f7   : > { %v1540_v6 = vrot.slane %v1539_v4, 2  ;;  %v1609_v7 = vadd.f32 %v1608_v5, %v1607_v3  ;;  %s1687_s30 = sshll.u32 %s327_s28, 4  ;;  %s1701_s10 = sshll.u32 %s333_s7, 4  ;;  %s3094_s30 = int_to_ptr.vmem [resolvable:$true] %s1687_s30  ;;  %s3101_s10 = int_to_ptr.vmem [resolvable:$true] %s1701_s10 }
 0x1f8   : > { %s3092_s11 = scalar_lea.hbm %s3180_s4, %s1982_s26  ;;  %s3099_s12 = scalar_lea.hbm %s3181_s5, %s1982_s26 }
 0x1f9   : > { %v1610_v8 = vrot.slane %v1609_v7, 2  ;;  %v1541_v9 = vadd.f32 %v1540_v6, %v1539_v4  ;;  %s3103_s15 = scalar_lea.sflag [#allocation11], %s1652_s13  ;;  %s2554_s8 = scalar_lea.vmem %s3094_s30, 16 }
 0x1fa   : > { %p2555_p7 = scmp.ne.s32.totalorder %s3094_s30, %s2554_s8  ;;  %s2684_s29 = smov [#allocation10]  }
 0x1fb   : > { %v1542_v10 = vrot.slane %v1541_v9, 1  ;;  %v1611_v11 = vadd.f32 %v1610_v8, %v1609_v7  ;;  %s2558_s16 = sshll.u32 %s2684_s29, 4  ;;  %s2559_s16 = int_to_ptr.vmem [resolvable:$false] %s2558_s16 }
 0x1fc   : > { %p2556_p12 = pnand %p2555_p7, %p3196_p2  ;;  %s2560_s25 = scalar_lea.vmem %s2559_s16, 32 }
 0x1fd   : > { %v1543_v12 = vadd.f32 %v1542_v10, %v1541_v9  ;;  %v1612_v13 = vrot.slane %v1611_v11, 1  ;;  %p2561_p1 = scmp.lt.s32.totalorder %s3094_s30, %s2559_s16  ;;  %p2562_p6 = scmp.lt.s32.totalorder %s2560_s25, %s2554_s8 }
 0x1fe   : > { %p2557_p0 = pneg %p2556_p12 }
 0x1ff   : > { %1544 = vst [vmem:[%s327_s28] sm:$0x1] %v1543_v12  ;;  %v1613_v14 = vadd.f32 %v1612_v13, %v1611_v11  ;;  %p2563_p10 = por %p2562_p6, %p2561_p1 }
 0x201   : > { %p2564_p3 = pnand %p2563_p10, %p2557_p0 }
 0x203   : > { %2567 = shalt.err (!%p2564_p3)
}
 0x204   : > { %s2568_s13 = scalar_lea.hbm %s3092_s11, 16  ;;  %s2572_s21 = scalar_lea.hbm %s3180_s4, 32 }
 0x205   : > { %p2569_p4 = scmp.ne.s32.totalorder %s3092_s11, %s2568_s13  ;;  %p2573_p11 = scmp.lt.u32.totalorder %s3092_s11, %s3180_s4 }
 0x206   : > { %p2574_p13 = scmp.lt.u32.totalorder %s2572_s21, %s2568_s13  ;;  %p2576_p7 = scmp.lt.u32.totalorder %s2568_s13, %s3092_s11 }
 0x207   : > { %p2570_p9 = pnand %p2569_p4, %p3196_p2 }
 0x208   : > { %p2575_p5 = por %p2574_p13, %p2573_p11 }
 0x209   : > { %p2571_p8 = pneg %p2570_p9 }
 0x20a   : > { %p2577_p12 = por %p2576_p7, %p2575_p5 }
 0x20c   : > { %p2578_p0 = pnand %p2577_p12, %p2571_p8 }
 0x20e   : > { %2581 = shalt.err (!%p2578_p0)
}
 0x20f   : > { %2224 = dma.vmem_to_hbm [thread:$0]  (%p3196_p2), %s3094_s30, 16, %s3092_s11, %s3103_s15   ;;  %1614 = vst [vmem:[%s333_s7] sm:$0x1] %v1613_v14 }
 0x210   : > { %s2582_s25 = scalar_lea.vmem %s3101_s10, 16  ;;  %s2685_s8 = smov [#allocation12]  }
 0x211   : > { %p2583_p1 = scmp.ne.s32.totalorder %s3101_s10, %s2582_s25  ;;  %s2586_s16 = sshll.u32 %s2685_s8, 4  ;;  %s2587_s16 = int_to_ptr.vmem [resolvable:$false] %s2586_s16 }
 0x212   : > { %s2588_s13 = scalar_lea.vmem %s2587_s16, 32  ;;  %p2589_p3 = scmp.lt.s32.totalorder %s3101_s10, %s2587_s16 }
 0x213   : > { %p2584_p6 = pnand %p2583_p1, %p3196_p2  ;;  %p2590_p4 = scmp.lt.s32.totalorder %s2588_s13, %s2582_s25 }
 0x215   : > { %p2585_p10 = pneg %p2584_p6  ;;  %p2591_p9 = por %p2590_p4, %p2589_p3 }
 0x217   : > { %p2592_p8 = pnand %p2591_p9, %p2585_p10 }
 0x219   : > { %2595 = shalt.err (!%p2592_p8)
}
 0x21a   : > { %s2596_s17 = scalar_lea.hbm %s3099_s12, 16  ;;  %s2600_s11 = scalar_lea.hbm %s3181_s5, 32 }
 0x21b   : > { %p2597_p11 = scmp.ne.s32.totalorder %s3099_s12, %s2596_s17  ;;  %p2601_p7 = scmp.lt.u32.totalorder %s3099_s12, %s3181_s5 }
 0x21c   : > { %p2602_p12 = scmp.lt.u32.totalorder %s2600_s11, %s2596_s17  ;;  %p2604_p1 = scmp.lt.u32.totalorder %s2596_s17, %s3099_s12 }
 0x21d   : > { %p2598_p13 = pnand %p2597_p11, %p3196_p2 }
 0x21e   : > { %p2603_p0 = por %p2602_p12, %p2601_p7 }
 0x21f   : > { %p2599_p5 = pneg %p2598_p13 }
 0x220   : > { %p2605_p6 = por %p2604_p1, %p2603_p0 }
 0x222   : > { %p2606_p10 = pnand %p2605_p6, %p2599_p5 }
 0x224   : > { %2609 = shalt.err (!%p2606_p10)
}
 0x225   : > { %2225 = dma.vmem_to_hbm [thread:$0]  (%p3196_p2), %s3101_s10, 16, %s3099_s12, %s3103_s15  }
 0x226 PF: > { %s1713_s21 = sand.u32 1, %s2652_s18   ;;  %p3197_p3 = scmp.ne.s32.totalorder %s3187_s27, 0 }
 0x227   : > { %p3198_p4 = scmp.ge.s32.totalorder %s2672_s23, 2  ;;  %s1714_s24 = scalar_lea.sflag [#allocation5], %s1713_s21 }
 0x229   : > { %p2241_p9 = pnand %p3198_p4, %p3197_p3 }
 0x22b   : > { %2643 = dma.done.wait (!%p2241_p9), %s1714_s24, 4096  }
 0x22c   : > { %2645 = vsyncadd (!%p2241_p9), %s1714_s24, 4294963200  ;;  %s3199_s29 = sadd.s32 4294967294, %s2672_s23  }
 0x22d   : > { %s1722_s25 = sand.u32 1, %s3199_s29  }
 0x22e   : > { %s1723_s8 = scalar_lea.sflag [#allocation11], %s1722_s25 }
 0x22f   : > { %2647 = dma.done.wait (!%p2241_p9), %s1723_s8, 32  }
 0x230   : > { %2649 = vsyncadd (!%p2241_p9), %s1723_s8, 4294967264  ;;  %s26_s23 = sadd.s32 1, %s2672_s23   ;;  %s3200_s18 = smov %s2656_s19 }
 0x231   : > { %p23_p2 = scmp.ge.s32.totalorder %s26_s23, 4   ;;  %s3201_s19 = smov %s2660_s20 }
 0x232   : > { %s3202_s20 = smov %s2857_s14  ;;  %s3203_s21 = smov %s2668_s22 }
 0x233   : > { %s3204_s22 = smov %s3206_s9  ;;  %25 = sbr.rel (!%p23_p2) target bundleno = 9 (0x9), region = 127 }
 0x23a   :  { %1735 = vsyncpa [#allocation4], 1 }
 0x23b   :  { %1737 = vsyncpa [#allocation4 + $0x1], 1 }
 0x23c   :  { %1738 = vsyncpa [#allocation7], 1 }
 0x23d   :  { %1739 = vsyncpa [#allocation5], 1 }
 0x23e   :  { %1741 = vsyncpa [#allocation5 + $0x1], 1 }
 0x23f   :  { %1742 = vsyncpa [#allocation11], 1 }
 0x240   :  { %1744 = vsyncpa [#allocation11 + $0x1], 1 }

// kernel: generator_forward.15
= control target key start
LH: loop header
LB: loop body
LE: loop exit
PB: predicated region body
PF: predicated region fallthrough
CT: control target
= control target key end

     0   :  { %11 = vsyncpa [#allocation4], 0  ;;  %s2545_s0 = inlined_call_operand.hbm [shape: bf16[2048,256], index: 0, kind: input, shape index: {}]   ;;  %s2546_s1 = inlined_call_operand.hbm [shape: bf16[256,128], index: 1, kind: input, shape index: {}]   ;;  %s2547_s2 = inlined_call_operand.hbm [shape: f32[1,128], index: 2, kind: input, shape index: {}]   ;;  %s2548_s3 = inlined_call_operand.hbm [shape: f32[2048,128], index: 3, kind: output, shape index: {0}]   ;;  %s2549_s4 = inlined_call_operand.hbm [shape: f32[8,1,128], index: 4, kind: output, shape index: {1}]   ;;  %s2550_s5 = inlined_call_operand.hbm [shape: f32[8,1,128], index: 5, kind: output, shape index: {2}]  }
   0x1   :  { %13 = vsyncpa [#allocation4 + $0x1], 0 }
   0x2   :  { %14 = vsyncpa [#allocation7], 0 }
   0x3   :  { %15 = vsyncpa [#allocation5], 0 }
   0x4   :  { %17 = vsyncpa [#allocation5 + $0x1], 0 }
   0x5   :  { %18 = vsyncpa [#allocation11], 0 }
   0x6   :  { %20 = vsyncpa [#allocation11 + $0x1], 0  ;;  %s2027_s18 = smov 0   ;;  %s2029_s19 = smov 0  }
   0x7   :  { %s2031_s20 = smov 0   ;;  %s2033_s21 = smov 0  }
   0x8   :  { %s2035_s22 = smov 0   ;;  %s2037_s23 = smov 0  }
   0x9 LB: > { %s2058_s24 = sadd.s32 4294967295, %s1983_s23   ;;  %s2554_s25 = sadd.s32 4294967294, %s1983_s23   ;;  %s1983_s23 = sphi %s2037_s23, %s26_s23   ;;  %s1979_s22 = sphi %s2035_s22, %s2572_s22   ;;  %s1975_s21 = sphi %s2033_s21, %s2571_s21   ;;  %s1971_s20 = sphi %s2031_s20, %s2570_s20   ;;  %s1967_s19 = sphi %s2029_s19, %s2569_s19   ;;  %s1963_s18 = sphi %s2027_s18, %s2568_s18  }
   0xa   : > { %p67_p0 = scmp.ne.s32.totalorder %s1967_s19, %s1963_s18  ;;  %p2551_p1 = scmp.eq.s32.totalorder %s2058_s24, 0 }
   0xb   : > { %p153_p3 = scmp.eq.s32.totalorder %s2554_s25, 7  ;;  %p1388_p5 = scmp.ge.s32.totalorder %s1983_s23, 1 }
   0xc   : > { %p2069_p4 = por %p2551_p1, %p67_p0  ;;  %p216_p7 = scmp.lt.s32.totalorder %s1983_s23, 9 }
   0xd   : > { %p2074_p6 = por %p153_p3, %p67_p0  ;;  %s1985_s29 = smov [#allocation6]  }
   0xe   : > { %s2555_s26 = scalar_select %p2069_p4, 1, 0 }
   0xf   : > { %s2556_s27 = scalar_select %p2074_p6, 1, 0 }
  0x10   : > { %p2079_p8 = pnand %p1388_p5, %p216_p7  ;;  %s232_s30 = sshll.u32 %s1985_s29, 4  ;;  %s233_s30 = int_to_ptr.vmem [resolvable:$true] %s232_s30 }
  0x11   : > { %s1986_s7 = smov [#allocation8]   ;;  %s1751_s11 = scalar_lea.hbm %s2546_s1, 2048 }
  0x12   : > { %s2557_s28 = scalar_select %p2079_p8, 1, 0 }
  0x13   : > { %p1604_p9 = pneg %p2079_p8  ;;  %s248_s8 = sshll.u32 %s1986_s7, 4  ;;  %s2091_s8 = int_to_ptr.vmem [resolvable:$true] %s248_s8 }
  0x14   : > { %p1752_p11 = scmp.ne.s32.totalorder %s2546_s1, %s1751_s11  ;;  %p1758_p3 = scmp.lt.u32.totalorder %s1751_s11, %s2546_s1 }
  0x15   : > { %p2087_p10 = pnand %p1604_p9, %p2551_p1 }
  0x17   : > { %p1753_p12 = pneg %p2087_p10 }
  0x19   : > { %p1754_p13 = pnand %p1753_p12, %p1752_p11 }
  0x1b   : > { %p1755_p0 = pneg %p1754_p13 }
  0x1d   : > { %p1760_p5 = pnand %p1758_p3, %p1755_p0 }
  0x1f   : > { %1763 = shalt.err (!%p1760_p5)
}
  0x20   : > { %s1764_s16 = scalar_lea.vmem %s233_s30, 2048  ;;  %p1772_p2 = scmp.lt.s32.totalorder %s233_s30, %s233_s30 }
  0x21   : > { %p1765_p7 = scmp.ne.s32.totalorder %s233_s30, %s1764_s16  ;;  %p1773_p6 = scmp.lt.s32.totalorder %s1764_s16, %s1764_s16 }
  0x23   : > { %p1767_p9 = pnand %p1765_p7, %p1753_p12  ;;  %p1774_p4 = por %p1773_p6, %p1772_p2 }
  0x25   : > { %p1768_p1 = pneg %p1767_p9 }
  0x27   : > { %p1775_p8 = pnand %p1774_p4, %p1768_p1 }
  0x29   : > { %1778 = shalt.err (!%p1775_p8)
}
  0x2a   : > { %s1987_s17 = smov 64   ;;  %s1988_s29 = smov 4  }
  0x2b   : > { %1607 = dma.hbm_to_vmem [thread:$0]  (!%p2087_p10), %s2546_s1, 2048, %s233_s30, [#allocation7], %s1987_s17, %s1987_s17, %s1988_s29  }
  0x2c   : > { %s1779_s12 = scalar_lea.hbm %s2547_s2, 16 }
  0x2d   : > { %p1780_p11 = scmp.ne.s32.totalorder %s2547_s2, %s1779_s12  ;;  %p1786_p4 = scmp.lt.u32.totalorder %s1779_s12, %s2547_s2 }
  0x2f   : > { %p1782_p1 = pnand %p1780_p11, %p1753_p12 }
  0x31   : > { %p1783_p2 = pneg %p1782_p1 }
  0x33   : > { %p1788_p6 = pnand %p1786_p4, %p1783_p2 }
  0x35   : > { %1791 = shalt.err (!%p1788_p6)
}
  0x36   : > { %s1792_s30 = scalar_lea.vmem %s2091_s8, 16  ;;  %s1799_s17 = scalar_lea.vmem %s2091_s8, 32 }
  0x37   : > { %p1793_p8 = scmp.ne.s32.totalorder %s2091_s8, %s1792_s30  ;;  %p1800_p3 = scmp.lt.s32.totalorder %s2091_s8, %s2091_s8 }
  0x38   : > { %p1801_p5 = scmp.lt.s32.totalorder %s1799_s17, %s1792_s30 }
  0x39   : > { %p1795_p13 = pnand %p1793_p8, %p1753_p12 }
  0x3a   : > { %p1802_p7 = por %p1801_p5, %p1800_p3 }
  0x3b   : > { %p1796_p0 = pneg %p1795_p13 }
  0x3d   : > { %p1803_p9 = pnand %p1802_p7, %p1796_p0 }
  0x3f   : > { %1806 = shalt.err (!%p1803_p9)
}
  0x40   : > { %1610 = dma.hbm_to_vmem [thread:$0]  (!%p2087_p10), %s2547_s2, 16, %s2091_s8, [#allocation7]  }
  0x41   : > { %s45_s9 = sadd.s32 1, %s1979_s22  ;;  %s54_s10 = sadd.s32 1, %s1971_s20 }
  0x42   : > { %p47_p12 = scmp.ge.s32.totalorder %s45_s9, 8  ;;  %p61_p11 = scmp.ne.s32.totalorder %s1971_s20, %s1967_s19 }
  0x43   : > { %p62_p1 = scmp.eq.s32.totalorder %s1983_s23, 0  ;;  %p1627_p2 = scmp.lt.s32.totalorder %s1983_s23, 8 }
  0x44   : > { %s2574_s9 = smov (%p47_p12, %s45_s9), 0  ;;  %p2559_p6 = scmp.eq.s32.totalorder %s2058_s24, 7 }
  0x45   : > { %p63_p4 = por %p62_p1, %p61_p11  ;;  %s49_s11 = ssub.s32 %s1979_s22, %s2574_s9 }
  0x46   : > { %p2151_p8 = por %p2559_p6, %p61_p11  ;;  %s259_s12 = sand.u32 1, %s1971_s20  }
  0x47   : > { %p52_p13 = scmp.eq.s32.totalorder %s49_s11, 0  ;;  %s1392_s8 = sshll.u32 %s259_s12, 8 }
  0x48   : > { %s1458_s13 = sshll.u32 %s1979_s22, 12  ;;  %s263_s17 = scalar_lea.vmem [#allocation3], %s1392_s8 }
  0x49   : > { %s2160_s14 = scalar_select %p52_p13, %s1971_s20, %s54_s10  }
  0x4a   : > { %s2165_s30 = scalar_lea.hbm %s2545_s0, %s1458_s13  ;;  %s273_s29 = sshll.u32 %s263_s17, 4  ;;  %s2173_s29 = int_to_ptr.vmem [resolvable:$true] %s273_s29 }
  0x4b   : > { %p2169_p10 = pnand %p1627_p2, %p63_p4  ;;  %s2175_s10 = scalar_lea.sflag [#allocation4], %s259_s12 }
  0x4c   : > { %s1807_s11 = scalar_lea.hbm %s2165_s30, 4096  ;;  %s1812_s15 = scalar_lea.hbm %s2545_s0, 32768 }
  0x4d   : > { %p1808_p0 = scmp.ne.s32.totalorder %s2165_s30, %s1807_s11  ;;  %p1809_p3 = pneg %p2169_p10 }
  0x4e   : > { %p1813_p9 = scmp.lt.u32.totalorder %s2165_s30, %s2545_s0  ;;  %p1814_p12 = scmp.lt.u32.totalorder %s1812_s15, %s1807_s11 }
  0x4f   : > { %p1810_p5 = pnand %p1809_p3, %p1808_p0  ;;  %p1816_p1 = scmp.lt.u32.totalorder %s1807_s11, %s2165_s30 }
  0x50   : > { %p1815_p11 = por %p1814_p12, %p1813_p9 }
  0x51   : > { %p1811_p7 = pneg %p1810_p5 }
  0x52   : > { %p1817_p2 = por %p1816_p1, %p1815_p11 }
  0x54   : > { %p1818_p4 = pnand %p1817_p2, %p1811_p7 }
  0x56   : > { %1821 = shalt.err (!%p1818_p4)
}
  0x57   : > { %s1822_s12 = scalar_lea.vmem %s2173_s29, 4096  ;;  %s1989_s8 = smov [#allocation3]  }
  0x58   : > { %p1823_p6 = scmp.ne.s32.totalorder %s2173_s29, %s1822_s12  ;;  %s1827_s13 = sshll.u32 %s1989_s8, 4  ;;  %s1828_s13 = int_to_ptr.vmem [resolvable:$false] %s1827_s13 }
  0x59   : > { %s1829_s16 = scalar_lea.vmem %s1828_s13, 8192  ;;  %p1830_p5 = scmp.lt.s32.totalorder %s2173_s29, %s1828_s13 }
  0x5a   : > { %p1825_p13 = pnand %p1823_p6, %p1809_p3  ;;  %p1831_p9 = scmp.lt.s32.totalorder %s1829_s16, %s1822_s12 }
  0x5c   : > { %p1826_p0 = pneg %p1825_p13  ;;  %p1832_p12 = por %p1831_p9, %p1830_p5 }
  0x5e   : > { %p1833_p11 = pnand %p1832_p12, %p1826_p0 }
  0x60   : > { %1836 = shalt.err (!%p1833_p11)
}
  0x61   : > { %s1990_s11 = smov 128   ;;  %s1991_s15 = smov 8  }
  0x62   : > { %1614 = dma.hbm_to_vmem [thread:$0]  (!%p2169_p10), %s2165_s30, 4096, %s2173_s29, %s2175_s10, %s1990_s11, %s1990_s11, %s1991_s15  }
  0x63   : > { %p2562_p3 = scmp.ne.s32.totalorder %s2557_s28, 0 }
  0x64   : > { %s2206_s17 = sand.u32 (!%p2562_p3), 1, %s1967_s19   ;;  %p2563_p7 = scmp.ne.s32.totalorder (!%p2562_p3), %s2555_s26, 0 }
  0x65   : > { %285 = sbr.rel (%p2562_p3) target bundleno = 513 (0x201), region = 32  ;;  %s1397_s12 = sshll.u32 (!%p2562_p3), %s2206_s17, 8 }
  0x66   : > { %s288_s8 = scalar_lea.sflag (!%p2562_p3), [#allocation4], %s2206_s17  ;;  %s2212_s13 = scalar_lea.vmem (!%p2562_p3), [#allocation3], %s1397_s12 }
  0x6c   : > { %1946 = dma.done.wait (%p2563_p7), %s288_s8, 4096  }
  0x6d   : > { %1948 = vsyncadd (%p2563_p7), %s288_s8, 4294963200  ;;  %p2564_p10 = scmp.eq.s32.totalorder %s2058_s24, 0 }
  0x6f   : > { %1950 = dma.done.wait (%p2564_p10), [#allocation7], 2064   ;;  %p2565_p1 = pmov %p2564_p10 }
  0x70   : > { %v1687_v0 = vld [vmem:[#allocation6 + $0x40] sm:$0xff]   ;;  %v1689_v2 = vld [vmem:[#allocation6 + $0x48] sm:$0xff]   ;;  %v1691_v4 = vld [vmem:[#allocation6 + $0x50] sm:$0xff]   ;;  %s2262_s26 = scalar_lea.vmem [#allocation9], %s1397_s12  ;;  %s1459_s28 = sshll.u32 %s1975_s21, 12 }
  0x71   : > { %1952 = vsyncadd (%p2565_p1), [#allocation7], 4294965232  ;;  %v1688_v1 = vld [vmem:[#allocation6] sm:$0xff]   ;;  %1460 = vmatprep.subr.bf16.mxu0 %v1687_v0  ;;  %1572 = vmatprep.subr.bf16.mxu1 %v1687_v0  ;;  %v1690_v3 = vld [vmem:[#allocation6 + $0x8] sm:$0xff]   ;;  %s1189_s30 = sshll.u32 %s2262_s26, 4  ;;  %s2369_s10 = scalar_lea.hbm %s2548_s3, %s1459_s28  ;;  %s2371_s30 = int_to_ptr.vmem [resolvable:$true] %s1189_s30 }
  0x72   : > { %1461 = vmatpush3.bf16.msra.mxu0 %v1688_v1  ;;  %1580 = vmatpush3.bf16.msra.mxu1 %v1688_v1  ;;  %v1692_v5 = vld [vmem:[#allocation6 + $0x10] sm:$0xff]   ;;  %v1693_v6 = vld [vmem:[#allocation6 + $0x58] sm:$0xff]   ;;  %v1695_v8 = vld [vmem:[#allocation6 + $0x60] sm:$0xff]   ;;  %s1167_s16 = scalar_lea.sflag [#allocation5], %s2206_s17  ;;  %s1837_s11 = scalar_lea.vmem %s2371_s30, 4096 }
  0x73   : > { %1462 = vmatprep.subr.bf16.mxu0 %v1689_v2  ;;  %1573 = vmatprep.subr.bf16.mxu1 %v1689_v2  ;;  %v1694_v7 = vld [vmem:[#allocation6 + $0x18] sm:$0xff]   ;;  %v1696_v9 = vld [vmem:[#allocation6 + $0x20] sm:$0xff]   ;;  %v1697_v10 = vld [vmem:[#allocation6 + $0x68] sm:$0xff]   ;;  %p1838_p2 = scmp.ne.s32.totalorder %s2371_s30, %s1837_s11  ;;  %s1992_s15 = smov [#allocation9]  }
  0x74   : > { %v1705_v11 = vld [vmem:[%s2212_s13 + $0x4] ss:$8 sps:$4 sm:$0xff]   ;;  %v1699_v13 = vld [vmem:[#allocation6 + $0x70] sm:$0xff]   ;;  %v1701_v16 = vld [vmem:[#allocation6 + $0x78] sm:$0xff]   ;;  %s1841_s12 = sshll.u32 %s1992_s15, 4  ;;  %s1842_s12 = int_to_ptr.vmem [resolvable:$false] %s1841_s12 }
  0x75   : > { %v1698_v12 = vld [vmem:[#allocation6 + $0x28] sm:$0xff]   ;;  %759 = vmatprep.mubr.bf16.mxu0 %v1705_v11  ;;  %v1700_v15 = vld [vmem:[#allocation6 + $0x30] sm:$0xff]   ;;  %v1702_v17 = vld [vmem:[#allocation6 + $0x38] sm:$0xff]   ;;  %p1839_p4 = pnand %p1838_p2, %p2151_p8  ;;  %s1843_s8 = scalar_lea.vmem %s1842_s12, 8192 }
  0x76   : > { %1463 = vmatpush3.bf16.msra.mxu0 %v1690_v3  ;;  %1581 = vmatpush3.bf16.msra.mxu1 %v1690_v3  ;;  %v1717_v14 = vld [vmem:[%s2212_s13 + $0x84] ss:$8 sps:$4 sm:$0xff]   ;;  %v1703_v18 = vld [vmem:[%s2212_s13] ss:$8 sps:$4 sm:$0xff]   ;;  %v1706_v19 = vld [vmem:[%s2212_s13 + $0x14] ss:$8 sps:$4 sm:$0xff]   ;;  %p1844_p13 = scmp.lt.s32.totalorder %s2371_s30, %s1842_s12  ;;  %p1845_p0 = scmp.lt.s32.totalorder %s1843_s8, %s1837_s11 }
  0x77   : > { %1464 = vmatprep.subr.bf16.mxu0 %v1691_v4  ;;  %1574 = vmatprep.subr.bf16.mxu1 %v1691_v4  ;;  %v1715_v20 = vld [vmem:[%s2212_s13 + $0x80] ss:$8 sps:$4 sm:$0xff]   ;;  %v1721_v21 = vld [vmem:[%s2212_s13 + $0x94] ss:$8 sps:$4 sm:$0xff]   ;;  %v1708_v22 = vld [vmem:[%s2212_s13 + $0x10] ss:$8 sps:$4 sm:$0xff]   ;;  %p1840_p6 = pneg %p1839_p4 }
  0x78   : > { %823 = vmatprep.mubr.bf16.mxu1 %v1717_v14  ;;  %v1709_v23 = vld [vmem:[%s2212_s13 + $0x24] ss:$8 sps:$4 sm:$0xff]   ;;  %v1723_v24 = vld [vmem:[%s2212_s13 + $0x90] ss:$8 sps:$4 sm:$0xff]   ;;  %v1711_v26 = vld [vmem:[%s2212_s13 + $0x20] ss:$8 sps:$4 sm:$0xff]   ;;  %p1846_p5 = por %p1845_p0, %p1844_p13 }
  0x79   : > { %v1727_v25 = vld [vmem:[%s2212_s13 + $0xa4] ss:$8 sps:$4 sm:$0xff]   ;;  %v1712_v27 = vld [vmem:[%s2212_s13 + $0x34] ss:$8 sps:$4 sm:$0xff]   ;;  %v1729_v28 = vld [vmem:[%s2212_s13 + $0xa0] ss:$8 sps:$4 sm:$0xff]  }
  0x7a   : > { %1465 = vmatpush3.bf16.msra.mxu0 %v1692_v5  ;;  %1582 = vmatpush3.bf16.msra.mxu1 %v1692_v5  ;;  %v1733_v29 = vld [vmem:[%s2212_s13 + $0xb4] ss:$8 sps:$4 sm:$0xff]   ;;  %v1714_v30 = vld [vmem:[%s2212_s13 + $0x30] ss:$8 sps:$4 sm:$0xff]   ;;  %v1718_v31 = vld [vmem:[%s2212_s13 + $0x44] ss:$8 sps:$4 sm:$0xff]   ;;  %p1847_p9 = pnand %p1846_p5, %p1840_p6 }
  0x7b   : > { %1466 = vmatprep.subr.bf16.mxu0 %v1693_v6  ;;  %1575 = vmatprep.subr.bf16.mxu1 %v1693_v6  ;;  %v1735_v32 = vld [vmem:[%s2212_s13 + $0xb0] ss:$8 sps:$4 sm:$0xff]   ;;  %v1739_v33 = vld [vmem:[%s2212_s13 + $0xc4] ss:$8 sps:$4 sm:$0xff]   ;;  %v1720_v34 = vld [vmem:[%s2212_s13 + $0x40] ss:$8 sps:$4 sm:$0xff]  }
  0x7c   : > { %v1724_v35 = vld [vmem:[%s2212_s13 + $0x54] ss:$8 sps:$4 sm:$0xff]   ;;  %v1741_v36 = vld [vmem:[%s2212_s13 + $0xc0] ss:$8 sps:$4 sm:$0xff]   ;;  %v1726_v38 = vld [vmem:[%s2212_s13 + $0x50] ss:$8 sps:$4 sm:$0xff]  }
  0x7d   : > { %v1742_v37 = vld [vmem:[%s2212_s13 + $0xd4] ss:$8 sps:$4 sm:$0xff]   ;;  %v1730_v39 = vld [vmem:[%s2212_s13 + $0x64] ss:$8 sps:$4 sm:$0xff]   ;;  %v1744_v40 = vld [vmem:[%s2212_s13 + $0xd0] ss:$8 sps:$4 sm:$0xff]  }
  0x7e   : > { %1467 = vmatpush3.bf16.msra.mxu0 %v1694_v7  ;;  %1583 = vmatpush3.bf16.msra.mxu1 %v1694_v7  ;;  %v1745_v41 = vld [vmem:[%s2212_s13 + $0xe4] ss:$8 sps:$4 sm:$0xff]   ;;  %v1732_v42 = vld [vmem:[%s2212_s13 + $0x60] ss:$8 sps:$4 sm:$0xff]   ;;  %v1736_v43 = vld [vmem:[%s2212_s13 + $0x74] ss:$8 sps:$4 sm:$0xff]  }
  0x7f   : > { %1468 = vmatprep.subr.bf16.mxu0 %v1695_v8  ;;  %1576 = vmatprep.subr.bf16.mxu1 %v1695_v8  ;;  %v1747_v44 = vld [vmem:[%s2212_s13 + $0xe0] ss:$8 sps:$4 sm:$0xff]   ;;  %v1748_v45 = vld [vmem:[%s2212_s13 + $0xf4] ss:$8 sps:$4 sm:$0xff]   ;;  %v1738_v46 = vld [vmem:[%s2212_s13 + $0x70] ss:$8 sps:$4 sm:$0xff]  }
  0x80   : > { %v1750_v47 = vld [vmem:[%s2212_s13 + $0xf0] ss:$8 sps:$4 sm:$0xff]   ;;  %v2254_v50 = vld [vmem:[#allocation8] ss:$0 sm:$0xff] }
  0x82   : > { %1469 = vmatpush3.bf16.msra.mxu0 %v1696_v9  ;;  %1584 = vmatpush3.bf16.msra.mxu1 %v1696_v9 }
  0x83   : > { %1470 = vmatprep.subr.bf16.mxu0 %v1697_v10  ;;  %1577 = vmatprep.subr.bf16.mxu1 %v1697_v10 }
  0x86   : > { %1471 = vmatpush3.bf16.msra.mxu0 %v1698_v12  ;;  %1585 = vmatpush3.bf16.msra.mxu1 %v1698_v12 }
  0x87   : > { %1472 = vmatprep.subr.bf16.mxu0 %v1699_v13  ;;  %1578 = vmatprep.subr.bf16.mxu1 %v1699_v13 }
  0x8a   : > { %1473 = vmatpush3.bf16.msra.mxu0 %v1700_v15  ;;  %1586 = vmatpush3.bf16.msra.mxu1 %v1700_v15 }
  0x8b   : > { %1474 = vmatprep.subr.bf16.mxu0 %v1701_v16  ;;  %1579 = vmatprep.subr.bf16.mxu1 %v1701_v16 }
  0x8e   : > { %1475 = vmatpush3.bf16.msra.mxu0 %v1702_v17  ;;  %1587 = vmatpush3.bf16.msra.mxu1 %v1702_v17 }
  0x91   : > { %760 = vmatmul.mubr.bf16.vlgmr.msra.gmra.mrb[0].mxu0 %v1703_v18  ;;  %824 = vmatmul.mubr.bf16.vlgmr.msra.gmra.mrb[0].mxu1 %v1715_v20 }
  0x92   : > { %767 = vmatprep.mubr.bf16.mxu0 %v1706_v19  ;;  %831 = vmatprep.mubr.bf16.mxu1 %v1721_v21 }
  0x99   : > { %768 = vmatmul.mubr.bf16.gmra.mrb[4].mxu0 %v1708_v22  ;;  %832 = vmatmul.mubr.bf16.gmra.mrb[4].mxu1 %v1723_v24 }
  0x9a   : > { %775 = vmatprep.mubr.bf16.mxu0 %v1709_v23  ;;  %839 = vmatprep.mubr.bf16.mxu1 %v1727_v25 }
  0xa1   : > { %776 = vmatmul.mubr.bf16.gmra.mrb[8].mxu0 %v1711_v26  ;;  %840 = vmatmul.mubr.bf16.gmra.mrb[8].mxu1 %v1729_v28 }
  0xa2   : > { %783 = vmatprep.mubr.bf16.mxu0 %v1712_v27  ;;  %847 = vmatprep.mubr.bf16.mxu1 %v1733_v29 }
  0xa9   : > { %784 = vmatmul.mubr.bf16.gmra.mrb[12].mxu0 %v1714_v30  ;;  %848 = vmatmul.mubr.bf16.gmra.mrb[12].mxu1 %v1735_v32 }
  0xaa   : > { %791 = vmatprep.mubr.bf16.mxu0 %v1718_v31  ;;  %855 = vmatprep.mubr.bf16.mxu1 %v1739_v33 }
  0xb1   : > { %792 = vmatmul.mubr.bf16.gmra.mrb[16].mxu0 %v1720_v34  ;;  %856 = vmatmul.mubr.bf16.gmra.mrb[16].mxu1 %v1741_v36 }
  0xb2   : > { %799 = vmatprep.mubr.bf16.mxu0 %v1724_v35  ;;  %863 = vmatprep.mubr.bf16.mxu1 %v1742_v37 }
  0xb9   : > { %800 = vmatmul.mubr.bf16.gmra.mrb[20].mxu0 %v1726_v38  ;;  %864 = vmatmul.mubr.bf16.gmra.mrb[20].mxu1 %v1744_v40 }
  0xba   : > { %807 = vmatprep.mubr.bf16.mxu0 %v1730_v39  ;;  %871 = vmatprep.mubr.bf16.mxu1 %v1745_v41 }
  0xc1   : > { %808 = vmatmul.mubr.bf16.gmra.mrb[24].mxu0 %v1732_v42  ;;  %872 = vmatmul.mubr.bf16.gmra.mrb[24].mxu1 %v1747_v44 }
  0xc2   : > { %815 = vmatprep.mubr.bf16.mxu0 %v1736_v43  ;;  %879 = vmatprep.mubr.bf16.mxu1 %v1748_v45 }
  0xc9   : > { %816 = vmatmul.mubr.bf16.gmra.mrb[28].mxu0 %v1738_v46  ;;  %880 = vmatmul.mubr.bf16.gmra.mrb[28].mxu1 %v1750_v47 }
 0x164   : > { %v1476_v48 = vpop.f32.mrb[0].mxu0  ;;  %v1524_v51 = vpop.f32.mrb[0].mxu1 }
 0x165   : > { %v1477_v49 = vpop.f32.mrb[1].mxu0  ;;  %v1525_v54 = vpop.f32.mrb[1].mxu1 }
 0x166   : > { %v1478_v52 = vadd.f32 %v1477_v49, %v1476_v48  ;;  %v1479_v53 = vpop.f32.mrb[2].mxu0  ;;  %v1526_v56 = vadd.f32 %v1525_v54, %v1524_v51  ;;  %v1527_v57 = vpop.f32.mrb[2].mxu1 }
 0x167   : > { %v1480_v55 = vpop.f32.mrb[3].mxu0  ;;  %v1528_v60 = vpop.f32.mrb[3].mxu1 }
 0x168   : > { %v994_v58 = vadd.f32 %v1478_v52, %v2254_v50  ;;  %v1481_v59 = vadd.f32 %v1480_v55, %v1479_v53  ;;  %v2258_v61 = vadd.f32 %v1526_v56, %v2254_v50  ;;  %v1529_v62 = vadd.f32 %v1528_v60, %v1527_v57 }
 0x16a   : > { %1134 = vst [vmem:[%s2262_s26] sm:$0xff] %v994_v58  ;;  %v995_v63 = vadd.f32 %v1481_v59, %v2254_v50  ;;  %1150 = vst [vmem:[%s2262_s26 + $0x80] sm:$0xff] %v2258_v61  ;;  %v2269_v0 = vadd.f32 %v1529_v62, %v2254_v50  ;;  %v1064_v1 = vmul.f32 %v994_v58, %v994_v58 }
 0x16c   : > { %v1026_v2 = vadd.f32 %v995_v63, %v994_v58  ;;  %v1065_v3 = vmul.f32 %v995_v63, %v995_v63  ;;  %1135 = vst [vmem:[%s2262_s26 + $0x8] sm:$0xff] %v995_v63  ;;  %v1482_v4 = vpop.f32.mrb[4].mxu0  ;;  %1151 = vst [vmem:[%s2262_s26 + $0x88] sm:$0xff] %v2269_v0  ;;  %v1530_v6 = vpop.f32.mrb[4].mxu1 }
 0x16d   : > { %v1483_v5 = vpop.f32.mrb[5].mxu0  ;;  %v1531_v10 = vpop.f32.mrb[5].mxu1 }
 0x16e   : > { %v1096_v7 = vadd.f32 %v1065_v3, %v1064_v1  ;;  %v1484_v8 = vadd.f32 %v1483_v5, %v1482_v4  ;;  %v1485_v9 = vpop.f32.mrb[6].mxu0  ;;  %v1532_v12 = vadd.f32 %v1531_v10, %v1530_v6  ;;  %v1533_v13 = vpop.f32.mrb[6].mxu1 }
 0x16f   : > { %v1486_v11 = vpop.f32.mrb[7].mxu0  ;;  %v1534_v16 = vpop.f32.mrb[7].mxu1 }
 0x170   : > { %v996_v14 = vadd.f32 %v1484_v8, %v2254_v50  ;;  %v1487_v15 = vadd.f32 %v1486_v11, %v1485_v9  ;;  %v2276_v17 = vadd.f32 %v1532_v12, %v2254_v50  ;;  %v1535_v18 = vadd.f32 %v1534_v16, %v1533_v13 }
 0x172   : > { %v1027_v19 = vadd.f32 %v1026_v2, %v996_v14  ;;  %v1066_v20 = vmul.f32 %v996_v14, %v996_v14  ;;  %1136 = vst [vmem:[%s2262_s26 + $0x10] sm:$0xff] %v996_v14  ;;  %v997_v21 = vadd.f32 %v1487_v15, %v2254_v50  ;;  %1152 = vst [vmem:[%s2262_s26 + $0x90] sm:$0xff] %v2276_v17 }
 0x173   : > { %v2283_v22 = vadd.f32 %v1535_v18, %v2254_v50 }
 0x174   : > { %v1097_v23 = vadd.f32 %v1096_v7, %v1066_v20  ;;  %v1028_v24 = vadd.f32 %v1027_v19, %v997_v21  ;;  %v1067_v25 = vmul.f32 %v997_v21, %v997_v21  ;;  %1137 = vst [vmem:[%s2262_s26 + $0x18] sm:$0xff] %v997_v21  ;;  %v1488_v26 = vpop.f32.mrb[8].mxu0  ;;  %v1536_v28 = vpop.f32.mrb[8].mxu1 }
 0x175   : > { %v1489_v27 = vpop.f32.mrb[9].mxu0  ;;  %1153 = vst [vmem:[%s2262_s26 + $0x98] sm:$0xff] %v2283_v22  ;;  %v1537_v32 = vpop.f32.mrb[9].mxu1 }
 0x176   : > { %v1098_v29 = vadd.f32 %v1097_v23, %v1067_v25  ;;  %v1490_v30 = vadd.f32 %v1489_v27, %v1488_v26  ;;  %v1491_v31 = vpop.f32.mrb[10].mxu0  ;;  %v1538_v34 = vadd.f32 %v1537_v32, %v1536_v28  ;;  %v1539_v35 = vpop.f32.mrb[10].mxu1 }
 0x177   : > { %v1492_v33 = vpop.f32.mrb[11].mxu0  ;;  %v1540_v38 = vpop.f32.mrb[11].mxu1 }
 0x178   : > { %v998_v36 = vadd.f32 %v1490_v30, %v2254_v50  ;;  %v1493_v37 = vadd.f32 %v1492_v33, %v1491_v31  ;;  %v2290_v39 = vadd.f32 %v1538_v34, %v2254_v50  ;;  %v1541_v40 = vadd.f32 %v1540_v38, %v1539_v35 }
 0x17a   : > { %v1029_v41 = vadd.f32 %v1028_v24, %v998_v36  ;;  %v1068_v42 = vmul.f32 %v998_v36, %v998_v36  ;;  %1138 = vst [vmem:[%s2262_s26 + $0x20] sm:$0xff] %v998_v36  ;;  %v999_v43 = vadd.f32 %v1493_v37, %v2254_v50  ;;  %1154 = vst [vmem:[%s2262_s26 + $0xa0] sm:$0xff] %v2290_v39 }
 0x17b   : > { %v2297_v44 = vadd.f32 %v1541_v40, %v2254_v50 }
 0x17c   : > { %v1099_v45 = vadd.f32 %v1098_v29, %v1068_v42  ;;  %v1030_v46 = vadd.f32 %v1029_v41, %v999_v43  ;;  %v1069_v47 = vmul.f32 %v999_v43, %v999_v43  ;;  %1139 = vst [vmem:[%s2262_s26 + $0x28] sm:$0xff] %v999_v43  ;;  %v1494_v48 = vpop.f32.mrb[12].mxu0  ;;  %v1542_v51 = vpop.f32.mrb[12].mxu1 }
 0x17d   : > { %v1495_v49 = vpop.f32.mrb[13].mxu0  ;;  %1155 = vst [vmem:[%s2262_s26 + $0xa8] sm:$0xff] %v2297_v44  ;;  %v1543_v55 = vpop.f32.mrb[13].mxu1 }
 0x17e   : > { %v1100_v52 = vadd.f32 %v1099_v45, %v1069_v47  ;;  %v1496_v53 = vadd.f32 %v1495_v49, %v1494_v48  ;;  %v1497_v54 = vpop.f32.mrb[14].mxu0  ;;  %v1544_v57 = vadd.f32 %v1543_v55, %v1542_v51  ;;  %v1545_v58 = vpop.f32.mrb[14].mxu1 }
 0x17f   : > { %v1498_v56 = vpop.f32.mrb[15].mxu0  ;;  %v1546_v62 = vpop.f32.mrb[15].mxu1 }
 0x180   : > { %v1000_v59 = vadd.f32 %v1496_v53, %v2254_v50  ;;  %v1499_v60 = vadd.f32 %v1498_v56, %v1497_v54  ;;  %v2304_v63 = vadd.f32 %v1544_v57, %v2254_v50  ;;  %v1547_v1 = vadd.f32 %v1546_v62, %v1545_v58 }
 0x182   : > { %v1031_v2 = vadd.f32 %v1030_v46, %v1000_v59  ;;  %v1070_v3 = vmul.f32 %v1000_v59, %v1000_v59  ;;  %1140 = vst [vmem:[%s2262_s26 + $0x30] sm:$0xff] %v1000_v59  ;;  %v1001_v4 = vadd.f32 %v1499_v60, %v2254_v50  ;;  %1156 = vst [vmem:[%s2262_s26 + $0xb0] sm:$0xff] %v2304_v63 }
 0x183   : > { %v2311_v5 = vadd.f32 %v1547_v1, %v2254_v50 }
 0x184   : > { %v1101_v6 = vadd.f32 %v1100_v52, %v1070_v3  ;;  %v1032_v7 = vadd.f32 %v1031_v2, %v1001_v4  ;;  %v1071_v8 = vmul.f32 %v1001_v4, %v1001_v4  ;;  %1141 = vst [vmem:[%s2262_s26 + $0x38] sm:$0xff] %v1001_v4  ;;  %v1500_v9 = vpop.f32.mrb[16].mxu0  ;;  %v1548_v11 = vpop.f32.mrb[16].mxu1 }
 0x185   : > { %v1501_v10 = vpop.f32.mrb[17].mxu0  ;;  %1157 = vst [vmem:[%s2262_s26 + $0xb8] sm:$0xff] %v2311_v5  ;;  %v1549_v15 = vpop.f32.mrb[17].mxu1 }
 0x186   : > { %v1102_v12 = vadd.f32 %v1101_v6, %v1071_v8  ;;  %v1502_v13 = vadd.f32 %v1501_v10, %v1500_v9  ;;  %v1503_v14 = vpop.f32.mrb[18].mxu0  ;;  %v1550_v18 = vadd.f32 %v1549_v15, %v1548_v11  ;;  %v1551_v19 = vpop.f32.mrb[18].mxu1 }
 0x187   : > { %v1504_v16 = vpop.f32.mrb[19].mxu0  ;;  %v1552_v23 = vpop.f32.mrb[19].mxu1 }
 0x188   : > { %v1002_v20 = vadd.f32 %v1502_v13, %v2254_v50  ;;  %v1505_v21 = vadd.f32 %v1504_v16, %v1503_v14  ;;  %v2318_v24 = vadd.f32 %v1550_v18, %v2254_v50  ;;  %v1553_v25 = vadd.f32 %v1552_v23, %v1551_v19 }
 0x18a   : > { %v1033_v26 = vadd.f32 %v1032_v7, %v1002_v20  ;;  %v1072_v27 = vmul.f32 %v1002_v20, %v1002_v20  ;;  %1142 = vst [vmem:[%s2262_s26 + $0x40] sm:$0xff] %v1002_v20  ;;  %v1003_v28 = vadd.f32 %v1505_v21, %v2254_v50  ;;  %1158 = vst [vmem:[%s2262_s26 + $0xc0] sm:$0xff] %v2318_v24 }
 0x18b   : > { %v2325_v29 = vadd.f32 %v1553_v25, %v2254_v50 }
 0x18c   : > { %v1103_v30 = vadd.f32 %v1102_v12, %v1072_v27  ;;  %v1034_v31 = vadd.f32 %v1033_v26, %v1003_v28  ;;  %v1073_v32 = vmul.f32 %v1003_v28, %v1003_v28  ;;  %1143 = vst [vmem:[%s2262_s26 + $0x48] sm:$0xff] %v1003_v28  ;;  %v1506_v33 = vpop.f32.mrb[20].mxu0  ;;  %v1554_v35 = vpop.f32.mrb[20].mxu1 }
 0x18d   : > { %v1507_v34 = vpop.f32.mrb[21].mxu0  ;;  %1159 = vst [vmem:[%s2262_s26 + $0xc8] sm:$0xff] %v2325_v29  ;;  %v1555_v40 = vpop.f32.mrb[21].mxu1 }
 0x18e   : > { %v1104_v36 = vadd.f32 %v1103_v30, %v1073_v32  ;;  %v1508_v37 = vadd.f32 %v1507_v34, %v1506_v33  ;;  %v1509_v38 = vpop.f32.mrb[22].mxu0  ;;  %v1556_v42 = vadd.f32 %v1555_v40, %v1554_v35  ;;  %v1557_v43 = vpop.f32.mrb[22].mxu1 }
 0x18f   : > { %v1510_v41 = vpop.f32.mrb[23].mxu0  ;;  %v1558_v47 = vpop.f32.mrb[23].mxu1 }
 0x190   : > { %v1004_v45 = vadd.f32 %v1508_v37, %v2254_v50  ;;  %v1511_v46 = vadd.f32 %v1510_v41, %v1509_v38  ;;  %v2332_v48 = vadd.f32 %v1556_v42, %v2254_v50  ;;  %v1559_v49 = vadd.f32 %v1558_v47, %v1557_v43 }
 0x192   : > { %v1035_v51 = vadd.f32 %v1034_v31, %v1004_v45  ;;  %v1074_v52 = vmul.f32 %v1004_v45, %v1004_v45  ;;  %1144 = vst [vmem:[%s2262_s26 + $0x50] sm:$0xff] %v1004_v45  ;;  %v1005_v53 = vadd.f32 %v1511_v46, %v2254_v50  ;;  %1160 = vst [vmem:[%s2262_s26 + $0xd0] sm:$0xff] %v2332_v48 }
 0x193   : > { %v2339_v54 = vadd.f32 %v1559_v49, %v2254_v50  ;;  %v1080_v49 = vmul.f32 %v2258_v61, %v2258_v61 }
 0x194   : > { %v1105_v55 = vadd.f32 %v1104_v36, %v1074_v52  ;;  %v1036_v56 = vadd.f32 %v1035_v51, %v1005_v53  ;;  %v1075_v57 = vmul.f32 %v1005_v53, %v1005_v53  ;;  %1145 = vst [vmem:[%s2262_s26 + $0x58] sm:$0xff] %v1005_v53  ;;  %v1512_v58 = vpop.f32.mrb[24].mxu0  ;;  %v1560_v60 = vpop.f32.mrb[24].mxu1 }
 0x195   : > { %v1513_v59 = vpop.f32.mrb[25].mxu0  ;;  %1161 = vst [vmem:[%s2262_s26 + $0xd8] sm:$0xff] %v2339_v54  ;;  %v1561_v3 = vpop.f32.mrb[25].mxu1 }
 0x196   : > { %v1106_v62 = vadd.f32 %v1105_v55, %v1075_v57  ;;  %v1514_v1 = vadd.f32 %v1513_v59, %v1512_v58  ;;  %v1515_v2 = vpop.f32.mrb[26].mxu0  ;;  %v1562_v6 = vadd.f32 %v1561_v3, %v1560_v60  ;;  %v1563_v7 = vpop.f32.mrb[26].mxu1 }
 0x197   : > { %v1516_v4 = vpop.f32.mrb[27].mxu0  ;;  %v1564_v10 = vpop.f32.mrb[27].mxu1 }
 0x198   : > { %v1006_v8 = vadd.f32 %v1514_v1, %v2254_v50  ;;  %v1517_v9 = vadd.f32 %v1516_v4, %v1515_v2  ;;  %v2346_v11 = vadd.f32 %v1562_v6, %v2254_v50  ;;  %v1565_v12 = vadd.f32 %v1564_v10, %v1563_v7 }
 0x19a   : > { %v1037_v13 = vadd.f32 %v1036_v56, %v1006_v8  ;;  %v1076_v14 = vmul.f32 %v1006_v8, %v1006_v8  ;;  %1146 = vst [vmem:[%s2262_s26 + $0x60] sm:$0xff] %v1006_v8  ;;  %v1007_v15 = vadd.f32 %v1517_v9, %v2254_v50  ;;  %1162 = vst [vmem:[%s2262_s26 + $0xe0] sm:$0xff] %v2346_v11 }
 0x19b   : > { %v2353_v16 = vadd.f32 %v1565_v12, %v2254_v50 }
 0x19c   : > { %v1107_v18 = vadd.f32 %v1106_v62, %v1076_v14  ;;  %v1038_v19 = vadd.f32 %v1037_v13, %v1007_v15  ;;  %v1077_v20 = vmul.f32 %v1007_v15, %v1007_v15  ;;  %1147 = vst [vmem:[%s2262_s26 + $0x68] sm:$0xff] %v1007_v15  ;;  %v1518_v21 = vpop.f32.mrb[28].mxu0  ;;  %v1566_v25 = vpop.f32.mrb[28].mxu1 }
 0x19d   : > { %v1519_v23 = vpop.f32.mrb[29].mxu0  ;;  %1163 = vst [vmem:[%s2262_s26 + $0xe8] sm:$0xff] %v2353_v16  ;;  %v1567_v30 = vpop.f32.mrb[29].mxu1 }
 0x19e   : > { %v1108_v26 = vadd.f32 %v1107_v18, %v1077_v20  ;;  %v1520_v27 = vadd.f32 %v1519_v23, %v1518_v21  ;;  %v1521_v28 = vpop.f32.mrb[30].mxu0  ;;  %v1568_v32 = vadd.f32 %v1567_v30, %v1566_v25  ;;  %v1569_v33 = vpop.f32.mrb[30].mxu1 }
 0x19f   : > { %v1522_v31 = vpop.f32.mrb[31].mxu0  ;;  %v1570_v36 = vpop.f32.mrb[31].mxu1 }
 0x1a0   : > { %v1008_v34 = vadd.f32 %v1520_v27, %v2254_v50  ;;  %v1523_v35 = vadd.f32 %v1522_v31, %v1521_v28  ;;  %v2362_v37 = vadd.f32 %v1568_v32, %v2254_v50  ;;  %v1571_v38 = vadd.f32 %v1570_v36, %v1569_v33 }
 0x1a2   : > { %v1039_v40 = vadd.f32 %v1038_v19, %v1008_v34  ;;  %v1078_v41 = vmul.f32 %v1008_v34, %v1008_v34  ;;  %1148 = vst [vmem:[%s2262_s26 + $0x70] sm:$0xff] %v1008_v34  ;;  %v1009_v42 = vadd.f32 %v1523_v35, %v2254_v50  ;;  %1164 = vst [vmem:[%s2262_s26 + $0xf0] sm:$0xff] %v2362_v37 }
 0x1a3   : > { %v2376_v43 = vadd.f32 %v1571_v38, %v2254_v50 }
 0x1a4   : > { %v1109_v45 = vadd.f32 %v1108_v26, %v1078_v41  ;;  %v1040_v46 = vadd.f32 %v1039_v40, %v1009_v42  ;;  %v1079_v47 = vmul.f32 %v1009_v42, %v1009_v42  ;;  %1149 = vst [vmem:[%s2262_s26 + $0x78] sm:$0xff] %v1009_v42 }
 0x1a5   : > { %1165 = vst [vmem:[%s2262_s26 + $0xf8] sm:$0xff] %v2376_v43 }
 0x1a6   : > { %v1041_v51 = vadd.f32 %v1040_v46, %v2258_v61  ;;  %v1110_v52 = vadd.f32 %v1109_v45, %v1079_v47 }
 0x1a7   : > { %1850 = shalt.err (!%p1847_p9)
}
 0x1a8   : > { %s1851_s13 = scalar_lea.hbm %s2369_s10, 4096  ;;  %s1855_s29 = scalar_lea.hbm %s2548_s3, 32768 }
 0x1a9   : > { %p1852_p12 = scmp.ne.s32.totalorder %s2369_s10, %s1851_s13  ;;  %p1856_p7 = scmp.lt.u32.totalorder %s2369_s10, %s2548_s3 }
 0x1aa   : > { %p1857_p10 = scmp.lt.u32.totalorder %s1855_s29, %s1851_s13  ;;  %p1859_p2 = scmp.lt.u32.totalorder %s1851_s13, %s2369_s10 }
 0x1ab   : > { %p1853_p11 = pnand %p1852_p12, %p2151_p8 }
 0x1ac   : > { %p1858_p1 = por %p1857_p10, %p1856_p7 }
 0x1ad   : > { %p1854_p3 = pneg %p1853_p11 }
 0x1ae   : > { %p1860_p4 = por %p1859_p2, %p1858_p1 }
 0x1b0   : > { %p1861_p6 = pnand %p1860_p4, %p1854_p3 }
 0x1b2   : > { %1864 = shalt.err (!%p1861_p6)
}
 0x1b3   : > { %s1993_s11 = smov 128   ;;  %s1994_s12 = smov 8   ;;  %v1081_v50 = vmul.f32 %v2269_v0, %v2269_v0  ;;  %v1042_v61 = vadd.f32 %v1041_v51, %v2269_v0  ;;  %v1111_v53 = vadd.f32 %v1110_v52, %v1080_v49  ;;  %v1082_v55 = vmul.f32 %v2276_v17, %v2276_v17 }
 0x1b4   : > { %1598 = dma.vmem_to_hbm [thread:$0]  (%p2151_p8), %s2371_s30, 4096, %s2369_s10, %s1167_s16, %s1993_s11, %s1993_s11, %s1994_s12   ;;  %v1083_v58 = vmul.f32 %v2283_v22, %v2283_v22  ;;  %v1084_v62 = vmul.f32 %v2290_v39, %v2290_v39  ;;  %v1085_v0 = vmul.f32 %v2297_v44, %v2297_v44  ;;  %v1088_v10 = vmul.f32 %v2318_v24, %v2318_v24 }
 0x1b5   : > { %v1043_v56 = vadd.f32 %v1042_v61, %v2276_v17  ;;  %v1112_v57 = vadd.f32 %v1111_v53, %v1081_v50  ;;  %v1086_v17 = vmul.f32 %v2304_v63, %v2304_v63  ;;  %v1089_v14 = vmul.f32 %v2325_v29, %v2325_v29  ;;  %s1171_s30 = sand.u32 1, %s2058_s24   ;;  %s1453_s10 = sshll.u32 %s1975_s21, 4 }
 0x1b6   : > { %v1090_v18 = vmul.f32 %v2332_v48, %v2332_v48  ;;  %v1091_v20 = vmul.f32 %v2339_v54, %v2339_v54  ;;  %v1092_v23 = vmul.f32 %v2346_v11, %v2346_v11  ;;  %v1093_v26 = vmul.f32 %v2353_v16, %v2353_v16  ;;  %s327_s16 = scalar_lea.vmem [#allocation10], %s2206_s17  ;;  %s333_s13 = scalar_lea.vmem [#allocation12], %s2206_s17 }
 0x1b7   : > { %v1044_v59 = vadd.f32 %v1043_v56, %v2283_v22  ;;  %v1113_v60 = vadd.f32 %v1112_v57, %v1082_v55  ;;  %v1087_v22 = vmul.f32 %v2311_v5, %v2311_v5  ;;  %s1206_s8 = sshll.u32 %s327_s16, 4  ;;  %s1220_s26 = sshll.u32 %s333_s13, 4  ;;  %s2464_s8 = int_to_ptr.vmem [resolvable:$true] %s1206_s8  ;;  %s2471_s26 = int_to_ptr.vmem [resolvable:$true] %s1220_s26 }
 0x1b8   : > { %s2462_s7 = scalar_lea.hbm %s2549_s4, %s1453_s10  ;;  %s2469_s15 = scalar_lea.hbm %s2550_s5, %s1453_s10 }
 0x1b9   : > { %v1114_v1 = vadd.f32 %v1113_v60, %v1083_v58  ;;  %v1045_v2 = vadd.f32 %v1044_v59, %v2290_v39  ;;  %s2473_s11 = scalar_lea.sflag [#allocation11], %s1171_s30  ;;  %s1865_s12 = scalar_lea.vmem %s2464_s8, 16 }
 0x1ba   : > { %p1866_p13 = scmp.ne.s32.totalorder %s2464_s8, %s1865_s12  ;;  %s1995_s28 = smov [#allocation10]  }
 0x1bb   : > { %v1046_v3 = vadd.f32 %v1045_v2, %v2297_v44  ;;  %v1115_v4 = vadd.f32 %v1114_v1, %v1084_v62  ;;  %s1869_s29 = sshll.u32 %s1995_s28, 4  ;;  %s1870_s29 = int_to_ptr.vmem [resolvable:$false] %s1869_s29 }
 0x1bc   : > { %p1867_p0 = pnand %p1866_p13, %p2151_p8  ;;  %s1871_s25 = scalar_lea.vmem %s1870_s29, 32 }
 0x1bd   : > { %v1047_v6 = vadd.f32 %v1046_v3, %v2304_v63  ;;  %v1116_v7 = vadd.f32 %v1115_v4, %v1085_v0  ;;  %p1872_p9 = scmp.lt.s32.totalorder %s2464_s8, %s1870_s29  ;;  %p1873_p12 = scmp.lt.s32.totalorder %s1871_s25, %s1865_s12 }
 0x1be   : > { %p1868_p5 = pneg %p1867_p0 }
 0x1bf   : > { %v1048_v8 = vadd.f32 %v1047_v6, %v2311_v5  ;;  %v1117_v9 = vadd.f32 %v1116_v7, %v1086_v17  ;;  %p1874_p11 = por %p1873_p12, %p1872_p9 }
 0x1c1   : > { %v1049_v39 = vadd.f32 %v1048_v8, %v2318_v24  ;;  %v1118_v12 = vadd.f32 %v1117_v9, %v1087_v22  ;;  %p1875_p3 = pnand %p1874_p11, %p1868_p5 }
 0x1c3   : > { %v1119_v44 = vadd.f32 %v1118_v12, %v1088_v10  ;;  %v1050_v13 = vadd.f32 %v1049_v39, %v2325_v29 }
 0x1c5   : > { %v1120_v63 = vadd.f32 %v1119_v44, %v1089_v14  ;;  %v1051_v15 = vadd.f32 %v1050_v13, %v2332_v48  ;;  %v1094_v48 = vmul.f32 %v2362_v37, %v2362_v37 }
 0x1c7   : > { %v1121_v5 = vadd.f32 %v1120_v63, %v1090_v18  ;;  %v1052_v19 = vadd.f32 %v1051_v15, %v2339_v54 }
 0x1c9   : > { %v1122_v24 = vadd.f32 %v1121_v5, %v1091_v20  ;;  %v1053_v21 = vadd.f32 %v1052_v19, %v2346_v11  ;;  %v1095_v11 = vmul.f32 %v2376_v43, %v2376_v43 }
 0x1cb   : > { %v1123_v25 = vadd.f32 %v1122_v24, %v1092_v23  ;;  %v1054_v29 = vadd.f32 %v1053_v21, %v2353_v16 }
 0x1cd   : > { %v1124_v27 = vadd.f32 %v1123_v25, %v1093_v26  ;;  %v1055_v54 = vadd.f32 %v1054_v29, %v2362_v37 }
 0x1cf   : > { %v1125_v28 = vadd.f32 %v1124_v27, %v1094_v48  ;;  %v1056_v30 = vadd.f32 %v1055_v54, %v2376_v43 }
 0x1d1   : > { %v1057_v31 = vrot.slane %v1056_v30, 4  ;;  %v1126_v32 = vadd.f32 %v1125_v28, %v1095_v11 }
 0x1d3   : > { %v1058_v33 = vadd.f32 %v1057_v31, %v1056_v30  ;;  %v1127_v16 = vrot.slane %v1126_v32, 4 }
 0x1d5   : > { %v1059_v34 = vrot.slane %v1058_v33, 2  ;;  %v1128_v35 = vadd.f32 %v1127_v16, %v1126_v32 }
 0x1d7   : > { %v1060_v36 = vadd.f32 %v1059_v34, %v1058_v33  ;;  %v1129_v38 = vrot.slane %v1128_v35, 2 }
 0x1d9   : > { %v1130_v37 = vadd.f32 %v1129_v38, %v1128_v35  ;;  %v1061_v40 = vrot.slane %v1060_v36, 1 }
 0x1db   : > { %v1062_v41 = vadd.f32 %v1061_v40, %v1060_v36  ;;  %v1131_v42 = vrot.slane %v1130_v37, 1 }
 0x1dd   : > { %1063 = vst [vmem:[%s327_s16] sm:$0x1] %v1062_v41  ;;  %v1132_v43 = vadd.f32 %v1131_v42, %v1130_v37 }
 0x1de   : > { %1878 = shalt.err (!%p1875_p3)
}
 0x1df   : > { %s1879_s30 = scalar_lea.hbm %s2462_s7, 16  ;;  %s1883_s21 = scalar_lea.hbm %s2549_s4, 128 }
 0x1e0   : > { %p1880_p7 = scmp.ne.s32.totalorder %s2462_s7, %s1879_s30  ;;  %p1884_p2 = scmp.lt.u32.totalorder %s2462_s7, %s2549_s4 }
 0x1e1   : > { %p1885_p4 = scmp.lt.u32.totalorder %s1883_s21, %s1879_s30  ;;  %p1887_p13 = scmp.lt.u32.totalorder %s1879_s30, %s2462_s7 }
 0x1e2   : > { %p1881_p10 = pnand %p1880_p7, %p2151_p8 }
 0x1e3   : > { %p1886_p6 = por %p1885_p4, %p1884_p2 }
 0x1e4   : > { %p1882_p1 = pneg %p1881_p10 }
 0x1e5   : > { %p1888_p0 = por %p1887_p13, %p1886_p6 }
 0x1e7   : > { %p1889_p5 = pnand %p1888_p0, %p1882_p1 }
 0x1e9   : > { %1892 = shalt.err (!%p1889_p5)
}
 0x1ea   : > { %1599 = dma.vmem_to_hbm [thread:$0]  (%p2151_p8), %s2464_s8, 16, %s2462_s7, %s2473_s11   ;;  %1133 = vst [vmem:[%s333_s13] sm:$0x1] %v1132_v43 }
 0x1eb   : > { %s1893_s25 = scalar_lea.vmem %s2471_s26, 16  ;;  %s1996_s12 = smov [#allocation12]  }
 0x1ec   : > { %p1894_p9 = scmp.ne.s32.totalorder %s2471_s26, %s1893_s25  ;;  %s1897_s29 = sshll.u32 %s1996_s12, 4  ;;  %s1898_s29 = int_to_ptr.vmem [resolvable:$false] %s1897_s29 }
 0x1ed   : > { %s1899_s30 = scalar_lea.vmem %s1898_s29, 32  ;;  %p1900_p3 = scmp.lt.s32.totalorder %s2471_s26, %s1898_s29 }
 0x1ee   : > { %p1895_p12 = pnand %p1894_p9, %p2151_p8  ;;  %p1901_p7 = scmp.lt.s32.totalorder %s1899_s30, %s1893_s25 }
 0x1f0   : > { %p1896_p11 = pneg %p1895_p12  ;;  %p1902_p10 = por %p1901_p7, %p1900_p3 }
 0x1f2   : > { %p1903_p1 = pnand %p1902_p10, %p1896_p11 }
 0x1f4   : > { %1906 = shalt.err (!%p1903_p1)
}
 0x1f5   : > { %s1907_s17 = scalar_lea.hbm %s2469_s15, 16  ;;  %s1911_s7 = scalar_lea.hbm %s2550_s5, 128 }
 0x1f6   : > { %p1908_p2 = scmp.ne.s32.totalorder %s2469_s15, %s1907_s17  ;;  %p1912_p13 = scmp.lt.u32.totalorder %s2469_s15, %s2550_s5 }
 0x1f7   : > { %p1913_p0 = scmp.lt.u32.totalorder %s1911_s7, %s1907_s17  ;;  %p1915_p9 = scmp.lt.u32.totalorder %s1907_s17, %s2469_s15 }
 0x1f8   : > { %p1909_p4 = pnand %p1908_p2, %p2151_p8 }
 0x1f9   : > { %p1914_p5 = por %p1913_p0, %p1912_p13 }
 0x1fa   : > { %p1910_p6 = pneg %p1909_p4 }
 0x1fb   : > { %p1916_p12 = por %p1915_p9, %p1914_p5 }
 0x1fd   : > { %p1917_p11 = pnand %p1916_p12, %p1910_p6 }
 0x1ff   : > { %1920 = shalt.err (!%p1917_p11)
}
 0x200   : > { %1600 = dma.vmem_to_hbm [thread:$0]  (%p2151_p8), %s2471_s26, 16, %s2469_s15, %s2473_s11  }
 0x201 PF: > { %p1630_p3 = scmp.ge.s32.totalorder %s1983_s23, 2  ;;  %s1232_s21 = sand.u32 1, %s1963_s18  }
 0x202   : > { %p2566_p7 = scmp.ne.s32.totalorder %s2556_s27, 0  ;;  %s1233_s24 = scalar_lea.sflag [#allocation5], %s1232_s21 }
 0x204   : > { %p1616_p10 = pnand %p1630_p3, %p2566_p7 }
 0x206   : > { %1954 = dma.done.wait (!%p1616_p10), %s1233_s24, 4096  }
 0x207   : > { %1956 = vsyncadd (!%p1616_p10), %s1233_s24, 4294963200  ;;  %s2567_s28 = sadd.s32 4294967294, %s1983_s23  }
 0x208   : > { %s1241_s25 = sand.u32 1, %s2567_s28  }
 0x209   : > { %s1242_s12 = scalar_lea.sflag [#allocation11], %s1241_s25 }
 0x20a   : > { %1958 = dma.done.wait (!%p1616_p10), %s1242_s12, 32  }
 0x20b   : > { %1960 = vsyncadd (!%p1616_p10), %s1242_s12, 4294967264  ;;  %s26_s23 = sadd.s32 1, %s1983_s23   ;;  %s2568_s18 = smov %s1967_s19 }
 0x20c   : > { %p23_p8 = scmp.ge.s32.totalorder %s26_s23, 10   ;;  %s2569_s19 = smov %s1971_s20 }
 0x20d   : > { %s2570_s20 = smov %s2160_s14  ;;  %s2571_s21 = smov %s1979_s22 }
 0x20e   : > { %s2572_s22 = smov %s2574_s9  ;;  %25 = sbr.rel (!%p23_p8) target bundleno = 9 (0x9), region = 127 }
 0x215   :  { %1254 = vsyncpa [#allocation4], 1 }
 0x216   :  { %1256 = vsyncpa [#allocation4 + $0x1], 1 }
 0x217   :  { %1257 = vsyncpa [#allocation7], 1 }
 0x218   :  { %1258 = vsyncpa [#allocation5], 1 }
 0x219   :  { %1260 = vsyncpa [#allocation5 + $0x1], 1 }
 0x21a   :  { %1261 = vsyncpa [#allocation11], 1 }
 0x21b   :  { %1263 = vsyncpa [#allocation11 + $0x1], 1 }

// kernel: generator_forward.16
= control target key start
LH: loop header
LB: loop body
LE: loop exit
PB: predicated region body
PF: predicated region fallthrough
CT: control target
= control target key end

     0   :  { %8 = vsyncpa [#allocation3], 0  ;;  %s3104_s0 = inlined_call_operand.hbm [shape: f32[2048,128], index: 0, kind: input, shape index: {}]   ;;  %s3105_s1 = inlined_call_operand.hbm [shape: f32[1,128], index: 1, kind: input, shape index: {}]   ;;  %s3106_s2 = inlined_call_operand.hbm [shape: f32[1,128], index: 2, kind: input, shape index: {}]   ;;  %s3107_s3 = inlined_call_operand.hbm [shape: bf16[2048,128], index: 3, kind: output, shape index: {}]  }
   0x1   :  { %10 = vsyncpa [#allocation3 + $0x1], 0 }
   0x2   :  { %11 = vsyncpa [#allocation6], 0 }
   0x3   :  { %12 = vsyncpa [#allocation4], 0 }
   0x4   :  { %14 = vsyncpa [#allocation4 + $0x1], 0  ;;  %s2408_s12 = smov 0   ;;  %s2410_s13 = smov 0  }
   0x5   :  { %s2412_s14 = smov 0   ;;  %s2414_s15 = smov 0  }
   0x6 LB: > { %s2429_s16 = sadd.s32 4294967295, %s2378_s15   ;;  %s1488_s17 = sadd.s32 4294967294, %s2378_s15   ;;  %s2378_s15 = sphi %s2414_s15, %s3132_s15   ;;  %s2374_s14 = sphi %s2412_s14, %s3131_s14   ;;  %s2370_s13 = sphi %s2410_s13, %s3130_s13   ;;  %s2366_s12 = sphi %s2408_s12, %s3129_s12  }
   0x7   : > { %s2433_s18 = sadd.s32 1, %s2378_s15   ;;  %s27_s19 = sadd.s32 1, %s2374_s14 }
   0x8   : > { %s24_s20 = ssub.s32 %s2378_s15, %s2433_s18  ;;  %p34_p0 = scmp.ne.s32.totalorder %s2374_s14, %s2370_s13 }
   0x9   : > { %p25_p1 = scmp.eq.s32.totalorder %s24_s20, 0  ;;  %p35_p2 = scmp.eq.s32.totalorder %s2378_s15, 0 }
   0xa   : > { %p40_p3 = scmp.ne.s32.totalorder %s2370_s13, %s2366_s12  ;;  %p3108_p4 = scmp.eq.s32.totalorder %s2429_s16, 0 }
   0xb   : > { %s2445_s21 = scalar_select %p25_p1, %s2374_s14, %s27_s19  }
   0xc   : > { %p2447_p5 = por %p35_p2, %p34_p0  ;;  %p2453_p6 = por %p3108_p4, %p40_p3 }
   0xd   : > { %p106_p7 = scmp.eq.s32.totalorder %s2429_s16, 1  ;;  %p112_p8 = scmp.eq.s32.totalorder %s1488_s17, 1 }
   0xe   : > { %s3114_s23 = scalar_select %p2453_p6, 1, 0 }
   0xf   : > { %p1489_p9 = scmp.ge.s32.totalorder %s2378_s15, 1  ;;  %p119_p10 = scmp.lt.s32.totalorder %s2378_s15, 3 }
  0x10   : > { %p2460_p11 = por %p106_p7, %p34_p0  ;;  %p2464_p12 = por %p112_p8, %p40_p3 }
  0x11   : > { %p2468_p13 = pnand %p1489_p9, %p119_p10  ;;  %s2380_s27 = smov [#allocation5]  }
  0x12   : > { %s3115_s24 = scalar_select %p2460_p11, 1, 0 }
  0x13   : > { %s3116_s25 = scalar_select %p2464_p12, 1, 0 }
  0x14   : > { %s3117_s26 = scalar_select %p2468_p13, 1, 0 }
  0x15   : > { %p2161_p2 = pneg %p2468_p13  ;;  %s132_s28 = sshll.u32 %s2380_s27, 4  ;;  %s133_s28 = int_to_ptr.vmem [resolvable:$true] %s132_s28 }
  0x16   : > { %p2178_p4 = scmp.lt.s32.totalorder %s2378_s15, 2  ;;  %p3118_p0 = scmp.eq.s32.totalorder %s2429_s16, 0 }
  0x17   : > { %s2381_s4 = smov [#allocation7]   ;;  %s2222_s8 = scalar_lea.hbm %s3105_s1, 16 }
  0x18   : > { %p2478_p7 = pnand %p2161_p2, %p3118_p0  ;;  %p2484_p3 = pnand %p2178_p4, %p2447_p5 }
  0x19   : > { %s143_s5 = sshll.u32 %s2381_s4, 4  ;;  %p2223_p8 = scmp.ne.s32.totalorder %s3105_s1, %s2222_s8  ;;  %s2488_s5 = int_to_ptr.vmem [resolvable:$true] %s143_s5 }
  0x1a   : > { %s3120_s30 = scalar_select %p2484_p3, 1, 0 }
  0x1b   : > { %p2224_p9 = pneg %p2478_p7  ;;  %p2229_p10 = scmp.lt.u32.totalorder %s2222_s8, %s3105_s1 }
  0x1d   : > { %p2225_p4 = pnand %p2224_p9, %p2223_p8 }
  0x1f   : > { %p2226_p5 = pneg %p2225_p4 }
  0x21   : > { %p2231_p2 = pnand %p2229_p10, %p2226_p5 }
  0x23   : > { %2234 = shalt.err (!%p2231_p2)
}
  0x24   : > { %s2235_s19 = scalar_lea.vmem %s133_s28, 16  ;;  %s2242_s20 = scalar_lea.vmem %s133_s28, 32 }
  0x25   : > { %p2236_p0 = scmp.ne.s32.totalorder %s133_s28, %s2235_s19  ;;  %p2243_p11 = scmp.lt.s32.totalorder %s133_s28, %s133_s28 }
  0x26   : > { %p2244_p6 = scmp.lt.s32.totalorder %s2242_s20, %s2235_s19 }
  0x27   : > { %p2238_p1 = pnand %p2236_p0, %p2224_p9 }
  0x28   : > { %p2245_p13 = por %p2244_p6, %p2243_p11 }
  0x29   : > { %p2239_p12 = pneg %p2238_p1 }
  0x2b   : > { %p2246_p3 = pnand %p2245_p13, %p2239_p12 }
  0x2d   : > { %2249 = shalt.err (!%p2246_p3)
}
  0x2e   : > { %2164 = dma.hbm_to_vmem [thread:$0]  (!%p2478_p7), %s3105_s1, 16, %s133_s28, [#allocation6]  }
  0x2f   : > { %s154_s4 = sand.u32 1, %s2374_s14   ;;  %s2250_s8 = scalar_lea.hbm %s3106_s2, 16 }
  0x30   : > { %p2251_p1 = scmp.ne.s32.totalorder %s3106_s2, %s2250_s8  ;;  %p2257_p12 = scmp.lt.u32.totalorder %s2250_s8, %s3106_s2 }
  0x32   : > { %p2253_p6 = pnand %p2251_p1, %p2224_p9 }
  0x34   : > { %p2254_p11 = pneg %p2253_p6 }
  0x36   : > { %p2259_p13 = pnand %p2257_p12, %p2254_p11 }
  0x38   : > { %2262 = shalt.err (!%p2259_p13)
}
  0x39   : > { %s2263_s28 = scalar_lea.vmem %s2488_s5, 16  ;;  %s2270_s19 = scalar_lea.vmem %s2488_s5, 32 }
  0x3a   : > { %p2264_p3 = scmp.ne.s32.totalorder %s2488_s5, %s2263_s28  ;;  %p2271_p5 = scmp.lt.s32.totalorder %s2488_s5, %s2488_s5 }
  0x3b   : > { %p2272_p10 = scmp.lt.s32.totalorder %s2270_s19, %s2263_s28 }
  0x3c   : > { %p2266_p8 = pnand %p2264_p3, %p2224_p9 }
  0x3d   : > { %p2273_p2 = por %p2272_p10, %p2271_p5 }
  0x3e   : > { %p2267_p4 = pneg %p2266_p8 }
  0x40   : > { %p2274_p0 = pnand %p2273_p2, %p2267_p4 }
  0x42   : > { %2277 = shalt.err (!%p2274_p0)
}
  0x43   : > { %2167 = dma.hbm_to_vmem [thread:$0]  (!%p2478_p7), %s3106_s2, 16, %s2488_s5, [#allocation6]  }
  0x44   : > { %s1493_s27 = sshll.u32 %s154_s4, 10  ;;  %s1636_s6 = sshll.u32 %s2378_s15, 14 }
  0x45   : > { %s2543_s9 = scalar_lea.hbm %s3104_s0, %s1636_s6  ;;  %s158_s29 = scalar_lea.vmem [#allocation2], %s1493_s27 }
  0x46   : > { %s165_s10 = sshll.u32 %s158_s29, 4  ;;  %s2547_s11 = scalar_lea.sflag [#allocation3], %s154_s4  ;;  %s2545_s10 = int_to_ptr.vmem [resolvable:$true] %s165_s10 }
  0x47   : > { %s2278_s17 = scalar_lea.hbm %s2543_s9, 16384  ;;  %p3121_p7 = scmp.ne.s32.totalorder %s3120_s30, 0 }
  0x48   : > { %p2279_p9 = scmp.ne.s32.totalorder %s2543_s9, %s2278_s17  ;;  %s2283_s19 = scalar_lea.hbm %s3104_s0, 32768 }
  0x49   : > { %p2280_p1 = pneg %p3121_p7  ;;  %p2284_p12 = scmp.lt.u32.totalorder %s2543_s9, %s3104_s0 }
  0x4a   : > { %p2285_p13 = scmp.lt.u32.totalorder %s2283_s19, %s2278_s17  ;;  %p2287_p8 = scmp.lt.u32.totalorder %s2278_s17, %s2543_s9 }
  0x4b   : > { %p2281_p6 = pnand %p2280_p1, %p2279_p9 }
  0x4c   : > { %p2286_p3 = por %p2285_p13, %p2284_p12 }
  0x4d   : > { %p2282_p11 = pneg %p2281_p6 }
  0x4e   : > { %p2288_p4 = por %p2287_p8, %p2286_p3 }
  0x50   : > { %p2289_p5 = pnand %p2288_p4, %p2282_p11 }
  0x52   : > { %2292 = shalt.err (!%p2289_p5)
}
  0x53   : > { %s2293_s4 = scalar_lea.vmem %s2545_s10, 16384  ;;  %s2382_s27 = smov [#allocation2]  }
  0x54   : > { %p2294_p10 = scmp.ne.s32.totalorder %s2545_s10, %s2293_s4  ;;  %s2298_s6 = sshll.u32 %s2382_s27, 4  ;;  %s2299_s6 = int_to_ptr.vmem [resolvable:$false] %s2298_s6 }
  0x55   : > { %s2300_s7 = scalar_lea.vmem %s2299_s6, 32768  ;;  %p2301_p9 = scmp.lt.s32.totalorder %s2545_s10, %s2299_s6 }
  0x56   : > { %p2296_p2 = pnand %p2294_p10, %p2280_p1  ;;  %p2302_p6 = scmp.lt.s32.totalorder %s2300_s7, %s2293_s4 }
  0x58   : > { %p2297_p0 = pneg %p2296_p2  ;;  %p2303_p12 = por %p2302_p6, %p2301_p9 }
  0x5a   : > { %p2304_p13 = pnand %p2303_p12, %p2297_p0 }
  0x5c   : > { %2307 = shalt.err (!%p2304_p13)
}
  0x5d   : > { %s2383_s8 = smov 128   ;;  %s2384_s29 = smov 8  }
  0x5e   : > { %2171 = dma.hbm_to_vmem [thread:$0]  (!%p3121_p7), %s2543_s9, 16384, %s2545_s10, %s2547_s11, %s2383_s8, %s2383_s8, %s2384_s29  }
  0x5f   : > { %p3122_p1 = scmp.ne.s32.totalorder %s3117_s26, 0 }
  0x60   : > { %s2578_s17 = sand.u32 (!%p3122_p1), 1, %s2370_s13   ;;  %p3123_p11 = scmp.ne.s32.totalorder (!%p3122_p1), %s3114_s23, 0 }
  0x61   : > { %177 = sbr.rel (%p3122_p1) target bundleno = 242 (0xf2), region = 32  ;;  %s1497_s5 = sshll.u32 (!%p3122_p1), %s2578_s17, 10 }
  0x62   : > { %s180_s28 = scalar_lea.sflag (!%p3122_p1), [#allocation3], %s2578_s17  ;;  %s2582_s19 = scalar_lea.vmem (!%p3122_p1), [#allocation2], %s1497_s5 }
  0x68   : > { %2353 = dma.done.wait (%p3123_p11), %s180_s28, 16384  }
  0x69   : > { %2355 = vsyncadd (%p3123_p11), %s180_s28, 4294950912  ;;  %p3124_p7 = scmp.eq.s32.totalorder %s2429_s16, 0 }
  0x6b   : > { %2357 = dma.done.wait (%p3124_p7), [#allocation6], 32   ;;  %p3125_p3 = pmov %p3124_p7 }
  0x6c   : > { %v216_v0 = vld [vmem:[%s2582_s19] sm:$0xff]  ;;  %v217_v1 = vld [vmem:[%s2582_s19 + $0x8] sm:$0xff]  ;;  %v218_v6 = vld [vmem:[%s2582_s19 + $0x10] sm:$0xff]  ;;  %s1500_s23 = sshll.u32 %s2578_s17, 9  ;;  %s1765_s30 = sshll.u32 %s2429_s16, 13 }
  0x6d   : > { %2359 = vsyncadd (%p3125_p3), [#allocation6], 4294967264  ;;  %v2594_v2 = vld [vmem:[#allocation5] ss:$0 sm:$0xff]  ;;  %v2598_v5 = vld [vmem:[#allocation7] ss:$0 sm:$0xff]  ;;  %s3056_s20 = scalar_lea.hbm %s3107_s3, %s1765_s30 }
  0x6e   : > { %v351_v3 = vmul.f32 %v2594_v2, %v216_v0  ;;  %v352_v4 = vmul.f32 %v2594_v2, %v217_v1  ;;  %v219_v7 = vld [vmem:[%s2582_s19 + $0x18] sm:$0xff]  ;;  %v353_v8 = vmul.f32 %v2594_v2, %v218_v6  ;;  %v220_v10 = vld [vmem:[%s2582_s19 + $0x20] sm:$0xff]  ;;  %v221_v11 = vld [vmem:[%s2582_s19 + $0x28] sm:$0xff]  ;;  %s2632_s26 = scalar_lea.vmem [#allocation8], %s1500_s23  ;;  %s1383_s16 = scalar_lea.sflag [#allocation4], %s2578_s17 }
  0x6f   : > { %v354_v9 = vmul.f32 %v2594_v2, %v219_v7  ;;  %v222_v12 = vld [vmem:[%s2582_s19 + $0x30] sm:$0xff]  ;;  %v355_v15 = vmul.f32 %v2594_v2, %v220_v10  ;;  %v356_v16 = vmul.f32 %v2594_v2, %v221_v11  ;;  %v223_v17 = vld [vmem:[%s2582_s19 + $0x38] sm:$0xff]  ;;  %v224_v22 = vld [vmem:[%s2582_s19 + $0x40] sm:$0xff]  ;;  %s1396_s9 = sshll.u32 %s2632_s26, 4  ;;  %p3126_p4 = scmp.ne.s32.totalorder %s3115_s24, 0  ;;  %s3058_s9 = int_to_ptr.vmem [resolvable:$true] %s1396_s9 }
  0x70   : > { %v486_v13 = vadd.f32 %v2598_v5, %v351_v3  ;;  %v487_v14 = vadd.f32 %v2598_v5, %v352_v4  ;;  %v488_v18 = vadd.f32 %v2598_v5, %v353_v8  ;;  %v357_v20 = vmul.f32 %v2594_v2, %v222_v12  ;;  %v225_v27 = vld [vmem:[%s2582_s19 + $0x48] sm:$0xff]  ;;  %v226_v32 = vld [vmem:[%s2582_s19 + $0x50] sm:$0xff]  ;;  %v227_v33 = vld [vmem:[%s2582_s19 + $0x58] sm:$0xff]  ;;  %s2308_s22 = scalar_lea.vmem %s3058_s9, 8192  ;;  %s2385_s4 = smov [#allocation8]  }
  0x71   : > { %v489_v19 = vadd.f32 %v2598_v5, %v354_v9  ;;  %v358_v21 = vmul.f32 %v2594_v2, %v223_v17  ;;  %v490_v25 = vadd.f32 %v2598_v5, %v355_v15  ;;  %v491_v26 = vadd.f32 %v2598_v5, %v356_v16  ;;  %v228_v38 = vld [vmem:[%s2582_s19 + $0x60] sm:$0xff]  ;;  %v229_v39 = vld [vmem:[%s2582_s19 + $0x68] sm:$0xff]  ;;  %v230_v44 = vld [vmem:[%s2582_s19 + $0x70] sm:$0xff]  ;;  %p2309_p8 = scmp.ne.s32.totalorder %s3058_s9, %s2308_s22  ;;  %s2312_s27 = sshll.u32 %s2385_s4, 4  ;;  %s2313_s27 = int_to_ptr.vmem [resolvable:$false] %s2312_s27 }
  0x72   : > { %v614_v23 = vmax.f32 %v486_v13, 0.0  ;;  %v615_v24 = vmax.f32 %v487_v14, 0.0  ;;  %v616_v28 = vmax.f32 %v488_v18, 0.0  ;;  %v492_v30 = vadd.f32 %v2598_v5, %v357_v20  ;;  %v231_v49 = vld [vmem:[%s2582_s19 + $0x78] sm:$0xff]  ;;  %v232_v54 = vld [vmem:[%s2582_s19 + $0x80] sm:$0xff]  ;;  %v233_v63 = vld [vmem:[%s2582_s19 + $0x88] sm:$0xff]  ;;  %p2315_p2 = scmp.lt.s32.totalorder %s3058_s9, %s2313_s27 }
  0x73   : > { %v617_v29 = vmax.f32 %v489_v19, 0.0  ;;  %v493_v31 = vadd.f32 %v2598_v5, %v358_v21  ;;  %v618_v35 = vmax.f32 %v490_v25, 0.0  ;;  %v619_v36 = vmax.f32 %v491_v26, 0.0  ;;  %v234_v6 = vld [vmem:[%s2582_s19 + $0x90] sm:$0xff]  ;;  %v235_v7 = vld [vmem:[%s2582_s19 + $0x98] sm:$0xff]  ;;  %v236_v12 = vld [vmem:[%s2582_s19 + $0xa0] sm:$0xff]  ;;  %p2310_p5 = pnand %p2309_p8, %p3126_p4 }
  0x74   : > { %v1769_v34 = vpack.c.bf16 %v615_v24, %v614_v23  ;;  %v359_v37 = vmul.f32 %v2594_v2, %v224_v22  ;;  %v620_v41 = vmax.f32 %v492_v30, 0.0  ;;  %v360_v43 = vmul.f32 %v2594_v2, %v225_v27  ;;  %v237_v13 = vld [vmem:[%s2582_s19 + $0xa8] sm:$0xff]  ;;  %v238_v18 = vld [vmem:[%s2582_s19 + $0xb0] sm:$0xff]  ;;  %v239_v23 = vld [vmem:[%s2582_s19 + $0xb8] sm:$0xff]  ;;  %s2314_s6 = scalar_lea.vmem %s2313_s27, 16384 }
  0x75   : > { %v1774_v40 = vpack.c.bf16 %v617_v29, %v616_v28  ;;  %v621_v42 = vmax.f32 %v493_v31, 0.0  ;;  %v1779_v45 = vpack.c.bf16 %v619_v36, %v618_v35  ;;  %v361_v47 = vmul.f32 %v2594_v2, %v226_v32  ;;  %v240_v28 = vld [vmem:[%s2582_s19 + $0xc0] sm:$0xff]  ;;  %p2311_p10 = pneg %p2310_p5  ;;  %p2316_p0 = scmp.lt.s32.totalorder %s2314_s6, %s2308_s22 }
  0x76   : > { %1770 = vst [vmem:[%s2632_s26] sm:$0xff] %v1769_v34   ;;  %v494_v46 = vadd.f32 %v2598_v5, %v359_v37  ;;  %v362_v48 = vmul.f32 %v2594_v2, %v227_v33  ;;  %v495_v51 = vadd.f32 %v2598_v5, %v360_v43  ;;  %v363_v52 = vmul.f32 %v2594_v2, %v228_v38  ;;  %v241_v37 = vld [vmem:[%s2582_s19 + $0xc8] sm:$0xff]  ;;  %v243_v43 = vld [vmem:[%s2582_s19 + $0xd8] sm:$0xff] }
  0x77   : > { %2086 = vst [vmem:[%s2632_s26 + $0x8] sm:$0xff] %v1774_v40   ;;  %v1784_v50 = vpack.c.bf16 %v621_v42, %v620_v41  ;;  %v364_v53 = vmul.f32 %v2594_v2, %v229_v39  ;;  %2087 = vst [vmem:[%s2632_s26 + $0x10] sm:$0xff] %v1779_v45   ;;  %v496_v56 = vadd.f32 %v2598_v5, %v361_v47  ;;  %v242_v42 = vld [vmem:[%s2582_s19 + $0xd0] sm:$0xff]  ;;  %p2317_p9 = por %p2316_p0, %p2315_p2 }
  0x78   : > { %v622_v55 = vmax.f32 %v494_v46, 0.0  ;;  %v497_v57 = vadd.f32 %v2598_v5, %v362_v48  ;;  %v365_v58 = vmul.f32 %v2594_v2, %v230_v44  ;;  %v623_v59 = vmax.f32 %v495_v51, 0.0  ;;  %v244_v48 = vld [vmem:[%s2582_s19 + $0xe0] sm:$0xff] }
  0x79   : > { %2088 = vst [vmem:[%s2632_s26 + $0x18] sm:$0xff] %v1784_v50   ;;  %v498_v60 = vadd.f32 %v2598_v5, %v363_v52  ;;  %v499_v61 = vadd.f32 %v2598_v5, %v364_v53  ;;  %v366_v62 = vmul.f32 %v2594_v2, %v231_v49  ;;  %v624_v0 = vmax.f32 %v496_v56, 0.0  ;;  %v245_v49 = vld [vmem:[%s2582_s19 + $0xe8] sm:$0xff]  ;;  %p2318_p6 = pnand %p2317_p9, %p2311_p10 }
  0x7a   : > { %v625_v1 = vmax.f32 %v497_v57, 0.0  ;;  %v500_v3 = vadd.f32 %v2598_v5, %v365_v58  ;;  %v367_v4 = vmul.f32 %v2594_v2, %v232_v54  ;;  %v1789_v8 = vpack.c.bf16 %v623_v59, %v622_v55  ;;  %v246_v54 = vld [vmem:[%s2582_s19 + $0xf0] sm:$0xff]  ;;  %v247_v59 = vld [vmem:[%s2582_s19 + $0xf8] sm:$0xff] }
  0x7b   : > { %v626_v9 = vmax.f32 %v498_v60, 0.0  ;;  %v627_v10 = vmax.f32 %v499_v61, 0.0  ;;  %v501_v11 = vadd.f32 %v2598_v5, %v366_v62  ;;  %v368_v16 = vmul.f32 %v2594_v2, %v233_v63 }
  0x7c   : > { %v1794_v14 = vpack.c.bf16 %v625_v1, %v624_v0  ;;  %v628_v15 = vmax.f32 %v500_v3, 0.0  ;;  %v502_v17 = vadd.f32 %v2598_v5, %v367_v4  ;;  %2089 = vst [vmem:[%s2632_s26 + $0x20] sm:$0xff] %v1789_v8   ;;  %v369_v21 = vmul.f32 %v2594_v2, %v234_v6  ;;  %v248_v0 = vld [vmem:[%s2582_s19 + $0x100] sm:$0xff] }
  0x7d   : > { %v1799_v19 = vpack.c.bf16 %v627_v10, %v626_v9  ;;  %v629_v20 = vmax.f32 %v501_v11, 0.0  ;;  %v370_v22 = vmul.f32 %v2594_v2, %v235_v7  ;;  %v503_v24 = vadd.f32 %v2598_v5, %v368_v16  ;;  %v249_v11 = vld [vmem:[%s2582_s19 + $0x108] sm:$0xff]  ;;  %v250_v16 = vld [vmem:[%s2582_s19 + $0x110] sm:$0xff] }
  0x7e   : > { %2090 = vst [vmem:[%s2632_s26 + $0x28] sm:$0xff] %v1794_v14   ;;  %v630_v25 = vmax.f32 %v502_v17, 0.0  ;;  %v371_v26 = vmul.f32 %v2594_v2, %v236_v12  ;;  %v372_v27 = vmul.f32 %v2594_v2, %v237_v13  ;;  %v504_v30 = vadd.f32 %v2598_v5, %v369_v21  ;;  %v251_v17 = vld [vmem:[%s2582_s19 + $0x118] sm:$0xff] }
  0x7f   : > { %2091 = vst [vmem:[%s2632_s26 + $0x30] sm:$0xff] %v1799_v19   ;;  %v1804_v29 = vpack.c.bf16 %v629_v20, %v628_v15  ;;  %v505_v31 = vadd.f32 %v2598_v5, %v370_v22  ;;  %v373_v32 = vmul.f32 %v2594_v2, %v238_v18  ;;  %v631_v33 = vmax.f32 %v503_v24, 0.0  ;;  %v252_v22 = vld [vmem:[%s2582_s19 + $0x120] sm:$0xff] }
  0x80   : > { %v506_v34 = vadd.f32 %v2598_v5, %v371_v26  ;;  %v507_v35 = vadd.f32 %v2598_v5, %v372_v27  ;;  %v374_v36 = vmul.f32 %v2594_v2, %v239_v23  ;;  %v632_v38 = vmax.f32 %v504_v30, 0.0  ;;  %v253_v23 = vld [vmem:[%s2582_s19 + $0x128] sm:$0xff] }
  0x81   : > { %2092 = vst [vmem:[%s2632_s26 + $0x38] sm:$0xff] %v1804_v29   ;;  %v633_v39 = vmax.f32 %v505_v31, 0.0  ;;  %v508_v40 = vadd.f32 %v2598_v5, %v373_v32  ;;  %v375_v41 = vmul.f32 %v2594_v2, %v240_v28  ;;  %v1809_v44 = vpack.c.bf16 %v631_v33, %v630_v25  ;;  %v254_v28 = vld [vmem:[%s2582_s19 + $0x130] sm:$0xff]  ;;  %v255_v33 = vld [vmem:[%s2582_s19 + $0x138] sm:$0xff] }
  0x82   : > { %v634_v45 = vmax.f32 %v506_v34, 0.0  ;;  %v635_v46 = vmax.f32 %v507_v35, 0.0  ;;  %v509_v47 = vadd.f32 %v2598_v5, %v374_v36  ;;  %v376_v52 = vmul.f32 %v2594_v2, %v241_v37 }
  0x83   : > { %v1814_v50 = vpack.c.bf16 %v633_v39, %v632_v38  ;;  %v636_v51 = vmax.f32 %v508_v40, 0.0  ;;  %v510_v53 = vadd.f32 %v2598_v5, %v375_v41  ;;  %2093 = vst [vmem:[%s2632_s26 + $0x40] sm:$0xff] %v1809_v44   ;;  %v377_v57 = vmul.f32 %v2594_v2, %v242_v42  ;;  %v256_v38 = vld [vmem:[%s2582_s19 + $0x140] sm:$0xff] }
  0x84   : > { %v1819_v55 = vpack.c.bf16 %v635_v46, %v634_v45  ;;  %v637_v56 = vmax.f32 %v509_v47, 0.0  ;;  %v378_v58 = vmul.f32 %v2594_v2, %v243_v43  ;;  %v511_v60 = vadd.f32 %v2598_v5, %v376_v52  ;;  %v257_v47 = vld [vmem:[%s2582_s19 + $0x148] sm:$0xff]  ;;  %v258_v52 = vld [vmem:[%s2582_s19 + $0x150] sm:$0xff] }
  0x85   : > { %2094 = vst [vmem:[%s2632_s26 + $0x48] sm:$0xff] %v1814_v50   ;;  %v638_v61 = vmax.f32 %v510_v53, 0.0  ;;  %v379_v62 = vmul.f32 %v2594_v2, %v244_v48  ;;  %v380_v63 = vmul.f32 %v2594_v2, %v245_v49  ;;  %v512_v3 = vadd.f32 %v2598_v5, %v377_v57  ;;  %v259_v53 = vld [vmem:[%s2582_s19 + $0x158] sm:$0xff] }
  0x86   : > { %2095 = vst [vmem:[%s2632_s26 + $0x50] sm:$0xff] %v1819_v55   ;;  %v1824_v1 = vpack.c.bf16 %v637_v56, %v636_v51  ;;  %v513_v4 = vadd.f32 %v2598_v5, %v378_v58  ;;  %v381_v6 = vmul.f32 %v2594_v2, %v246_v54  ;;  %v639_v7 = vmax.f32 %v511_v60, 0.0  ;;  %v260_v58 = vld [vmem:[%s2582_s19 + $0x160] sm:$0xff] }
  0x87   : > { %v514_v8 = vadd.f32 %v2598_v5, %v379_v62  ;;  %v515_v9 = vadd.f32 %v2598_v5, %v380_v63  ;;  %v382_v10 = vmul.f32 %v2594_v2, %v247_v59  ;;  %v640_v12 = vmax.f32 %v512_v3, 0.0  ;;  %v261_v59 = vld [vmem:[%s2582_s19 + $0x168] sm:$0xff] }
  0x88   : > { %2096 = vst [vmem:[%s2632_s26 + $0x58] sm:$0xff] %v1824_v1   ;;  %v641_v13 = vmax.f32 %v513_v4, 0.0  ;;  %v516_v14 = vadd.f32 %v2598_v5, %v381_v6  ;;  %v383_v15 = vmul.f32 %v2594_v2, %v248_v0  ;;  %v1829_v18 = vpack.c.bf16 %v639_v7, %v638_v61  ;;  %v262_v0 = vld [vmem:[%s2582_s19 + $0x170] sm:$0xff]  ;;  %v263_v7 = vld [vmem:[%s2582_s19 + $0x178] sm:$0xff] }
  0x89   : > { %v642_v19 = vmax.f32 %v514_v8, 0.0  ;;  %v643_v20 = vmax.f32 %v515_v9, 0.0  ;;  %v517_v21 = vadd.f32 %v2598_v5, %v382_v10  ;;  %v384_v26 = vmul.f32 %v2594_v2, %v249_v11 }
  0x8a   : > { %v1834_v24 = vpack.c.bf16 %v641_v13, %v640_v12  ;;  %v644_v25 = vmax.f32 %v516_v14, 0.0  ;;  %v518_v27 = vadd.f32 %v2598_v5, %v383_v15  ;;  %2097 = vst [vmem:[%s2632_s26 + $0x60] sm:$0xff] %v1829_v18   ;;  %v385_v31 = vmul.f32 %v2594_v2, %v250_v16  ;;  %v264_v12 = vld [vmem:[%s2582_s19 + $0x180] sm:$0xff] }
  0x8b   : > { %v1839_v29 = vpack.c.bf16 %v643_v20, %v642_v19  ;;  %v645_v30 = vmax.f32 %v517_v21, 0.0  ;;  %v386_v32 = vmul.f32 %v2594_v2, %v251_v17  ;;  %v519_v34 = vadd.f32 %v2598_v5, %v384_v26  ;;  %v265_v21 = vld [vmem:[%s2582_s19 + $0x188] sm:$0xff]  ;;  %v266_v26 = vld [vmem:[%s2582_s19 + $0x190] sm:$0xff] }
  0x8c   : > { %2098 = vst [vmem:[%s2632_s26 + $0x68] sm:$0xff] %v1834_v24   ;;  %v646_v35 = vmax.f32 %v518_v27, 0.0  ;;  %v387_v36 = vmul.f32 %v2594_v2, %v252_v22  ;;  %v388_v37 = vmul.f32 %v2594_v2, %v253_v23  ;;  %v520_v40 = vadd.f32 %v2598_v5, %v385_v31  ;;  %v267_v27 = vld [vmem:[%s2582_s19 + $0x198] sm:$0xff] }
  0x8d   : > { %2099 = vst [vmem:[%s2632_s26 + $0x70] sm:$0xff] %v1839_v29   ;;  %v1844_v39 = vpack.c.bf16 %v645_v30, %v644_v25  ;;  %v521_v41 = vadd.f32 %v2598_v5, %v386_v32  ;;  %v389_v42 = vmul.f32 %v2594_v2, %v254_v28  ;;  %v647_v43 = vmax.f32 %v519_v34, 0.0  ;;  %v268_v32 = vld [vmem:[%s2582_s19 + $0x1a0] sm:$0xff] }
  0x8e   : > { %v522_v44 = vadd.f32 %v2598_v5, %v387_v36  ;;  %v523_v45 = vadd.f32 %v2598_v5, %v388_v37  ;;  %v390_v46 = vmul.f32 %v2594_v2, %v255_v33  ;;  %v648_v48 = vmax.f32 %v520_v40, 0.0  ;;  %v269_v33 = vld [vmem:[%s2582_s19 + $0x1a8] sm:$0xff] }
  0x8f   : > { %2100 = vst [vmem:[%s2632_s26 + $0x78] sm:$0xff] %v1844_v39   ;;  %v649_v49 = vmax.f32 %v521_v41, 0.0  ;;  %v524_v50 = vadd.f32 %v2598_v5, %v389_v42  ;;  %v391_v51 = vmul.f32 %v2594_v2, %v256_v38  ;;  %v1849_v54 = vpack.c.bf16 %v647_v43, %v646_v35  ;;  %v270_v38 = vld [vmem:[%s2582_s19 + $0x1b0] sm:$0xff]  ;;  %v271_v43 = vld [vmem:[%s2582_s19 + $0x1b8] sm:$0xff] }
  0x90   : > { %v650_v55 = vmax.f32 %v522_v44, 0.0  ;;  %v651_v56 = vmax.f32 %v523_v45, 0.0  ;;  %v525_v57 = vadd.f32 %v2598_v5, %v390_v46  ;;  %v392_v62 = vmul.f32 %v2594_v2, %v257_v47 }
  0x91   : > { %v1854_v60 = vpack.c.bf16 %v649_v49, %v648_v48  ;;  %v652_v61 = vmax.f32 %v524_v50, 0.0  ;;  %v526_v63 = vadd.f32 %v2598_v5, %v391_v51  ;;  %2101 = vst [vmem:[%s2632_s26 + $0x80] sm:$0xff] %v1849_v54   ;;  %v393_v4 = vmul.f32 %v2594_v2, %v258_v52  ;;  %v272_v48 = vld [vmem:[%s2582_s19 + $0x1c0] sm:$0xff] }
  0x92   : > { %v1859_v1 = vpack.c.bf16 %v651_v56, %v650_v55  ;;  %v653_v3 = vmax.f32 %v525_v57, 0.0  ;;  %v394_v6 = vmul.f32 %v2594_v2, %v259_v53  ;;  %v527_v8 = vadd.f32 %v2598_v5, %v392_v62  ;;  %v273_v57 = vld [vmem:[%s2582_s19 + $0x1c8] sm:$0xff]  ;;  %v274_v62 = vld [vmem:[%s2582_s19 + $0x1d0] sm:$0xff] }
  0x93   : > { %2102 = vst [vmem:[%s2632_s26 + $0x88] sm:$0xff] %v1854_v60   ;;  %v654_v9 = vmax.f32 %v526_v63, 0.0  ;;  %v395_v10 = vmul.f32 %v2594_v2, %v260_v58  ;;  %v396_v11 = vmul.f32 %v2594_v2, %v261_v59  ;;  %v528_v14 = vadd.f32 %v2598_v5, %v393_v4  ;;  %v275_v63 = vld [vmem:[%s2582_s19 + $0x1d8] sm:$0xff] }
  0x94   : > { %2103 = vst [vmem:[%s2632_s26 + $0x90] sm:$0xff] %v1859_v1   ;;  %v1864_v13 = vpack.c.bf16 %v653_v3, %v652_v61  ;;  %v529_v15 = vadd.f32 %v2598_v5, %v394_v6  ;;  %v397_v16 = vmul.f32 %v2594_v2, %v262_v0  ;;  %v655_v17 = vmax.f32 %v527_v8, 0.0  ;;  %v276_v6 = vld [vmem:[%s2582_s19 + $0x1e0] sm:$0xff] }
  0x95   : > { %v530_v18 = vadd.f32 %v2598_v5, %v395_v10  ;;  %v531_v19 = vadd.f32 %v2598_v5, %v396_v11  ;;  %v398_v20 = vmul.f32 %v2594_v2, %v263_v7  ;;  %v656_v22 = vmax.f32 %v528_v14, 0.0  ;;  %v277_v7 = vld [vmem:[%s2582_s19 + $0x1e8] sm:$0xff] }
  0x96   : > { %2104 = vst [vmem:[%s2632_s26 + $0x98] sm:$0xff] %v1864_v13   ;;  %v657_v23 = vmax.f32 %v529_v15, 0.0  ;;  %v532_v24 = vadd.f32 %v2598_v5, %v397_v16  ;;  %v399_v25 = vmul.f32 %v2594_v2, %v264_v12  ;;  %v1869_v28 = vpack.c.bf16 %v655_v17, %v654_v9  ;;  %v278_v12 = vld [vmem:[%s2582_s19 + $0x1f0] sm:$0xff]  ;;  %v279_v17 = vld [vmem:[%s2582_s19 + $0x1f8] sm:$0xff] }
  0x97   : > { %v658_v29 = vmax.f32 %v530_v18, 0.0  ;;  %v659_v30 = vmax.f32 %v531_v19, 0.0  ;;  %v533_v31 = vadd.f32 %v2598_v5, %v398_v20  ;;  %v400_v36 = vmul.f32 %v2594_v2, %v265_v21 }
  0x98   : > { %v1874_v34 = vpack.c.bf16 %v657_v23, %v656_v22  ;;  %v660_v35 = vmax.f32 %v532_v24, 0.0  ;;  %v534_v37 = vadd.f32 %v2598_v5, %v399_v25  ;;  %2105 = vst [vmem:[%s2632_s26 + $0xa0] sm:$0xff] %v1869_v28   ;;  %v401_v41 = vmul.f32 %v2594_v2, %v266_v26  ;;  %v280_v22 = vld [vmem:[%s2582_s19 + $0x200] sm:$0xff] }
  0x99   : > { %v1879_v39 = vpack.c.bf16 %v659_v30, %v658_v29  ;;  %v661_v40 = vmax.f32 %v533_v31, 0.0  ;;  %v402_v42 = vmul.f32 %v2594_v2, %v267_v27  ;;  %v535_v44 = vadd.f32 %v2598_v5, %v400_v36  ;;  %v281_v31 = vld [vmem:[%s2582_s19 + $0x208] sm:$0xff]  ;;  %v282_v36 = vld [vmem:[%s2582_s19 + $0x210] sm:$0xff] }
  0x9a   : > { %2106 = vst [vmem:[%s2632_s26 + $0xa8] sm:$0xff] %v1874_v34   ;;  %v662_v45 = vmax.f32 %v534_v37, 0.0  ;;  %v403_v46 = vmul.f32 %v2594_v2, %v268_v32  ;;  %v404_v47 = vmul.f32 %v2594_v2, %v269_v33  ;;  %v536_v50 = vadd.f32 %v2598_v5, %v401_v41  ;;  %v283_v37 = vld [vmem:[%s2582_s19 + $0x218] sm:$0xff] }
  0x9b   : > { %2107 = vst [vmem:[%s2632_s26 + $0xb0] sm:$0xff] %v1879_v39   ;;  %v1884_v49 = vpack.c.bf16 %v661_v40, %v660_v35  ;;  %v537_v51 = vadd.f32 %v2598_v5, %v402_v42  ;;  %v405_v52 = vmul.f32 %v2594_v2, %v270_v38  ;;  %v663_v53 = vmax.f32 %v535_v44, 0.0  ;;  %v284_v42 = vld [vmem:[%s2582_s19 + $0x220] sm:$0xff] }
  0x9c   : > { %v538_v54 = vadd.f32 %v2598_v5, %v403_v46  ;;  %v539_v55 = vadd.f32 %v2598_v5, %v404_v47  ;;  %v406_v56 = vmul.f32 %v2594_v2, %v271_v43  ;;  %v664_v58 = vmax.f32 %v536_v50, 0.0  ;;  %v285_v43 = vld [vmem:[%s2582_s19 + $0x228] sm:$0xff] }
  0x9d   : > { %2108 = vst [vmem:[%s2632_s26 + $0xb8] sm:$0xff] %v1884_v49   ;;  %v665_v59 = vmax.f32 %v537_v51, 0.0  ;;  %v540_v60 = vadd.f32 %v2598_v5, %v405_v52  ;;  %v407_v61 = vmul.f32 %v2594_v2, %v272_v48  ;;  %v1889_v0 = vpack.c.bf16 %v663_v53, %v662_v45  ;;  %v286_v48 = vld [vmem:[%s2582_s19 + $0x230] sm:$0xff]  ;;  %v287_v53 = vld [vmem:[%s2582_s19 + $0x238] sm:$0xff] }
  0x9e   : > { %v666_v1 = vmax.f32 %v538_v54, 0.0  ;;  %v667_v3 = vmax.f32 %v539_v55, 0.0  ;;  %v541_v4 = vadd.f32 %v2598_v5, %v406_v56  ;;  %v408_v10 = vmul.f32 %v2594_v2, %v273_v57 }
  0x9f   : > { %v1894_v8 = vpack.c.bf16 %v665_v59, %v664_v58  ;;  %v668_v9 = vmax.f32 %v540_v60, 0.0  ;;  %v542_v11 = vadd.f32 %v2598_v5, %v407_v61  ;;  %2109 = vst [vmem:[%s2632_s26 + $0xc0] sm:$0xff] %v1889_v0   ;;  %v409_v15 = vmul.f32 %v2594_v2, %v274_v62  ;;  %v288_v58 = vld [vmem:[%s2582_s19 + $0x240] sm:$0xff] }
  0xa0   : > { %v1899_v13 = vpack.c.bf16 %v667_v3, %v666_v1  ;;  %v669_v14 = vmax.f32 %v541_v4, 0.0  ;;  %v410_v16 = vmul.f32 %v2594_v2, %v275_v63  ;;  %v543_v18 = vadd.f32 %v2598_v5, %v408_v10  ;;  %v289_v4 = vld [vmem:[%s2582_s19 + $0x248] sm:$0xff]  ;;  %v290_v10 = vld [vmem:[%s2582_s19 + $0x250] sm:$0xff] }
  0xa1   : > { %2110 = vst [vmem:[%s2632_s26 + $0xc8] sm:$0xff] %v1894_v8   ;;  %v670_v19 = vmax.f32 %v542_v11, 0.0  ;;  %v411_v20 = vmul.f32 %v2594_v2, %v276_v6  ;;  %v412_v21 = vmul.f32 %v2594_v2, %v277_v7  ;;  %v544_v24 = vadd.f32 %v2598_v5, %v409_v15  ;;  %v291_v11 = vld [vmem:[%s2582_s19 + $0x258] sm:$0xff] }
  0xa2   : > { %2111 = vst [vmem:[%s2632_s26 + $0xd0] sm:$0xff] %v1899_v13   ;;  %v1904_v23 = vpack.c.bf16 %v669_v14, %v668_v9  ;;  %v545_v25 = vadd.f32 %v2598_v5, %v410_v16  ;;  %v413_v26 = vmul.f32 %v2594_v2, %v278_v12  ;;  %v671_v27 = vmax.f32 %v543_v18, 0.0  ;;  %v292_v16 = vld [vmem:[%s2582_s19 + $0x260] sm:$0xff] }
  0xa3   : > { %v546_v28 = vadd.f32 %v2598_v5, %v411_v20  ;;  %v547_v29 = vadd.f32 %v2598_v5, %v412_v21  ;;  %v414_v30 = vmul.f32 %v2594_v2, %v279_v17  ;;  %v672_v32 = vmax.f32 %v544_v24, 0.0  ;;  %v293_v17 = vld [vmem:[%s2582_s19 + $0x268] sm:$0xff] }
  0xa4   : > { %2112 = vst [vmem:[%s2632_s26 + $0xd8] sm:$0xff] %v1904_v23   ;;  %v673_v33 = vmax.f32 %v545_v25, 0.0  ;;  %v548_v34 = vadd.f32 %v2598_v5, %v413_v26  ;;  %v415_v35 = vmul.f32 %v2594_v2, %v280_v22  ;;  %v1909_v38 = vpack.c.bf16 %v671_v27, %v670_v19  ;;  %v294_v22 = vld [vmem:[%s2582_s19 + $0x270] sm:$0xff]  ;;  %v295_v27 = vld [vmem:[%s2582_s19 + $0x278] sm:$0xff] }
  0xa5   : > { %v674_v39 = vmax.f32 %v546_v28, 0.0  ;;  %v675_v40 = vmax.f32 %v547_v29, 0.0  ;;  %v549_v41 = vadd.f32 %v2598_v5, %v414_v30  ;;  %v416_v46 = vmul.f32 %v2594_v2, %v281_v31 }
  0xa6   : > { %v1914_v44 = vpack.c.bf16 %v673_v33, %v672_v32  ;;  %v676_v45 = vmax.f32 %v548_v34, 0.0  ;;  %v550_v47 = vadd.f32 %v2598_v5, %v415_v35  ;;  %2113 = vst [vmem:[%s2632_s26 + $0xe0] sm:$0xff] %v1909_v38   ;;  %v417_v51 = vmul.f32 %v2594_v2, %v282_v36  ;;  %v296_v32 = vld [vmem:[%s2582_s19 + $0x280] sm:$0xff] }
  0xa7   : > { %v1919_v49 = vpack.c.bf16 %v675_v40, %v674_v39  ;;  %v677_v50 = vmax.f32 %v549_v41, 0.0  ;;  %v418_v52 = vmul.f32 %v2594_v2, %v283_v37  ;;  %v551_v54 = vadd.f32 %v2598_v5, %v416_v46  ;;  %v297_v41 = vld [vmem:[%s2582_s19 + $0x288] sm:$0xff]  ;;  %v298_v46 = vld [vmem:[%s2582_s19 + $0x290] sm:$0xff] }
  0xa8   : > { %2114 = vst [vmem:[%s2632_s26 + $0xe8] sm:$0xff] %v1914_v44   ;;  %v678_v55 = vmax.f32 %v550_v47, 0.0  ;;  %v419_v56 = vmul.f32 %v2594_v2, %v284_v42  ;;  %v420_v57 = vmul.f32 %v2594_v2, %v285_v43  ;;  %v552_v60 = vadd.f32 %v2598_v5, %v417_v51  ;;  %v299_v47 = vld [vmem:[%s2582_s19 + $0x298] sm:$0xff] }
  0xa9   : > { %2115 = vst [vmem:[%s2632_s26 + $0xf0] sm:$0xff] %v1919_v49   ;;  %v1924_v59 = vpack.c.bf16 %v677_v50, %v676_v45  ;;  %v553_v61 = vadd.f32 %v2598_v5, %v418_v52  ;;  %v421_v62 = vmul.f32 %v2594_v2, %v286_v48  ;;  %v679_v63 = vmax.f32 %v551_v54, 0.0  ;;  %v300_v52 = vld [vmem:[%s2582_s19 + $0x2a0] sm:$0xff] }
  0xaa   : > { %v554_v0 = vadd.f32 %v2598_v5, %v419_v56  ;;  %v555_v1 = vadd.f32 %v2598_v5, %v420_v57  ;;  %v422_v3 = vmul.f32 %v2594_v2, %v287_v53  ;;  %v680_v6 = vmax.f32 %v552_v60, 0.0  ;;  %v301_v53 = vld [vmem:[%s2582_s19 + $0x2a8] sm:$0xff] }
  0xab   : > { %2116 = vst [vmem:[%s2632_s26 + $0xf8] sm:$0xff] %v1924_v59   ;;  %v681_v7 = vmax.f32 %v553_v61, 0.0  ;;  %v556_v8 = vadd.f32 %v2598_v5, %v421_v62  ;;  %v423_v9 = vmul.f32 %v2594_v2, %v288_v58  ;;  %v1929_v12 = vpack.c.bf16 %v679_v63, %v678_v55  ;;  %v302_v58 = vld [vmem:[%s2582_s19 + $0x2b0] sm:$0xff]  ;;  %v303_v63 = vld [vmem:[%s2582_s19 + $0x2b8] sm:$0xff] }
  0xac   : > { %v682_v13 = vmax.f32 %v554_v0, 0.0  ;;  %v683_v14 = vmax.f32 %v555_v1, 0.0  ;;  %v557_v15 = vadd.f32 %v2598_v5, %v422_v3  ;;  %v424_v20 = vmul.f32 %v2594_v2, %v289_v4 }
  0xad   : > { %v1934_v18 = vpack.c.bf16 %v681_v7, %v680_v6  ;;  %v684_v19 = vmax.f32 %v556_v8, 0.0  ;;  %v558_v21 = vadd.f32 %v2598_v5, %v423_v9  ;;  %2117 = vst [vmem:[%s2632_s26 + $0x100] sm:$0xff] %v1929_v12   ;;  %v425_v25 = vmul.f32 %v2594_v2, %v290_v10  ;;  %v304_v6 = vld [vmem:[%s2582_s19 + $0x2c0] sm:$0xff] }
  0xae   : > { %v1939_v23 = vpack.c.bf16 %v683_v14, %v682_v13  ;;  %v685_v24 = vmax.f32 %v557_v15, 0.0  ;;  %v426_v26 = vmul.f32 %v2594_v2, %v291_v11  ;;  %v559_v28 = vadd.f32 %v2598_v5, %v424_v20  ;;  %v305_v15 = vld [vmem:[%s2582_s19 + $0x2c8] sm:$0xff]  ;;  %v306_v20 = vld [vmem:[%s2582_s19 + $0x2d0] sm:$0xff] }
  0xaf   : > { %2118 = vst [vmem:[%s2632_s26 + $0x108] sm:$0xff] %v1934_v18   ;;  %v686_v29 = vmax.f32 %v558_v21, 0.0  ;;  %v427_v30 = vmul.f32 %v2594_v2, %v292_v16  ;;  %v428_v31 = vmul.f32 %v2594_v2, %v293_v17  ;;  %v560_v34 = vadd.f32 %v2598_v5, %v425_v25  ;;  %v307_v21 = vld [vmem:[%s2582_s19 + $0x2d8] sm:$0xff] }
  0xb0   : > { %2119 = vst [vmem:[%s2632_s26 + $0x110] sm:$0xff] %v1939_v23   ;;  %v1944_v33 = vpack.c.bf16 %v685_v24, %v684_v19  ;;  %v561_v35 = vadd.f32 %v2598_v5, %v426_v26  ;;  %v429_v36 = vmul.f32 %v2594_v2, %v294_v22  ;;  %v687_v37 = vmax.f32 %v559_v28, 0.0  ;;  %v308_v26 = vld [vmem:[%s2582_s19 + $0x2e0] sm:$0xff] }
  0xb1   : > { %v562_v38 = vadd.f32 %v2598_v5, %v427_v30  ;;  %v563_v39 = vadd.f32 %v2598_v5, %v428_v31  ;;  %v430_v40 = vmul.f32 %v2594_v2, %v295_v27  ;;  %v688_v42 = vmax.f32 %v560_v34, 0.0  ;;  %v309_v27 = vld [vmem:[%s2582_s19 + $0x2e8] sm:$0xff] }
  0xb2   : > { %2120 = vst [vmem:[%s2632_s26 + $0x118] sm:$0xff] %v1944_v33   ;;  %v689_v43 = vmax.f32 %v561_v35, 0.0  ;;  %v564_v44 = vadd.f32 %v2598_v5, %v429_v36  ;;  %v431_v45 = vmul.f32 %v2594_v2, %v296_v32  ;;  %v1949_v48 = vpack.c.bf16 %v687_v37, %v686_v29  ;;  %v310_v32 = vld [vmem:[%s2582_s19 + $0x2f0] sm:$0xff]  ;;  %v311_v37 = vld [vmem:[%s2582_s19 + $0x2f8] sm:$0xff] }
  0xb3   : > { %v690_v49 = vmax.f32 %v562_v38, 0.0  ;;  %v691_v50 = vmax.f32 %v563_v39, 0.0  ;;  %v565_v51 = vadd.f32 %v2598_v5, %v430_v40  ;;  %v432_v56 = vmul.f32 %v2594_v2, %v297_v41 }
  0xb4   : > { %v1954_v54 = vpack.c.bf16 %v689_v43, %v688_v42  ;;  %v692_v55 = vmax.f32 %v564_v44, 0.0  ;;  %v566_v57 = vadd.f32 %v2598_v5, %v431_v45  ;;  %2121 = vst [vmem:[%s2632_s26 + $0x120] sm:$0xff] %v1949_v48   ;;  %v433_v61 = vmul.f32 %v2594_v2, %v298_v46  ;;  %v312_v42 = vld [vmem:[%s2582_s19 + $0x300] sm:$0xff] }
  0xb5   : > { %v1959_v59 = vpack.c.bf16 %v691_v50, %v690_v49  ;;  %v693_v60 = vmax.f32 %v565_v51, 0.0  ;;  %v434_v62 = vmul.f32 %v2594_v2, %v299_v47  ;;  %v567_v0 = vadd.f32 %v2598_v5, %v432_v56  ;;  %v313_v51 = vld [vmem:[%s2582_s19 + $0x308] sm:$0xff]  ;;  %v314_v56 = vld [vmem:[%s2582_s19 + $0x310] sm:$0xff] }
  0xb6   : > { %2122 = vst [vmem:[%s2632_s26 + $0x128] sm:$0xff] %v1954_v54   ;;  %v694_v1 = vmax.f32 %v566_v57, 0.0  ;;  %v435_v3 = vmul.f32 %v2594_v2, %v300_v52  ;;  %v436_v4 = vmul.f32 %v2594_v2, %v301_v53  ;;  %v568_v8 = vadd.f32 %v2598_v5, %v433_v61  ;;  %v315_v57 = vld [vmem:[%s2582_s19 + $0x318] sm:$0xff] }
  0xb7   : > { %2123 = vst [vmem:[%s2632_s26 + $0x130] sm:$0xff] %v1959_v59   ;;  %v1964_v7 = vpack.c.bf16 %v693_v60, %v692_v55  ;;  %v569_v9 = vadd.f32 %v2598_v5, %v434_v62  ;;  %v437_v10 = vmul.f32 %v2594_v2, %v302_v58  ;;  %v695_v11 = vmax.f32 %v567_v0, 0.0  ;;  %v316_v62 = vld [vmem:[%s2582_s19 + $0x320] sm:$0xff] }
  0xb8   : > { %v570_v12 = vadd.f32 %v2598_v5, %v435_v3  ;;  %v571_v13 = vadd.f32 %v2598_v5, %v436_v4  ;;  %v438_v14 = vmul.f32 %v2594_v2, %v303_v63  ;;  %v696_v16 = vmax.f32 %v568_v8, 0.0  ;;  %v317_v63 = vld [vmem:[%s2582_s19 + $0x328] sm:$0xff] }
  0xb9   : > { %2124 = vst [vmem:[%s2632_s26 + $0x138] sm:$0xff] %v1964_v7   ;;  %v697_v17 = vmax.f32 %v569_v9, 0.0  ;;  %v572_v18 = vadd.f32 %v2598_v5, %v437_v10  ;;  %v439_v19 = vmul.f32 %v2594_v2, %v304_v6  ;;  %v1969_v22 = vpack.c.bf16 %v695_v11, %v694_v1  ;;  %v318_v6 = vld [vmem:[%s2582_s19 + $0x330] sm:$0xff]  ;;  %v319_v11 = vld [vmem:[%s2582_s19 + $0x338] sm:$0xff] }
  0xba   : > { %v698_v23 = vmax.f32 %v570_v12, 0.0  ;;  %v699_v24 = vmax.f32 %v571_v13, 0.0  ;;  %v573_v25 = vadd.f32 %v2598_v5, %v438_v14  ;;  %v440_v30 = vmul.f32 %v2594_v2, %v305_v15 }
  0xbb   : > { %v1974_v28 = vpack.c.bf16 %v697_v17, %v696_v16  ;;  %v700_v29 = vmax.f32 %v572_v18, 0.0  ;;  %v574_v31 = vadd.f32 %v2598_v5, %v439_v19  ;;  %2125 = vst [vmem:[%s2632_s26 + $0x140] sm:$0xff] %v1969_v22   ;;  %v441_v35 = vmul.f32 %v2594_v2, %v306_v20  ;;  %v320_v16 = vld [vmem:[%s2582_s19 + $0x340] sm:$0xff] }
  0xbc   : > { %v1979_v33 = vpack.c.bf16 %v699_v24, %v698_v23  ;;  %v701_v34 = vmax.f32 %v573_v25, 0.0  ;;  %v442_v36 = vmul.f32 %v2594_v2, %v307_v21  ;;  %v575_v38 = vadd.f32 %v2598_v5, %v440_v30  ;;  %v321_v25 = vld [vmem:[%s2582_s19 + $0x348] sm:$0xff]  ;;  %v322_v30 = vld [vmem:[%s2582_s19 + $0x350] sm:$0xff] }
  0xbd   : > { %2126 = vst [vmem:[%s2632_s26 + $0x148] sm:$0xff] %v1974_v28   ;;  %v702_v39 = vmax.f32 %v574_v31, 0.0  ;;  %v443_v40 = vmul.f32 %v2594_v2, %v308_v26  ;;  %v444_v41 = vmul.f32 %v2594_v2, %v309_v27  ;;  %v576_v44 = vadd.f32 %v2598_v5, %v441_v35  ;;  %v323_v31 = vld [vmem:[%s2582_s19 + $0x358] sm:$0xff]  ;;  %v2965_v35 = vld [vmem:[#allocation7] ss:$0 sm:$0xff] }
  0xbe   : > { %2127 = vst [vmem:[%s2632_s26 + $0x150] sm:$0xff] %v1979_v33   ;;  %v1984_v43 = vpack.c.bf16 %v701_v34, %v700_v29  ;;  %v577_v45 = vadd.f32 %v2598_v5, %v442_v36  ;;  %v445_v46 = vmul.f32 %v2594_v2, %v310_v32  ;;  %v703_v47 = vmax.f32 %v575_v38, 0.0  ;;  %v325_v38 = vld [vmem:[%s2582_s19 + $0x368] sm:$0xff] }
  0xbf   : > { %v578_v48 = vadd.f32 %v2598_v5, %v443_v40  ;;  %v579_v49 = vadd.f32 %v2598_v5, %v444_v41  ;;  %v446_v50 = vmul.f32 %v2594_v2, %v311_v37  ;;  %v704_v52 = vmax.f32 %v576_v44, 0.0  ;;  %v324_v37 = vld [vmem:[%s2582_s19 + $0x360] sm:$0xff] }
  0xc0   : > { %2128 = vst [vmem:[%s2632_s26 + $0x158] sm:$0xff] %v1984_v43   ;;  %v705_v53 = vmax.f32 %v577_v45, 0.0  ;;  %v580_v54 = vadd.f32 %v2598_v5, %v445_v46  ;;  %v447_v55 = vmul.f32 %v2594_v2, %v312_v42  ;;  %v1989_v58 = vpack.c.bf16 %v703_v47, %v702_v39  ;;  %v326_v42 = vld [vmem:[%s2582_s19 + $0x370] sm:$0xff]  ;;  %v327_v47 = vld [vmem:[%s2582_s19 + $0x378] sm:$0xff] }
  0xc1   : > { %v706_v59 = vmax.f32 %v578_v48, 0.0  ;;  %v707_v60 = vmax.f32 %v579_v49, 0.0  ;;  %v581_v61 = vadd.f32 %v2598_v5, %v446_v50  ;;  %v448_v3 = vmul.f32 %v2594_v2, %v313_v51 }
  0xc2   : > { %v1994_v0 = vpack.c.bf16 %v705_v53, %v704_v52  ;;  %v708_v1 = vmax.f32 %v580_v54, 0.0  ;;  %v582_v4 = vadd.f32 %v2598_v5, %v447_v55  ;;  %2129 = vst [vmem:[%s2632_s26 + $0x160] sm:$0xff] %v1989_v58   ;;  %v449_v9 = vmul.f32 %v2594_v2, %v314_v56  ;;  %v328_v52 = vld [vmem:[%s2582_s19 + $0x380] sm:$0xff] }
  0xc3   : > { %v1999_v7 = vpack.c.bf16 %v707_v60, %v706_v59  ;;  %v709_v8 = vmax.f32 %v581_v61, 0.0  ;;  %v450_v10 = vmul.f32 %v2594_v2, %v315_v57  ;;  %v583_v12 = vadd.f32 %v2598_v5, %v448_v3  ;;  %v329_v61 = vld [vmem:[%s2582_s19 + $0x388] sm:$0xff]  ;;  %v330_v3 = vld [vmem:[%s2582_s19 + $0x390] sm:$0xff] }
  0xc4   : > { %2130 = vst [vmem:[%s2632_s26 + $0x168] sm:$0xff] %v1994_v0   ;;  %v710_v13 = vmax.f32 %v582_v4, 0.0  ;;  %v451_v14 = vmul.f32 %v2594_v2, %v316_v62  ;;  %v452_v15 = vmul.f32 %v2594_v2, %v317_v63  ;;  %v584_v18 = vadd.f32 %v2598_v5, %v449_v9  ;;  %v331_v4 = vld [vmem:[%s2582_s19 + $0x398] sm:$0xff] }
  0xc5   : > { %2131 = vst [vmem:[%s2632_s26 + $0x170] sm:$0xff] %v1999_v7   ;;  %v2004_v17 = vpack.c.bf16 %v709_v8, %v708_v1  ;;  %v585_v19 = vadd.f32 %v2598_v5, %v450_v10  ;;  %v453_v20 = vmul.f32 %v2594_v2, %v318_v6  ;;  %v711_v21 = vmax.f32 %v583_v12, 0.0  ;;  %v332_v10 = vld [vmem:[%s2582_s19 + $0x3a0] sm:$0xff] }
  0xc6   : > { %v586_v22 = vadd.f32 %v2598_v5, %v451_v14  ;;  %v587_v23 = vadd.f32 %v2598_v5, %v452_v15  ;;  %v454_v24 = vmul.f32 %v2594_v2, %v319_v11  ;;  %v712_v26 = vmax.f32 %v584_v18, 0.0  ;;  %v333_v11 = vld [vmem:[%s2582_s19 + $0x3a8] sm:$0xff] }
  0xc7   : > { %2132 = vst [vmem:[%s2632_s26 + $0x178] sm:$0xff] %v2004_v17   ;;  %v713_v27 = vmax.f32 %v585_v19, 0.0  ;;  %v588_v28 = vadd.f32 %v2598_v5, %v453_v20  ;;  %v455_v29 = vmul.f32 %v2594_v2, %v320_v16  ;;  %v2009_v32 = vpack.c.bf16 %v711_v21, %v710_v13  ;;  %v2970_v5 = vld [vmem:[#allocation5] ss:$0 sm:$0xff]  ;;  %v334_v16 = vld [vmem:[%s2582_s19 + $0x3b0] sm:$0xff]  ;;  %v335_v21 = vld [vmem:[%s2582_s19 + $0x3b8] sm:$0xff] }
  0xc8   : > { %v714_v33 = vmax.f32 %v586_v22, 0.0  ;;  %v715_v34 = vmax.f32 %v587_v23, 0.0  ;;  %v589_v36 = vadd.f32 %v2965_v35, %v454_v24  ;;  %v456_v2 = vmul.f32 %v2970_v5, %v321_v25 }
  0xc9   : > { %v2014_v39 = vpack.c.bf16 %v713_v27, %v712_v26  ;;  %v716_v40 = vmax.f32 %v588_v28, 0.0  ;;  %v590_v41 = vadd.f32 %v2965_v35, %v455_v29  ;;  %2133 = vst [vmem:[%s2632_s26 + $0x180] sm:$0xff] %v2009_v32   ;;  %v457_v45 = vmul.f32 %v2970_v5, %v322_v30  ;;  %v336_v26 = vld [vmem:[%s2582_s19 + $0x3c0] sm:$0xff] }
  0xca   : > { %v2019_v43 = vpack.c.bf16 %v715_v34, %v714_v33  ;;  %v717_v44 = vmax.f32 %v589_v36, 0.0  ;;  %v458_v46 = vmul.f32 %v2970_v5, %v323_v31  ;;  %v591_v48 = vadd.f32 %v2965_v35, %v456_v2  ;;  %v337_v36 = vld [vmem:[%s2582_s19 + $0x3c8] sm:$0xff]  ;;  %v338_v2 = vld [vmem:[%s2582_s19 + $0x3d0] sm:$0xff] }
  0xcb   : > { %2134 = vst [vmem:[%s2632_s26 + $0x188] sm:$0xff] %v2014_v39   ;;  %v718_v49 = vmax.f32 %v590_v41, 0.0  ;;  %v459_v50 = vmul.f32 %v2970_v5, %v324_v37  ;;  %v460_v51 = vmul.f32 %v2970_v5, %v325_v38  ;;  %v592_v54 = vadd.f32 %v2965_v35, %v457_v45  ;;  %v339_v41 = vld [vmem:[%s2582_s19 + $0x3d8] sm:$0xff] }
  0xcc   : > { %2135 = vst [vmem:[%s2632_s26 + $0x190] sm:$0xff] %v2019_v43   ;;  %v2024_v53 = vpack.c.bf16 %v717_v44, %v716_v40  ;;  %v593_v55 = vadd.f32 %v2965_v35, %v458_v46  ;;  %v461_v56 = vmul.f32 %v2970_v5, %v326_v42  ;;  %v719_v57 = vmax.f32 %v591_v48, 0.0  ;;  %v340_v46 = vld [vmem:[%s2582_s19 + $0x3e0] sm:$0xff] }
  0xcd   : > { %v594_v58 = vadd.f32 %v2965_v35, %v459_v50  ;;  %v595_v59 = vadd.f32 %v2965_v35, %v460_v51  ;;  %v462_v60 = vmul.f32 %v2970_v5, %v327_v47  ;;  %v720_v62 = vmax.f32 %v592_v54, 0.0  ;;  %v341_v47 = vld [vmem:[%s2582_s19 + $0x3e8] sm:$0xff] }
  0xce   : > { %2136 = vst [vmem:[%s2632_s26 + $0x198] sm:$0xff] %v2024_v53   ;;  %v721_v63 = vmax.f32 %v593_v55, 0.0  ;;  %v596_v0 = vadd.f32 %v2965_v35, %v461_v56  ;;  %v463_v1 = vmul.f32 %v2970_v5, %v328_v52  ;;  %v2029_v6 = vpack.c.bf16 %v719_v57, %v718_v49  ;;  %v342_v52 = vld [vmem:[%s2582_s19 + $0x3f0] sm:$0xff]  ;;  %v343_v57 = vld [vmem:[%s2582_s19 + $0x3f8] sm:$0xff] }
  0xcf   : > { %v722_v7 = vmax.f32 %v594_v58, 0.0  ;;  %v723_v8 = vmax.f32 %v595_v59, 0.0  ;;  %v597_v9 = vadd.f32 %v2965_v35, %v462_v60  ;;  %v464_v14 = vmul.f32 %v2970_v5, %v329_v61 }
  0xd0   : > { %v2034_v12 = vpack.c.bf16 %v721_v63, %v720_v62  ;;  %v724_v13 = vmax.f32 %v596_v0, 0.0  ;;  %v598_v15 = vadd.f32 %v2965_v35, %v463_v1  ;;  %2137 = vst [vmem:[%s2632_s26 + $0x1a0] sm:$0xff] %v2029_v6   ;;  %v465_v19 = vmul.f32 %v2970_v5, %v330_v3 }
  0xd1   : > { %v2039_v17 = vpack.c.bf16 %v723_v8, %v722_v7  ;;  %v725_v18 = vmax.f32 %v597_v9, 0.0  ;;  %v466_v20 = vmul.f32 %v2970_v5, %v331_v4  ;;  %v599_v22 = vadd.f32 %v2965_v35, %v464_v14 }
  0xd2   : > { %2138 = vst [vmem:[%s2632_s26 + $0x1a8] sm:$0xff] %v2034_v12   ;;  %v726_v23 = vmax.f32 %v598_v15, 0.0  ;;  %v467_v24 = vmul.f32 %v2970_v5, %v332_v10  ;;  %v468_v25 = vmul.f32 %v2970_v5, %v333_v11  ;;  %v600_v28 = vadd.f32 %v2965_v35, %v465_v19 }
  0xd3   : > { %2139 = vst [vmem:[%s2632_s26 + $0x1b0] sm:$0xff] %v2039_v17   ;;  %v2044_v27 = vpack.c.bf16 %v725_v18, %v724_v13  ;;  %v601_v29 = vadd.f32 %v2965_v35, %v466_v20  ;;  %v469_v30 = vmul.f32 %v2970_v5, %v334_v16  ;;  %v727_v31 = vmax.f32 %v599_v22, 0.0 }
  0xd4   : > { %v602_v32 = vadd.f32 %v2965_v35, %v467_v24  ;;  %v603_v33 = vadd.f32 %v2965_v35, %v468_v25  ;;  %v470_v34 = vmul.f32 %v2970_v5, %v335_v21  ;;  %v728_v37 = vmax.f32 %v600_v28, 0.0 }
  0xd5   : > { %2140 = vst [vmem:[%s2632_s26 + $0x1b8] sm:$0xff] %v2044_v27   ;;  %v729_v38 = vmax.f32 %v601_v29, 0.0  ;;  %v604_v39 = vadd.f32 %v2965_v35, %v469_v30  ;;  %v471_v40 = vmul.f32 %v2970_v5, %v336_v26  ;;  %v2049_v42 = vpack.c.bf16 %v727_v31, %v726_v23 }
  0xd6   : > { %v730_v43 = vmax.f32 %v602_v32, 0.0  ;;  %v731_v44 = vmax.f32 %v603_v33, 0.0  ;;  %v605_v45 = vadd.f32 %v2965_v35, %v470_v34  ;;  %v472_v50 = vmul.f32 %v2970_v5, %v337_v36 }
  0xd7   : > { %v2054_v48 = vpack.c.bf16 %v729_v38, %v728_v37  ;;  %v732_v49 = vmax.f32 %v604_v39, 0.0  ;;  %v606_v51 = vadd.f32 %v2965_v35, %v471_v40  ;;  %2141 = vst [vmem:[%s2632_s26 + $0x1c0] sm:$0xff] %v2049_v42   ;;  %v473_v55 = vmul.f32 %v2970_v5, %v338_v2 }
  0xd8   : > { %v2059_v53 = vpack.c.bf16 %v731_v44, %v730_v43  ;;  %v733_v54 = vmax.f32 %v605_v45, 0.0  ;;  %v474_v56 = vmul.f32 %v2970_v5, %v339_v41  ;;  %v607_v58 = vadd.f32 %v2965_v35, %v472_v50 }
  0xd9   : > { %2142 = vst [vmem:[%s2632_s26 + $0x1c8] sm:$0xff] %v2054_v48   ;;  %v734_v59 = vmax.f32 %v606_v51, 0.0  ;;  %v475_v60 = vmul.f32 %v2970_v5, %v340_v46  ;;  %v476_v61 = vmul.f32 %v2970_v5, %v341_v47  ;;  %v608_v63 = vadd.f32 %v2965_v35, %v473_v55 }
  0xda   : > { %2143 = vst [vmem:[%s2632_s26 + $0x1d0] sm:$0xff] %v2059_v53   ;;  %v2064_v62 = vpack.c.bf16 %v733_v54, %v732_v49  ;;  %v609_v0 = vadd.f32 %v2965_v35, %v474_v56  ;;  %v477_v1 = vmul.f32 %v2970_v5, %v342_v52  ;;  %v735_v3 = vmax.f32 %v607_v58, 0.0 }
  0xdb   : > { %v610_v4 = vadd.f32 %v2965_v35, %v475_v60  ;;  %v611_v6 = vadd.f32 %v2965_v35, %v476_v61  ;;  %v478_v7 = vmul.f32 %v2970_v5, %v343_v57  ;;  %v736_v8 = vmax.f32 %v608_v63, 0.0 }
  0xdc   : > { %2144 = vst [vmem:[%s2632_s26 + $0x1d8] sm:$0xff] %v2064_v62   ;;  %v737_v9 = vmax.f32 %v609_v0, 0.0  ;;  %v612_v10 = vadd.f32 %v2965_v35, %v477_v1  ;;  %v2069_v11 = vpack.c.bf16 %v735_v3, %v734_v59 }
  0xdd   : > { %v738_v12 = vmax.f32 %v610_v4, 0.0  ;;  %v739_v13 = vmax.f32 %v611_v6, 0.0  ;;  %v613_v14 = vadd.f32 %v2965_v35, %v478_v7 }
  0xde   : > { %v2074_v15 = vpack.c.bf16 %v737_v9, %v736_v8  ;;  %v740_v16 = vmax.f32 %v612_v10, 0.0  ;;  %2145 = vst [vmem:[%s2632_s26 + $0x1e0] sm:$0xff] %v2069_v11  }
  0xdf   : > { %v2079_v5 = vpack.c.bf16 %v739_v13, %v738_v12  ;;  %v741_v17 = vmax.f32 %v613_v14, 0.0 }
  0xe0   : > { %2146 = vst [vmem:[%s2632_s26 + $0x1e8] sm:$0xff] %v2074_v15  }
  0xe1   : > { %2147 = vst [vmem:[%s2632_s26 + $0x1f0] sm:$0xff] %v2079_v5   ;;  %v2084_v35 = vpack.c.bf16 %v741_v17, %v740_v16 }
  0xe3   : > { %2148 = vst [vmem:[%s2632_s26 + $0x1f8] sm:$0xff] %v2084_v35  }
  0xe4   : > { %2321 = shalt.err (!%p2318_p6)
}
  0xe5   : > { %s2322_s7 = scalar_lea.hbm %s3056_s20, 8192  ;;  %s2326_s5 = scalar_lea.hbm %s3107_s3, 16384 }
  0xe6   : > { %p2323_p12 = scmp.ne.s32.totalorder %s3056_s20, %s2322_s7  ;;  %p2327_p11 = scmp.lt.u32.totalorder %s3056_s20, %s3107_s3 }
  0xe7   : > { %p2328_p7 = scmp.lt.u32.totalorder %s2326_s5, %s2322_s7  ;;  %p2330_p8 = scmp.lt.u32.totalorder %s2322_s7, %s3056_s20 }
  0xe8   : > { %p2324_p13 = pnand %p2323_p12, %p3126_p4 }
  0xe9   : > { %p2329_p3 = por %p2328_p7, %p2327_p11 }
  0xea   : > { %p2325_p1 = pneg %p2324_p13 }
  0xeb   : > { %p2331_p5 = por %p2330_p8, %p2329_p3 }
  0xed   : > { %p2332_p10 = pnand %p2331_p5, %p2325_p1 }
  0xef   : > { %2335 = shalt.err (!%p2332_p10)
}
  0xf0   : > { %s2386_s23 = smov 64   ;;  %s2387_s26 = smov 4  }
  0xf1   : > { %2159 = dma.vmem_to_hbm [thread:$0]  (%p3126_p4), %s3058_s9, 8192, %s3056_s20, %s1383_s16, %s2386_s23, %s2386_s23, %s2387_s26  }
  0xf2 PF: > { %s1411_s30 = sand.u32 1, %s2366_s12   ;;  %p3127_p2 = scmp.ne.s32.totalorder %s3116_s25, 0 }
  0xf3   : > { %p3128_p0 = scmp.ge.s32.totalorder %s2378_s15, 2  ;;  %s1412_s10 = scalar_lea.sflag [#allocation4], %s1411_s30 }
  0xf5   : > { %p2173_p9 = pnand %p3128_p0, %p3127_p2 }
  0xf7   : > { %2361 = dma.done.wait (!%p2173_p9), %s1412_s10, 8192  }
  0xf8   : > { %2363 = vsyncadd (!%p2173_p9), %s1412_s10, 4294959104  ;;  %p17_p6 = scmp.ge.s32.totalorder %s2433_s18, 4   ;;  %s3129_s12 = smov %s2370_s13 }
  0xf9   : > { %s3130_s13 = smov %s2374_s14  ;;  %s3131_s14 = smov %s2445_s21 }
  0xfa   : > { %s3132_s15 = smov %s2433_s18  ;;  %19 = sbr.rel (!%p17_p6) target bundleno = 6 (0x6), region = 85 }
 0x101   :  { %1417 = vsyncpa [#allocation3], 1 }
 0x102   :  { %1419 = vsyncpa [#allocation3 + $0x1], 1 }
 0x103   :  { %1420 = vsyncpa [#allocation6], 1 }
 0x104   :  { %1421 = vsyncpa [#allocation4], 1 }
 0x105   :  { %1423 = vsyncpa [#allocation4 + $0x1], 1 }

// kernel: generator_forward.17
= control target key start
LH: loop header
LB: loop body
LE: loop exit
PB: predicated region body
PF: predicated region fallthrough
CT: control target
= control target key end

     0   :  { %11 = vsyncpa [#allocation4], 0  ;;  %s2388_s0 = inlined_call_operand.hbm [shape: bf16[8192,128], index: 0, kind: input, shape index: {}]   ;;  %s2389_s1 = inlined_call_operand.hbm [shape: bf16[128,128], index: 1, kind: input, shape index: {}]   ;;  %s2390_s2 = inlined_call_operand.hbm [shape: f32[1,128], index: 2, kind: input, shape index: {}]   ;;  %s2391_s3 = inlined_call_operand.hbm [shape: f32[8192,128], index: 3, kind: output, shape index: {0}]   ;;  %s2392_s4 = inlined_call_operand.hbm [shape: f32[32,1,128], index: 4, kind: output, shape index: {1}]   ;;  %s2393_s5 = inlined_call_operand.hbm [shape: f32[32,1,128], index: 5, kind: output, shape index: {2}]  }
   0x1   :  { %13 = vsyncpa [#allocation4 + $0x1], 0 }
   0x2   :  { %14 = vsyncpa [#allocation7], 0 }
   0x3   :  { %15 = vsyncpa [#allocation5], 0 }
   0x4   :  { %17 = vsyncpa [#allocation5 + $0x1], 0 }
   0x5   :  { %18 = vsyncpa [#allocation11], 0 }
   0x6   :  { %20 = vsyncpa [#allocation11 + $0x1], 0  ;;  %s1881_s18 = smov 0   ;;  %s1883_s19 = smov 0  }
   0x7   :  { %s1885_s20 = smov 0   ;;  %s1887_s21 = smov 0  }
   0x8   :  { %s1889_s22 = smov 0   ;;  %s1891_s23 = smov 0  }
   0x9 LB: > { %s1912_s24 = sadd.s32 4294967295, %s1839_s23   ;;  %s2397_s25 = sadd.s32 4294967294, %s1839_s23   ;;  %s1839_s23 = sphi %s1891_s23, %s26_s23   ;;  %s1835_s22 = sphi %s1889_s22, %s2417_s22   ;;  %s1831_s21 = sphi %s1887_s21, %s2416_s21   ;;  %s1827_s20 = sphi %s1885_s20, %s2415_s20   ;;  %s1823_s19 = sphi %s1883_s19, %s2414_s19   ;;  %s1819_s18 = sphi %s1881_s18, %s2413_s18  }
   0xa   : > { %p67_p0 = scmp.ne.s32.totalorder %s1823_s19, %s1819_s18  ;;  %p2394_p1 = scmp.eq.s32.totalorder %s1912_s24, 0 }
   0xb   : > { %p153_p3 = scmp.eq.s32.totalorder %s2397_s25, 31  ;;  %p1288_p5 = scmp.ge.s32.totalorder %s1839_s23, 1 }
   0xc   : > { %p1923_p4 = por %p2394_p1, %p67_p0  ;;  %p216_p7 = scmp.lt.s32.totalorder %s1839_s23, 33 }
   0xd   : > { %p1928_p6 = por %p153_p3, %p67_p0  ;;  %s1841_s29 = smov [#allocation6]  }
   0xe   : > { %s2399_s26 = scalar_select %p1923_p4, 1, 0 }
   0xf   : > { %s2400_s27 = scalar_select %p1928_p6, 1, 0 }
  0x10   : > { %p1933_p8 = pnand %p1288_p5, %p216_p7  ;;  %s232_s30 = sshll.u32 %s1841_s29, 4  ;;  %s233_s30 = int_to_ptr.vmem [resolvable:$true] %s232_s30 }
  0x11   : > { %s1842_s7 = smov [#allocation8]   ;;  %s1607_s11 = scalar_lea.hbm %s2389_s1, 1024 }
  0x12   : > { %s2401_s28 = scalar_select %p1933_p8, 1, 0 }
  0x13   : > { %p1438_p9 = pneg %p1933_p8  ;;  %s248_s8 = sshll.u32 %s1842_s7, 4  ;;  %s1945_s8 = int_to_ptr.vmem [resolvable:$true] %s248_s8 }
  0x14   : > { %p1608_p11 = scmp.ne.s32.totalorder %s2389_s1, %s1607_s11  ;;  %p1614_p3 = scmp.lt.u32.totalorder %s1607_s11, %s2389_s1 }
  0x15   : > { %p1941_p10 = pnand %p1438_p9, %p2394_p1 }
  0x17   : > { %p1609_p12 = pneg %p1941_p10 }
  0x19   : > { %p1610_p13 = pnand %p1609_p12, %p1608_p11 }
  0x1b   : > { %p1611_p0 = pneg %p1610_p13 }
  0x1d   : > { %p1616_p5 = pnand %p1614_p3, %p1611_p0 }
  0x1f   : > { %1619 = shalt.err (!%p1616_p5)
}
  0x20   : > { %s1620_s16 = scalar_lea.vmem %s233_s30, 1024  ;;  %p1628_p2 = scmp.lt.s32.totalorder %s233_s30, %s233_s30 }
  0x21   : > { %p1621_p7 = scmp.ne.s32.totalorder %s233_s30, %s1620_s16  ;;  %p1629_p6 = scmp.lt.s32.totalorder %s1620_s16, %s1620_s16 }
  0x23   : > { %p1623_p9 = pnand %p1621_p7, %p1609_p12  ;;  %p1630_p4 = por %p1629_p6, %p1628_p2 }
  0x25   : > { %p1624_p1 = pneg %p1623_p9 }
  0x27   : > { %p1631_p8 = pnand %p1630_p4, %p1624_p1 }
  0x29   : > { %1634 = shalt.err (!%p1631_p8)
}
  0x2a   : > { %s2398_s17 = smov 64   ;;  %s1844_s29 = smov 4  }
  0x2b   : > { %1441 = dma.hbm_to_vmem [thread:$0]  (!%p1941_p10), %s2389_s1, 1024, %s233_s30, [#allocation7], %s2398_s17, %s2398_s17, %s1844_s29  }
  0x2c   : > { %s1635_s12 = scalar_lea.hbm %s2390_s2, 16 }
  0x2d   : > { %p1636_p1 = scmp.ne.s32.totalorder %s2390_s2, %s1635_s12  ;;  %p1642_p6 = scmp.lt.u32.totalorder %s1635_s12, %s2390_s2 }
  0x2f   : > { %p1638_p2 = pnand %p1636_p1, %p1609_p12 }
  0x31   : > { %p1639_p4 = pneg %p1638_p2 }
  0x33   : > { %p1644_p8 = pnand %p1642_p6, %p1639_p4 }
  0x35   : > { %1647 = shalt.err (!%p1644_p8)
}
  0x36   : > { %s1648_s30 = scalar_lea.vmem %s1945_s8, 16  ;;  %s1655_s7 = scalar_lea.vmem %s1945_s8, 32 }
  0x37   : > { %p1649_p11 = scmp.ne.s32.totalorder %s1945_s8, %s1648_s30  ;;  %p1656_p3 = scmp.lt.s32.totalorder %s1945_s8, %s1945_s8 }
  0x38   : > { %p1657_p5 = scmp.lt.s32.totalorder %s1655_s7, %s1648_s30 }
  0x39   : > { %p1651_p13 = pnand %p1649_p11, %p1609_p12 }
  0x3a   : > { %p1658_p7 = por %p1657_p5, %p1656_p3 }
  0x3b   : > { %p1652_p0 = pneg %p1651_p13 }
  0x3d   : > { %p1659_p9 = pnand %p1658_p7, %p1652_p0 }
  0x3f   : > { %1662 = shalt.err (!%p1659_p9)
}
  0x40   : > { %1444 = dma.hbm_to_vmem [thread:$0]  (!%p1941_p10), %s2390_s2, 16, %s1945_s8, [#allocation7]  }
  0x41   : > { %s45_s11 = sadd.s32 1, %s1835_s22  ;;  %s54_s12 = sadd.s32 1, %s1827_s20 }
  0x42   : > { %p47_p12 = scmp.ge.s32.totalorder %s45_s11, 32  ;;  %p61_p1 = scmp.ne.s32.totalorder %s1827_s20, %s1823_s19 }
  0x43   : > { %p62_p2 = scmp.eq.s32.totalorder %s1839_s23, 0  ;;  %p1461_p4 = scmp.lt.s32.totalorder %s1839_s23, 32 }
  0x44   : > { %s2419_s11 = smov (%p47_p12, %s45_s11), 0  ;;  %p2403_p8 = scmp.eq.s32.totalorder %s1912_s24, 31 }
  0x45   : > { %p63_p6 = por %p62_p2, %p61_p1  ;;  %s49_s13 = ssub.s32 %s1835_s22, %s2419_s11 }
  0x46   : > { %p2008_p11 = por %p2403_p8, %p61_p1  ;;  %s259_s14 = sand.u32 1, %s1827_s20  }
  0x47   : > { %p52_p13 = scmp.eq.s32.totalorder %s49_s13, 0  ;;  %s1292_s8 = sshll.u32 %s259_s14, 7 }
  0x48   : > { %s1332_s15 = sshll.u32 %s1835_s22, 11  ;;  %s263_s10 = scalar_lea.vmem [#allocation3], %s1292_s8 }
  0x49   : > { %s2017_s16 = scalar_select %p52_p13, %s1827_s20, %s54_s12  }
  0x4a   : > { %s2022_s9 = scalar_lea.hbm %s2388_s0, %s1332_s15  ;;  %s271_s25 = sshll.u32 %s263_s10, 4  ;;  %s2030_s25 = int_to_ptr.vmem [resolvable:$true] %s271_s25 }
  0x4b   : > { %p2026_p10 = pnand %p1461_p4, %p63_p6  ;;  %s2032_s12 = scalar_lea.sflag [#allocation4], %s259_s14 }
  0x4c   : > { %s1663_s13 = scalar_lea.hbm %s2022_s9, 2048  ;;  %s1668_s30 = scalar_lea.hbm %s2388_s0, 65536 }
  0x4d   : > { %p1664_p0 = scmp.ne.s32.totalorder %s2022_s9, %s1663_s13  ;;  %p1665_p3 = pneg %p2026_p10 }
  0x4e   : > { %p1669_p9 = scmp.lt.u32.totalorder %s2022_s9, %s2388_s0  ;;  %p1670_p12 = scmp.lt.u32.totalorder %s1668_s30, %s1663_s13 }
  0x4f   : > { %p1666_p5 = pnand %p1665_p3, %p1664_p0  ;;  %p1672_p2 = scmp.lt.u32.totalorder %s1663_s13, %s2022_s9 }
  0x50   : > { %p1671_p1 = por %p1670_p12, %p1669_p9 }
  0x51   : > { %p1667_p7 = pneg %p1666_p5 }
  0x52   : > { %p1673_p4 = por %p1672_p2, %p1671_p1 }
  0x54   : > { %p1674_p6 = pnand %p1673_p4, %p1667_p7 }
  0x56   : > { %1677 = shalt.err (!%p1674_p6)
}
  0x57   : > { %s1678_s14 = scalar_lea.vmem %s2030_s25, 2048  ;;  %s1845_s8 = smov [#allocation3]  }
  0x58   : > { %p1679_p8 = scmp.ne.s32.totalorder %s2030_s25, %s1678_s14  ;;  %s1683_s15 = sshll.u32 %s1845_s8, 4  ;;  %s1684_s15 = int_to_ptr.vmem [resolvable:$false] %s1683_s15 }
  0x59   : > { %s1685_s7 = scalar_lea.vmem %s1684_s15, 4096  ;;  %p1686_p5 = scmp.lt.s32.totalorder %s2030_s25, %s1684_s15 }
  0x5a   : > { %p1681_p13 = pnand %p1679_p8, %p1665_p3  ;;  %p1687_p9 = scmp.lt.s32.totalorder %s1685_s7, %s1678_s14 }
  0x5c   : > { %p1682_p0 = pneg %p1681_p13  ;;  %p1688_p12 = por %p1687_p9, %p1686_p5 }
  0x5e   : > { %p1689_p1 = pnand %p1688_p12, %p1682_p0 }
  0x60   : > { %1692 = shalt.err (!%p1689_p1)
}
  0x61   : > { %s2406_s13 = smov 64   ;;  %p2407_p3 = scmp.ne.s32.totalorder %s2401_s28, 0 }
  0x62   : > { %1448 = dma.hbm_to_vmem [thread:$0]  (!%p2026_p10), %s2022_s9, 2048, %s2030_s25, %s2032_s12, %s2406_s13, %s2406_s13, %s1844_s29  }
  0x63   : > { %283 = sbr.rel (%p2407_p3) target bundleno = 484 (0x1e4), region = 32  ;;  %s2066_s30 = sand.u32 (!%p2407_p3), 1, %s1823_s19  }
  0x64   : > { %s1296_s10 = sshll.u32 (!%p2407_p3), %s2066_s30, 7  ;;  %s286_s14 = scalar_lea.sflag (!%p2407_p3), [#allocation4], %s2066_s30 }
  0x65   : > { %s2070_s8 = scalar_lea.vmem (!%p2407_p3), [#allocation3], %s1296_s10  ;;  %p2408_p7 = scmp.ne.s32.totalorder (!%p2407_p3), %s2399_s26, 0 }
  0x6a   : > { %1802 = dma.done.wait (%p2408_p7), %s286_s14, 2048  }
  0x6b   : > { %1804 = vsyncadd (%p2408_p7), %s286_s14, 4294965248  ;;  %p2409_p10 = scmp.eq.s32.totalorder %s1912_s24, 0 }
  0x6d   : > { %1806 = dma.done.wait (%p2409_p10), [#allocation7], 1040   ;;  %p2410_p2 = pmov %p2409_p10 }
  0x6e   : > { %v1519_v0 = vld [vmem:[#allocation6] sm:$0xff]   ;;  %v1520_v1 = vld [vmem:[#allocation6 + $0x8] sm:$0xff]   ;;  %v1521_v2 = vld [vmem:[#allocation6 + $0x10] sm:$0xff]   ;;  %s1299_s25 = sshll.u32 %s2066_s30, 8  ;;  %s1333_s28 = sshll.u32 %s1831_s21, 12 }
  0x6f   : > { %1808 = vsyncadd (%p2410_p2), [#allocation7], 4294966256  ;;  %1358 = vmatprep.subr.bf16.mxu0 %v1519_v0  ;;  %1406 = vmatprep.subr.bf16.mxu1 %v1519_v0  ;;  %v1522_v3 = vld [vmem:[#allocation6 + $0x18] sm:$0xff]   ;;  %v1527_v4 = vld [vmem:[%s2070_s8] sm:$0xff]   ;;  %s2131_s26 = scalar_lea.vmem [#allocation9], %s1299_s25  ;;  %s2231_s12 = scalar_lea.hbm %s2391_s3, %s1333_s28 }
  0x70   : > { %1359 = vmatpush3.bf16.msra.mxu0 %v1519_v0  ;;  %1414 = vmatpush3.bf16.msra.mxu1 %v1519_v0  ;;  %v1523_v5 = vld [vmem:[#allocation6 + $0x20] sm:$0xff]   ;;  %v1524_v6 = vld [vmem:[#allocation6 + $0x28] sm:$0xff]   ;;  %v1525_v8 = vld [vmem:[#allocation6 + $0x30] sm:$0xff]   ;;  %s1090_s17 = sshll.u32 %s2131_s26, 4  ;;  %s1068_s15 = scalar_lea.sflag [#allocation5], %s2066_s30  ;;  %s2233_s17 = int_to_ptr.vmem [resolvable:$true] %s1090_s17 }
  0x71   : > { %1360 = vmatprep.subr.bf16.mxu0 %v1520_v1  ;;  %1407 = vmatprep.subr.bf16.mxu1 %v1520_v1  ;;  %v1535_v7 = vld [vmem:[%s2070_s8 + $0x40] sm:$0xff]   ;;  %v1526_v9 = vld [vmem:[#allocation6 + $0x38] sm:$0xff]   ;;  %v1528_v10 = vld [vmem:[%s2070_s8 + $0x8] sm:$0xff]   ;;  %s1693_s7 = scalar_lea.vmem %s2233_s17, 4096  ;;  %s1846_s13 = smov [#allocation9]  }
  0x72   : > { %1374 = vmatprep.mubr.bf16.mxu0 %v1527_v4  ;;  %1390 = vmatprep.mubr.bf16.mxu1 %v1535_v7  ;;  %v1536_v11 = vld [vmem:[%s2070_s8 + $0x48] sm:$0xff]   ;;  %v1529_v12 = vld [vmem:[%s2070_s8 + $0x10] sm:$0xff]   ;;  %v1530_v14 = vld [vmem:[%s2070_s8 + $0x18] sm:$0xff]   ;;  %p1694_p4 = scmp.ne.s32.totalorder %s2233_s17, %s1693_s7  ;;  %s1697_s10 = sshll.u32 %s1846_s13, 4  ;;  %s1698_s10 = int_to_ptr.vmem [resolvable:$false] %s1697_s10 }
  0x73   : > { %v1537_v13 = vld [vmem:[%s2070_s8 + $0x50] sm:$0xff]   ;;  %v1538_v15 = vld [vmem:[%s2070_s8 + $0x58] sm:$0xff]   ;;  %v1531_v16 = vld [vmem:[%s2070_s8 + $0x20] sm:$0xff]   ;;  %s1699_s14 = scalar_lea.vmem %s1698_s10, 8192  ;;  %p1700_p13 = scmp.lt.s32.totalorder %s2233_s17, %s1698_s10 }
  0x74   : > { %1361 = vmatpush3.bf16.msra.mxu0 %v1520_v1  ;;  %1415 = vmatpush3.bf16.msra.mxu1 %v1520_v1  ;;  %v1539_v17 = vld [vmem:[%s2070_s8 + $0x60] sm:$0xff]   ;;  %v1532_v18 = vld [vmem:[%s2070_s8 + $0x28] sm:$0xff]   ;;  %v1533_v20 = vld [vmem:[%s2070_s8 + $0x30] sm:$0xff]   ;;  %p1695_p6 = pnand %p1694_p4, %p2008_p11  ;;  %p1701_p0 = scmp.lt.s32.totalorder %s1699_s14, %s1693_s7 }
  0x75   : > { %1362 = vmatprep.subr.bf16.mxu0 %v1521_v2  ;;  %1408 = vmatprep.subr.bf16.mxu1 %v1521_v2  ;;  %v1540_v19 = vld [vmem:[%s2070_s8 + $0x68] sm:$0xff]   ;;  %v1541_v21 = vld [vmem:[%s2070_s8 + $0x70] sm:$0xff]   ;;  %v1534_v22 = vld [vmem:[%s2070_s8 + $0x38] sm:$0xff]  }
  0x76   : > { %v1542_v23 = vld [vmem:[%s2070_s8 + $0x78] sm:$0xff]   ;;  %v2096_v24 = vld [vmem:[#allocation8] ss:$0 sm:$0xff]  ;;  %p1696_p8 = pneg %p1695_p6  ;;  %p1702_p5 = por %p1701_p0, %p1700_p13 }
  0x78   : > { %1363 = vmatpush3.bf16.msra.mxu0 %v1521_v2  ;;  %1416 = vmatpush3.bf16.msra.mxu1 %v1521_v2  ;;  %p1703_p9 = pnand %p1702_p5, %p1696_p8 }
  0x79   : > { %1364 = vmatprep.subr.bf16.mxu0 %v1522_v3  ;;  %1409 = vmatprep.subr.bf16.mxu1 %v1522_v3 }
  0x7c   : > { %1365 = vmatpush3.bf16.msra.mxu0 %v1522_v3  ;;  %1417 = vmatpush3.bf16.msra.mxu1 %v1522_v3 }
  0x7d   : > { %1366 = vmatprep.subr.bf16.mxu0 %v1523_v5  ;;  %1410 = vmatprep.subr.bf16.mxu1 %v1523_v5 }
  0x80   : > { %1367 = vmatpush3.bf16.msra.mxu0 %v1523_v5  ;;  %1418 = vmatpush3.bf16.msra.mxu1 %v1523_v5 }
  0x81   : > { %1368 = vmatprep.subr.bf16.mxu0 %v1524_v6  ;;  %1411 = vmatprep.subr.bf16.mxu1 %v1524_v6 }
  0x84   : > { %1369 = vmatpush3.bf16.msra.mxu0 %v1524_v6  ;;  %1419 = vmatpush3.bf16.msra.mxu1 %v1524_v6 }
  0x85   : > { %1370 = vmatprep.subr.bf16.mxu0 %v1525_v8  ;;  %1412 = vmatprep.subr.bf16.mxu1 %v1525_v8 }
  0x88   : > { %1371 = vmatpush3.bf16.msra.mxu0 %v1525_v8  ;;  %1420 = vmatpush3.bf16.msra.mxu1 %v1525_v8 }
  0x89   : > { %1372 = vmatprep.subr.bf16.mxu0 %v1526_v9  ;;  %1413 = vmatprep.subr.bf16.mxu1 %v1526_v9 }
  0x8c   : > { %1373 = vmatpush3.bf16.msra.mxu0 %v1526_v9  ;;  %1421 = vmatpush3.bf16.msra.mxu1 %v1526_v9 }
  0x8f   : > { %1375 = vmatmul.mubr.bf16.vlgmr.msra.gmra.mrb[0].mxu0 %v1528_v10  ;;  %1391 = vmatmul.mubr.bf16.vlgmr.msra.gmra.mrb[0].mxu1 %v1536_v11 }
  0x90   : > { %1378 = vmatprep.mubr.bf16.mxu0 %v1529_v12  ;;  %1394 = vmatprep.mubr.bf16.mxu1 %v1537_v13 }
  0x97   : > { %1379 = vmatmul.mubr.bf16.gmra.mrb[4].mxu0 %v1530_v14  ;;  %1395 = vmatmul.mubr.bf16.gmra.mrb[4].mxu1 %v1538_v15 }
  0x98   : > { %1382 = vmatprep.mubr.bf16.mxu0 %v1531_v16  ;;  %1398 = vmatprep.mubr.bf16.mxu1 %v1539_v17 }
  0x9f   : > { %1383 = vmatmul.mubr.bf16.gmra.mrb[8].mxu0 %v1532_v18  ;;  %1399 = vmatmul.mubr.bf16.gmra.mrb[8].mxu1 %v1540_v19 }
  0xa0   : > { %1386 = vmatprep.mubr.bf16.mxu0 %v1533_v20  ;;  %1402 = vmatprep.mubr.bf16.mxu1 %v1541_v21 }
  0xa7   : > { %1387 = vmatmul.mubr.bf16.gmra.mrb[12].mxu0 %v1534_v22  ;;  %1403 = vmatmul.mubr.bf16.gmra.mrb[12].mxu1 %v1542_v23 }
 0x162   : > { %v1376_v25 = vpop.f32.mrb[0].mxu0  ;;  %v1392_v26 = vpop.f32.mrb[0].mxu1 }
 0x163   : > { %v865_v27 = vadd.f32 %v1376_v25, %v2096_v24  ;;  %v630_v28 = vpop.f32.mrb[1].mxu0  ;;  %v694_v29 = vpop.f32.mrb[1].mxu1  ;;  %v2102_v35 = vadd.f32 %v1392_v26, %v2096_v24 }
 0x164   : > { %v863_v30 = vadd.f32 %v2096_v24, %v630_v28  ;;  %v1377_v31 = vpop.f32.mrb[2].mxu0  ;;  %v1393_v32 = vpop.f32.mrb[2].mxu1  ;;  %v2106_v38 = vadd.f32 %v2096_v24, %v694_v29 }
 0x165   : > { %1543 = vtanh.f32 %v865_v27  ;;  %v866_v33 = vadd.f32 %v1377_v31, %v2096_v24  ;;  %v633_v34 = vpop.f32.mrb[3].mxu0  ;;  %v697_v36 = vpop.f32.mrb[3].mxu1  ;;  %v2109_v40 = vadd.f32 %v1393_v32, %v2096_v24  ;;  %v935_v44 = vmul.f32 %v865_v27, %v865_v27 }
 0x166   : > { %1545 = vtanh.f32 %v863_v30  ;;  %v864_v37 = vadd.f32 %v2096_v24, %v633_v34  ;;  %v933_v39 = vmul.f32 %v863_v30, %v863_v30  ;;  %v2112_v43 = vadd.f32 %v2096_v24, %v697_v36 }
 0x167   : > { %1547 = vtanh.f32 %v866_v33  ;;  %v936_v49 = vmul.f32 %v866_v33, %v866_v33 }
 0x168   : > { %v895_v41 = vadd.f32 %v864_v37, %v863_v30  ;;  %v934_v42 = vmul.f32 %v864_v37, %v864_v37  ;;  %1549 = vtanh.f32 %v864_v37 }
 0x169   : > { %1551 = vtanh.f32 %v2102_v35 }
 0x16a   : > { %v896_v45 = vadd.f32 %v895_v41, %v865_v27  ;;  %v965_v46 = vadd.f32 %v934_v42, %v933_v39  ;;  %v1380_v47 = vpop.f32.mrb[4].mxu0  ;;  %1553 = vtanh.f32 %v2106_v38  ;;  %v1396_v48 = vpop.f32.mrb[4].mxu1 }
 0x16b   : > { %v869_v50 = vadd.f32 %v1380_v47, %v2096_v24  ;;  %v646_v51 = vpop.f32.mrb[5].mxu0  ;;  %1555 = vtanh.f32 %v2109_v40  ;;  %v2120_v52 = vadd.f32 %v1396_v48, %v2096_v24  ;;  %v710_v53 = vpop.f32.mrb[5].mxu1 }
 0x16c   : > { %v966_v54 = vadd.f32 %v965_v46, %v935_v44  ;;  %v867_v55 = vadd.f32 %v2096_v24, %v646_v51  ;;  %v897_v56 = vadd.f32 %v896_v45, %v866_v33  ;;  %v1381_v57 = vpop.f32.mrb[6].mxu0  ;;  %1557 = vtanh.f32 %v2112_v43  ;;  %v1397_v58 = vpop.f32.mrb[6].mxu1 }
 0x16d   : > { %1559 = vtanh.f32 %v869_v50  ;;  %v870_v59 = vadd.f32 %v1381_v57, %v2096_v24  ;;  %v649_v60 = vpop.f32.mrb[7].mxu0  ;;  %v713_v61 = vpop.f32.mrb[7].mxu1  ;;  %v2127_v3 = vadd.f32 %v2096_v24, %v710_v53  ;;  %v2136_v6 = vadd.f32 %v1397_v58, %v2096_v24 }
 0x16e   : > { %v898_v62 = vadd.f32 %v897_v56, %v867_v55  ;;  %v937_v63 = vmul.f32 %v867_v55, %v867_v55  ;;  %v967_v0 = vadd.f32 %v966_v54, %v936_v49  ;;  %1561 = vtanh.f32 %v867_v55 }
 0x16f   : > { %v1544_v1 = vpop.eup %1543  ;;  %1563 = vtanh.f32 %v870_v59  ;;  %v868_v2 = vadd.f32 %v2096_v24, %v649_v60  ;;  %v2139_v7 = vadd.f32 %v2096_v24, %v713_v61  ;;  %v939_v12 = vmul.f32 %v869_v50, %v869_v50 }
 0x170   : > { %v1546_v4 = vpop.eup %1545  ;;  %1037 = vst [vmem:[%s2131_s26 + $0x10] sm:$0xff] %v1544_v1  ;;  %v968_v5 = vadd.f32 %v967_v0, %v937_v63  ;;  %1565 = vtanh.f32 %v2120_v52  ;;  %v940_v22 = vmul.f32 %v870_v59, %v870_v59 }
 0x171   : > { %v1548_v8 = vpop.eup %1547  ;;  %1035 = vst [vmem:[%s2131_s26] sm:$0xff] %v1546_v4  ;;  %v899_v9 = vadd.f32 %v898_v62, %v868_v2  ;;  %v938_v10 = vmul.f32 %v868_v2, %v868_v2  ;;  %1567 = vtanh.f32 %v868_v2 }
 0x172   : > { %v1550_v11 = vpop.eup %1549  ;;  %1038 = vst [vmem:[%s2131_s26 + $0x18] sm:$0xff] %v1548_v8  ;;  %v1384_v13 = vpop.f32.mrb[8].mxu0  ;;  %1569 = vtanh.f32 %v2127_v3 }
 0x173   : > { %v1400_v14 = vpop.f32.mrb[8].mxu1  ;;  %v1552_v15 = vpop.eup %1551  ;;  %1036 = vst [vmem:[%s2131_s26 + $0x8] sm:$0xff] %v1550_v11  ;;  %v900_v16 = vadd.f32 %v899_v9, %v869_v50  ;;  %v969_v17 = vadd.f32 %v968_v5, %v938_v10  ;;  %v873_v18 = vadd.f32 %v1384_v13, %v2096_v24  ;;  %1571 = vtanh.f32 %v2136_v6 }
 0x174   : > { %v662_v19 = vpop.f32.mrb[9].mxu0  ;;  %v726_v20 = vpop.f32.mrb[9].mxu1  ;;  %1053 = vst [vmem:[%s2131_s26 + $0x90] sm:$0xff] %v1552_v15  ;;  %1573 = vtanh.f32 %v2139_v7  ;;  %v2151_v26 = vadd.f32 %v1400_v14, %v2096_v24 }
 0x175   : > { %v1554_v21 = vpop.eup %1553  ;;  %v871_v23 = vadd.f32 %v2096_v24, %v662_v19  ;;  %v1385_v25 = vpop.f32.mrb[10].mxu0  ;;  %v970_v29 = vadd.f32 %v969_v17, %v939_v12  ;;  %1575 = vtanh.f32 %v873_v18  ;;  %v901_v30 = vadd.f32 %v900_v16, %v870_v59 }
 0x176   : > { %v1401_v27 = vpop.f32.mrb[10].mxu1  ;;  %v1556_v28 = vpop.eup %1555  ;;  %1051 = vst [vmem:[%s2131_s26 + $0x80] sm:$0xff] %v1554_v21  ;;  %v2155_v32 = vadd.f32 %v2096_v24, %v726_v20  ;;  %v874_v37 = vadd.f32 %v1385_v25, %v2096_v24  ;;  %v943_v53 = vmul.f32 %v873_v18, %v873_v18 }
 0x177   : > { %v665_v31 = vpop.f32.mrb[11].mxu0  ;;  %v729_v33 = vpop.f32.mrb[11].mxu1  ;;  %v941_v36 = vmul.f32 %v871_v23, %v871_v23  ;;  %1577 = vtanh.f32 %v871_v23  ;;  %1054 = vst [vmem:[%s2131_s26 + $0x98] sm:$0xff] %v1556_v28  ;;  %v902_v42 = vadd.f32 %v901_v30, %v871_v23  ;;  %v971_v44 = vadd.f32 %v970_v29, %v940_v22 }
 0x178   : > { %v1558_v34 = vpop.eup %1557  ;;  %v872_v39 = vadd.f32 %v2096_v24, %v665_v31  ;;  %1579 = vtanh.f32 %v2151_v26  ;;  %v2165_v50 = vadd.f32 %v1401_v27, %v2096_v24  ;;  %v2172_v61 = vadd.f32 %v2096_v24, %v729_v33 }
 0x179   : > { %v1560_v41 = vpop.eup %1559  ;;  %1052 = vst [vmem:[%s2131_s26 + $0x88] sm:$0xff] %v1558_v34  ;;  %1581 = vtanh.f32 %v874_v37  ;;  %v972_v48 = vadd.f32 %v971_v44, %v941_v36  ;;  %v944_v0 = vmul.f32 %v874_v37, %v874_v37 }
 0x17a   : > { %v1562_v45 = vpop.eup %1561  ;;  %1041 = vst [vmem:[%s2131_s26 + $0x30] sm:$0xff] %v1560_v41  ;;  %v942_v46 = vmul.f32 %v872_v39, %v872_v39  ;;  %v903_v49 = vadd.f32 %v902_v42, %v872_v39  ;;  %1583 = vtanh.f32 %v872_v39  ;;  %v1388_v54 = vpop.f32.mrb[12].mxu0  ;;  %v949_v39 = vmul.f32 %v2106_v38, %v2106_v38 }
 0x17b   : > { %v1564_v47 = vpop.eup %1563  ;;  %1039 = vst [vmem:[%s2131_s26 + $0x20] sm:$0xff] %v1562_v45  ;;  %1585 = vtanh.f32 %v2155_v32  ;;  %v1404_v55 = vpop.f32.mrb[12].mxu1  ;;  %v877_v59 = vadd.f32 %v1388_v54, %v2096_v24  ;;  %v950_v54 = vmul.f32 %v2112_v43, %v2112_v43 }
 0x17c   : > { %v1566_v51 = vpop.eup %1565  ;;  %1042 = vst [vmem:[%s2131_s26 + $0x38] sm:$0xff] %v1564_v47  ;;  %v904_v57 = vadd.f32 %v903_v49, %v873_v18  ;;  %v973_v58 = vadd.f32 %v972_v48, %v942_v46  ;;  %v678_v60 = vpop.f32.mrb[13].mxu0  ;;  %1587 = vtanh.f32 %v2165_v50  ;;  %v2179_v11 = vadd.f32 %v1404_v55, %v2096_v24 }
 0x17d   : > { %v1568_v56 = vpop.eup %1567  ;;  %1057 = vst [vmem:[%s2131_s26 + $0xb0] sm:$0xff] %v1566_v51  ;;  %v742_v62 = vpop.f32.mrb[13].mxu1  ;;  %v875_v1 = vadd.f32 %v2096_v24, %v678_v60  ;;  %1589 = vtanh.f32 %v877_v59  ;;  %v947_v33 = vmul.f32 %v877_v59, %v877_v59 }
 0x17e   : > { %v1570_v63 = vpop.eup %1569  ;;  %1040 = vst [vmem:[%s2131_s26 + $0x28] sm:$0xff] %v1568_v56  ;;  %v1389_v2 = vpop.f32.mrb[14].mxu0  ;;  %v974_v8 = vadd.f32 %v973_v58, %v943_v53  ;;  %v905_v9 = vadd.f32 %v904_v57, %v874_v37  ;;  %v2188_v22 = vadd.f32 %v2096_v24, %v742_v62 }
 0x17f   : > { %v1405_v4 = vpop.f32.mrb[14].mxu1  ;;  %v1572_v5 = vpop.eup %1571  ;;  %1055 = vst [vmem:[%s2131_s26 + $0xa0] sm:$0xff] %v1570_v63  ;;  %v945_v14 = vmul.f32 %v875_v1, %v875_v1  ;;  %1591 = vtanh.f32 %v875_v1  ;;  %v878_v15 = vadd.f32 %v1389_v2, %v2096_v24 }
 0x180   : > { %v681_v10 = vpop.f32.mrb[15].mxu0  ;;  %v745_v12 = vpop.f32.mrb[15].mxu1  ;;  %1058 = vst [vmem:[%s2131_s26 + $0xb8] sm:$0xff] %v1572_v5  ;;  %v906_v18 = vadd.f32 %v905_v9, %v875_v1  ;;  %v975_v19 = vadd.f32 %v974_v8, %v944_v0  ;;  %1593 = vtanh.f32 %v2172_v61  ;;  %v2192_v28 = vadd.f32 %v1405_v4, %v2096_v24 }
 0x181   : > { %v1574_v13 = vpop.eup %1573  ;;  %v876_v16 = vadd.f32 %v2096_v24, %v681_v10  ;;  %1595 = vtanh.f32 %v878_v15  ;;  %v2197_v30 = vadd.f32 %v2096_v24, %v745_v12  ;;  %v948_v41 = vmul.f32 %v878_v15, %v878_v15 }
 0x182   : > { %v1576_v17 = vpop.eup %1575  ;;  %1056 = vst [vmem:[%s2131_s26 + $0xa8] sm:$0xff] %v1574_v13  ;;  %v976_v25 = vadd.f32 %v975_v19, %v945_v14  ;;  %v953_v0 = vmul.f32 %v2127_v3, %v2127_v3  ;;  %v954_v8 = vmul.f32 %v2139_v7, %v2139_v7 }
 0x183   : > { %v1578_v20 = vpop.eup %1577  ;;  %1045 = vst [vmem:[%s2131_s26 + $0x50] sm:$0xff] %v1576_v17  ;;  %v946_v21 = vmul.f32 %v876_v16, %v876_v16  ;;  %v907_v27 = vadd.f32 %v906_v18, %v876_v16  ;;  %1597 = vtanh.f32 %v876_v16 }
 0x184   : > { %v1580_v23 = vpop.eup %1579  ;;  %1043 = vst [vmem:[%s2131_s26 + $0x40] sm:$0xff] %v1578_v20  ;;  %1599 = vtanh.f32 %v2179_v11 }
 0x185   : > { %v1582_v29 = vpop.eup %1581  ;;  %1061 = vst [vmem:[%s2131_s26 + $0xd0] sm:$0xff] %v1580_v23  ;;  %v908_v34 = vadd.f32 %v907_v27, %v877_v59  ;;  %v977_v36 = vadd.f32 %v976_v25, %v946_v21  ;;  %1601 = vtanh.f32 %v2188_v22 }
 0x186   : > { %v1584_v31 = vpop.eup %1583  ;;  %1046 = vst [vmem:[%s2131_s26 + $0x58] sm:$0xff] %v1582_v29  ;;  %1603 = vtanh.f32 %v2192_v28 }
 0x187   : > { %v1586_v37 = vpop.eup %1585  ;;  %1044 = vst [vmem:[%s2131_s26 + $0x48] sm:$0xff] %v1584_v31  ;;  %v978_v24 = vadd.f32 %v977_v36, %v947_v33  ;;  %v909_v42 = vadd.f32 %v908_v34, %v878_v15  ;;  %1605 = vtanh.f32 %v2197_v30 }
 0x188   : > { %1059 = vst [vmem:[%s2131_s26 + $0xc0] sm:$0xff] %v1586_v37  ;;  %v1588_v44 = vpop.eup %1587 }
 0x189   : > { %v1590_v45 = vpop.eup %1589  ;;  %v910_v46 = vadd.f32 %v909_v42, %v2106_v38  ;;  %v979_v47 = vadd.f32 %v978_v24, %v948_v41  ;;  %1062 = vst [vmem:[%s2131_s26 + $0xd8] sm:$0xff] %v1588_v44  ;;  %v951_v38 = vmul.f32 %v2102_v35, %v2102_v35 }
 0x18a   : > { %v1592_v48 = vpop.eup %1591  ;;  %1049 = vst [vmem:[%s2131_s26 + $0x70] sm:$0xff] %v1590_v45 }
 0x18b   : > { %v1594_v49 = vpop.eup %1593  ;;  %1047 = vst [vmem:[%s2131_s26 + $0x60] sm:$0xff] %v1592_v48  ;;  %v980_v51 = vadd.f32 %v979_v47, %v949_v39  ;;  %v911_v53 = vadd.f32 %v910_v46, %v2112_v43  ;;  %v952_v43 = vmul.f32 %v2109_v40, %v2109_v40 }
 0x18c   : > { %v1596_v55 = vpop.eup %1595  ;;  %1060 = vst [vmem:[%s2131_s26 + $0xc8] sm:$0xff] %v1594_v49 }
 0x18d   : > { %v1598_v56 = vpop.eup %1597  ;;  %1050 = vst [vmem:[%s2131_s26 + $0x78] sm:$0xff] %v1596_v55  ;;  %v912_v57 = vadd.f32 %v911_v53, %v2102_v35  ;;  %v981_v58 = vadd.f32 %v980_v51, %v950_v54 }
 0x18e   : > { %v1600_v59 = vpop.eup %1599  ;;  %1048 = vst [vmem:[%s2131_s26 + $0x68] sm:$0xff] %v1598_v56 }
 0x18f   : > { %v1602_v60 = vpop.eup %1601  ;;  %v982_v62 = vadd.f32 %v981_v58, %v951_v38  ;;  %v913_v63 = vadd.f32 %v912_v57, %v2109_v40  ;;  %1065 = vst [vmem:[%s2131_s26 + $0xf0] sm:$0xff] %v1600_v59 }
 0x190   : > { %v1604_v35 = vpop.eup %1603  ;;  %1063 = vst [vmem:[%s2131_s26 + $0xe0] sm:$0xff] %v1602_v60 }
 0x191   : > { %v1606_v1 = vpop.eup %1605  ;;  %v914_v2 = vadd.f32 %v913_v63, %v2127_v3  ;;  %v983_v40 = vadd.f32 %v982_v62, %v952_v43  ;;  %1066 = vst [vmem:[%s2131_s26 + $0xf8] sm:$0xff] %v1604_v35 }
 0x192   : > { %1064 = vst [vmem:[%s2131_s26 + $0xe8] sm:$0xff] %v1606_v1 }
 0x193   : > { %v984_v4 = vadd.f32 %v983_v40, %v953_v0  ;;  %v915_v5 = vadd.f32 %v914_v2, %v2139_v7 }
 0x194   : > { %1706 = shalt.err (!%p1703_p9)
}
 0x195   : > { %s1707_s8 = scalar_lea.hbm %s2231_s12, 4096  ;;  %s1711_s28 = scalar_lea.hbm %s2391_s3, 131072 }
 0x196   : > { %p1708_p12 = scmp.ne.s32.totalorder %s2231_s12, %s1707_s8  ;;  %p1712_p7 = scmp.lt.u32.totalorder %s2231_s12, %s2391_s3 }
 0x197   : > { %p1713_p10 = scmp.lt.u32.totalorder %s1711_s28, %s1707_s8  ;;  %p1715_p4 = scmp.lt.u32.totalorder %s1707_s8, %s2231_s12 }
 0x198   : > { %p1709_p1 = pnand %p1708_p12, %p2008_p11 }
 0x199   : > { %p1714_p2 = por %p1713_p10, %p1712_p7 }
 0x19a   : > { %p1710_p3 = pneg %p1709_p1 }
 0x19b   : > { %p1716_p6 = por %p1715_p4, %p1714_p2 }
 0x19d   : > { %p1717_p8 = pnand %p1716_p6, %p1710_p3 }
 0x19f   : > { %1720 = shalt.err (!%p1717_p8)
}
 0x1a0   : > { %s1847_s7 = smov 128   ;;  %s1848_s13 = smov 8   ;;  %v955_v3 = vmul.f32 %v2120_v52, %v2120_v52  ;;  %v916_v7 = vadd.f32 %v915_v5, %v2120_v52  ;;  %v985_v9 = vadd.f32 %v984_v4, %v954_v8  ;;  %v956_v10 = vmul.f32 %v2136_v6, %v2136_v6 }
 0x1a1   : > { %1432 = dma.vmem_to_hbm [thread:$0]  (%p2008_p11), %s2233_s17, 4096, %s2231_s12, %s1068_s15, %s1847_s7, %s1847_s7, %s1848_s13   ;;  %v957_v14 = vmul.f32 %v2155_v32, %v2155_v32  ;;  %v958_v19 = vmul.f32 %v2172_v61, %v2172_v61  ;;  %v959_v52 = vmul.f32 %v2151_v26, %v2151_v26  ;;  %v963_v33 = vmul.f32 %v2179_v11, %v2179_v11 }
 0x1a2   : > { %v986_v12 = vadd.f32 %v985_v9, %v955_v3  ;;  %v917_v13 = vadd.f32 %v916_v7, %v2136_v6  ;;  %v960_v6 = vmul.f32 %v2165_v50, %v2165_v50  ;;  %v964_v36 = vmul.f32 %v2192_v28, %v2192_v28  ;;  %s1072_s17 = sand.u32 1, %s1912_s24   ;;  %s1328_s12 = sshll.u32 %s1831_s21, 4 }
 0x1a3   : > { %s325_s15 = scalar_lea.vmem [#allocation10], %s2066_s30  ;;  %s331_s14 = scalar_lea.vmem [#allocation12], %s2066_s30 }
 0x1a4   : > { %v918_v15 = vadd.f32 %v917_v13, %v2155_v32  ;;  %v987_v16 = vadd.f32 %v986_v12, %v956_v10  ;;  %v961_v32 = vmul.f32 %v2188_v22, %v2188_v22  ;;  %s1107_s10 = sshll.u32 %s325_s15, 4  ;;  %s1121_s8 = sshll.u32 %s331_s14, 4  ;;  %s2307_s10 = int_to_ptr.vmem [resolvable:$true] %s1107_s10  ;;  %s2314_s8 = int_to_ptr.vmem [resolvable:$true] %s1121_s8 }
 0x1a5   : > { %s2305_s28 = scalar_lea.hbm %s2392_s4, %s1328_s12  ;;  %s2312_s29 = scalar_lea.hbm %s2393_s5, %s1328_s12 }
 0x1a6   : > { %v988_v17 = vadd.f32 %v987_v16, %v957_v14  ;;  %v919_v18 = vadd.f32 %v918_v15, %v2172_v61  ;;  %s2316_s9 = scalar_lea.sflag [#allocation11], %s1072_s17  ;;  %s1721_s7 = scalar_lea.vmem %s2307_s10, 16 }
 0x1a7   : > { %p1722_p13 = scmp.ne.s32.totalorder %s2307_s10, %s1721_s7  ;;  %s1849_s13 = smov [#allocation10]  }
 0x1a8   : > { %v920_v20 = vadd.f32 %v919_v18, %v2151_v26  ;;  %v989_v21 = vadd.f32 %v988_v17, %v958_v19  ;;  %v962_v26 = vmul.f32 %v2197_v30, %v2197_v30  ;;  %s1725_s25 = sshll.u32 %s1849_s13, 4  ;;  %s1726_s25 = int_to_ptr.vmem [resolvable:$false] %s1725_s25 }
 0x1a9   : > { %p1723_p0 = pnand %p1722_p13, %p2008_p11  ;;  %s1727_s26 = scalar_lea.vmem %s1726_s25, 32 }
 0x1aa   : > { %v990_v23 = vadd.f32 %v989_v21, %v959_v52  ;;  %v921_v25 = vadd.f32 %v920_v20, %v2165_v50  ;;  %p1728_p9 = scmp.lt.s32.totalorder %s2307_s10, %s1726_s25  ;;  %p1729_p12 = scmp.lt.s32.totalorder %s1727_s26, %s1721_s7 }
 0x1ab   : > { %p1724_p5 = pneg %p1723_p0 }
 0x1ac   : > { %v922_v27 = vadd.f32 %v921_v25, %v2188_v22  ;;  %v991_v29 = vadd.f32 %v990_v23, %v960_v6  ;;  %p1730_p1 = por %p1729_p12, %p1728_p9 }
 0x1ae   : > { %v992_v31 = vadd.f32 %v991_v29, %v961_v32  ;;  %v923_v61 = vadd.f32 %v922_v27, %v2197_v30  ;;  %p1731_p3 = pnand %p1730_p1, %p1724_p5 }
 0x1b0   : > { %v924_v50 = vadd.f32 %v923_v61, %v2179_v11  ;;  %v993_v34 = vadd.f32 %v992_v31, %v962_v26 }
 0x1b2   : > { %v925_v22 = vadd.f32 %v924_v50, %v2192_v28  ;;  %v994_v37 = vadd.f32 %v993_v34, %v963_v33 }
 0x1b4   : > { %v926_v39 = vrot.slane %v925_v22, 4  ;;  %v995_v41 = vadd.f32 %v994_v37, %v964_v36 }
 0x1b6   : > { %v927_v24 = vadd.f32 %v926_v39, %v925_v22  ;;  %v996_v30 = vrot.slane %v995_v41, 4 }
 0x1b8   : > { %v928_v42 = vrot.slane %v927_v24, 2  ;;  %v997_v44 = vadd.f32 %v996_v30, %v995_v41 }
 0x1ba   : > { %v998_v45 = vrot.slane %v997_v44, 2  ;;  %v929_v46 = vadd.f32 %v928_v42, %v927_v24 }
 0x1bc   : > { %v930_v11 = vrot.slane %v929_v46, 1  ;;  %v999_v47 = vadd.f32 %v998_v45, %v997_v44 }
 0x1be   : > { %v931_v28 = vadd.f32 %v930_v11, %v929_v46  ;;  %v1000_v48 = vrot.slane %v999_v47, 1 }
 0x1c0   : > { %932 = vst [vmem:[%s325_s15] sm:$0x1] %v931_v28  ;;  %v1001_v49 = vadd.f32 %v1000_v48, %v999_v47 }
 0x1c1   : > { %1734 = shalt.err (!%p1731_p3)
}
 0x1c2   : > { %s1735_s17 = scalar_lea.hbm %s2305_s28, 16  ;;  %s1739_s21 = scalar_lea.hbm %s2392_s4, 512 }
 0x1c3   : > { %p1736_p7 = scmp.ne.s32.totalorder %s2305_s28, %s1735_s17  ;;  %p1740_p4 = scmp.lt.u32.totalorder %s2305_s28, %s2392_s4 }
 0x1c4   : > { %p1741_p6 = scmp.lt.u32.totalorder %s1739_s21, %s1735_s17  ;;  %p1743_p13 = scmp.lt.u32.totalorder %s1735_s17, %s2305_s28 }
 0x1c5   : > { %p1737_p10 = pnand %p1736_p7, %p2008_p11 }
 0x1c6   : > { %p1742_p8 = por %p1741_p6, %p1740_p4 }
 0x1c7   : > { %p1738_p2 = pneg %p1737_p10 }
 0x1c8   : > { %p1744_p0 = por %p1743_p13, %p1742_p8 }
 0x1ca   : > { %p1745_p5 = pnand %p1744_p0, %p1738_p2 }
 0x1cc   : > { %1748 = shalt.err (!%p1745_p5)
}
 0x1cd   : > { %1433 = dma.vmem_to_hbm [thread:$0]  (%p2008_p11), %s2307_s10, 16, %s2305_s28, %s2316_s9   ;;  %1002 = vst [vmem:[%s331_s14] sm:$0x1] %v1001_v49 }
 0x1ce   : > { %s1749_s7 = scalar_lea.vmem %s2314_s8, 16  ;;  %s1850_s25 = smov [#allocation12]  }
 0x1cf   : > { %p1750_p9 = scmp.ne.s32.totalorder %s2314_s8, %s1749_s7  ;;  %s1753_s26 = sshll.u32 %s1850_s25, 4  ;;  %s1754_s26 = int_to_ptr.vmem [resolvable:$false] %s1753_s26 }
 0x1d0   : > { %s1755_s17 = scalar_lea.vmem %s1754_s26, 32  ;;  %p1756_p3 = scmp.lt.s32.totalorder %s2314_s8, %s1754_s26 }
 0x1d1   : > { %p1751_p12 = pnand %p1750_p9, %p2008_p11  ;;  %p1757_p7 = scmp.lt.s32.totalorder %s1755_s17, %s1749_s7 }
 0x1d3   : > { %p1752_p1 = pneg %p1751_p12  ;;  %p1758_p10 = por %p1757_p7, %p1756_p3 }
 0x1d5   : > { %p1759_p2 = pnand %p1758_p10, %p1752_p1 }
 0x1d7   : > { %1762 = shalt.err (!%p1759_p2)
}
 0x1d8   : > { %s1763_s30 = scalar_lea.hbm %s2312_s29, 16  ;;  %s1767_s28 = scalar_lea.hbm %s2393_s5, 512 }
 0x1d9   : > { %p1764_p4 = scmp.ne.s32.totalorder %s2312_s29, %s1763_s30  ;;  %p1768_p13 = scmp.lt.u32.totalorder %s2312_s29, %s2393_s5 }
 0x1da   : > { %p1769_p0 = scmp.lt.u32.totalorder %s1767_s28, %s1763_s30  ;;  %p1771_p9 = scmp.lt.u32.totalorder %s1763_s30, %s2312_s29 }
 0x1db   : > { %p1765_p6 = pnand %p1764_p4, %p2008_p11 }
 0x1dc   : > { %p1770_p5 = por %p1769_p0, %p1768_p13 }
 0x1dd   : > { %p1766_p8 = pneg %p1765_p6 }
 0x1de   : > { %p1772_p12 = por %p1771_p9, %p1770_p5 }
 0x1e0   : > { %p1773_p1 = pnand %p1772_p12, %p1766_p8 }
 0x1e2   : > { %1776 = shalt.err (!%p1773_p1)
}
 0x1e3   : > { %1434 = dma.vmem_to_hbm [thread:$0]  (%p2008_p11), %s2314_s8, 16, %s2312_s29, %s2316_s9  }
 0x1e4 PF: > { %p1464_p3 = scmp.ge.s32.totalorder %s1839_s23, 2  ;;  %s1133_s21 = sand.u32 1, %s1819_s18  }
 0x1e5   : > { %p2411_p7 = scmp.ne.s32.totalorder %s2400_s27, 0  ;;  %s1134_s24 = scalar_lea.sflag [#allocation5], %s1133_s21 }
 0x1e7   : > { %p1450_p10 = pnand %p1464_p3, %p2411_p7 }
 0x1e9   : > { %1810 = dma.done.wait (!%p1450_p10), %s1134_s24, 4096  }
 0x1ea   : > { %1812 = vsyncadd (!%p1450_p10), %s1134_s24, 4294963200  ;;  %s2412_s13 = sadd.s32 4294967294, %s1839_s23  }
 0x1eb   : > { %s1142_s7 = sand.u32 1, %s2412_s13  }
 0x1ec   : > { %s1143_s25 = scalar_lea.sflag [#allocation11], %s1142_s7 }
 0x1ed   : > { %1814 = dma.done.wait (!%p1450_p10), %s1143_s25, 32  }
 0x1ee   : > { %1816 = vsyncadd (!%p1450_p10), %s1143_s25, 4294967264  ;;  %s26_s23 = sadd.s32 1, %s1839_s23   ;;  %s2413_s18 = smov %s1823_s19 }
 0x1ef   : > { %p23_p11 = scmp.ge.s32.totalorder %s26_s23, 34   ;;  %s2414_s19 = smov %s1827_s20 }
 0x1f0   : > { %s2415_s20 = smov %s2017_s16  ;;  %s2416_s21 = smov %s1835_s22 }
 0x1f1   : > { %s2417_s22 = smov %s2419_s11  ;;  %25 = sbr.rel (!%p23_p11) target bundleno = 9 (0x9), region = 127 }
 0x1f8   :  { %1155 = vsyncpa [#allocation4], 1 }
 0x1f9   :  { %1157 = vsyncpa [#allocation4 + $0x1], 1 }
 0x1fa   :  { %1158 = vsyncpa [#allocation7], 1 }
 0x1fb   :  { %1159 = vsyncpa [#allocation5], 1 }
 0x1fc   :  { %1161 = vsyncpa [#allocation5 + $0x1], 1 }
 0x1fd   :  { %1162 = vsyncpa [#allocation11], 1 }
 0x1fe   :  { %1164 = vsyncpa [#allocation11 + $0x1], 1 }

</bundles_post_ra>
